<compile_context>
chip_gen: v5e
topology: v5e:2x2
jax: 0.10.0
libtpu: 0.0.40
codegen_flags: <defaults>
</compile_context>

<pallas_src>
import functools

import jax
import jax.numpy as jnp
from jax import lax
from jax.experimental import pallas as pl
from jax.experimental.pallas import tpu as pltpu


def _round_up(x, m):
    return (x + m - 1) // m * m


def _pick_cout_pad(cout, w_half):
    """Smallest multiple of 8 >= cout such that w_half * pad is a multiple of 128 lanes."""
    c = _round_up(cout, 8)
    while (w_half * c) % 128 != 0:
        c += 8
    return c


def convblock_kernel(p_ref, w_ref, gamma_ref, beta_ref, o_ref, *,
                     quarter_rows, out_rows, w_half, cout_pad, inv_count):
    # p_ref:     (4*quarter_rows, KP)  im2col patches; rows ordered (quadrant, w', n, h'),
    #                                  contraction dim zero-padded to a lane-dense 128.
    # w_ref:     (KP, cout_pad)        im2col weights, (ky,kx,cin) row order.
    # gamma_ref: (1, cout_pad)         BN weight (zero-padded channels).
    # beta_ref:  (1, cout_pad)         BN bias   (zero-padded channels).
    # o_ref:     (out_rows, w_half*cout_pad)  lane-dense pooled output;
    #                                  rows = (n, h'), lanes = (w', cout).

    # ---- Conv2d(3x3, pad=1): one lane-dense im2col matmul on the MXU. ----------------
    # (Conv bias omitted: a per-channel constant cancels exactly under train-mode BN.)
    acc = jnp.dot(p_ref[...], w_ref[...], preferred_element_type=jnp.float32)

    # ---- BatchNorm2d, training mode: biased batch stats over all N*H*W positions. ----
    # Two-pass mean / centered variance (numerically safer than E[x^2] - E[x]^2).
    mean = jnp.sum(acc, axis=0, keepdims=True) * inv_count          # (1, cout_pad)
    centered = acc - mean
    var = jnp.sum(centered * centered, axis=0, keepdims=True) * inv_count
    scale = gamma_ref[...] * lax.rsqrt(var + 1e-5)
    y = centered * scale + beta_ref[...]

    # ---- Exact GELU (nn.GELU default approximate='none'). ----------------------------
    y = 0.5 * y * (1.0 + lax.erf(y * 0.7071067811865476))

    # ---- AvgPool2d(2): rows were pre-grouped by pool quadrant, so the pool is four ----
    # static, sublane-aligned contiguous row slices (no reshapes / cross-lane shuffles).
    q = quarter_rows
    pooled = 0.25 * (y[0 * q:1 * q, :] + y[1 * q:2 * q, :] +
                     y[2 * q:3 * q, :] + y[3 * q:4 * q, :])          # rows = (w', n, h')

    # ---- Fold pooled-W into the lane axis with static slices: the HBM write-back of --
    # o_ref is one dense 128-lane-multiple block (no 16x channel padding).
    for w2 in range(w_half):
        o_ref[:, w2 * cout_pad:(w2 + 1) * cout_pad] = (
            pooled[w2 * out_rows:(w2 + 1) * out_rows, :].astype(o_ref.dtype))


def conv_block(x_nchw, w_oihw, bias, gamma, beta):
    """ConvBlock forward. Public interface NCHW (PyTorch); lane-dense packing inside."""
    N, Cin, H, W = x_nchw.shape
    Cout = w_oihw.shape[0]
    assert H % 2 == 0 and W % 2 == 0
    del bias  # exact no-op under training-mode BatchNorm (cancelled by mean subtraction)

    H2, W2 = H // 2, W // 2
    K = 9 * Cin
    KP = _round_up(K, 128)              # lane-dense contraction dim
    COUT_P = _pick_cout_pad(Cout, W2)   # small channel pad; W2*COUT_P is a multiple of 128
    NH2 = N * H2                        # output rows (multiple of 8 for these shapes)
    MQ = W2 * NH2                       # rows per pool quadrant
    M = 4 * MQ                          # = N*H*W conv output positions

    # ---- Wrapper-side im2col (pure layout plumbing, runs once in XLA). ---------------
    x = jnp.transpose(x_nchw, (0, 2, 3, 1)).astype(jnp.float32)          # (N,H,W,Cin)
    xp = jnp.pad(x, ((0, 0), (1, 1), (1, 1), (0, 0)))                    # 1-px halo
    taps = [xp[:, ky:ky + H, kx:kx + W, :] for ky in range(3) for kx in range(3)]
    patches = jnp.stack(taps, axis=3).reshape(N, H, W, K)                # (ky,kx,cin) order
    # Reorder rows to (quadrant=(h%2,w%2), w', n, h') so pooling and lane-folding in the
    # kernel become static contiguous row slices.
    patches = patches.reshape(N, H2, 2, W2, 2, K)
    patches = jnp.transpose(patches, (2, 4, 3, 0, 1, 5)).reshape(M, K)
    patches = jnp.pad(patches, ((0, 0), (0, KP - K)))                    # (M, KP) lane-dense

    # (Cout,Cin,3,3) -> (ky,kx,cin,cout) -> (9*Cin, Cout) -> zero-pad to (KP, COUT_P).
    w = jnp.transpose(w_oihw, (2, 3, 1, 0)).astype(jnp.float32).reshape(K, Cout)
    w = jnp.pad(w, ((0, KP - K), (0, COUT_P - Cout)))

    gamma_p = jnp.pad(gamma.astype(jnp.float32).reshape(1, Cout),
                      ((0, 0), (0, COUT_P - Cout)))
    beta_p = jnp.pad(beta.astype(jnp.float32).reshape(1, Cout),
                     ((0, 0), (0, COUT_P - Cout)))

    kernel = functools.partial(
        convblock_kernel,
        quarter_rows=MQ, out_rows=NH2, w_half=W2, cout_pad=COUT_P,
        inv_count=1.0 / float(M))

    out2d = pl.pallas_call(
        kernel,
        out_shape=jax.ShapeDtypeStruct((NH2, W2 * COUT_P), jnp.float32),
        grid=(1,),                       # whole problem in one step: global BN stats,
                                         # conv output stays resident (no recompute).
        in_specs=[
            pl.BlockSpec((M, KP), lambda i: (0, 0)),
            pl.BlockSpec((KP, COUT_P), lambda i: (0, 0)),
            pl.BlockSpec((1, COUT_P), lambda i: (0, 0)),
            pl.BlockSpec((1, COUT_P), lambda i: (0, 0)),
        ],
        out_specs=pl.BlockSpec((NH2, W2 * COUT_P), lambda i: (0, 0)),
        compiler_params=pltpu.CompilerParams(
            dimension_semantics=("arbitrary",)),
    )(patches, w, gamma_p, beta_p)

    # Un-fold lanes -> (N, H/2, W/2, COUT_P) -> drop the small channel pad -> NCHW.
    out = out2d.reshape(N, H2, W2, COUT_P)[..., :Cout]
    return jnp.transpose(out, (0, 3, 1, 2))


def conv_block_ref(x_nchw, w_oihw, bias, gamma, beta):
    """Pure-JAX reference (same math as the PyTorch module in train mode)."""
    x = jnp.transpose(x_nchw, (0, 2, 3, 1)).astype(jnp.float32)
    y = lax.conv_general_dilated(
        x, jnp.transpose(w_oihw, (2, 3, 1, 0)).astype(jnp.float32),
        window_strides=(1, 1), padding=((1, 1), (1, 1)),
        dimension_numbers=("NHWC", "HWIO", "NHWC"),
        precision=lax.Precision.HIGHEST)
    y = y + bias.reshape(1, 1, 1, -1)
    mean = jnp.mean(y, axis=(0, 1, 2), keepdims=True)
    var = jnp.mean((y - mean) ** 2, axis=(0, 1, 2), keepdims=True)
    y = (y - mean) * lax.rsqrt(var + 1e-5)
    y = y * gamma.reshape(1, 1, 1, -1) + beta.reshape(1, 1, 1, -1)
    y = 0.5 * y * (1.0 + lax.erf(y / jnp.sqrt(2.0)))
    n, h, w, c = y.shape
    y = y.reshape(n, h // 2, 2, w // 2, 2, c).mean(axis=(2, 4))
    return jnp.transpose(y, (0, 3, 1, 2))


if __name__ == "__main__":
    # Small shapes consistent with the module: batch=2, in_ch=4, out_ch=8, 16x16 spatial.
    N, Cin, Cout, H, W = 2, 4, 8, 16, 16

    key = jax.random.PRNGKey(0)
    kx, kw, kb = jax.random.split(key, 3)
    x = jax.random.normal(kx, (N, Cin, H, W), jnp.float32)
    w = jax.random.normal(kw, (Cout, Cin, 3, 3), jnp.float32) * 0.1
    b = jax.random.normal(kb, (Cout,), jnp.float32) * 0.1
    gamma = jnp.ones((Cout,), jnp.float32)   # BatchNorm2d default weight
    beta = jnp.zeros((Cout,), jnp.float32)   # BatchNorm2d default bias

    out = jax.block_until_ready(conv_block(x, w, b, gamma, beta))
    ref = jax.block_until_ready(conv_block_ref(x, w, b, gamma, beta))

    assert out.shape == (N, Cout, H // 2, W // 2), out.shape
    err = float(jnp.max(jnp.abs(out - ref)))
    # Tolerance sized for MXU f32 matmul pass rounding vs. the XLA reference path.
    assert err < 5e-3, err

    print("KERNEL_OK")
</pallas_src>

<mosaic_0001>
module attributes {stable_mosaic.version = 11 : i64} {
  func.func @convblock_kernel(%arg0: i32, %arg1: memref<512x128xf32, #tpu.memory_space<vmem>>, %arg2: memref<128x16xf32, #tpu.memory_space<vmem>>, %arg3: memref<1x16xf32, #tpu.memory_space<vmem>>, %arg4: memref<1x16xf32, #tpu.memory_space<vmem>>, %arg5: memref<16x128xf32, #tpu.memory_space<vmem>>) attributes {dimension_semantics = [#tpu.dimension_semantics<arbitrary>], iteration_bounds = array<i64: 1>, scalar_prefetch = 0 : i64, scratch_operands = 0 : i64, tpu.core_type = #tpu.core_type<tc>, window_params = [{pipeline_mode = #tpu.pipeline_mode<synchronous>, transform_indices = @transform_0, window_bounds = array<i64: 512, 128>}, {pipeline_mode = #tpu.pipeline_mode<synchronous>, transform_indices = @transform_1, window_bounds = array<i64: 128, 16>}, {pipeline_mode = #tpu.pipeline_mode<synchronous>, transform_indices = @transform_2, window_bounds = array<i64: 1, 16>}, {pipeline_mode = #tpu.pipeline_mode<synchronous>, transform_indices = @transform_3, window_bounds = array<i64: 1, 16>}, {pipeline_mode = #tpu.pipeline_mode<synchronous>, transform_indices = @transform_4, window_bounds = array<i64: 16, 128>}]} {
    %c0 = arith.constant 0 : index
    %c0_0 = arith.constant 0 : index
    %0 = vector.load %arg1[%c0, %c0_0] : memref<512x128xf32, #tpu.memory_space<vmem>>, vector<512x128xf32>
    %c0_1 = arith.constant 0 : index
    %c0_2 = arith.constant 0 : index
    %1 = vector.load %arg2[%c0_1, %c0_2] : memref<128x16xf32, #tpu.memory_space<vmem>>, vector<128x16xf32>
    %cst = arith.constant dense<0.000000e+00> : vector<512x16xf32>
    %2 = tpu.matmul %0, %1, %cst {dimension_numbers = #tpu.dot_dimension_numbers<[1], [0], [0], [1], [0, 0, 1, 1], [], []>} : vector<512x128xf32>, vector<128x16xf32>, vector<512x16xf32> -> vector<512x16xf32>
    %cst_3 = arith.constant dense<0.000000e+00> : vector<16xf32>
    %3 = vector.multi_reduction <add>, %2, %cst_3 [0] : vector<512x16xf32> to vector<16xf32>
    %4 = vector.shape_cast %3 : vector<16xf32> to vector<1x16xf32>
    %cst_4 = arith.constant 0.001953125 : f32
    %5 = vector.broadcast %cst_4 : f32 to vector<1x16xf32>
    %6 = arith.mulf %4, %5 : vector<1x16xf32>
    %7 = vector.broadcast %6 : vector<1x16xf32> to vector<512x16xf32>
    %8 = arith.subf %2, %7 : vector<512x16xf32>
    %9 = arith.mulf %8, %8 : vector<512x16xf32>
    %cst_5 = arith.constant dense<0.000000e+00> : vector<16xf32>
    %10 = vector.multi_reduction <add>, %9, %cst_5 [0] : vector<512x16xf32> to vector<16xf32>
    %11 = vector.shape_cast %10 : vector<16xf32> to vector<1x16xf32>
    %cst_6 = arith.constant 0.001953125 : f32
    %12 = vector.broadcast %cst_6 : f32 to vector<1x16xf32>
    %13 = arith.mulf %11, %12 : vector<1x16xf32>
    %c0_7 = arith.constant 0 : index
    %c0_8 = arith.constant 0 : index
    %14 = vector.load %arg3[%c0_7, %c0_8] : memref<1x16xf32, #tpu.memory_space<vmem>>, vector<1x16xf32>
    %cst_9 = arith.constant 9.99999974E-6 : f32
    %15 = vector.broadcast %cst_9 : f32 to vector<1x16xf32>
    %16 = arith.addf %13, %15 : vector<1x16xf32>
    %17 = math.rsqrt %16 : vector<1x16xf32>
    %18 = arith.mulf %14, %17 : vector<1x16xf32>
    %19 = vector.broadcast %18 : vector<1x16xf32> to vector<512x16xf32>
    %20 = arith.mulf %8, %19 : vector<512x16xf32>
    %c0_10 = arith.constant 0 : index
    %c0_11 = arith.constant 0 : index
    %21 = vector.load %arg4[%c0_10, %c0_11] : memref<1x16xf32, #tpu.memory_space<vmem>>, vector<1x16xf32>
    %22 = vector.broadcast %21 : vector<1x16xf32> to vector<512x16xf32>
    %23 = arith.addf %20, %22 : vector<512x16xf32>
    %cst_12 = arith.constant 5.000000e-01 : f32
    %24 = vector.broadcast %cst_12 : f32 to vector<512x16xf32>
    %25 = arith.mulf %24, %23 : vector<512x16xf32>
    %cst_13 = arith.constant 0.707106769 : f32
    %26 = vector.broadcast %cst_13 : f32 to vector<512x16xf32>
    %27 = arith.mulf %23, %26 : vector<512x16xf32>
    %28 = math.erf %27 : vector<512x16xf32>
    %cst_14 = arith.constant 1.000000e+00 : f32
    %29 = vector.broadcast %cst_14 : f32 to vector<512x16xf32>
    %30 = arith.addf %29, %28 : vector<512x16xf32>
    %31 = arith.mulf %25, %30 : vector<512x16xf32>
    %32 = vector.extract_strided_slice %31 {offsets = [0, 0], sizes = [128, 16], strides = [1, 1]} : vector<512x16xf32> to vector<128x16xf32>
    %33 = vector.extract_strided_slice %31 {offsets = [128, 0], sizes = [128, 16], strides = [1, 1]} : vector<512x16xf32> to vector<128x16xf32>
    %34 = arith.addf %32, %33 : vector<128x16xf32>
    %35 = vector.extract_strided_slice %31 {offsets = [256, 0], sizes = [128, 16], strides = [1, 1]} : vector<512x16xf32> to vector<128x16xf32>
    %36 = arith.addf %34, %35 : vector<128x16xf32>
    %37 = vector.extract_strided_slice %31 {offsets = [384, 0], sizes = [128, 16], strides = [1, 1]} : vector<512x16xf32> to vector<128x16xf32>
    %38 = arith.addf %36, %37 : vector<128x16xf32>
    %cst_15 = arith.constant 2.500000e-01 : f32
    %39 = vector.broadcast %cst_15 : f32 to vector<128x16xf32>
    %40 = arith.mulf %39, %38 : vector<128x16xf32>
    %41 = vector.extract_strided_slice %40 {offsets = [0, 0], sizes = [16, 16], strides = [1, 1]} : vector<128x16xf32> to vector<16x16xf32>
    %c0_16 = arith.constant 0 : index
    %c0_17 = arith.constant 0 : index
    %42 = vector.load %arg5[%c0_16, %c0_17] : memref<16x128xf32, #tpu.memory_space<vmem>>, vector<16x16xf32>
    tpu.vector_store %arg5[%c0_16, %c0_17], %41 {strides = array<i32>} : memref<16x128xf32, #tpu.memory_space<vmem>>, vector<16x16xf32>,
    %43 = vector.extract_strided_slice %40 {offsets = [16, 0], sizes = [16, 16], strides = [1, 1]} : vector<128x16xf32> to vector<16x16xf32>
    %c0_18 = arith.constant 0 : index
    %c16 = arith.constant 16 : index
    %44 = vector.load %arg5[%c0_18, %c16] : memref<16x128xf32, #tpu.memory_space<vmem>>, vector<16x16xf32>
    tpu.vector_store %arg5[%c0_18, %c16], %43 {strides = array<i32>} : memref<16x128xf32, #tpu.memory_space<vmem>>, vector<16x16xf32>,
    %45 = vector.extract_strided_slice %40 {offsets = [32, 0], sizes = [16, 16], strides = [1, 1]} : vector<128x16xf32> to vector<16x16xf32>
    %c0_19 = arith.constant 0 : index
    %c32 = arith.constant 32 : index
    %46 = vector.load %arg5[%c0_19, %c32] : memref<16x128xf32, #tpu.memory_space<vmem>>, vector<16x16xf32>
    tpu.vector_store %arg5[%c0_19, %c32], %45 {strides = array<i32>} : memref<16x128xf32, #tpu.memory_space<vmem>>, vector<16x16xf32>,
    %47 = vector.extract_strided_slice %40 {offsets = [48, 0], sizes = [16, 16], strides = [1, 1]} : vector<128x16xf32> to vector<16x16xf32>
    %c0_20 = arith.constant 0 : index
    %c48 = arith.constant 48 : index
    %48 = vector.load %arg5[%c0_20, %c48] : memref<16x128xf32, #tpu.memory_space<vmem>>, vector<16x16xf32>
    tpu.vector_store %arg5[%c0_20, %c48], %47 {strides = array<i32>} : memref<16x128xf32, #tpu.memory_space<vmem>>, vector<16x16xf32>,
    %49 = vector.extract_strided_slice %40 {offsets = [64, 0], sizes = [16, 16], strides = [1, 1]} : vector<128x16xf32> to vector<16x16xf32>
    %c0_21 = arith.constant 0 : index
    %c64 = arith.constant 64 : index
    %50 = vector.load %arg5[%c0_21, %c64] : memref<16x128xf32, #tpu.memory_space<vmem>>, vector<16x16xf32>
    tpu.vector_store %arg5[%c0_21, %c64], %49 {strides = array<i32>} : memref<16x128xf32, #tpu.memory_space<vmem>>, vector<16x16xf32>,
    %51 = vector.extract_strided_slice %40 {offsets = [80, 0], sizes = [16, 16], strides = [1, 1]} : vector<128x16xf32> to vector<16x16xf32>
    %c0_22 = arith.constant 0 : index
    %c80 = arith.constant 80 : index
    %52 = vector.load %arg5[%c0_22, %c80] : memref<16x128xf32, #tpu.memory_space<vmem>>, vector<16x16xf32>
    tpu.vector_store %arg5[%c0_22, %c80], %51 {strides = array<i32>} : memref<16x128xf32, #tpu.memory_space<vmem>>, vector<16x16xf32>,
    %53 = vector.extract_strided_slice %40 {offsets = [96, 0], sizes = [16, 16], strides = [1, 1]} : vector<128x16xf32> to vector<16x16xf32>
    %c0_23 = arith.constant 0 : index
    %c96 = arith.constant 96 : index
    %54 = vector.load %arg5[%c0_23, %c96] : memref<16x128xf32, #tpu.memory_space<vmem>>, vector<16x16xf32>
    tpu.vector_store %arg5[%c0_23, %c96], %53 {strides = array<i32>} : memref<16x128xf32, #tpu.memory_space<vmem>>, vector<16x16xf32>,
    %55 = vector.extract_strided_slice %40 {offsets = [112, 0], sizes = [16, 16], strides = [1, 1]} : vector<128x16xf32> to vector<16x16xf32>
    %c0_24 = arith.constant 0 : index
    %c112 = arith.constant 112 : index
    %56 = vector.load %arg5[%c0_24, %c112] : memref<16x128xf32, #tpu.memory_space<vmem>>, vector<16x16xf32>
    tpu.vector_store %arg5[%c0_24, %c112], %55 {strides = array<i32>} : memref<16x128xf32, #tpu.memory_space<vmem>>, vector<16x16xf32>,
    return
  }
  func.func @transform_0(%arg0: i32) -> (i32, i32) {
    %c0_i32 = arith.constant 0 : i32
    %c0_i32_0 = arith.constant 0 : i32
    %c0_i32_1 = arith.constant 0 : i32
    return %c0_i32, %c0_i32_0 : i32, i32
  }
  func.func @transform_1(%arg0: i32) -> (i32, i32) {
    %c0_i32 = arith.constant 0 : i32
    %c0_i32_0 = arith.constant 0 : i32
    %c0_i32_1 = arith.constant 0 : i32
    return %c0_i32, %c0_i32_0 : i32, i32
  }
  func.func @transform_2(%arg0: i32) -> (i32, i32) {
    %c0_i32 = arith.constant 0 : i32
    %c0_i32_0 = arith.constant 0 : i32
    %c0_i32_1 = arith.constant 0 : i32
    return %c0_i32, %c0_i32_0 : i32, i32
  }
  func.func @transform_3(%arg0: i32) -> (i32, i32) {
    %c0_i32 = arith.constant 0 : i32
    %c0_i32_0 = arith.constant 0 : i32
    %c0_i32_1 = arith.constant 0 : i32
    return %c0_i32, %c0_i32_0 : i32, i32
  }
  func.func @transform_4(%arg0: i32) -> (i32, i32) {
    %c0_i32 = arith.constant 0 : i32
    %c0_i32_0 = arith.constant 0 : i32
    %c0_i32_1 = arith.constant 0 : i32
    return %c0_i32, %c0_i32_0 : i32, i32
  }
}

</mosaic_0001>

<bundles_post_ra>
// kernel: tpu_custom_call.1
= control target key start
LH: loop header
LB: loop body
LE: loop exit
PB: predicated region body
PF: predicated region fallthrough
CT: control target
= control target key end

     0   :  { %9 = vsyncpa [#allocation3], 0  ;;  %s9085_s0 = inlined_call_operand.hbm [shape: f32[512,128], index: 0, kind: input, shape index: {}]   ;;  %s9086_s1 = inlined_call_operand.vmem [shape: f32[128,16], index: 1, kind: input, shape index: {}]   ;;  %s9087_s2 = inlined_call_operand.vmem [shape: f32[1,16], index: 2, kind: input, shape index: {}]   ;;  %s9088_s3 = inlined_call_operand.vmem [shape: f32[1,16], index: 3, kind: input, shape index: {}]   ;;  %s9089_s4 = inlined_call_operand.hbm [shape: f32[16,128], index: 4, kind: output, shape index: {}]  }
   0x1   :  { %10 = vsyncpa [#allocation4], 0  ;;  %s15_s17 = sshll.u32 %s9085_s0, 4  ;;  %s4153_s18 = smov [#allocation2]   ;;  %s16_s17 = int_to_ptr.hbm [resolvable:$true] %s15_s17 }
   0x2   :  { %s17_s19 = sshll.u32 %s4153_s18, 4  ;;  %s4154_s20 = smov 128   ;;  %s18_s19 = int_to_ptr.vmem [resolvable:$true] %s17_s19 }
   0x3   :  { %s4155_s21 = smov 8  }
   0x4   :  { %23 = dma.hbm_to_vmem [thread:$0]  %s16_s17, 8192, %s18_s19, [#allocation3], %s4154_s20, %s4154_s20, %s4155_s21  }
   0x5   :  { %4149 = dma.done.wait [#allocation3], 8192  }
   0x6   :  { %4150 = vsyncadd [#allocation3], 4294959104  ;;  %v113_v0 = vld [vmem:[%s9086_s1 + $0x78] sm:$0xff]  ;;  %v112_v1 = vld [vmem:[%s9086_s1 + $0x70] sm:$0xff]  ;;  %vm9321_vm0 = vcmask 130048   ;;  %s4158_s7 = smov 16  }
   0x7   :  { %114 = vmatpush.msra.mxu0 %v113_v0  ;;  %3910 = vmatpush.msra.mxu1 %v113_v0  ;;  %v111_v2 = vld [vmem:[%s9086_s1 + $0x68] sm:$0xff]  ;;  %v110_v3 = vld [vmem:[%s9086_s1 + $0x60] sm:$0xff]  ;;  %v109_v4 = vld [vmem:[%s9086_s1 + $0x58] sm:$0xff]  ;;  %s4159_s8 = smov 80   ;;  %s4160_s9 = smov 64  }
   0x8   :  { %3911 = vmatpush.msra.mxu2 %v113_v0  ;;  %3912 = vmatpush.msra.mxu3 %v113_v0  ;;  %v108_v5 = vld [vmem:[%s9086_s1 + $0x50] sm:$0xff]  ;;  %v107_v6 = vld [vmem:[%s9086_s1 + $0x48] sm:$0xff]  ;;  %v106_v7 = vld [vmem:[%s9086_s1 + $0x40] sm:$0xff]  ;;  %s4161_s10 = smov 96   ;;  %s4162_s11 = smov 112  }
   0x9   :  { %115 = vmatpush.msra.mxu0 %v112_v1  ;;  %3913 = vmatpush.msra.mxu1 %v112_v1  ;;  %v105_v8 = vld [vmem:[%s9086_s1 + $0x38] sm:$0xff]  ;;  %v104_v9 = vld [vmem:[%s9086_s1 + $0x30] sm:$0xff]  ;;  %v103_v10 = vld [vmem:[%s9086_s1 + $0x28] sm:$0xff]  ;;  %s4163_s12 = smov [#allocation5]   ;;  %s3833_s16 = sshll.u32 %s9089_s4, 4  ;;  %s3834_s16 = int_to_ptr.hbm [resolvable:$true] %s3833_s16 }
   0xa   :  { %3914 = vmatpush.msra.mxu2 %v112_v1  ;;  %3915 = vmatpush.msra.mxu3 %v112_v1  ;;  %v102_v11 = vld [vmem:[%s9086_s1 + $0x20] sm:$0xff]  ;;  %v101_v12 = vld [vmem:[%s9086_s1 + $0x18] sm:$0xff]  ;;  %v100_v13 = vld [vmem:[%s9086_s1 + $0x10] sm:$0xff]  ;;  %s3831_s13 = sshll.u32 %s4163_s12, 4  ;;  %s3832_s13 = int_to_ptr.vmem [resolvable:$true] %s3831_s13 }
   0xb   :  { %116 = vmatpush.msra.mxu0 %v111_v2  ;;  %3916 = vmatpush.msra.mxu1 %v111_v2  ;;  %v99_v14 = vld [vmem:[%s9086_s1 + $0x8] sm:$0xff]  ;;  %v98_v15 = vld [vmem:[%s9086_s1] sm:$0xff]  ;;  %v36_v20 = vld [vmem:[#allocation2 + $0x10] sm:$0xff] }
   0xc   :  { %3917 = vmatpush.msra.mxu2 %v111_v2  ;;  %3918 = vmatpush.msra.mxu3 %v111_v2  ;;  %v34_v16 = vld [vmem:[#allocation2] sm:$0xff]  ;;  %v35_v18 = vld [vmem:[#allocation2 + $0x8] sm:$0xff]  ;;  %v52_v21 = vld [vmem:[#allocation2 + $0x90] sm:$0xff] }
   0xd   :  { %117 = vmatpush.msra.mxu0 %v110_v3  ;;  %3919 = vmatpush.msra.mxu1 %v110_v3  ;;  %v50_v17 = vld [vmem:[#allocation2 + $0x80] sm:$0xff]  ;;  %v51_v19 = vld [vmem:[#allocation2 + $0x88] sm:$0xff]  ;;  %v37_v22 = vld [vmem:[#allocation2 + $0x18] sm:$0xff] }
   0xe   :  { %3920 = vmatpush.msra.mxu2 %v110_v3  ;;  %3921 = vmatpush.msra.mxu3 %v110_v3  ;;  %v53_v23 = vld [vmem:[#allocation2 + $0x98] sm:$0xff]  ;;  %v66_v24 = vld [vmem:[#allocation2 + $0x100] sm:$0xff]  ;;  %v67_v27 = vld [vmem:[#allocation2 + $0x108] sm:$0xff] }
   0xf   :  { %118 = vmatpush.msra.mxu0 %v109_v4  ;;  %3922 = vmatpush.msra.mxu1 %v109_v4  ;;  %v38_v25 = vld [vmem:[#allocation2 + $0x20] sm:$0xff]  ;;  %v39_v28 = vld [vmem:[#allocation2 + $0x28] sm:$0xff]  ;;  %v68_v30 = vld [vmem:[#allocation2 + $0x110] sm:$0xff] }
  0x10   :  { %3923 = vmatpush.msra.mxu2 %v109_v4  ;;  %3924 = vmatpush.msra.mxu3 %v109_v4  ;;  %v54_v26 = vld [vmem:[#allocation2 + $0xa0] sm:$0xff]  ;;  %v55_v29 = vld [vmem:[#allocation2 + $0xa8] sm:$0xff]  ;;  %v40_v31 = vld [vmem:[#allocation2 + $0x30] sm:$0xff] }
  0x11   :  { %119 = vmatpush.msra.mxu0 %v108_v5  ;;  %3925 = vmatpush.msra.mxu1 %v108_v5  ;;  %v56_v32 = vld [vmem:[#allocation2 + $0xb0] sm:$0xff]  ;;  %v69_v33 = vld [vmem:[#allocation2 + $0x118] sm:$0xff]  ;;  %v70_v36 = vld [vmem:[#allocation2 + $0x120] sm:$0xff] }
  0x12   :  { %3926 = vmatpush.msra.mxu2 %v108_v5  ;;  %3927 = vmatpush.msra.mxu3 %v108_v5  ;;  %v41_v34 = vld [vmem:[#allocation2 + $0x38] sm:$0xff]  ;;  %v82_v37 = vld [vmem:[#allocation2 + $0x180] sm:$0xff]  ;;  %v71_v40 = vld [vmem:[#allocation2 + $0x128] sm:$0xff] }
  0x13   :  { %120 = vmatpush.msra.mxu0 %v107_v6  ;;  %3928 = vmatpush.msra.mxu1 %v107_v6  ;;  %v57_v35 = vld [vmem:[#allocation2 + $0xb8] sm:$0xff]  ;;  %v42_v38 = vld [vmem:[#allocation2 + $0x40] sm:$0xff]  ;;  %v83_v41 = vld [vmem:[#allocation2 + $0x188] sm:$0xff] }
  0x14   :  { %3929 = vmatpush.msra.mxu2 %v107_v6  ;;  %3930 = vmatpush.msra.mxu3 %v107_v6  ;;  %v58_v39 = vld [vmem:[#allocation2 + $0xc0] sm:$0xff]  ;;  %v43_v42 = vld [vmem:[#allocation2 + $0x48] sm:$0xff]  ;;  %v72_v44 = vld [vmem:[#allocation2 + $0x130] sm:$0xff] }
  0x15   :  { %121 = vmatpush.msra.mxu0 %v106_v7  ;;  %3931 = vmatpush.msra.mxu1 %v106_v7  ;;  %v59_v43 = vld [vmem:[#allocation2 + $0xc8] sm:$0xff]  ;;  %v84_v45 = vld [vmem:[#allocation2 + $0x190] sm:$0xff]  ;;  %v73_v48 = vld [vmem:[#allocation2 + $0x138] sm:$0xff] }
  0x16   :  { %3932 = vmatpush.msra.mxu2 %v106_v7  ;;  %3933 = vmatpush.msra.mxu3 %v106_v7  ;;  %v44_v46 = vld [vmem:[#allocation2 + $0x50] sm:$0xff]  ;;  %v85_v49 = vld [vmem:[#allocation2 + $0x198] sm:$0xff]  ;;  %v74_v52 = vld [vmem:[#allocation2 + $0x140] sm:$0xff] }
  0x17   :  { %122 = vmatpush.msra.mxu0 %v105_v8  ;;  %3934 = vmatpush.msra.mxu1 %v105_v8  ;;  %v60_v47 = vld [vmem:[#allocation2 + $0xd0] sm:$0xff]  ;;  %v45_v50 = vld [vmem:[#allocation2 + $0x58] sm:$0xff]  ;;  %v86_v53 = vld [vmem:[#allocation2 + $0x1a0] sm:$0xff] }
  0x18   :  { %3935 = vmatpush.msra.mxu2 %v105_v8  ;;  %3936 = vmatpush.msra.mxu3 %v105_v8  ;;  %v61_v51 = vld [vmem:[#allocation2 + $0xd8] sm:$0xff]  ;;  %v46_v54 = vld [vmem:[#allocation2 + $0x60] sm:$0xff]  ;;  %v75_v56 = vld [vmem:[#allocation2 + $0x148] sm:$0xff] }
  0x19   :  { %123 = vmatpush.msra.mxu0 %v104_v9  ;;  %3937 = vmatpush.msra.mxu1 %v104_v9  ;;  %v62_v55 = vld [vmem:[#allocation2 + $0xe0] sm:$0xff]  ;;  %v87_v57 = vld [vmem:[#allocation2 + $0x1a8] sm:$0xff]  ;;  %v76_v60 = vld [vmem:[#allocation2 + $0x150] sm:$0xff] }
  0x1a   :  { %3938 = vmatpush.msra.mxu2 %v104_v9  ;;  %3939 = vmatpush.msra.mxu3 %v104_v9  ;;  %v47_v58 = vld [vmem:[#allocation2 + $0x68] sm:$0xff]  ;;  %v88_v61 = vld [vmem:[#allocation2 + $0x1b0] sm:$0xff]  ;;  %v77_v0 = vld [vmem:[#allocation2 + $0x158] sm:$0xff] }
  0x1b   :  { %124 = vmatpush.msra.mxu0 %v103_v10  ;;  %3940 = vmatpush.msra.mxu1 %v103_v10  ;;  %v63_v59 = vld [vmem:[#allocation2 + $0xe8] sm:$0xff]  ;;  %v48_v62 = vld [vmem:[#allocation2 + $0x70] sm:$0xff]  ;;  %v89_v1 = vld [vmem:[#allocation2 + $0x1b8] sm:$0xff] }
  0x1c   :  { %3941 = vmatpush.msra.mxu2 %v103_v10  ;;  %3942 = vmatpush.msra.mxu3 %v103_v10  ;;  %v64_v63 = vld [vmem:[#allocation2 + $0xf0] sm:$0xff]  ;;  %v49_v2 = vld [vmem:[#allocation2 + $0x78] sm:$0xff]  ;;  %v78_v4 = vld [vmem:[#allocation2 + $0x160] sm:$0xff] }
  0x1d   :  { %125 = vmatpush.msra.mxu0 %v102_v11  ;;  %3943 = vmatpush.msra.mxu1 %v102_v11  ;;  %v65_v3 = vld [vmem:[#allocation2 + $0xf8] sm:$0xff]  ;;  %v90_v5 = vld [vmem:[#allocation2 + $0x1c0] sm:$0xff]  ;;  %v79_v8 = vld [vmem:[#allocation2 + $0x168] sm:$0xff] }
  0x1e   :  { %3944 = vmatpush.msra.mxu2 %v102_v11  ;;  %3945 = vmatpush.msra.mxu3 %v102_v11  ;;  %v91_v9 = vld [vmem:[#allocation2 + $0x1c8] sm:$0xff] }
  0x1f   :  { %126 = vmatpush.msra.mxu0 %v101_v12  ;;  %3946 = vmatpush.msra.mxu1 %v101_v12 }
  0x20   :  { %3947 = vmatpush.msra.mxu2 %v101_v12  ;;  %3948 = vmatpush.msra.mxu3 %v101_v12  ;;  %v80_v12 = vld [vmem:[#allocation2 + $0x170] sm:$0xff] }
  0x21   :  { %127 = vmatpush.msra.mxu0 %v100_v13  ;;  %3949 = vmatpush.msra.mxu1 %v100_v13 }
  0x22   :  { %3950 = vmatpush.msra.mxu2 %v100_v13  ;;  %3951 = vmatpush.msra.mxu3 %v100_v13  ;;  %v92_v13 = vld [vmem:[#allocation2 + $0x1d0] sm:$0xff] }
  0x23   :  { %128 = vmatpush.msra.mxu0 %v99_v14  ;;  %3952 = vmatpush.msra.mxu1 %v99_v14 }
  0x24   :  { %3953 = vmatpush.msra.mxu2 %v99_v14  ;;  %3954 = vmatpush.msra.mxu3 %v99_v14 }
  0x25   :  { %129 = vmatpush.msra.mxu0 %v98_v15  ;;  %3955 = vmatpush.msra.mxu1 %v98_v15 }
  0x26   :  { %130 = vmatmul.f32.vlgmr.msra.gmra.mxu0 %v34_v16  ;;  %178 = vmatmul.f32.vlgmr.msra.gmra.mxu1 %v50_v17  ;;  %v81_v16 = vld [vmem:[#allocation2 + $0x178] sm:$0xff] }
  0x27   :  { %3956 = vmatpush.msra.mxu2 %v98_v15  ;;  %3957 = vmatpush.msra.mxu3 %v98_v15  ;;  %v93_v17 = vld [vmem:[#allocation2 + $0x1d8] sm:$0xff] }
  0x28   :  { %226 = vmatmul.f32.vlgmr.msra.gmra.mxu2 %v66_v24  ;;  %274 = vmatmul.f32.vlgmr.msra.gmra.mxu3 %v82_v37 }
  0x2e   :  { %133 = vmatmul.f32.gmra.mxu0 %v35_v18  ;;  %181 = vmatmul.f32.gmra.mxu1 %v51_v19  ;;  %v94_v19 = vld [vmem:[#allocation2 + $0x1e0] sm:$0xff] }
  0x30   :  { %229 = vmatmul.f32.gmra.mxu2 %v67_v27  ;;  %277 = vmatmul.f32.gmra.mxu3 %v83_v41  ;;  %v96_v27 = vld [vmem:[#allocation2 + $0x1f0] sm:$0xff] }
  0x36   :  { %136 = vmatmul.f32.gmra.mxu0 %v36_v20  ;;  %184 = vmatmul.f32.gmra.mxu1 %v52_v21 }
  0x38   :  { %232 = vmatmul.f32.gmra.mxu2 %v68_v30  ;;  %280 = vmatmul.f32.gmra.mxu3 %v84_v45 }
  0x3e   :  { %139 = vmatmul.f32.gmra.mxu0 %v37_v22  ;;  %187 = vmatmul.f32.gmra.mxu1 %v53_v23  ;;  %v95_v23 = vld [vmem:[#allocation2 + $0x1e8] sm:$0xff] }
  0x40   :  { %235 = vmatmul.f32.gmra.mxu2 %v69_v33  ;;  %283 = vmatmul.f32.gmra.mxu3 %v85_v49 }
  0x46   :  { %142 = vmatmul.f32.gmra.mxu0 %v38_v25  ;;  %190 = vmatmul.f32.gmra.mxu1 %v54_v26 }
  0x48   :  { %238 = vmatmul.f32.gmra.mxu2 %v70_v36  ;;  %286 = vmatmul.f32.gmra.mxu3 %v86_v53 }
  0x4e   :  { %145 = vmatmul.f32.gmra.mxu0 %v39_v28  ;;  %193 = vmatmul.f32.gmra.mxu1 %v55_v29 }
  0x50   :  { %241 = vmatmul.f32.gmra.mxu2 %v71_v40  ;;  %289 = vmatmul.f32.gmra.mxu3 %v87_v57 }
  0x56   :  { %148 = vmatmul.f32.gmra.mxu0 %v40_v31  ;;  %196 = vmatmul.f32.gmra.mxu1 %v56_v32  ;;  %v97_v31 = vld [vmem:[#allocation2 + $0x1f8] sm:$0xff] }
  0x58   :  { %244 = vmatmul.f32.gmra.mxu2 %v72_v44  ;;  %292 = vmatmul.f32.gmra.mxu3 %v88_v61 }
  0x5e   :  { %151 = vmatmul.f32.gmra.mxu0 %v41_v34  ;;  %199 = vmatmul.f32.gmra.mxu1 %v57_v35 }
  0x60   :  { %247 = vmatmul.f32.gmra.mxu2 %v73_v48  ;;  %295 = vmatmul.f32.gmra.mxu3 %v89_v1 }
  0x66   :  { %154 = vmatmul.f32.gmra.mxu0 %v42_v38  ;;  %202 = vmatmul.f32.gmra.mxu1 %v58_v39 }
  0x68   :  { %250 = vmatmul.f32.gmra.mxu2 %v74_v52  ;;  %298 = vmatmul.f32.gmra.mxu3 %v90_v5 }
  0x6e   :  { %157 = vmatmul.f32.gmra.mxu0 %v43_v42  ;;  %205 = vmatmul.f32.gmra.mxu1 %v59_v43 }
  0x70   :  { %253 = vmatmul.f32.gmra.mxu2 %v75_v56  ;;  %301 = vmatmul.f32.gmra.mxu3 %v91_v9 }
  0x76   :  { %160 = vmatmul.f32.gmra.mxu0 %v44_v46  ;;  %208 = vmatmul.f32.gmra.mxu1 %v60_v47 }
  0x78   :  { %256 = vmatmul.f32.gmra.mxu2 %v76_v60  ;;  %304 = vmatmul.f32.gmra.mxu3 %v92_v13 }
  0x7e   :  { %163 = vmatmul.f32.gmra.mxu0 %v45_v50  ;;  %211 = vmatmul.f32.gmra.mxu1 %v61_v51 }
  0x80   :  { %259 = vmatmul.f32.gmra.mxu2 %v77_v0  ;;  %307 = vmatmul.f32.gmra.mxu3 %v93_v17 }
  0x86   :  { %166 = vmatmul.f32.gmra.mxu0 %v46_v54  ;;  %214 = vmatmul.f32.gmra.mxu1 %v62_v55 }
  0x88   :  { %262 = vmatmul.f32.gmra.mxu2 %v78_v4  ;;  %310 = vmatmul.f32.gmra.mxu3 %v94_v19 }
  0x8e   :  { %169 = vmatmul.f32.gmra.mxu0 %v47_v58  ;;  %217 = vmatmul.f32.gmra.mxu1 %v63_v59 }
  0x90   :  { %265 = vmatmul.f32.gmra.mxu2 %v79_v8  ;;  %313 = vmatmul.f32.gmra.mxu3 %v95_v23 }
  0x96   :  { %172 = vmatmul.f32.gmra.mxu0 %v48_v62  ;;  %220 = vmatmul.f32.gmra.mxu1 %v64_v63 }
  0x98   :  { %268 = vmatmul.f32.gmra.mxu2 %v80_v12  ;;  %316 = vmatmul.f32.gmra.mxu3 %v96_v27 }
  0x9e   :  { %175 = vmatmul.f32.gmra.mxu0 %v49_v2  ;;  %223 = vmatmul.f32.gmra.mxu1 %v65_v3 }
  0xa0   :  { %271 = vmatmul.f32.gmra.mxu2 %v81_v16  ;;  %319 = vmatmul.f32.gmra.mxu3 %v97_v31 }
  0xa3   :  { %v4243_v6 = vpop.f32.mrf.mxu0  ;;  %v4245_v7 = vpop.f32.mrf.mxu1 }
  0xa4   :  { %v324_v50 = vsel %vm9321_vm0, %v4243_v6, 0.0 }
  0xab   :  { %v4247_v10 = vpop.f32.mrf.mxu0  ;;  %v4249_v11 = vpop.f32.mrf.mxu1 }
  0xac   :  { %v4261_v22 = vpop.f32.mrf.mxu2  ;;  %v4283_v36 = vpop.f32.mrf.mxu3  ;;  %v325_v48 = vsel %vm9321_vm0, %v4247_v10, 0.0 }
  0xad   :  { %v326_v52 = vadd.f32 %v325_v48, %v324_v50 }
  0xb3   :  { %v4251_v14 = vpop.f32.mrf.mxu0  ;;  %v4253_v15 = vpop.f32.mrf.mxu1 }
  0xb4   :  { %v4267_v26 = vpop.f32.mrf.mxu2  ;;  %v4291_v40 = vpop.f32.mrf.mxu3  ;;  %v327_v51 = vsel %vm9321_vm0, %v4251_v14, 0.0 }
  0xb5   :  { %v328_v54 = vadd.f32 %v327_v51, %v326_v52 }
  0xbb   :  { %v4255_v18 = vpop.f32.mrf.mxu0  ;;  %v4257_v20 = vpop.f32.mrf.mxu1 }
  0xbc   :  { %v4273_v30 = vpop.f32.mrf.mxu2  ;;  %v4299_v44 = vpop.f32.mrf.mxu3  ;;  %v329_v53 = vsel %vm9321_vm0, %v4255_v18, 0.0 }
  0xbd   :  { %v330_v57 = vadd.f32 %v329_v53, %v328_v54 }
  0xc3   :  { %v4259_v21 = vpop.f32.mrf.mxu0  ;;  %v4263_v24 = vpop.f32.mrf.mxu1 }
  0xc4   :  { %v4279_v34 = vpop.f32.mrf.mxu2  ;;  %v4309_v49 = vpop.f32.mrf.mxu3  ;;  %v331_v56 = vsel %vm9321_vm0, %v4259_v21, 0.0 }
  0xc5   :  { %9322 = vst [vmem:[#allocation8_spill] sm:$0xff] %v4279_v34  ;;  %v332_v60 = vadd.f32 %v331_v56, %v330_v57 }
  0xcb   :  { %v4265_v25 = vpop.f32.mrf.mxu0  ;;  %v4271_v29 = vpop.f32.mrf.mxu1 }
  0xcc   :  { %v4287_v38 = vpop.f32.mrf.mxu2  ;;  %v333_v59 = vsel %vm9321_vm0, %v4265_v25, 0.0  ;;  %v4329_v0 = vpop.f32.mrf.mxu3 }
  0xcd   :  { %9323 = vst [vmem:[#allocation9_spill] sm:$0xff] %v4287_v38  ;;  %v334_v63 = vadd.f32 %v333_v59, %v332_v60 }
  0xd3   :  { %v4269_v28 = vpop.f32.mrf.mxu0  ;;  %v4277_v33 = vpop.f32.mrf.mxu1 }
  0xd4   :  { %v4297_v43 = vpop.f32.mrf.mxu2  ;;  %v335_v62 = vsel %vm9321_vm0, %v4269_v28, 0.0  ;;  %v4349_v31 = vpop.f32.mrf.mxu3 }
  0xd5   :  { %v336_v2 = vadd.f32 %v335_v62, %v334_v63 }
  0xdb   :  { %v4275_v32 = vpop.f32.mrf.mxu0  ;;  %v4285_v37 = vpop.f32.mrf.mxu1 }
  0xdc   :  { %v4305_v47 = vpop.f32.mrf.mxu2  ;;  %v337_v1 = vsel %vm9321_vm0, %v4275_v32, 0.0 }
  0xdd   :  { %v338_v5 = vadd.f32 %v337_v1, %v336_v2  ;;  %v4365_v1 = vpop.f32.mrf.mxu3  ;;  %v355_v2 = vsel %vm9321_vm0, %v4245_v7, 0.0 }
  0xe3   :  { %v4281_v35 = vpop.f32.mrf.mxu0  ;;  %v4293_v41 = vpop.f32.mrf.mxu1 }
  0xe4   :  { %v4325_v61 = vpop.f32.mrf.mxu2  ;;  %v339_v4 = vsel %vm9321_vm0, %v4281_v35, 0.0 }
  0xe5   :  { %v340_v9 = vadd.f32 %v339_v4, %v338_v5  ;;  %v357_v5 = vsel %vm9321_vm0, %v4249_v11, 0.0 }
  0xeb   :  { %v4289_v39 = vpop.f32.mrf.mxu0  ;;  %v4303_v46 = vpop.f32.mrf.mxu1 }
  0xec   :  { %v341_v8 = vsel %vm9321_vm0, %v4289_v39, 0.0  ;;  %v4343_v17 = vpop.f32.mrf.mxu2 }
  0xed   :  { %v342_v16 = vadd.f32 %v341_v8, %v340_v9  ;;  %9324 = vst [vmem:[#allocation10_spill] sm:$0xff] %v4343_v17  ;;  %v359_v9 = vsel %vm9321_vm0, %v4253_v15, 0.0 }
  0xf3   :  { %v4295_v42 = vpop.f32.mrf.mxu0  ;;  %v4321_v58 = vpop.f32.mrf.mxu1 }
  0xf4   :  { %v343_v13 = vsel %vm9321_vm0, %v4295_v42, 0.0  ;;  %v4361_v60 = vpop.f32.mrf.mxu2 }
  0xf5   :  { %v344_v23 = vadd.f32 %v343_v13, %v342_v16  ;;  %9326 = vst [vmem:[#allocation12_spill] sm:$0xff] %v4361_v60 }
  0xfb   :  { %v4301_v45 = vpop.f32.mrf.mxu0  ;;  %v4339_v12 = vpop.f32.mrf.mxu1 }
  0xfc   :  { %v345_v19 = vsel %vm9321_vm0, %v4301_v45, 0.0 }
  0xfd   :  { %v346_v50 = vadd.f32 %v345_v19, %v344_v23  ;;  %v361_v19 = vsel %vm9321_vm0, %v4257_v20, 0.0 }
 0x103   :  { %v4317_v55 = vpop.f32.mrf.mxu0  ;;  %v4357_v56 = vpop.f32.mrf.mxu1 }
 0x104   :  { %v347_v48 = vsel %vm9321_vm0, %v4317_v55, 0.0  ;;  %9325 = vst [vmem:[#allocation11_spill] sm:$0xff] %v4357_v56 }
 0x105   :  { %v348_v52 = vadd.f32 %v347_v48, %v346_v50  ;;  %v4377_v48 = vpop.f32.mrf.mxu2  ;;  %v363_v50 = vsel %vm9321_vm0, %v4263_v24, 0.0 }
 0x10b   :  { %v4333_v3 = vpop.f32.mrf.mxu0  ;;  %v4373_v16 = vpop.f32.mrf.mxu1 }
 0x10c   :  { %v349_v51 = vsel %vm9321_vm0, %v4333_v3, 0.0  ;;  %9327 = vst [vmem:[#allocation13_spill] sm:$0xff] %v4373_v16 }
 0x10d   :  { %v350_v54 = vadd.f32 %v349_v51, %v348_v52  ;;  %v4381_v52 = vpop.f32.mrf.mxu3 }
 0x113   :  { %v4347_v27 = vpop.f32.mrf.mxu0 }
 0x114   :  { %v351_v53 = vsel %vm9321_vm0, %v4347_v27, 0.0 }
 0x115   :  { %v352_v57 = vadd.f32 %v351_v53, %v350_v54  ;;  %v365_v53 = vsel %vm9321_vm0, %v4271_v29, 0.0 }
 0x11b   :  { %v4359_v59 = vpop.f32.mrf.mxu0 }
 0x11c   :  { %v353_v62 = vsel %vm9321_vm0, %v4359_v59, 0.0 }
 0x11d   :  { %v354_v63 = vadd.f32 %v353_v62, %v352_v57  ;;  %v367_v57 = vsel %vm9321_vm0, %v4277_v33, 0.0 }
 0x11f   :  { %v356_v4 = vadd.f32 %v355_v2, %v354_v63  ;;  %v369_v63 = vsel %vm9321_vm0, %v4285_v37, 0.0 }
 0x121   :  { %v358_v8 = vadd.f32 %v357_v5, %v356_v4  ;;  %v4389_v4 = vpop.f32.mrf.mxu1  ;;  %v371_v5 = vsel %vm9321_vm0, %v4293_v41, 0.0 }
 0x122   :  { %9328 = vst [vmem:[#allocation14_spill] sm:$0xff] %v4389_v4 }
 0x123   :  { %v360_v13 = vadd.f32 %v359_v9, %v358_v8  ;;  %v4393_v9 = vpop.f32.mrf.mxu2 }
 0x125   :  { %v362_v23 = vadd.f32 %v361_v19, %v360_v13  ;;  %v373_v13 = vsel %vm9321_vm0, %v4303_v46, 0.0 }
 0x127   :  { %v364_v51 = vadd.f32 %v363_v50, %v362_v23  ;;  %v4397_v23 = vpop.f32.mrf.mxu3  ;;  %v375_v50 = vsel %vm9321_vm0, %v4321_v58, 0.0 }
 0x128   :  { %9329 = vst [vmem:[#allocation15_spill] sm:$0xff] %v4397_v23 }
 0x129   :  { %v366_v54 = vadd.f32 %v365_v53, %v364_v51  ;;  %v377_v53 = vsel %vm9321_vm0, %v4339_v12, 0.0 }
 0x12b   :  { %v368_v62 = vadd.f32 %v367_v57, %v366_v54  ;;  %v379_v57 = vsel %vm9321_vm0, %v4357_v56, 0.0 }
 0x12d   :  { %v370_v2 = vadd.f32 %v369_v63, %v368_v62  ;;  %v4405_v63 = vpop.f32.mrf.mxu1 }
 0x12e   :  { %9330 = vst [vmem:[#allocation16_spill] sm:$0xff] %v4405_v63 }
 0x12f   :  { %v372_v8 = vadd.f32 %v371_v5, %v370_v2  ;;  %v381_v2 = vsel %vm9321_vm0, %v4373_v16, 0.0  ;;  %v389_v16 = vsel %vm9321_vm0, %v4267_v26, 0.0 }
 0x131   :  { %v374_v19 = vadd.f32 %v373_v13, %v372_v8  ;;  %v4409_v8 = vpop.f32.mrf.mxu2  ;;  %v383_v13 = vsel %vm9321_vm0, %v4389_v4, 0.0 }
 0x133   :  { %v376_v51 = vadd.f32 %v375_v50, %v374_v19  ;;  %v385_v19 = vsel %vm9321_vm0, %v4405_v63, 0.0 }
 0x135   :  { %v378_v54 = vadd.f32 %v377_v53, %v376_v51  ;;  %v4415_v51 = vpop.f32.mrf.mxu3 }
 0x136   :  { %9331 = vst [vmem:[#allocation17_spill] sm:$0xff] %v4415_v51 }
 0x137   :  { %v380_v62 = vadd.f32 %v379_v57, %v378_v54  ;;  %v387_v54 = vsel %vm9321_vm0, %v4261_v22, 0.0 }
 0x139   :  { %v382_v5 = vadd.f32 %v381_v2, %v380_v62  ;;  %v391_v2 = vsel %vm9321_vm0, %v4273_v30, 0.0  ;;  %v4423_v4 = vpop.f32.mrf.mxu2 }
 0x13a   :  { %9332 = vst [vmem:[#allocation18_spill] sm:$0xff] %v4423_v4 }
 0x13b   :  { %v384_v50 = vadd.f32 %v383_v13, %v382_v5  ;;  %v393_v5 = vsel %vm9321_vm0, %v4279_v34, 0.0 }
 0x13d   :  { %v386_v53 = vadd.f32 %v385_v19, %v384_v50  ;;  %v4427_v63 = vpop.f32.mrf.mxu3  ;;  %v395_v19 = vsel %vm9321_vm0, %v4287_v38, 0.0 }
 0x13e   :  { %9333 = vst [vmem:[#allocation19_spill] sm:$0xff] %v4427_v63 }
 0x13f   :  { %v388_v57 = vadd.f32 %v387_v54, %v386_v53  ;;  %v397_v53 = vsel %vm9321_vm0, %v4297_v43, 0.0  ;;  %v399_v54 = vsel %vm9321_vm0, %v4305_v47, 0.0 }
 0x141   :  { %v390_v62 = vadd.f32 %v389_v16, %v388_v57  ;;  %v4437_v34 = vpop.f32.mrf.mxu2 }
 0x142   :  { %9334 = vst [vmem:[#allocation20_spill] sm:$0xff] %v4437_v34 }
 0x143   :  { %v392_v56 = vadd.f32 %v391_v2, %v390_v62  ;;  %v401_v62 = vsel %vm9321_vm0, %v4325_v61, 0.0 }
 0x145   :  { %v394_v13 = vadd.f32 %v393_v5, %v392_v56  ;;  %v403_v56 = vsel %vm9321_vm0, %v4343_v17, 0.0  ;;  %v4441_v38 = vpop.f32.mrf.mxu3 }
 0x146   :  { %9335 = vst [vmem:[#allocation21_spill] sm:$0xff] %v4441_v38 }
 0x147   :  { %v396_v50 = vadd.f32 %v395_v19, %v394_v13  ;;  %v405_v13 = vsel %vm9321_vm0, %v4361_v60, 0.0 }
 0x149   :  { %v398_v16 = vadd.f32 %v397_v53, %v396_v50  ;;  %v407_v50 = vsel %vm9321_vm0, %v4377_v48, 0.0  ;;  %v4451_v17 = vpop.f32.mrf.mxu2 }
 0x14a   :  { %9336 = vst [vmem:[#allocation22_spill] sm:$0xff] %v4451_v17 }
 0x14b   :  { %v400_v57 = vadd.f32 %v399_v54, %v398_v16  ;;  %v409_v16 = vsel %vm9321_vm0, %v4393_v9, 0.0 }
 0x14d   :  { %v402_v2 = vadd.f32 %v401_v62, %v400_v57  ;;  %v411_v57 = vsel %vm9321_vm0, %v4409_v8, 0.0  ;;  %v4455_v60 = vpop.f32.mrf.mxu3 }
 0x14e   :  { %9337 = vst [vmem:[#allocation23_spill] sm:$0xff] %v4455_v60 }
 0x14f   :  { %v404_v5 = vadd.f32 %v403_v56, %v402_v2  ;;  %v413_v2 = vsel %vm9321_vm0, %v4423_v4, 0.0 }
 0x151   :  { %v406_v19 = vadd.f32 %v405_v13, %v404_v5  ;;  %v415_v5 = vsel %vm9321_vm0, %v4437_v34, 0.0  ;;  %v417_v13 = vsel %vm9321_vm0, %v4451_v17, 0.0  ;;  %v425_v34 = vsel %vm9321_vm0, %v4309_v49, 0.0 }
 0x153   :  { %v408_v53 = vadd.f32 %v407_v50, %v406_v19 }
 0x155   :  { %v410_v54 = vadd.f32 %v409_v16, %v408_v53  ;;  %v419_v53 = vsel %vm9321_vm0, %v4283_v36, 0.0  ;;  %v4467_v4 = vpop.f32.mrf.mxu3 }
 0x157   :  { %v412_v62 = vadd.f32 %v411_v57, %v410_v54  ;;  %v421_v54 = vsel %vm9321_vm0, %v4291_v40, 0.0 }
 0x159   :  { %v414_v56 = vadd.f32 %v413_v2, %v412_v62  ;;  %v423_v62 = vsel %vm9321_vm0, %v4299_v44, 0.0 }
 0x15b   :  { %v416_v19 = vadd.f32 %v415_v5, %v414_v56  ;;  %v427_v56 = vsel %vm9321_vm0, %v4329_v0, 0.0 }
 0x15d   :  { %v418_v50 = vadd.f32 %v417_v13, %v416_v19  ;;  %v429_v13 = vsel %vm9321_vm0, %v4349_v31, 0.0 }
 0x15f   :  { %v420_v16 = vadd.f32 %v419_v53, %v418_v50  ;;  %v431_v50 = vsel %vm9321_vm0, %v4365_v1, 0.0 }
 0x161   :  { %v422_v57 = vadd.f32 %v421_v54, %v420_v16  ;;  %v433_v16 = vsel %vm9321_vm0, %v4381_v52, 0.0 }
 0x163   :  { %v424_v2 = vadd.f32 %v423_v62, %v422_v57  ;;  %v4479_v57 = vpop.f32.mrf.mxu3 }
 0x165   :  { %v426_v17 = vadd.f32 %v425_v34, %v424_v2  ;;  %v435_v34 = vsel %vm9321_vm0, %v4397_v23, 0.0 }
 0x167   :  { %v428_v5 = vadd.f32 %v427_v56, %v426_v17  ;;  %v437_v17 = vsel %vm9321_vm0, %v4415_v51, 0.0  ;;  %v439_v56 = vsel %vm9321_vm0, %v4427_v63, 0.0 }
 0x169   :  { %v430_v19 = vadd.f32 %v429_v13, %v428_v5  ;;  %v441_v13 = vsel %vm9321_vm0, %v4441_v38, 0.0 }
 0x16b   :  { %v432_v53 = vadd.f32 %v431_v50, %v430_v19  ;;  %v443_v50 = vsel %vm9321_vm0, %v4455_v60, 0.0 }
 0x16d   :  { %v434_v54 = vadd.f32 %v433_v16, %v432_v53  ;;  %v320_v16 = vpop.f32.mrf.mxu3 }
 0x16f   :  { %v436_v62 = vadd.f32 %v435_v34, %v434_v54  ;;  %v445_v54 = vsel %vm9321_vm0, %v4467_v4, 0.0 }
 0x171   :  { %v438_v2 = vadd.f32 %v437_v17, %v436_v62  ;;  %v447_v62 = vsel %vm9321_vm0, %v4479_v57, 0.0  ;;  %v449_v17 = vsel %vm9321_vm0, %v320_v16, 0.0 }
 0x173   :  { %v440_v5 = vadd.f32 %v439_v56, %v438_v2 }
 0x175   :  { %v442_v19 = vadd.f32 %v441_v13, %v440_v5 }
 0x177   :  { %v444_v53 = vadd.f32 %v443_v50, %v442_v19 }
 0x179   :  { %v446_v34 = vadd.f32 %v445_v54, %v444_v53 }
 0x17b   :  { %v448_v63 = vadd.f32 %v447_v62, %v446_v34 }
 0x17d   :  { %v450_v2 = vadd.f32 %v449_v17, %v448_v63 }
 0x17f   :  { %v451_v56 = vrot.slane %v450_v2, 4 }
 0x181   :  { %v452_v51 = vadd.f32 %v451_v56, %v450_v2 }
 0x183   :  { %v453_v38 = vrot.slane %v452_v51, 2 }
 0x185   :  { %v454_v5 = vadd.f32 %v453_v38, %v452_v51 }
 0x187   :  { %v455_v13 = vrot.slane %v454_v5, 1 }
 0x189   :  { %v456_v23 = vadd.f32 %v455_v13, %v454_v5 }
 0x18b   :  { %v4496_v60 = vmul.f32 0.001953125, %v456_v23 }
 0x18d   :  { %v4499_v19 = vsub.f32 %v320_v16, %v4496_v60  ;;  %v4503_v50 = vsub.f32 %v4243_v6, %v4496_v60  ;;  %v4507_v53 = vsub.f32 %v4247_v10, %v4496_v60  ;;  %v4511_v63 = vsub.f32 %v4251_v14, %v4496_v60 }
 0x18e   :  { %v4515_v38 = vsub.f32 %v4255_v18, %v4496_v60  ;;  %v4523_v6 = vsub.f32 %v4259_v21, %v4496_v60  ;;  %v4529_v14 = vsub.f32 %v4265_v25, %v4496_v60  ;;  %v4537_v62 = vsub.f32 %v4269_v28, %v4496_v60 }
 0x18f   :  { %v522_v23 = vmul.f32 %v4503_v50, %v4503_v50  ;;  %v523_v51 = vmul.f32 %v4507_v53, %v4507_v53  ;;  %v524_v10 = vmul.f32 %v4511_v63, %v4511_v63  ;;  %v4544_v25 = vsub.f32 %v4275_v32, %v4496_v60 }
 0x190   :  { %v525_v18 = vmul.f32 %v4515_v38, %v4515_v38  ;;  %v526_v21 = vmul.f32 %v4523_v6, %v4523_v6  ;;  %v527_v56 = vmul.f32 %v4529_v14, %v4529_v14  ;;  %v4551_v28 = vsub.f32 %v4281_v35, %v4496_v60 }
 0x191   :  { %v586_v16 = vsel %vm9321_vm0, %v522_v23, 0.0  ;;  %v587_v54 = vsel %vm9321_vm0, %v523_v51, 0.0  ;;  %v589_v17 = vsel %vm9321_vm0, %v524_v10, 0.0  ;;  %v528_v23 = vmul.f32 %v4537_v62, %v4537_v62 }
 0x192   :  { %v588_v34 = vadd.f32 %v587_v54, %v586_v16  ;;  %v591_v5 = vsel %vm9321_vm0, %v525_v18, 0.0  ;;  %v593_v51 = vsel %vm9321_vm0, %v526_v21, 0.0  ;;  %v4558_v32 = vsub.f32 %v4289_v39, %v4496_v60 }
 0x193   :  { %v529_v16 = vmul.f32 %v4544_v25, %v4544_v25  ;;  %v595_v18 = vsel %vm9321_vm0, %v527_v56, 0.0  ;;  %v4565_v35 = vsub.f32 %v4295_v42, %v4496_v60  ;;  %v597_v21 = vsel %vm9321_vm0, %v528_v23, 0.0 }
 0x194   :  { %v590_v2 = vadd.f32 %v589_v17, %v588_v34  ;;  %v530_v34 = vmul.f32 %v4551_v28, %v4551_v28  ;;  %v4572_v39 = vsub.f32 %v4301_v45, %v4496_v60  ;;  %v4579_v42 = vsub.f32 %v4317_v55, %v4496_v60 }
 0x195   :  { %v599_v56 = vsel %vm9321_vm0, %v529_v16, 0.0  ;;  %v4586_v45 = vsub.f32 %v4333_v3, %v4496_v60  ;;  %v4593_v55 = vsub.f32 %v4347_v27, %v4496_v60  ;;  %v4600_v3 = vsub.f32 %v4359_v59, %v4496_v60 }
 0x196   :  { %v592_v13 = vadd.f32 %v591_v5, %v590_v2  ;;  %v531_v2 = vmul.f32 %v4558_v32, %v4558_v32  ;;  %v601_v23 = vsel %vm9321_vm0, %v530_v34, 0.0  ;;  %v4607_v27 = vsub.f32 %v4245_v7, %v4496_v60 }
 0x197   :  { %v4614_v59 = vsub.f32 %v4249_v11, %v4496_v60  ;;  %v4621_v7 = vsub.f32 %v4253_v15, %v4496_v60  ;;  %v4628_v11 = vsub.f32 %v4257_v20, %v4496_v60  ;;  %v4635_v15 = vsub.f32 %v4263_v24, %v4496_v60 }
 0x198   :  { %v594_v10 = vadd.f32 %v593_v51, %v592_v13  ;;  %v532_v13 = vmul.f32 %v4565_v35, %v4565_v35  ;;  %v603_v16 = vsel %vm9321_vm0, %v531_v2, 0.0  ;;  %v4642_v20 = vsub.f32 %v4271_v29, %v4496_v60 }
 0x199   :  { %v4649_v24 = vsub.f32 %v4277_v33, %v4496_v60  ;;  %v4656_v29 = vsub.f32 %v4285_v37, %v4496_v60  ;;  %v4663_v33 = vsub.f32 %v4293_v41, %v4496_v60  ;;  %v4670_v37 = vsub.f32 %v4303_v46, %v4496_v60 }
 0x19a   :  { %v596_v54 = vadd.f32 %v595_v18, %v594_v10  ;;  %v533_v10 = vmul.f32 %v4572_v39, %v4572_v39  ;;  %v605_v34 = vsel %vm9321_vm0, %v532_v13, 0.0  ;;  %v4677_v41 = vsub.f32 %v4321_v58, %v4496_v60 }
 0x19b   :  { %v4684_v46 = vsub.f32 %v4339_v12, %v4496_v60 }
 0x19c   :  { %v598_v17 = vadd.f32 %v597_v21, %v596_v54  ;;  %v534_v54 = vmul.f32 %v4579_v42, %v4579_v42  ;;  %v607_v2 = vsel %vm9321_vm0, %v533_v10, 0.0 }
 0x19d   :  { %9338 = vst [vmem:[#allocation24_spill] sm:$0xff] %v4684_v46 }
 0x19e   :  { %v600_v5 = vadd.f32 %v599_v56, %v598_v17  ;;  %v535_v17 = vmul.f32 %v4586_v45, %v4586_v45  ;;  %v609_v13 = vsel %vm9321_vm0, %v534_v54, 0.0 }
 0x1a0   :  { %v602_v51 = vadd.f32 %v601_v23, %v600_v5  ;;  %v536_v5 = vmul.f32 %v4593_v55, %v4593_v55  ;;  %v611_v10 = vsel %vm9321_vm0, %v535_v17, 0.0 }
 0x1a2   :  { %v604_v18 = vadd.f32 %v603_v16, %v602_v51  ;;  %v537_v51 = vmul.f32 %v4600_v3, %v4600_v3  ;;  %v613_v54 = vsel %vm9321_vm0, %v536_v5, 0.0 }
 0x1a4   :  { %v606_v21 = vadd.f32 %v605_v34, %v604_v18  ;;  %v538_v18 = vmul.f32 %v4607_v27, %v4607_v27  ;;  %v615_v17 = vsel %vm9321_vm0, %v537_v51, 0.0 }
 0x1a6   :  { %v608_v56 = vadd.f32 %v607_v2, %v606_v21  ;;  %v539_v21 = vmul.f32 %v4614_v59, %v4614_v59  ;;  %v617_v5 = vsel %vm9321_vm0, %v538_v18, 0.0 }
 0x1a8   :  { %v610_v23 = vadd.f32 %v609_v13, %v608_v56  ;;  %v540_v56 = vmul.f32 %v4621_v7, %v4621_v7  ;;  %v619_v51 = vsel %vm9321_vm0, %v539_v21, 0.0 }
 0x1aa   :  { %v612_v16 = vadd.f32 %v611_v10, %v610_v23  ;;  %v541_v23 = vmul.f32 %v4628_v11, %v4628_v11  ;;  %v621_v18 = vsel %vm9321_vm0, %v540_v56, 0.0 }
 0x1ac   :  { %v614_v34 = vadd.f32 %v613_v54, %v612_v16  ;;  %v542_v16 = vmul.f32 %v4635_v15, %v4635_v15  ;;  %v623_v21 = vsel %vm9321_vm0, %v541_v23, 0.0 }
 0x1ae   :  { %v616_v2 = vadd.f32 %v615_v17, %v614_v34  ;;  %v543_v34 = vmul.f32 %v4642_v20, %v4642_v20  ;;  %v625_v56 = vsel %vm9321_vm0, %v542_v16, 0.0 }
 0x1b0   :  { %v618_v13 = vadd.f32 %v617_v5, %v616_v2  ;;  %v544_v2 = vmul.f32 %v4649_v24, %v4649_v24  ;;  %v627_v23 = vsel %vm9321_vm0, %v543_v34, 0.0 }
 0x1b2   :  { %v620_v10 = vadd.f32 %v619_v51, %v618_v13  ;;  %v545_v13 = vmul.f32 %v4656_v29, %v4656_v29  ;;  %v629_v16 = vsel %vm9321_vm0, %v544_v2, 0.0 }
 0x1b4   :  { %v622_v54 = vadd.f32 %v621_v18, %v620_v10  ;;  %v546_v10 = vmul.f32 %v4663_v33, %v4663_v33  ;;  %v631_v34 = vsel %vm9321_vm0, %v545_v13, 0.0 }
 0x1b6   :  { %v624_v17 = vadd.f32 %v623_v21, %v622_v54  ;;  %v547_v54 = vmul.f32 %v4670_v37, %v4670_v37  ;;  %v633_v2 = vsel %vm9321_vm0, %v546_v10, 0.0 }
 0x1b8   :  { %v626_v5 = vadd.f32 %v625_v56, %v624_v17  ;;  %v9339_v17 = vld [vmem:[#allocation11_spill] sm:$0xff]  ;;  %v548_v56 = vmul.f32 %v4677_v41, %v4677_v41  ;;  %v635_v13 = vsel %vm9321_vm0, %v547_v54, 0.0 }
 0x1b9   :  { %v4691_v58 = vsub.f32 %v9339_v17, %v4496_v60 }
 0x1ba   :  { %v628_v51 = vadd.f32 %v627_v23, %v626_v5  ;;  %v9340_v23 = vld [vmem:[#allocation13_spill] sm:$0xff]  ;;  %v637_v10 = vsel %vm9321_vm0, %v548_v56, 0.0 }
 0x1bb   :  { %v4698_v12 = vsub.f32 %v9340_v23, %v4496_v60  ;;  %v550_v17 = vmul.f32 %v4691_v58, %v4691_v58 }
 0x1bc   :  { %v630_v18 = vadd.f32 %v629_v16, %v628_v51  ;;  %v549_v51 = vmul.f32 %v4684_v46, %v4684_v46 }
 0x1bd   :  { %v551_v46 = vmul.f32 %v4698_v12, %v4698_v12  ;;  %v641_v56 = vsel %vm9321_vm0, %v550_v17, 0.0 }
 0x1be   :  { %v632_v21 = vadd.f32 %v631_v34, %v630_v18  ;;  %v9341_v18 = vld [vmem:[#allocation14_spill] sm:$0xff]  ;;  %v639_v54 = vsel %vm9321_vm0, %v549_v51, 0.0 }
 0x1bf   :  { %v4705_v34 = vsub.f32 %v9341_v18, %v4496_v60  ;;  %v643_v51 = vsel %vm9321_vm0, %v551_v46, 0.0 }
 0x1c0   :  { %v634_v5 = vadd.f32 %v633_v2, %v632_v21  ;;  %v9342_v2 = vld [vmem:[#allocation16_spill] sm:$0xff] }
 0x1c1   :  { %v4712_v23 = vsub.f32 %v9342_v2, %v4496_v60  ;;  %v552_v18 = vmul.f32 %v4705_v34, %v4705_v34 }
 0x1c2   :  { %v636_v16 = vadd.f32 %v635_v13, %v634_v5  ;;  %v4719_v13 = vsub.f32 %v4261_v22, %v4496_v60  ;;  %v4733_v22 = vsub.f32 %v4273_v30, %v4496_v60 }
 0x1c3   :  { %9343 = vst [vmem:[#allocation11_spill] sm:$0xff] %v4712_v23  ;;  %v553_v2 = vmul.f32 %v4712_v23, %v4712_v23  ;;  %v645_v17 = vsel %vm9321_vm0, %v552_v18, 0.0 }
 0x1c4   :  { %v638_v21 = vadd.f32 %v637_v10, %v636_v16  ;;  %9344 = vst [vmem:[#allocation13_spill] sm:$0xff] %v4719_v13  ;;  %v4726_v10 = vsub.f32 %v4267_v26, %v4496_v60 }
 0x1c5   :  { %v647_v46 = vsel %vm9321_vm0, %v553_v2, 0.0 }
 0x1c6   :  { %v640_v5 = vadd.f32 %v639_v54, %v638_v21  ;;  %v554_v54 = vmul.f32 %v4719_v13, %v4719_v13  ;;  %v555_v23 = vmul.f32 %v4726_v10, %v4726_v10  ;;  %v556_v13 = vmul.f32 %v4733_v22, %v4733_v22 }
 0x1c8   :  { %v642_v16 = vadd.f32 %v641_v56, %v640_v5  ;;  %v9345_v56 = vld [vmem:[#allocation8_spill] sm:$0xff]  ;;  %v649_v18 = vsel %vm9321_vm0, %v554_v54, 0.0  ;;  %v651_v2 = vsel %vm9321_vm0, %v555_v23, 0.0  ;;  %v653_v54 = vsel %vm9321_vm0, %v556_v13, 0.0 }
 0x1c9   :  { %v4740_v26 = vsub.f32 %v9345_v56, %v4496_v60 }
 0x1ca   :  { %v644_v21 = vadd.f32 %v643_v51, %v642_v16  ;;  %v9346_v51 = vld [vmem:[#allocation9_spill] sm:$0xff] }
 0x1cb   :  { %v4747_v30 = vsub.f32 %v9346_v51, %v4496_v60  ;;  %v557_v56 = vmul.f32 %v4740_v26, %v4740_v26 }
 0x1cc   :  { %v646_v5 = vadd.f32 %v645_v17, %v644_v21  ;;  %v4754_v17 = vsub.f32 %v4297_v43, %v4496_v60  ;;  %v4768_v43 = vsub.f32 %v4325_v61, %v4496_v60 }
 0x1cd   :  { %9347 = vst [vmem:[#allocation14_spill] sm:$0xff] %v4747_v30  ;;  %v558_v51 = vmul.f32 %v4747_v30, %v4747_v30  ;;  %v655_v23 = vsel %vm9321_vm0, %v557_v56, 0.0 }
 0x1ce   :  { %v648_v16 = vadd.f32 %v647_v46, %v646_v5  ;;  %9348 = vst [vmem:[#allocation16_spill] sm:$0xff] %v4754_v17  ;;  %v4761_v46 = vsub.f32 %v4305_v47, %v4496_v60 }
 0x1cf   :  { %v657_v13 = vsel %vm9321_vm0, %v558_v51, 0.0 }
 0x1d0   :  { %v650_v21 = vadd.f32 %v649_v18, %v648_v16  ;;  %v559_v18 = vmul.f32 %v4754_v17, %v4754_v17  ;;  %v560_v30 = vmul.f32 %v4761_v46, %v4761_v46  ;;  %v561_v17 = vmul.f32 %v4768_v43, %v4768_v43 }
 0x1d2   :  { %v652_v5 = vadd.f32 %v651_v2, %v650_v21  ;;  %v9349_v2 = vld [vmem:[#allocation10_spill] sm:$0xff]  ;;  %v659_v56 = vsel %vm9321_vm0, %v559_v18, 0.0  ;;  %v661_v51 = vsel %vm9321_vm0, %v560_v30, 0.0  ;;  %v663_v18 = vsel %vm9321_vm0, %v561_v17, 0.0 }
 0x1d3   :  { %v4775_v47 = vsub.f32 %v9349_v2, %v4496_v60 }
 0x1d4   :  { %v654_v16 = vadd.f32 %v653_v54, %v652_v5  ;;  %v9350_v54 = vld [vmem:[#allocation12_spill] sm:$0xff] }
 0x1d5   :  { %v4782_v61 = vsub.f32 %v9350_v54, %v4496_v60  ;;  %v562_v2 = vmul.f32 %v4775_v47, %v4775_v47 }
 0x1d6   :  { %v656_v21 = vadd.f32 %v655_v23, %v654_v16  ;;  %v4789_v23 = vsub.f32 %v4377_v48, %v4496_v60  ;;  %v4803_v48 = vsub.f32 %v4409_v8, %v4496_v60 }
 0x1d7   :  { %9351 = vst [vmem:[#allocation8_spill] sm:$0xff] %v4782_v61  ;;  %v563_v54 = vmul.f32 %v4782_v61, %v4782_v61  ;;  %v665_v30 = vsel %vm9321_vm0, %v562_v2, 0.0 }
 0x1d8   :  { %v658_v5 = vadd.f32 %v657_v13, %v656_v21  ;;  %9352 = vst [vmem:[#allocation9_spill] sm:$0xff] %v4789_v23  ;;  %v4796_v13 = vsub.f32 %v4393_v9, %v4496_v60 }
 0x1d9   :  { %v667_v17 = vsel %vm9321_vm0, %v563_v54, 0.0 }
 0x1da   :  { %v660_v16 = vadd.f32 %v659_v56, %v658_v5  ;;  %9353 = vst [vmem:[#allocation10_spill] sm:$0xff] %v4796_v13  ;;  %v564_v56 = vmul.f32 %v4789_v23, %v4789_v23  ;;  %v565_v61 = vmul.f32 %v4796_v13, %v4796_v13  ;;  %v566_v23 = vmul.f32 %v4803_v48, %v4803_v48 }
 0x1dc   :  { %v662_v21 = vadd.f32 %v661_v51, %v660_v16  ;;  %v9354_v51 = vld [vmem:[#allocation18_spill] sm:$0xff]  ;;  %v669_v2 = vsel %vm9321_vm0, %v564_v56, 0.0  ;;  %v671_v54 = vsel %vm9321_vm0, %v565_v61, 0.0  ;;  %v673_v56 = vsel %vm9321_vm0, %v566_v23, 0.0 }
 0x1dd   :  { %v4810_v9 = vsub.f32 %v9354_v51, %v4496_v60 }
 0x1de   :  { %v664_v5 = vadd.f32 %v663_v18, %v662_v21  ;;  %v9355_v18 = vld [vmem:[#allocation20_spill] sm:$0xff] }
 0x1df   :  { %v4817_v8 = vsub.f32 %v9355_v18, %v4496_v60  ;;  %v567_v13 = vmul.f32 %v4810_v9, %v4810_v9 }
 0x1e0   :  { %v666_v16 = vadd.f32 %v665_v30, %v664_v5  ;;  %v9356_v30 = vld [vmem:[#allocation22_spill] sm:$0xff] }
 0x1e1   :  { %v4824_v51 = vsub.f32 %v9356_v30, %v4496_v60  ;;  %v568_v18 = vmul.f32 %v4817_v8, %v4817_v8  ;;  %v675_v61 = vsel %vm9321_vm0, %v567_v13, 0.0 }
 0x1e2   :  { %v668_v21 = vadd.f32 %v667_v17, %v666_v16  ;;  %v4831_v17 = vsub.f32 %v4283_v36, %v4496_v60  ;;  %v4845_v36 = vsub.f32 %v4299_v44, %v4496_v60  ;;  %v4859_v44 = vsub.f32 %v4329_v0, %v4496_v60 }
 0x1e3   :  { %v569_v30 = vmul.f32 %v4824_v51, %v4824_v51  ;;  %v677_v23 = vsel %vm9321_vm0, %v568_v18, 0.0  ;;  %v4873_v0 = vsub.f32 %v4365_v1, %v4496_v60 }
 0x1e4   :  { %v670_v5 = vadd.f32 %v669_v2, %v668_v21  ;;  %v4838_v2 = vsub.f32 %v4291_v40, %v4496_v60  ;;  %9358 = vst [vmem:[#allocation18_spill] sm:$0xff] %v4845_v36  ;;  %v4852_v40 = vsub.f32 %v4309_v49, %v4496_v60  ;;  %v4866_v49 = vsub.f32 %v4349_v31, %v4496_v60 }
 0x1e5   :  { %v679_v13 = vsel %vm9321_vm0, %v569_v30, 0.0  ;;  %9360 = vst [vmem:[#allocation22_spill] sm:$0xff] %v4859_v44  ;;  %v4880_v31 = vsub.f32 %v4381_v52, %v4496_v60 }
 0x1e6   :  { %v672_v16 = vadd.f32 %v671_v54, %v670_v5  ;;  %9357 = vst [vmem:[#allocation12_spill] sm:$0xff] %v4838_v2  ;;  %v570_v54 = vmul.f32 %v4831_v17, %v4831_v17 }
 0x1e7   :  { %9359 = vst [vmem:[#allocation20_spill] sm:$0xff] %v4852_v40 }
 0x1e8   :  { %v674_v21 = vadd.f32 %v673_v56, %v672_v16  ;;  %v571_v56 = vmul.f32 %v4838_v2, %v4838_v2  ;;  %v681_v18 = vsel %vm9321_vm0, %v570_v54, 0.0  ;;  %9361 = vst [vmem:[#allocation25_spill] sm:$0xff] %v4866_v49  ;;  %v576_v2 = vmul.f32 %v4873_v0, %v4873_v0 }
 0x1e9   :  { %9362 = vst [vmem:[#allocation26_spill] sm:$0xff] %v4880_v31 }
 0x1ea   :  { %v676_v5 = vadd.f32 %v675_v61, %v674_v21  ;;  %v572_v61 = vmul.f32 %v4845_v36, %v4845_v36  ;;  %v683_v30 = vsel %vm9321_vm0, %v571_v56, 0.0 }
 0x1ec   :  { %v678_v16 = vadd.f32 %v677_v23, %v676_v5  ;;  %v573_v23 = vmul.f32 %v4852_v40, %v4852_v40  ;;  %v685_v54 = vsel %vm9321_vm0, %v572_v61, 0.0 }
 0x1ee   :  { %v680_v21 = vadd.f32 %v679_v13, %v678_v16  ;;  %v574_v13 = vmul.f32 %v4859_v44, %v4859_v44  ;;  %v687_v56 = vsel %vm9321_vm0, %v573_v23, 0.0 }
 0x1f0   :  { %v682_v5 = vadd.f32 %v681_v18, %v680_v21  ;;  %v575_v18 = vmul.f32 %v4866_v49, %v4866_v49  ;;  %v689_v61 = vsel %vm9321_vm0, %v574_v13, 0.0  ;;  %v577_v49 = vmul.f32 %v4880_v31, %v4880_v31 }
 0x1f1   :  { %v693_v13 = vsel %vm9321_vm0, %v576_v2, 0.0 }
 0x1f2   :  { %v684_v16 = vadd.f32 %v683_v30, %v682_v5  ;;  %v9363_v30 = vld [vmem:[#allocation15_spill] sm:$0xff]  ;;  %v691_v23 = vsel %vm9321_vm0, %v575_v18, 0.0  ;;  %v695_v18 = vsel %vm9321_vm0, %v577_v49, 0.0 }
 0x1f3   :  { %v4887_v1 = vsub.f32 %v9363_v30, %v4496_v60 }
 0x1f4   :  { %v686_v21 = vadd.f32 %v685_v54, %v684_v16  ;;  %v9365_v54 = vld [vmem:[#allocation17_spill] sm:$0xff] }
 0x1f5   :  { %9364 = vst [vmem:[#allocation15_spill] sm:$0xff] %v4887_v1  ;;  %v4894_v52 = vsub.f32 %v9365_v54, %v4496_v60  ;;  %v578_v44 = vmul.f32 %v4887_v1, %v4887_v1 }
 0x1f6   :  { %v688_v5 = vadd.f32 %v687_v56, %v686_v21  ;;  %v9367_v56 = vld [vmem:[#allocation19_spill] sm:$0xff] }
 0x1f7   :  { %9366 = vst [vmem:[#allocation17_spill] sm:$0xff] %v4894_v52  ;;  %v4901_v30 = vsub.f32 %v9367_v56, %v4496_v60  ;;  %v579_v31 = vmul.f32 %v4894_v52, %v4894_v52  ;;  %v697_v2 = vsel %vm9321_vm0, %v578_v44, 0.0 }
 0x1f8   :  { %v690_v16 = vadd.f32 %v689_v61, %v688_v5  ;;  %v9369_v61 = vld [vmem:[#allocation21_spill] sm:$0xff] }
 0x1f9   :  { %9368 = vst [vmem:[#allocation19_spill] sm:$0xff] %v4901_v30  ;;  %v4908_v54 = vsub.f32 %v9369_v61, %v4496_v60  ;;  %v580_v1 = vmul.f32 %v4901_v30, %v4901_v30  ;;  %v699_v49 = vsel %vm9321_vm0, %v579_v31, 0.0 }
 0x1fa   :  { %v692_v21 = vadd.f32 %v691_v23, %v690_v16  ;;  %v9371_v23 = vld [vmem:[#allocation23_spill] sm:$0xff] }
 0x1fb   :  { %9370 = vst [vmem:[#allocation21_spill] sm:$0xff] %v4908_v54  ;;  %v4915_v56 = vsub.f32 %v9371_v23, %v4496_v60  ;;  %v581_v61 = vmul.f32 %v4908_v54, %v4908_v54  ;;  %v701_v44 = vsel %vm9321_vm0, %v580_v1, 0.0 }
 0x1fc   :  { %v694_v5 = vadd.f32 %v693_v13, %v692_v21  ;;  %v4922_v13 = vsub.f32 %v4467_v4, %v4496_v60 }
 0x1fd   :  { %9372 = vst [vmem:[#allocation23_spill] sm:$0xff] %v4915_v56  ;;  %v582_v23 = vmul.f32 %v4915_v56, %v4915_v56 }
 0x1fe   :  { %v696_v16 = vadd.f32 %v695_v18, %v694_v5  ;;  %9373 = vst [vmem:[#allocation27_spill] sm:$0xff] %v4922_v13  ;;  %v4929_v18 = vsub.f32 %v4479_v57, %v4496_v60  ;;  %v583_v4 = vmul.f32 %v4922_v13, %v4922_v13  ;;  %v585_v60 = vmul.f32 %v4499_v19, %v4499_v19 }
 0x200   :  { %v698_v21 = vadd.f32 %v697_v2, %v696_v16  ;;  %9374 = vst [vmem:[#allocation28_spill] sm:$0xff] %v4929_v18  ;;  %v703_v2 = vsel %vm9321_vm0, %v581_v61, 0.0  ;;  %v584_v31 = vmul.f32 %v4929_v18, %v4929_v18  ;;  %v707_v57 = vsel %vm9321_vm0, %v583_v4, 0.0 }
 0x202   :  { %v700_v5 = vadd.f32 %v699_v49, %v698_v21  ;;  %v705_v21 = vsel %vm9321_vm0, %v582_v23, 0.0  ;;  %v709_v1 = vsel %vm9321_vm0, %v584_v31, 0.0 }
 0x204   :  { %v702_v16 = vadd.f32 %v701_v44, %v700_v5  ;;  %v711_v44 = vsel %vm9321_vm0, %v585_v60, 0.0 }
 0x206   :  { %v704_v30 = vadd.f32 %v703_v2, %v702_v16 }
 0x208   :  { %v706_v49 = vadd.f32 %v705_v21, %v704_v30 }
 0x20a   :  { %v708_v56 = vadd.f32 %v707_v57, %v706_v49 }
 0x20c   :  { %v710_v5 = vadd.f32 %v709_v1, %v708_v56  ;;  %v720_v56 = vld [vmem:[%s9087_s2] sm:$0x1]  ;;  %s4156_s2 = smov 48  }
 0x20e   :  { %v712_v13 = vadd.f32 %v711_v44, %v710_v5 }
 0x210   :  { %v713_v61 = vrot.slane %v712_v13, 4 }
 0x212   :  { %v714_v16 = vadd.f32 %v713_v61, %v712_v13 }
 0x214   :  { %v715_v2 = vrot.slane %v714_v16, 2 }
 0x216   :  { %v716_v54 = vadd.f32 %v715_v2, %v714_v16 }
 0x218   :  { %v717_v18 = vrot.slane %v716_v54, 1 }
 0x21a   :  { %v718_v52 = vadd.f32 %v717_v18, %v716_v54 }
 0x21c   :  { %v719_v23 = vmul.f32 0.001953125, %v718_v52  ;;  %v4953_v52 = vld [vmem:[%s9088_s3] ss:$0 sm:$0xff] }
 0x21e   :  { %v721_v30 = vadd.f32 1e-05, %v719_v23 }
 0x220   :  { %3970 = vrsqrt.f32 %v721_v30  ;;  %vm728_vm2 = vweird.f32 %v721_v30 }
 0x226   :  { %v3971_v21 = vpop.eup %3970 }
 0x227   :  { %v723_v40 = vmul.f32 %v3971_v21, %v721_v30  ;;  %vm729_vm1 = vweird.f32 %v3971_v21 }
 0x228   :  { %vm730_vm3 = vmor %vm728_vm2, %vm729_vm1 }
 0x229   :  { %v724_v36 = vmul.f32 %v3971_v21, %v723_v40 }
 0x22b   :  { %v725_v4 = vmul.f32 0.5, %v724_v36 }
 0x22d   :  { %v726_v49 = vsub.f32 1.5, %v725_v4 }
 0x22f   :  { %v727_v31 = vmul.f32 %v3971_v21, %v726_v49 }
 0x231   :  { %v731_v13 = vsel %vm730_vm3, %v3971_v21, %v727_v31 }
 0x232   :  { %v732_v60 = vmul.f32 %v731_v13, %v720_v56  ;;  %v9384_v56 = vld [vmem:[#allocation24_spill] sm:$0xff] }
 0x234   :  { %v4948_v57 = vperm.slane %v732_v60, 0 }
 0x236   :  { %9375 = vst [vmem:[#allocation29_spill] sm:$0xff] %v4948_v57  ;;  %v799_v36 = vmul.f32 %v4948_v57, %v4499_v19  ;;  %v4960_v54 = vmul.f32 %v4948_v57, %v4503_v50  ;;  %v4964_v18 = vmul.f32 %v4948_v57, %v4507_v53  ;;  %v4970_v5 = vmul.f32 %v4948_v57, %v4511_v63 }
 0x237   :  { %v4974_v44 = vmul.f32 %v4948_v57, %v4515_v38  ;;  %v4978_v19 = vmul.f32 %v4948_v57, %v4523_v6  ;;  %v4982_v50 = vmul.f32 %v4948_v57, %v4529_v14  ;;  %v742_v53 = vmul.f32 %v4948_v57, %v4537_v62 }
 0x238   :  { %v867_v40 = vadd.f32 %v4953_v52, %v799_v36  ;;  %v4988_v61 = vmul.f32 %v4948_v57, %v4544_v25  ;;  %v758_v63 = vmul.f32 %v4948_v57, %v4649_v24  ;;  %v4994_v38 = vmul.f32 %v4948_v57, %v4551_v28 }
 0x239   :  { %v4998_v6 = vmul.f32 %v4948_v57, %v4558_v32  ;;  %v774_v14 = vmul.f32 %v4948_v57, %v4761_v46  ;;  %v790_v62 = vmul.f32 %v4948_v57, %v4873_v0  ;;  %v5006_v25 = vmul.f32 %v4948_v57, %v4565_v35 }
 0x23a   :  { %v4966_v1 = vmul.f32 0.70710677, %v867_v40  ;;  %v5010_v24 = vmul.f32 %v4948_v57, %v4572_v39  ;;  %v5014_v28 = vmul.f32 %v4948_v57, %v4579_v42  ;;  %v5018_v32 = vmul.f32 %v4948_v57, %v4586_v45 }
 0x23b   :  { %v5020_v46 = vmul.f32 0.5, %v867_v40  ;;  %v5026_v35 = vmul.f32 %v4948_v57, %v4593_v55  ;;  %v5030_v39 = vmul.f32 %v4948_v57, %v4600_v3  ;;  %v5034_v42 = vmul.f32 %v4948_v57, %v4607_v27 }
 0x23c   :  { %9376 = vst [vmem:[#allocation30_spill] sm:$0xff] %v4966_v1  ;;  %v3516_v0 = vmul.f32 %v4966_v1, %v4966_v1  ;;  %v5038_v45 = vmul.f32 %v4948_v57, %v4614_v59  ;;  %v5041_v16 = vadd.f32 %v4953_v52, %v742_v53  ;;  %v5044_v2 = vadd.f32 %v4953_v52, %v758_v63 }
 0x23d   :  { %9377 = vst [vmem:[#allocation31_spill] sm:$0xff] %v5020_v46  ;;  %v5048_v55 = vmul.f32 %v4948_v57, %v4621_v7  ;;  %v5052_v3 = vmul.f32 %v4948_v57, %v4628_v11  ;;  %v5055_v27 = vadd.f32 %v4953_v52, %v774_v14  ;;  %v5058_v59 = vadd.f32 %v4953_v52, %v790_v62  ;;  %v9389_v14 = vld [vmem:[#allocation11_spill] sm:$0xff] }
 0x23e   :  { %9378 = vst [vmem:[#allocation32_spill] sm:$0xff] %v5038_v45  ;;  %v5062_v23 = vmul.f32 %v4948_v57, %v4635_v15  ;;  %v5066_v30 = vmul.f32 %v4948_v57, %v4642_v20  ;;  %v5070_v7 = vmul.f32 %v4948_v57, %v4656_v29  ;;  %v5073_v11 = vmul.f32 0.70710677, %v5041_v16 }
 0x23f   :  { %v5075_v21 = vmin.f32 %v3516_v0, 16.0  ;;  %v5079_v4 = vmul.f32 %v4948_v57, %v4663_v33  ;;  %v5082_v15 = vmul.f32 0.70710677, %v5044_v2  ;;  %v5085_v49 = vmul.f32 0.70710677, %v5055_v27 }
 0x240   :  { %9379 = vst [vmem:[#allocation33_spill] sm:$0xff] %v5070_v7  ;;  %v5089_v20 = vmul.f32 %v4948_v57, %v4670_v37  ;;  %v5093_v29 = vmul.f32 %v4948_v57, %v4677_v41  ;;  %v5096_v31 = vmul.f32 0.70710677, %v5058_v59  ;;  %v1236_v33 = vmul.f32 %v5073_v11, %v5073_v11 }
 0x241   :  { %9380 = vst [vmem:[#allocation34_spill] sm:$0xff] %v5075_v21  ;;  %v5102_v13 = vmul.f32 %v4948_v57, %v9384_v56  ;;  %v5106_v60 = vmul.f32 %v4948_v57, %v4691_v58  ;;  %v1876_v37 = vmul.f32 %v5082_v15, %v5082_v15  ;;  %v2516_v41 = vmul.f32 %v5085_v49, %v5085_v49 }
 0x242   :  { %9381 = vst [vmem:[#allocation35_spill] sm:$0xff] %v5079_v4  ;;  %v5114_v36 = vmul.f32 %v4948_v57, %v4698_v12  ;;  %v5118_v40 = vmul.f32 %v4948_v57, %v4705_v34  ;;  %v5120_v53 = vmin.f32 %v1236_v33, 16.0  ;;  %v3156_v58 = vmul.f32 %v5096_v31, %v5096_v31  ;;  %v9391_v12 = vld [vmem:[#allocation13_spill] sm:$0xff] }
 0x243   :  { %9382 = vst [vmem:[#allocation36_spill] sm:$0xff] %v5089_v20  ;;  %v3518_v63 = vmul.f32 2.1237322e-06, %v5075_v21  ;;  %v5127_v62 = vmul.f32 %v4948_v57, %v9389_v14  ;;  %v5129_v0 = vmin.f32 %v1876_v37, 16.0  ;;  %v5131_v56 = vmin.f32 %v2516_v41, 16.0 }
 0x244   :  { %9383 = vst [vmem:[#allocation37_spill] sm:$0xff] %v5093_v29  ;;  %v5135_v46 = vmul.f32 %v4948_v57, %v9391_v12  ;;  %v1238_v34 = vmul.f32 2.1237322e-06, %v5120_v53  ;;  %v1249_v33 = vmul.f32 3.8918573e-05, %v5120_v53  ;;  %v5139_v1 = vmin.f32 %v3156_v58, 16.0 }
 0x245   :  { %9385 = vst [vmem:[#allocation24_spill] sm:$0xff] %v5102_v13  ;;  %v5143_v45 = vmul.f32 %v4948_v57, %v4726_v10  ;;  %v1878_v14 = vmul.f32 2.1237322e-06, %v5129_v0  ;;  %v1889_v37 = vmul.f32 3.8918573e-05, %v5129_v0  ;;  %v5150_v12 = vmul.f32 %v4948_v57, %v4733_v22 }
 0x246   :  { %9386 = vst [vmem:[#allocation38_spill] sm:$0xff] %v5106_v60  ;;  %v2518_v41 = vmul.f32 2.1237322e-06, %v5131_v56  ;;  %v1239_v58 = vadd.f32 0.00028619796, %v1238_v34 }
 0x247   :  { %9387 = vst [vmem:[#allocation39_spill] sm:$0xff] %v5114_v36  ;;  %v1890_v36 = vadd.f32 0.001143296, %v1889_v37  ;;  %v3519_v13 = vadd.f32 0.00028619796, %v3518_v63 }
 0x248   :  { %9388 = vst [vmem:[#allocation40_spill] sm:$0xff] %v5118_v40  ;;  %v9396_v40 = vld [vmem:[#allocation14_spill] sm:$0xff]  ;;  %v2519_v60 = vadd.f32 0.00028619796, %v2518_v41  ;;  %v1240_v29 = vmul.f32 %v1239_v58, %v5120_v53  ;;  %v2529_v22 = vmul.f32 3.8918573e-05, %v5131_v56 }
 0x249   :  { %9390 = vst [vmem:[#allocation11_spill] sm:$0xff] %v5127_v62  ;;  %v1250_v62 = vadd.f32 0.001143296, %v1249_v33  ;;  %v5158_v10 = vmul.f32 %v4948_v57, %v9396_v40  ;;  %v3158_v33 = vmul.f32 2.1237322e-06, %v5139_v1  ;;  %v9397_v40 = vld [vmem:[#allocation16_spill] sm:$0xff] }
 0x24a   :  { %9392 = vst [vmem:[#allocation13_spill] sm:$0xff] %v5135_v46  ;;  %v5154_v46 = vmul.f32 %v4948_v57, %v4740_v26  ;;  %v1891_v26 = vmul.f32 %v1890_v36, %v5129_v0  ;;  %v2520_v34 = vmul.f32 %v2519_v60, %v5131_v56  ;;  %v1241_v37 = vadd.f32 0.0036580483, %v1240_v29 }
 0x24b   :  { %9393 = vst [vmem:[#allocation41_spill] sm:$0xff] %v5143_v45  ;;  %v1879_v45 = vadd.f32 0.00028619796, %v1878_v14  ;;  %v1251_v20 = vmul.f32 %v1250_v62, %v5120_v53  ;;  %v5169_v14 = vmul.f32 %v4948_v57, %v9397_v40  ;;  %v2530_v41 = vadd.f32 0.001143296, %v2529_v22 }
 0x24c   :  { %9394 = vst [vmem:[#allocation42_spill] sm:$0xff] %v5150_v12  ;;  %v5173_v62 = vmul.f32 %v4948_v57, %v4768_v43  ;;  %v3520_v36 = vmul.f32 %v3519_v13, %v5075_v21  ;;  %v1242_v60 = vmul.f32 %v1241_v37, %v5120_v53  ;;  %v3159_v29 = vadd.f32 0.00028619796, %v3158_v33 }
 0x24d   :  { %9395 = vst [vmem:[#allocation43_spill] sm:$0xff] %v5154_v46  ;;  %v1880_v12 = vmul.f32 %v1879_v45, %v5129_v0  ;;  %v1252_v63 = vadd.f32 0.014752088, %v1251_v20  ;;  %v1892_v46 = vadd.f32 0.014752088, %v1891_v26  ;;  %v2531_v7 = vmul.f32 %v2530_v41, %v5131_v56 }
 0x24e   :  { %9398 = vst [vmem:[#allocation14_spill] sm:$0xff] %v5173_v62  ;;  %v2521_v45 = vadd.f32 0.0036580483, %v2520_v34  ;;  %v3169_v22 = vmul.f32 3.8918573e-05, %v5139_v1  ;;  %v5184_v43 = vmul.f32 %v4948_v57, %v4775_v47  ;;  %v9400_v34 = vld [vmem:[#allocation8_spill] sm:$0xff] }
 0x24f   :  { %v1881_v58 = vadd.f32 0.0036580483, %v1880_v12  ;;  %v1253_v4 = vmul.f32 %v1252_v63, %v5120_v53  ;;  %v1893_v20 = vmul.f32 %v1892_v46, %v5129_v0  ;;  %v2532_v26 = vadd.f32 0.014752088, %v2531_v7  ;;  %v9402_v63 = vld [vmem:[#allocation9_spill] sm:$0xff]  ;;  %v9404_v46 = vld [vmem:[#allocation10_spill] sm:$0xff] }
 0x250   :  { %9399 = vst [vmem:[#allocation16_spill] sm:$0xff] %v5184_v43  ;;  %v2522_v13 = vmul.f32 %v2521_v45, %v5131_v56  ;;  %v5189_v37 = vmul.f32 %v4948_v57, %v9400_v34  ;;  %v5193_v41 = vmul.f32 %v4948_v57, %v9402_v63  ;;  %v5197_v33 = vmul.f32 %v4948_v57, %v9404_v46 }
 0x251   :  { %v1882_v40 = vmul.f32 %v1881_v58, %v5129_v0  ;;  %v1254_v12 = vadd.f32 0.112945676, %v1253_v4  ;;  %v1894_v58 = vadd.f32 0.112945676, %v1893_v20  ;;  %v3521_v62 = vadd.f32 0.0036580483, %v3520_v36 }
 0x252   :  { %9401 = vst [vmem:[#allocation8_spill] sm:$0xff] %v5189_v37  ;;  %v1243_v47 = vadd.f32 0.05243302, %v1242_v60  ;;  %v2533_v45 = vmul.f32 %v2532_v26, %v5131_v56  ;;  %v3160_v34 = vmul.f32 %v3159_v29, %v5139_v1  ;;  %v3170_v37 = vadd.f32 0.001143296, %v3169_v22 }
 0x253   :  { %9403 = vst [vmem:[#allocation9_spill] sm:$0xff] %v5193_v41  ;;  %v1255_v4 = vmul.f32 %v1254_v12, %v5120_v53  ;;  %v1883_v7 = vadd.f32 0.05243302, %v1882_v40  ;;  %v1895_v43 = vmul.f32 %v1894_v58, %v5129_v0  ;;  %v5205_v63 = vmul.f32 %v4948_v57, %v4803_v48 }
 0x254   :  { %9405 = vst [vmem:[#allocation10_spill] sm:$0xff] %v5197_v33  ;;  %v2523_v46 = vadd.f32 0.05243302, %v2522_v13  ;;  %v2534_v33 = vadd.f32 0.112945676, %v2533_v45  ;;  %v5209_v36 = vmul.f32 %v4948_v57, %v4810_v9  ;;  %v5213_v60 = vmul.f32 %v4948_v57, %v4817_v8 }
 0x255   :  { %v1256_v41 = vadd.f32 0.4994258, %v1255_v4  ;;  %v1896_v40 = vadd.f32 0.4994258, %v1895_v43  ;;  %v3171_v20 = vmul.f32 %v3170_v37, %v5139_v1  ;;  %v3522_v29 = vmul.f32 %v3521_v62, %v5075_v21 }
 0x256   :  { %v1244_v22 = vmul.f32 %v1243_v47, %v5120_v53  ;;  %v2535_v12 = vmul.f32 %v2534_v33, %v5131_v56  ;;  %v1884_v13 = vmul.f32 %v1883_v7, %v5129_v0  ;;  %v3161_v26 = vadd.f32 0.0036580483, %v3160_v34 }
 0x257   :  { %v1257_v48 = vmul.f32 %v1256_v41, %v5120_v53  ;;  %v1897_v9 = vmul.f32 %v1896_v40, %v5129_v0  ;;  %v3172_v58 = vadd.f32 0.014752088, %v3171_v20  ;;  %v5224_v8 = vmul.f32 %v4948_v57, %v4824_v51  ;;  %v9407_v41 = vld [vmem:[#allocation18_spill] sm:$0xff]  ;;  %v9408_v51 = vld [vmem:[#allocation20_spill] sm:$0xff] }
 0x258   :  { %v5228_v43 = vmul.f32 %v4948_v57, %v4831_v17  ;;  %v2524_v37 = vmul.f32 %v2523_v46, %v5131_v56  ;;  %v5235_v33 = vmul.f32 %v4948_v57, %v9407_v41  ;;  %v2536_v4 = vadd.f32 0.4994258, %v2535_v12  ;;  %v9410_v40 = vld [vmem:[#allocation22_spill] sm:$0xff]  ;;  %v9411_v12 = vld [vmem:[#allocation25_spill] sm:$0xff] }
 0x259   :  { %v5230_v62 = vadd.f32 1.0, %v1257_v48  ;;  %v5237_v47 = vadd.f32 1.0, %v1897_v9  ;;  %v3173_v45 = vmul.f32 %v3172_v58, %v5139_v1  ;;  %v3523_v7 = vadd.f32 0.05243302, %v3522_v29  ;;  %v9413_v29 = vld [vmem:[#allocation26_spill] sm:$0xff] }
 0x25a   :  { %9406 = vst [vmem:[#allocation44_spill] sm:$0xff] %v5228_v43  ;;  %v5242_v34 = vmul.f32 %v4948_v57, %v9408_v51  ;;  %v1245_v17 = vadd.f32 0.18741608, %v1244_v22  ;;  %v5247_v46 = vmul.f32 %v4948_v57, %v9410_v40  ;;  %v1885_v20 = vadd.f32 0.18741608, %v1884_v13  ;;  %v9415_v22 = vld [vmem:[#allocation15_spill] sm:$0xff] }
 0x25b   :  { %3972 = vrcp.f32 %v5230_v62  ;;  %v3162_v48 = vmul.f32 %v3161_v26, %v5139_v1  ;;  %v5253_v9 = vmul.f32 %v4948_v57, %v9411_v12  ;;  %v5257_v58 = vmul.f32 %v4948_v57, %v9413_v29  ;;  %v9417_v40 = vld [vmem:[#allocation17_spill] sm:$0xff]  ;;  %v9419_v43 = vld [vmem:[#allocation19_spill] sm:$0xff] }
 0x25c   :  { %9409 = vst [vmem:[#allocation18_spill] sm:$0xff] %v5242_v34  ;;  %3974 = vrcp.f32 %v5237_v47  ;;  %v5261_v41 = vmul.f32 %v4948_v57, %v9415_v22  ;;  %v2525_v51 = vadd.f32 0.18741608, %v2524_v37  ;;  %v5265_v13 = vmul.f32 %v4948_v57, %v9417_v40  ;;  %v9421_v29 = vld [vmem:[#allocation21_spill] sm:$0xff]  ;;  %v9423_v22 = vld [vmem:[#allocation23_spill] sm:$0xff] }
 0x25d   :  { %9412 = vst [vmem:[#allocation20_spill] sm:$0xff] %v5253_v9  ;;  %v5269_v26 = vmul.f32 %v4948_v57, %v9419_v43  ;;  %v2537_v12 = vmul.f32 %v2536_v4, %v5131_v56  ;;  %v3174_v9 = vadd.f32 0.112945676, %v3173_v45  ;;  %v3524_v34 = vmul.f32 %v3523_v7, %v5075_v21 }
 0x25e   :  { %9414 = vst [vmem:[#allocation22_spill] sm:$0xff] %v5257_v58  ;;  %v5275_v58 = vmul.f32 %v4948_v57, %v9421_v29  ;;  %v5279_v37 = vmul.f32 %v4948_v57, %v9423_v22  ;;  %v1246_v40 = vmul.f32 %v1245_v17, %v5120_v53  ;;  %v3163_v43 = vadd.f32 0.05243302, %v3162_v48  ;;  %v9427_v29 = vld [vmem:[#allocation28_spill] sm:$0xff] }
 0x25f   :  { %9416 = vst [vmem:[#allocation25_spill] sm:$0xff] %v5261_v41  ;;  %v5283_v41 = vadd.f32 1.0, %v2537_v12  ;;  %v3175_v4 = vmul.f32 %v3174_v9, %v5139_v1  ;;  %v2526_v22 = vmul.f32 %v2525_v51, %v5131_v56  ;;  %v5297_v53 = vadd.f32 %v4953_v52, %v4960_v54 }
 0x260   :  { %9418 = vst [vmem:[#allocation26_spill] sm:$0xff] %v5265_v13  ;;  %v1886_v13 = vmul.f32 %v1885_v20, %v5129_v0  ;;  %v5300_v17 = vmul.f32 0.5, %v5041_v16  ;;  %v5306_v48 = vadd.f32 %v4953_v52, %v4964_v18  ;;  %v3525_v9 = vadd.f32 0.18741608, %v3524_v34 }
 0x261   :  { %9420 = vst [vmem:[#allocation15_spill] sm:$0xff] %v5269_v26  ;;  %v3973_v45 = vpop.eup %3972  ;;  %v9425_v26 = vld [vmem:[#allocation27_spill] sm:$0xff]  ;;  %3976 = vrcp.f32 %v5283_v41  ;;  %v1247_v56 = vadd.f32 1.1283791, %v1246_v40  ;;  %v3164_v16 = vmul.f32 %v3163_v43, %v5139_v1  ;;  %v1910_v34 = vand.u32 2147483648, %v5237_v47 }
 0x262   :  { %9422 = vst [vmem:[#allocation17_spill] sm:$0xff] %v5275_v58  ;;  %v5288_v7 = vmul.f32 %v4948_v57, %v9425_v26  ;;  %v5292_v58 = vmul.f32 %v4948_v57, %v9427_v29  ;;  %v3975_v0 = vpop.eup %3974  ;;  %v1260_v20 = vmul.f32 %v3973_v45, %v5230_v62  ;;  %v5309_v26 = vmul.f32 0.5, %v5044_v2 }
 0x263   :  { %9424 = vst [vmem:[#allocation19_spill] sm:$0xff] %v5279_v37  ;;  %v1900_v54 = vmul.f32 %v3975_v0, %v5237_v47  ;;  %v1887_v12 = vadd.f32 1.1283791, %v1886_v13  ;;  %v3176_v29 = vadd.f32 0.4994258, %v3175_v4  ;;  %vm1265_vm4 = vweird.f32 %v3973_v45 }
 0x264   :  { %9426 = vst [vmem:[#allocation21_spill] sm:$0xff] %v5288_v7  ;;  %v1261_v51 = vsub.f32 1.0, %v1260_v20  ;;  %v1268_v57 = vand.u32 2147483647, %v5230_v62  ;;  %v2527_v7 = vadd.f32 1.1283791, %v2526_v22  ;;  %v1248_v40 = vmul.f32 %v1247_v56, %v5073_v11 }
 0x265   :  { %9428 = vst [vmem:[#allocation23_spill] sm:$0xff] %v5292_v58  ;;  %v1901_v58 = vsub.f32 1.0, %v1900_v54  ;;  %v3177_v2 = vmul.f32 %v3176_v29, %v5139_v1  ;;  %vm1905_vm5 = vweird.f32 %v3975_v0  ;;  %v1908_v13 = vand.u32 2147483647, %v5237_v47 }
 0x266   :  { %9429 = vst [vmem:[#allocation27_spill] sm:$0xff] %v5297_v53  ;;  %v1270_v53 = vand.u32 2147483648, %v5230_v62  ;;  %v1262_v18 = vmul.f32 %v3973_v45, %v1261_v51  ;;  %vm1264_vm6 = vweird.f32 %v5230_v62  ;;  %v1888_v20 = vmul.f32 %v1887_v12, %v5082_v15 }
 0x267   :  { %9430 = vst [vmem:[#allocation28_spill] sm:$0xff] %v5306_v48  ;;  %v1902_v48 = vmul.f32 %v3975_v0, %v1901_v58  ;;  %v3977_v43 = vpop.eup %3976  ;;  %v5321_v54 = vadd.f32 1.0, %v3177_v2  ;;  %vm1266_vm7 = vmor %vm1264_vm6, %vm1265_vm4  ;;  %vm1904_vm8 = vweird.f32 %v5237_v47  ;;  %vm1269_vm9 = vcmp.eq.f32.partialorder %v1268_v57, 8.507059e+37 }
 0x268   :  { %v1263_v4 = vadd.f32 %v3973_v45, %v1262_v18  ;;  %v1271_v22 = vor.u32 1.1754944e-38, %v1270_v53  ;;  %v2540_v29 = vmul.f32 %v3977_v43, %v5283_v41  ;;  %vm1906_vm10 = vmor %vm1904_vm8, %vm1905_vm5  ;;  %v1911_v58 = vor.u32 1.1754944e-38, %v1910_v34 }
 0x269   :  { %v1903_v51 = vadd.f32 %v3975_v0, %v1902_v48  ;;  %3978 = vrcp.f32 %v5321_v54  ;;  %vm1909_vm11 = vcmp.eq.f32.partialorder %v1908_v13, 8.507059e+37  ;;  %v2550_v2 = vand.u32 2147483648, %v5283_v41 }
 0x26a   :  { %v1267_v11 = vsel %vm1266_vm7, %v3973_v45, %v1263_v4  ;;  %v2541_v62 = vsub.f32 1.0, %v2540_v29  ;;  %v3165_v53 = vadd.f32 0.18741608, %v3164_v16  ;;  %vm2545_vm12 = vweird.f32 %v3977_v43 }
 0x26b   :  { %v1272_v56 = vsel %vm1269_vm9, %v1271_v22, %v1267_v11  ;;  %v1907_v18 = vsel %vm1906_vm10, %v3975_v0, %v1903_v51  ;;  %v2548_v47 = vand.u32 2147483647, %v5283_v41  ;;  %v5329_v57 = vmul.f32 0.5, %v5055_v27 }
 0x26c   :  { %v1273_v15 = vmul.f32 %v1272_v56, %v1248_v40  ;;  %v1912_v12 = vsel %vm1909_vm11, %v1911_v58, %v1907_v18  ;;  %v2542_v37 = vmul.f32 %v3977_v43, %v2541_v62  ;;  %v5332_v45 = vmul.f32 0.5, %v5058_v59 }
 0x26d   :  { %v1913_v48 = vmul.f32 %v1912_v12, %v1888_v20  ;;  %v5336_v0 = vadd.f32 %v4953_v52, %v4970_v5  ;;  %v5340_v34 = vadd.f32 %v4953_v52, %v4974_v44  ;;  %vm2544_vm13 = vweird.f32 %v5283_v41 }
 0x26e   :  { %v3852_v16 = vclamps-f32 %v1273_v15, 1.0  ;;  %v2543_v13 = vadd.f32 %v3977_v43, %v2542_v37  ;;  %v3526_v27 = vmul.f32 %v3525_v9, %v5075_v21  ;;  %vm2546_vm14 = vmor %vm2544_vm13, %vm2545_vm12  ;;  %v2551_v20 = vor.u32 1.1754944e-38, %v2550_v2  ;;  %v9440_v21 = vld [vmem:[#allocation11_spill] sm:$0xff] }
 0x26f   :  { %v3868_v40 = vclamps-f32 %v1913_v48, 1.0  ;;  %v3979_v4 = vpop.eup %3978  ;;  %v3166_v59 = vmul.f32 %v3165_v53, %v5139_v1  ;;  %v5347_v5 = vadd.f32 %v4953_v52, %v4978_v19  ;;  %v2528_v22 = vmul.f32 %v2527_v7, %v5085_v49 }
 0x270   :  { %v2547_v44 = vsel %vm2546_vm14, %v3977_v43, %v2543_v13  ;;  %vm2549_vm15 = vcmp.eq.f32.partialorder %v2548_v47, 8.507059e+37  ;;  %v3180_v51 = vmul.f32 %v3979_v4, %v5321_v54  ;;  %v5353_v41 = vadd.f32 %v4953_v52, %v4982_v50 }
 0x271   :  { %v2552_v37 = vsel %vm2549_vm15, %v2551_v20, %v2547_v44  ;;  %v5357_v9 = vadd.f32 %v4953_v52, %v4988_v61  ;;  %v5361_v1 = vadd.f32 %v4953_v52, %v4994_v38  ;;  %v3562_v49 = vadd.f32 1.0, %v3852_v16 }
 0x272   :  { %v2553_v19 = vmul.f32 %v2552_v37, %v2528_v22  ;;  %v3181_v29 = vsub.f32 1.0, %v3180_v51  ;;  %v3578_v7 = vadd.f32 1.0, %v3868_v40  ;;  %v5363_v43 = vadd.f32 1.1283791, %v3526_v27 }
 0x273   :  { %v3167_v11 = vadd.f32 1.1283791, %v3166_v59  ;;  %v3190_v58 = vand.u32 2147483648, %v5321_v54  ;;  %v5368_v50 = vadd.f32 %v4953_v52, %v4998_v6  ;;  %vm3185_vm1 = vweird.f32 %v3979_v4 }
 0x274   :  { %9431 = vst [vmem:[#allocation45_spill] sm:$0xff] %v5363_v43  ;;  %v3884_v56 = vclamps-f32 %v2553_v19, 1.0  ;;  %v3182_v61 = vmul.f32 %v3979_v4, %v3181_v29  ;;  %v3188_v18 = vand.u32 2147483647, %v5321_v54  ;;  %v5373_v38 = vadd.f32 %v4953_v52, %v5006_v25 }
 0x275   :  { %v5377_v62 = vadd.f32 %v4953_v52, %v5010_v24  ;;  %v5381_v15 = vadd.f32 %v4953_v52, %v5014_v28  ;;  %v5385_v6 = vadd.f32 %v4953_v52, %v5062_v23  ;;  %vm3184_vm2 = vweird.f32 %v5321_v54 }
 0x276   :  { %v3183_v12 = vadd.f32 %v3979_v4, %v3182_v61  ;;  %v3626_v2 = vmul.f32 %v3562_v49, %v5300_v17  ;;  %v3642_v25 = vmul.f32 %v3578_v7, %v5309_v26  ;;  %vm3186_vm3 = vmor %vm3184_vm2, %vm3185_vm1  ;;  %v3191_v53 = vor.u32 1.1754944e-38, %v3190_v58  ;;  %v9433_v49 = vld [vmem:[#allocation35_spill] sm:$0xff]  ;;  %v9434_v7 = vld [vmem:[#allocation36_spill] sm:$0xff] }
 0x277   :  { %v5392_v24 = vadd.f32 %v4953_v52, %v5018_v32  ;;  %v5396_v28 = vadd.f32 %v4953_v52, %v5158_v10  ;;  %v5400_v23 = vadd.f32 %v4953_v52, %v5247_v46  ;;  %v3168_v54 = vmul.f32 %v3167_v11, %v5096_v31 }
 0x278   :  { %v3187_v48 = vsel %vm3186_vm3, %v3979_v4, %v3183_v12  ;;  %vm3189_vm4 = vcmp.eq.f32.partialorder %v3188_v18, 8.507059e+37  ;;  %v3594_v17 = vadd.f32 1.0, %v3884_v56  ;;  %v5405_v47 = vadd.f32 %v4953_v52, %v5026_v35 }
 0x279   :  { %v3192_v26 = vsel %vm3189_vm4, %v3191_v53, %v3187_v48  ;;  %v5409_v32 = vadd.f32 %v4953_v52, %v5030_v39  ;;  %v5413_v10 = vadd.f32 %v4953_v52, %v5034_v42  ;;  %v3690_v16 = vadd.f32 %v3642_v25, %v3626_v2  ;;  %v9435_v25 = vld [vmem:[#allocation37_spill] sm:$0xff] }
 0x27a   :  { %v3193_v46 = vmul.f32 %v3192_v26, %v3168_v54  ;;  %v5416_v31 = vmul.f32 0.70710677, %v5347_v5  ;;  %v5419_v40 = vmul.f32 0.70710677, %v5385_v6  ;;  %v5423_v35 = vadd.f32 %v4953_v52, %v5048_v55 }
 0x27b   :  { %v5427_v39 = vadd.f32 %v4953_v52, %v5052_v3  ;;  %v5430_v13 = vmul.f32 0.70710677, %v5396_v28  ;;  %v5433_v42 = vmul.f32 0.70710677, %v5400_v23  ;;  %v3658_v27 = vmul.f32 %v3594_v17, %v5329_v57  ;;  %v9432_v3 = vld [vmem:[#allocation33_spill] sm:$0xff] }
 0x27c   :  { %v3900_v4 = vclamps-f32 %v3193_v46, 1.0  ;;  %v1156_v20 = vmul.f32 %v5416_v31, %v5416_v31  ;;  %v1796_v55 = vmul.f32 %v5419_v40, %v5419_v40  ;;  %v5442_v59 = vadd.f32 %v4953_v52, %v5066_v30 }
 0x27d   :  { %v5446_v22 = vadd.f32 %v4953_v52, %v9432_v3  ;;  %v2436_v44 = vmul.f32 %v5430_v13, %v5430_v13  ;;  %v3076_v57 = vmul.f32 %v5433_v42, %v5433_v42  ;;  %v3706_v37 = vadd.f32 %v3690_v16, %v3658_v27 }
 0x27e   :  { %v3610_v51 = vadd.f32 1.0, %v3900_v4  ;;  %v5452_v19 = vmin.f32 %v1156_v20, 16.0  ;;  %v5454_v29 = vmin.f32 %v1796_v55, 16.0  ;;  %v5458_v30 = vadd.f32 %v4953_v52, %v9433_v49  ;;  %v9436_v4 = vld [vmem:[#allocation24_spill] sm:$0xff] }
 0x27f   :  { %v5462_v11 = vadd.f32 %v4953_v52, %v9434_v7  ;;  %v5464_v58 = vmin.f32 %v2436_v44, 16.0  ;;  %v5466_v56 = vmin.f32 %v3076_v57, 16.0  ;;  %v5474_v53 = vadd.f32 %v4953_v52, %v9435_v25 }
 0x280   :  { %v3674_v61 = vmul.f32 %v3610_v51, %v5332_v45  ;;  %v1158_v18 = vmul.f32 2.1237322e-06, %v5452_v19  ;;  %v1169_v12 = vmul.f32 3.8918573e-05, %v5452_v19  ;;  %v1798_v2 = vmul.f32 2.1237322e-06, %v5454_v29 }
 0x281   :  { %v1809_v54 = vmul.f32 3.8918573e-05, %v5454_v29  ;;  %v2438_v48 = vmul.f32 2.1237322e-06, %v5464_v58  ;;  %v2449_v17 = vmul.f32 3.8918573e-05, %v5464_v58  ;;  %v5481_v27 = vadd.f32 %v4953_v52, %v9436_v4 }
 0x282   :  { %v3722_v26 = vadd.f32 %v3706_v37, %v3674_v61  ;;  %v1159_v46 = vadd.f32 0.00028619796, %v1158_v18  ;;  %v1170_v16 = vadd.f32 0.001143296, %v1169_v12  ;;  %v1799_v45 = vadd.f32 0.00028619796, %v1798_v2 }
 0x283   :  { %v1810_v20 = vadd.f32 0.001143296, %v1809_v54  ;;  %v2439_v55 = vadd.f32 0.00028619796, %v2438_v48  ;;  %v2450_v3 = vadd.f32 0.001143296, %v2449_v17 }
 0x284   :  { %v3738_v44 = vmul.f32 0.25, %v3722_v26  ;;  %v1160_v57 = vmul.f32 %v1159_v46, %v5452_v19  ;;  %v1171_v51 = vmul.f32 %v1170_v16, %v5452_v19  ;;  %v1800_v49 = vmul.f32 %v1799_v45, %v5454_v29  ;;  %v9437_v12 = vld [vmem:[#allocation38_spill] sm:$0xff]  ;;  %v9438_v17 = vld [vmem:[#allocation39_spill] sm:$0xff] }
 0x285   :  { %v1811_v7 = vmul.f32 %v1810_v20, %v5454_v29  ;;  %v2440_v37 = vmul.f32 %v2439_v55, %v5464_v58  ;;  %v2451_v61 = vmul.f32 %v2450_v3, %v5464_v58  ;;  %v3078_v18 = vmul.f32 2.1237322e-06, %v5466_v56 }
 0x286   :  { %3774 = vrot.lane.b32.xlu2 %v3738_v44, %s4156_s2  ;;  %v5493_v2 = vadd.f32 %v4953_v52, %v9437_v12  ;;  %v1161_v25 = vadd.f32 0.0036580483, %v1160_v57  ;;  %v1172_v54 = vadd.f32 0.014752088, %v1171_v51  ;;  %v1801_v48 = vadd.f32 0.0036580483, %v1800_v49 }
 0x287   :  { %v5497_v26 = vadd.f32 %v4953_v52, %v9438_v17  ;;  %v1812_v46 = vadd.f32 0.014752088, %v1811_v7  ;;  %v2441_v16 = vadd.f32 0.0036580483, %v2440_v37  ;;  %v2452_v45 = vadd.f32 0.014752088, %v2451_v61 }
 0x288   :  { %v1162_v4 = vmul.f32 %v1161_v25, %v5452_v19  ;;  %v1173_v20 = vmul.f32 %v1172_v54, %v5452_v19  ;;  %v1802_v55 = vmul.f32 %v1801_v48, %v5454_v29  ;;  %v3079_v3 = vadd.f32 0.00028619796, %v3078_v18  ;;  %v9439_v61 = vld [vmem:[#allocation40_spill] sm:$0xff] }
 0x289   :  { %v1813_v44 = vmul.f32 %v1812_v46, %v5454_v29  ;;  %v2442_v57 = vmul.f32 %v2441_v16, %v5464_v58  ;;  %v2453_v51 = vmul.f32 %v2452_v45, %v5464_v58  ;;  %v3089_v49 = vmul.f32 3.8918573e-05, %v5466_v56  ;;  %v9441_v16 = vld [vmem:[#allocation42_spill] sm:$0xff] }
 0x28a   :  { %v1163_v12 = vadd.f32 0.05243302, %v1162_v4  ;;  %v1174_v17 = vadd.f32 0.112945676, %v1173_v20  ;;  %v1803_v7 = vadd.f32 0.05243302, %v1802_v55  ;;  %v3080_v37 = vmul.f32 %v3079_v3, %v5466_v56 }
 0x28b   :  { %v5509_v25 = vadd.f32 %v4953_v52, %v9439_v61  ;;  %v1814_v54 = vadd.f32 0.112945676, %v1813_v44  ;;  %v2443_v48 = vadd.f32 0.05243302, %v2442_v57  ;;  %v2454_v18 = vadd.f32 0.112945676, %v2453_v51 }
 0x28c   :  { %v5513_v46 = vadd.f32 %v4953_v52, %v9440_v21  ;;  %v5517_v45 = vadd.f32 %v4953_v52, %v9441_v16  ;;  %v1164_v4 = vmul.f32 %v1163_v12, %v5452_v19  ;;  %v1175_v20 = vmul.f32 %v1174_v17, %v5452_v19  ;;  %v9443_v51 = vld [vmem:[#allocation43_spill] sm:$0xff] }
 0x28d   :  { %v1804_v55 = vmul.f32 %v1803_v7, %v5454_v29  ;;  %v1815_v3 = vmul.f32 %v1814_v54, %v5454_v29  ;;  %v2455_v44 = vmul.f32 %v2454_v18, %v5464_v58  ;;  %v3090_v57 = vadd.f32 0.001143296, %v3089_v49  ;;  %v9446_v54 = vld [vmem:[#allocation14_spill] sm:$0xff]  ;;  %v9448_v49 = vld [vmem:[#allocation16_spill] sm:$0xff] }
 0x28e   :  { %9442 = vst [vmem:[#allocation33_spill] sm:$0xff] %v5517_v45  ;;  %v5526_v61 = vadd.f32 %v4953_v52, %v9443_v51  ;;  %v5530_v21 = vadd.f32 %v4953_v52, %v5169_v14  ;;  %v1176_v16 = vadd.f32 0.4994258, %v1175_v20  ;;  %v3081_v43 = vadd.f32 0.0036580483, %v3080_v37 }
 0x28f   :  { %v1816_v12 = vadd.f32 0.4994258, %v1815_v3  ;;  %v2444_v17 = vmul.f32 %v2443_v48, %v5464_v58  ;;  %v2456_v45 = vadd.f32 0.4994258, %v2455_v44  ;;  %v3091_v7 = vmul.f32 %v3090_v57, %v5466_v56  ;;  %v9449_v3 = vld [vmem:[#allocation8_spill] sm:$0xff]  ;;  %v9450_v57 = vld [vmem:[#allocation9_spill] sm:$0xff] }
 0x290   :  { %9444 = vst [vmem:[#allocation35_spill] sm:$0xff] %v5526_v61  ;;  %v5536_v18 = vadd.f32 %v4953_v52, %v9446_v54  ;;  %v5540_v51 = vadd.f32 %v4953_v52, %v9448_v49  ;;  %v1165_v61 = vadd.f32 0.18741608, %v1164_v4  ;;  %v1177_v14 = vmul.f32 %v1176_v16, %v5452_v19 }
 0x291   :  { %9445 = vst [vmem:[#allocation36_spill] sm:$0xff] %v5530_v21  ;;  %v1805_v21 = vadd.f32 0.18741608, %v1804_v55  ;;  %v1817_v37 = vmul.f32 %v1816_v12, %v5454_v29  ;;  %v2457_v20 = vmul.f32 %v2456_v45, %v5464_v58  ;;  %v3092_v48 = vadd.f32 0.014752088, %v3091_v7 }
 0x292   :  { %9447 = vst [vmem:[#allocation37_spill] sm:$0xff] %v5536_v18  ;;  %v5547_v44 = vadd.f32 %v4953_v52, %v9449_v3  ;;  %v5551_v54 = vadd.f32 %v4953_v52, %v9450_v57  ;;  %v9452_v18 = vld [vmem:[#allocation10_spill] sm:$0xff]  ;;  %v5557_v4 = vadd.f32 1.0, %v1177_v14  ;;  %v2445_v16 = vadd.f32 0.18741608, %v2444_v17 }
 0x293   :  { %v5555_v49 = vadd.f32 %v4953_v52, %v9452_v18  ;;  %v5559_v55 = vadd.f32 1.0, %v1817_v37  ;;  %v5561_v12 = vadd.f32 1.0, %v2457_v20  ;;  %v3082_v45 = vmul.f32 %v3081_v43, %v5466_v56  ;;  %v9467_v57 = vld [vmem:[#allocation26_spill] sm:$0xff] }
 0x294   :  { %9451 = vst [vmem:[#allocation24_spill] sm:$0xff] %v5551_v54  ;;  %v5566_v7 = vadd.f32 %v4953_v52, %v5205_v63  ;;  %v5570_v3 = vadd.f32 %v4953_v52, %v5209_v36  ;;  %v1166_v18 = vmul.f32 %v1165_v61, %v5452_v19  ;;  %3980 = vrcp.f32 %v5557_v4  ;;  %v9459_v19 = vld [vmem:[#allocation18_spill] sm:$0xff] }
 0x295   :  { %9453 = vst [vmem:[#allocation38_spill] sm:$0xff] %v5555_v49  ;;  %v5576_v14 = vadd.f32 %v4953_v52, %v5213_v60  ;;  %v1806_v17 = vmul.f32 %v1805_v21, %v5454_v29  ;;  %3982 = vrcp.f32 %v5559_v55  ;;  %v3093_v43 = vmul.f32 %v3092_v48, %v5466_v56  ;;  %v9461_v60 = vld [vmem:[#allocation20_spill] sm:$0xff]  ;;  %v9463_v29 = vld [vmem:[#allocation22_spill] sm:$0xff]  ;;  %v9465_v48 = vld [vmem:[#allocation25_spill] sm:$0xff] }
 0x296   :  { %9454 = vst [vmem:[#allocation39_spill] sm:$0xff] %v5566_v7  ;;  %v5583_v63 = vadd.f32 %v4953_v52, %v5224_v8  ;;  %v5587_v36 = vadd.f32 %v4953_v52, %v5235_v33  ;;  %v5591_v61 = vadd.f32 %v4953_v52, %v9459_v19  ;;  %v5595_v37 = vadd.f32 %v4953_v52, %v9461_v60 }
 0x297   :  { %9455 = vst [vmem:[#allocation40_spill] sm:$0xff] %v5570_v3  ;;  %v5599_v21 = vadd.f32 %v4953_v52, %v9463_v29  ;;  %v2446_v20 = vmul.f32 %v2445_v16, %v5464_v58  ;;  %3984 = vrcp.f32 %v5561_v12  ;;  %v3083_v8 = vadd.f32 0.05243302, %v3082_v45  ;;  %v9471_v29 = vld [vmem:[#allocation17_spill] sm:$0xff]  ;;  %v9473_v58 = vld [vmem:[#allocation19_spill] sm:$0xff] }
 0x298   :  { %9456 = vst [vmem:[#allocation11_spill] sm:$0xff] %v5576_v14  ;;  %v5605_v33 = vadd.f32 %v4953_v52, %v9465_v48  ;;  %v5609_v19 = vadd.f32 %v4953_v52, %v9467_v57  ;;  %v5621_v16 = vadd.f32 %v4953_v52, %v9473_v58  ;;  %v1807_v45 = vadd.f32 1.1283791, %v1806_v17 }
 0x299   :  { %9457 = vst [vmem:[#allocation42_spill] sm:$0xff] %v5583_v63  ;;  %v3094_v48 = vadd.f32 0.112945676, %v3093_v43  ;;  %v3084_v17 = vmul.f32 %v3083_v8, %v5466_v56  ;;  %vm1184_vm5 = vweird.f32 %v5557_v4  ;;  %vm1824_vm6 = vweird.f32 %v5559_v55 }
 0x29a   :  { %9458 = vst [vmem:[#allocation43_spill] sm:$0xff] %v5587_v36  ;;  %v9469_v36 = vld [vmem:[#allocation15_spill] sm:$0xff]  ;;  %v1830_v63 = vand.u32 2147483648, %v5559_v55  ;;  %v2468_v49 = vand.u32 2147483647, %v5561_v12  ;;  %vm2464_vm13 = vweird.f32 %v5561_v12 }
 0x29b   :  { %9460 = vst [vmem:[#allocation14_spill] sm:$0xff] %v5591_v61  ;;  %v5613_v60 = vadd.f32 %v4953_v52, %v9469_v36  ;;  %v9475_v61 = vld [vmem:[#allocation21_spill] sm:$0xff]  ;;  %v3095_v43 = vmul.f32 %v3094_v48, %v5466_v56  ;;  %v3085_v3 = vadd.f32 0.18741608, %v3084_v17 }
 0x29c   :  { %9462 = vst [vmem:[#allocation16_spill] sm:$0xff] %v5595_v37  ;;  %v1167_v37 = vadd.f32 1.1283791, %v1166_v18  ;;  %v5625_v57 = vadd.f32 %v4953_v52, %v9475_v61  ;;  %v5632_v18 = vmul.f32 0.5, %v5347_v5  ;;  %vm2469_vm1 = vcmp.eq.f32.partialorder %v2468_v49, 8.507059e+37 }
 0x29d   :  { %9464 = vst [vmem:[#allocation8_spill] sm:$0xff] %v5599_v21  ;;  %v5617_v21 = vadd.f32 %v4953_v52, %v9471_v29  ;;  %v1188_v29 = vand.u32 2147483647, %v5557_v4  ;;  %v5680_v49 = vmul.f32 0.5, %v5353_v41 }
 0x29e   :  { %9466 = vst [vmem:[#allocation9_spill] sm:$0xff] %v5605_v33  ;;  %v3981_v33 = vpop.eup %3980  ;;  %v1168_v61 = vmul.f32 %v1167_v37, %v5416_v31  ;;  %v1828_v31 = vand.u32 2147483647, %v5559_v55 }
 0x29f   :  { %9468 = vst [vmem:[#allocation10_spill] sm:$0xff] %v5609_v19  ;;  %v9477_v19 = vld [vmem:[#allocation23_spill] sm:$0xff]  ;;  %v1180_v58 = vmul.f32 %v3981_v33, %v5557_v4  ;;  %vm5644_vm7 = vcmp.eq.f32.partialorder %v1188_v29, 8.507059e+37  ;;  %vm1185_vm8 = vweird.f32 %v3981_v33  ;;  %v2470_v29 = vand.u32 2147483648, %v5561_v12 }
 0x2a0   :  { %9470 = vst [vmem:[#allocation18_spill] sm:$0xff] %v5613_v60  ;;  %v5629_v36 = vadd.f32 %v4953_v52, %v9477_v19  ;;  %v1190_v52 = vand.u32 2147483648, %v5557_v4  ;;  %v3096_v60 = vadd.f32 0.4994258, %v3095_v43  ;;  %vm1186_vm10 = vmor %vm1184_vm5, %vm1185_vm8  ;;  %vm1829_vm14 = vcmp.eq.f32.partialorder %v1828_v31, 8.507059e+37 }
 0x2a1   :  { %9472 = vst [vmem:[#allocation20_spill] sm:$0xff] %v5617_v21  ;;  %v3983_v21 = vpop.eup %3982 }
 0x2a2   :  { %9474 = vst [vmem:[#allocation22_spill] sm:$0xff] %v5621_v16  ;;  %v2447_v16 = vadd.f32 1.1283791, %v2446_v20  ;;  %v1820_v19 = vmul.f32 %v3983_v21, %v5559_v55  ;;  %v3985_v5 = vpop.eup %3984  ;;  %v1191_v14 = vor.u32 1.1754944e-38, %v1190_v52  ;;  %vm1825_vm9 = vweird.f32 %v3983_v21 }
 0x2a3   :  { %9476 = vst [vmem:[#allocation25_spill] sm:$0xff] %v5625_v57  ;;  %v1808_v57 = vmul.f32 %v1807_v45, %v5419_v40  ;;  %v2460_v37 = vmul.f32 %v3985_v5, %v5561_v12  ;;  %vm2465_vm11 = vweird.f32 %v3985_v5  ;;  %vm1826_vm12 = vmor %vm1824_vm6, %vm1825_vm9  ;;  %v888_v55 = vmul.f32 0.5, %v5385_v6 }
 0x2a4   :  { %9478 = vst [vmem:[#allocation26_spill] sm:$0xff] %v5629_v36  ;;  %v1181_v36 = vsub.f32 1.0, %v1180_v58  ;;  %v1821_v8 = vsub.f32 1.0, %v1820_v19  ;;  %v3097_v58 = vmul.f32 %v3096_v60, %v5466_v56  ;;  %v1831_v60 = vor.u32 1.1754944e-38, %v1830_v63  ;;  %vm2466_vm15 = vmor %vm2464_vm13, %vm2465_vm11 }
 0x2a5   :  { %v2461_v45 = vsub.f32 1.0, %v2460_v37  ;;  %v5667_v12 = vmul.f32 0.5, %v5396_v28  ;;  %v5670_v20 = vmul.f32 0.5, %v5400_v23  ;;  %v2448_v31 = vmul.f32 %v2447_v16, %v5430_v13  ;;  %9482 = vst [vmem:[#allocation17_spill] sm:$0xff] %v5680_v49 }
 0x2a6   :  { %v1182_v48 = vmul.f32 %v3981_v33, %v1181_v36  ;;  %v1822_v40 = vmul.f32 %v3983_v21, %v1821_v8  ;;  %v5653_v7 = vadd.f32 1.0, %v3097_v58  ;;  %v5683_v28 = vmul.f32 0.5, %v5357_v9 }
 0x2a7   :  { %v2462_v36 = vmul.f32 %v3985_v5, %v2461_v45  ;;  %v5686_v23 = vmul.f32 0.5, %v5361_v1  ;;  %v5693_v13 = vmul.f32 0.5, %v5373_v38  ;;  %v5696_v16 = vmul.f32 0.5, %v5377_v62 }
 0x2a8   :  { %v1183_v43 = vadd.f32 %v3981_v33, %v1182_v48  ;;  %v1823_v19 = vadd.f32 %v3983_v21, %v1822_v40  ;;  %3986 = vrcp.f32 %v5653_v7  ;;  %v2471_v48 = vor.u32 1.1754944e-38, %v2470_v29  ;;  %9483 = vst [vmem:[#allocation19_spill] sm:$0xff] %v5683_v28 }
 0x2a9   :  { %v2463_v4 = vadd.f32 %v3985_v5, %v2462_v36  ;;  %9484 = vst [vmem:[#allocation21_spill] sm:$0xff] %v5686_v23  ;;  %v5690_v40 = vmul.f32 0.5, %v5368_v50  ;;  %v5699_v45 = vmul.f32 0.5, %v5381_v15  ;;  %v5705_v29 = vmul.f32 0.5, %v5405_v47 }
 0x2aa   :  { %v1187_v54 = vsel %vm1186_vm10, %v3981_v33, %v1183_v43  ;;  %v1827_v52 = vsel %vm1826_vm12, %v3983_v21, %v1823_v19  ;;  %v3086_v33 = vmul.f32 %v3085_v3, %v5466_v56  ;;  %v5677_v56 = vmul.f32 0.5, %v5340_v34  ;;  %9486 = vst [vmem:[#allocation46_spill] sm:$0xff] %v5693_v13 }
 0x2ab   :  { %v1192_v17 = vsel %vm5644_vm7, %v1191_v14, %v1187_v54  ;;  %v1832_v37 = vsel %vm1829_vm14, %v1831_v60, %v1827_v52  ;;  %v2467_v63 = vsel %vm2466_vm15, %v3985_v5, %v2463_v4  ;;  %v5673_v14 = vmul.f32 0.5, %v5336_v0  ;;  %9485 = vst [vmem:[#allocation23_spill] sm:$0xff] %v5690_v40  ;;  %v9524_v40 = vld [vmem:[#allocation42_spill] sm:$0xff] }
 0x2ac   :  { %v1193_v8 = vmul.f32 %v1192_v17, %v1168_v61  ;;  %v1833_v58 = vmul.f32 %v1832_v37, %v1808_v57  ;;  %v2472_v54 = vsel %vm2469_vm1, %v2471_v48, %v2467_v63  ;;  %9481 = vst [vmem:[#allocation15_spill] sm:$0xff] %v5677_v56  ;;  %v3087_v3 = vadd.f32 1.1283791, %v3086_v33 }
 0x2ad   :  { %v2473_v57 = vmul.f32 %v2472_v54, %v2448_v31  ;;  %9487 = vst [vmem:[#allocation47_spill] sm:$0xff] %v5696_v16  ;;  %v5702_v43 = vmul.f32 0.5, %v5392_v24  ;;  %v5708_v17 = vmul.f32 0.5, %v5409_v32  ;;  %v3110_v4 = vand.u32 2147483648, %v5653_v7  ;;  %v9504_v16 = vld [vmem:[#allocation33_spill] sm:$0xff] }
 0x2ae   :  { %v3850_v21 = vclamps-f32 %v1193_v8, 1.0  ;;  %v3866_v61 = vclamps-f32 %v1833_v58, 1.0  ;;  %v3987_v6 = vpop.eup %3986  ;;  %9488 = vst [vmem:[#allocation48_spill] sm:$0xff] %v5699_v45  ;;  %v3088_v52 = vmul.f32 %v3087_v3, %v5433_v42  ;;  %v5713_v8 = vmul.f32 0.5, %v5413_v10 }
 0x2af   :  { %v3100_v5 = vmul.f32 %v3987_v6, %v5653_v7  ;;  %9489 = vst [vmem:[#allocation49_spill] sm:$0xff] %v5702_v43  ;;  %v5716_v37 = vmul.f32 0.5, %v5423_v35  ;;  %v3882_v48 = vclamps-f32 %v2473_v57, 1.0  ;;  %vm3105_vm2 = vweird.f32 %v3987_v6 }
 0x2b0   :  { %9490 = vst [vmem:[#allocation50_spill] sm:$0xff] %v5705_v29  ;;  %v3560_v36 = vadd.f32 1.0, %v3850_v21  ;;  %v3576_v60 = vadd.f32 1.0, %v3866_v61  ;;  %v3108_v58 = vand.u32 2147483647, %v5653_v7  ;;  %v5720_v63 = vmul.f32 0.5, %v5427_v39 }
 0x2b1   :  { %v3101_v19 = vsub.f32 1.0, %v3100_v5  ;;  %9491 = vst [vmem:[#allocation51_spill] sm:$0xff] %v5708_v17  ;;  %v5723_v54 = vmul.f32 0.5, %v5442_v59  ;;  %v5726_v42 = vmul.f32 0.5, %v5446_v22  ;;  %v5729_v21 = vmul.f32 0.5, %v5458_v30 }
 0x2b2   :  { %9492 = vst [vmem:[#allocation52_spill] sm:$0xff] %v5713_v8  ;;  %vm3104_vm3 = vweird.f32 %v5653_v7  ;;  %v3624_v31 = vmul.f32 %v3560_v36, %v5632_v18  ;;  %v3640_v3 = vmul.f32 %v3576_v60, %v888_v55  ;;  %v3111_v57 = vor.u32 1.1754944e-38, %v3110_v4 }
 0x2b3   :  { %v3102_v33 = vmul.f32 %v3987_v6, %v3101_v19  ;;  %9493 = vst [vmem:[#allocation53_spill] sm:$0xff] %v5720_v63  ;;  %vm3106_vm4 = vmor %vm3104_vm3, %vm3105_vm2  ;;  %v5734_v5 = vmul.f32 0.5, %v5462_v11  ;;  %v5737_v19 = vmul.f32 0.5, %v5474_v53  ;;  %v5740_v8 = vmul.f32 0.5, %v5481_v27 }
 0x2b4   :  { %9494 = vst [vmem:[#allocation54_spill] sm:$0xff] %v5723_v54  ;;  %vm3109_vm5 = vcmp.eq.f32.partialorder %v3108_v58, 8.507059e+37  ;;  %v3592_v17 = vadd.f32 1.0, %v3882_v48  ;;  %v5746_v18 = vmul.f32 0.5, %v5497_v26  ;;  %v5749_v55 = vmul.f32 0.5, %v5509_v25  ;;  %v9508_v58 = vld [vmem:[#allocation36_spill] sm:$0xff] }
 0x2b5   :  { %9495 = vst [vmem:[#allocation55_spill] sm:$0xff] %v5726_v42  ;;  %v3103_v61 = vadd.f32 %v3987_v6, %v3102_v33  ;;  %v5743_v33 = vmul.f32 0.5, %v5493_v2  ;;  %v5752_v36 = vmul.f32 0.5, %v5513_v46  ;;  %v3688_v4 = vadd.f32 %v3640_v3, %v3624_v31  ;;  %v9514_v3 = vld [vmem:[#allocation24_spill] sm:$0xff]  ;;  %v9557_v42 = vld [vmem:[#allocation29_spill] sm:$0xff] }
 0x2b6   :  { %9496 = vst [vmem:[#allocation56_spill] sm:$0xff] %v5729_v21  ;;  %v3656_v31 = vmul.f32 %v3592_v17, %v5667_v12  ;;  %v9520_v21 = vld [vmem:[#allocation40_spill] sm:$0xff]  ;;  %v9526_v17 = vld [vmem:[#allocation14_spill] sm:$0xff]  ;;  %v5865_v28 = vmul.f32 0.70710677, %v5381_v15  ;;  %v9564_v15 = vld [vmem:[#allocation43_spill] sm:$0xff] }
 0x2b7   :  { %9497 = vst [vmem:[#allocation57_spill] sm:$0xff] %v5734_v5  ;;  %v3107_v29 = vsel %vm3106_vm4, %v3987_v6, %v3103_v61  ;;  %v9506_v6 = vld [vmem:[#allocation35_spill] sm:$0xff]  ;;  %v5761_v61 = vmul.f32 0.5, %v9508_v58  ;;  %v5783_v23 = vmul.f32 0.5, %v9520_v21 }
 0x2b8   :  { %9498 = vst [vmem:[#allocation58_spill] sm:$0xff] %v5737_v19  ;;  %v3112_v7 = vsel %vm3109_vm5, %v3111_v57, %v3107_v29  ;;  %v5758_v48 = vmul.f32 0.5, %v9506_v6  ;;  %v9510_v29 = vld [vmem:[#allocation37_spill] sm:$0xff]  ;;  %v9522_v5 = vld [vmem:[#allocation11_spill] sm:$0xff]  ;;  %v3704_v12 = vadd.f32 %v3688_v4, %v3656_v31  ;;  %v5792_v19 = vmul.f32 0.5, %v9526_v17 }
 0x2b9   :  { %9499 = vst [vmem:[#allocation59_spill] sm:$0xff] %v5740_v8  ;;  %v3113_v60 = vmul.f32 %v3112_v7, %v3088_v52  ;;  %v5755_v8 = vmul.f32 0.5, %v9504_v16  ;;  %v5764_v57 = vmul.f32 0.5, %v9510_v29  ;;  %v5774_v7 = vmul.f32 0.5, %v9514_v3 }
 0x2ba   :  { %9500 = vst [vmem:[#allocation60_spill] sm:$0xff] %v5743_v33  ;;  %v5767_v33 = vmul.f32 0.5, %v5540_v51 }
 0x2bb   :  { %9501 = vst [vmem:[#allocation61_spill] sm:$0xff] %v5746_v18  ;;  %v3898_v52 = vclamps-f32 %v3113_v60, 1.0  ;;  %v9518_v18 = vld [vmem:[#allocation39_spill] sm:$0xff] }
 0x2bc   :  { %9502 = vst [vmem:[#allocation62_spill] sm:$0xff] %v5749_v55  ;;  %v5770_v55 = vmul.f32 0.5, %v5547_v44  ;;  %v5780_v43 = vmul.f32 0.5, %v9518_v18 }
 0x2bd   :  { %9503 = vst [vmem:[#allocation63_spill] sm:$0xff] %v5752_v36  ;;  %v9516_v36 = vld [vmem:[#allocation38_spill] sm:$0xff]  ;;  %v3608_v60 = vadd.f32 1.0, %v3898_v52  ;;  %v9538_v52 = vld [vmem:[#allocation20_spill] sm:$0xff] }
 0x2be   :  { %9505 = vst [vmem:[#allocation33_spill] sm:$0xff] %v5755_v8  ;;  %v5777_v45 = vmul.f32 0.5, %v9516_v36  ;;  %v5811_v31 = vmul.f32 0.5, %v9538_v52  ;;  %v5878_v8 = vmul.f32 0.70710677, %v5405_v47 }
 0x2bf   :  { %9507 = vst [vmem:[#allocation35_spill] sm:$0xff] %v5758_v48  ;;  %v3672_v4 = vmul.f32 %v3608_v60, %v5670_v20  ;;  %v5899_v47 = vmul.f32 0.70710677, %v5442_v59  ;;  %v5920_v59 = vmul.f32 0.70710677, %v5474_v53 }
 0x2c0   :  { %9509 = vst [vmem:[#allocation36_spill] sm:$0xff] %v5761_v61  ;;  %v5940_v53 = vmul.f32 0.70710677, %v5513_v46 }
 0x2c1   :  { %9511 = vst [vmem:[#allocation37_spill] sm:$0xff] %v5764_v57  ;;  %v3720_v60 = vadd.f32 %v3704_v12, %v3672_v4  ;;  %v5850_v12 = vmul.f32 0.70710677, %v5368_v50  ;;  %v9556_v57 = vld [vmem:[#allocation12_spill] sm:$0xff]  ;;  %v5868_v50 = vmul.f32 0.70710677, %v5392_v24 }
 0x2c2   :  { %9512 = vst [vmem:[#allocation64_spill] sm:$0xff] %v5767_v33  ;;  %v5786_v33 = vmul.f32 0.5, %v9522_v5  ;;  %v9566_v24 = vld [vmem:[#allocation13_spill] sm:$0xff] }
 0x2c3   :  { %9513 = vst [vmem:[#allocation65_spill] sm:$0xff] %v5770_v55  ;;  %v5789_v55 = vmul.f32 0.5, %v9524_v40 }
 0x2c4   :  { %9515 = vst [vmem:[#allocation24_spill] sm:$0xff] %v5774_v7  ;;  %v9528_v7 = vld [vmem:[#allocation16_spill] sm:$0xff] }
 0x2c5   :  { %9517 = vst [vmem:[#allocation38_spill] sm:$0xff] %v5777_v45  ;;  %v5795_v13 = vmul.f32 0.5, %v9528_v7  ;;  %v9530_v45 = vld [vmem:[#allocation8_spill] sm:$0xff] }
 0x2c6   :  { %9519 = vst [vmem:[#allocation39_spill] sm:$0xff] %v5780_v43  ;;  %v5798_v48 = vmul.f32 0.5, %v9530_v45  ;;  %v9532_v43 = vld [vmem:[#allocation9_spill] sm:$0xff] }
 0x2c7   :  { %9521 = vst [vmem:[#allocation40_spill] sm:$0xff] %v5783_v23  ;;  %v5801_v63 = vmul.f32 0.5, %v9532_v43  ;;  %v9534_v23 = vld [vmem:[#allocation10_spill] sm:$0xff] }
 0x2c8   :  { %9523 = vst [vmem:[#allocation11_spill] sm:$0xff] %v5786_v33  ;;  %v5804_v56 = vmul.f32 0.5, %v9534_v23  ;;  %v9536_v33 = vld [vmem:[#allocation18_spill] sm:$0xff] }
 0x2c9   :  { %9525 = vst [vmem:[#allocation42_spill] sm:$0xff] %v5789_v55  ;;  %v5807_v61 = vmul.f32 0.5, %v9536_v33  ;;  %v5814_v55 = vmul.f32 0.70710677, %v5336_v0  ;;  %v5835_v0 = vmul.f32 0.70710677, %v5353_v41 }
 0x2ca   :  { %9527 = vst [vmem:[#allocation14_spill] sm:$0xff] %v5792_v19  ;;  %v5817_v19 = vmul.f32 0.70710677, %v5423_v35  ;;  %v5838_v35 = vmul.f32 0.70710677, %v5357_v9  ;;  %v3736_v41 = vmul.f32 0.25, %v3720_v60 }
 0x2cb   :  { %9529 = vst [vmem:[#allocation16_spill] sm:$0xff] %v5795_v13  ;;  %v9540_v13 = vld [vmem:[#allocation22_spill] sm:$0xff]  ;;  %v5856_v9 = vmul.f32 0.70710677, %v5377_v62  ;;  %v1076_v4 = vmul.f32 %v5814_v55, %v5814_v55 }
 0x2cc   :  { %9531 = vst [vmem:[#allocation8_spill] sm:$0xff] %v5798_v48  ;;  %v5820_v54 = vmul.f32 0.5, %v9540_v13  ;;  %v9560_v62 = vld [vmem:[#allocation26_spill] sm:$0xff] }
 0x2cd   :  { %9533 = vst [vmem:[#allocation9_spill] sm:$0xff] %v5801_v63  ;;  %v9542_v63 = vld [vmem:[#allocation25_spill] sm:$0xff]  ;;  %v5875_v60 = vmul.f32 0.5, %v9560_v62 }
 0x2ce   :  { %9535 = vst [vmem:[#allocation10_spill] sm:$0xff] %v5804_v56  ;;  %v5823_v49 = vmul.f32 0.5, %v9542_v63  ;;  %v9544_v56 = vld [vmem:[#allocation27_spill] sm:$0xff] }
 0x2cf   :  { %9537 = vst [vmem:[#allocation18_spill] sm:$0xff] %v5807_v61  ;;  %v5826_v48 = vmul.f32 0.70710677, %v9544_v56  ;;  %v9546_v61 = vld [vmem:[#allocation28_spill] sm:$0xff] }
 0x2d0   :  { %9539 = vst [vmem:[#allocation20_spill] sm:$0xff] %v5811_v31  ;;  %v5829_v20 = vmul.f32 0.70710677, %v9546_v61  ;;  %v5832_v31 = vmul.f32 0.70710677, %v5340_v34 }
 0x2d1   :  { %9541 = vst [vmem:[#allocation22_spill] sm:$0xff] %v5820_v54  ;;  %v4100_v54 = vld [vmem:[%s9088_s3] ss:$0 sm:$0xff]  ;;  %v5847_v61 = vmul.f32 0.70710677, %v5361_v1  ;;  %v785_v1 = vmul.f32 %v9557_v42, %v9556_v57  ;;  %s4157_s3 = smov 32  }
 0x2d2   :  { %9543 = vst [vmem:[#allocation25_spill] sm:$0xff] %v5823_v49  ;;  %v9550_v49 = vld [vmem:[#allocation32_spill] sm:$0xff]  ;;  %v5853_v34 = vmul.f32 0.70710677, %v5373_v38  ;;  %v5871_v38 = vmul.f32 0.70710677, %v9504_v16  ;;  %3763 = vrot.lane.b32.xlu1 %v3736_v41, %s4157_s3 }
 0x2d3   :  { %9545 = vst [vmem:[#allocation66_spill] sm:$0xff] %v5826_v48  ;;  %v5844_v56 = vadd.f32 %v4100_v54, %v9550_v49  ;;  %v1716_v49 = vmul.f32 %v5817_v19, %v5817_v19  ;;  %v5881_v42 = vmul.f32 0.70710677, %v5409_v32  ;;  %v5884_v57 = vmul.f32 0.5, %v9564_v15 }
 0x2d4   :  { %9547 = vst [vmem:[#allocation67_spill] sm:$0xff] %v5829_v20  ;;  %v5890_v16 = vmul.f32 0.70710677, %v5413_v10  ;;  %v5902_v32 = vmul.f32 0.70710677, %v9564_v15  ;;  %v5956_v46 = vadd.f32 %v4100_v54, %v785_v1 }
 0x2d5   :  { %9548 = vst [vmem:[#allocation68_spill] sm:$0xff] %v5832_v31  ;;  %v5893_v41 = vmul.f32 0.70710677, %v5844_v56  ;;  %v5912_v10 = vmul.f32 0.70710677, %v5458_v30  ;;  %v9577_v30 = vld [vmem:[#allocation41_spill] sm:$0xff] }
 0x2d6   :  { %9549 = vst [vmem:[#allocation69_spill] sm:$0xff] %v5835_v0  ;;  %v5931_v15 = vadd.f32 %v4100_v54, %v9577_v30 }
 0x2d7   :  { %9551 = vst [vmem:[#allocation32_spill] sm:$0xff] %v5844_v56  ;;  %v5915_v56 = vmul.f32 0.70710677, %v5462_v11  ;;  %v5934_v11 = vmul.f32 0.70710677, %v5497_v26 }
 0x2d8   :  { %9552 = vst [vmem:[#allocation70_spill] sm:$0xff] %v5847_v61 }
 0x2d9   :  { %9553 = vst [vmem:[#allocation71_spill] sm:$0xff] %v5850_v12 }
 0x2da   :  { %9554 = vst [vmem:[#allocation72_spill] sm:$0xff] %v5853_v34 }
 0x2db   :  { %9555 = vst [vmem:[#allocation73_spill] sm:$0xff] %v5856_v9 }
 0x2dc   :  { %9558 = vst [vmem:[#allocation12_spill] sm:$0xff] %v5865_v28 }
 0x2dd   :  { %9559 = vst [vmem:[#allocation29_spill] sm:$0xff] %v5868_v50  ;;  %v5887_v50 = vadd.f32 %v4100_v54, %v9566_v24  ;;  %v5909_v24 = vmul.f32 0.70710677, %v5446_v22  ;;  %v2996_v22 = vmul.f32 %v5902_v32, %v5902_v32 }
 0x2de   :  { %9561 = vst [vmem:[#allocation26_spill] sm:$0xff] %v5875_v60  ;;  %v5896_v60 = vmul.f32 0.70710677, %v5427_v39  ;;  %v2356_v39 = vmul.f32 %v5871_v38, %v5871_v38 }
 0x2df   :  { %9562 = vst [vmem:[#allocation74_spill] sm:$0xff] %v5878_v8  ;;  %v5949_v30 = vmul.f32 0.70710677, %v5887_v50 }
 0x2e0   :  { %9563 = vst [vmem:[#allocation75_spill] sm:$0xff] %v5881_v42  ;;  %v5904_v42 = vmin.f32 %v1076_v4, 16.0  ;;  %v5923_v4 = vmul.f32 0.70710677, %v5481_v27  ;;  %v9582_v27 = vld [vmem:[#allocation44_spill] sm:$0xff] }
 0x2e1   :  { %9565 = vst [vmem:[#allocation43_spill] sm:$0xff] %v5884_v57  ;;  %v5906_v57 = vmin.f32 %v1716_v49, 16.0  ;;  %v5926_v49 = vmul.f32 0.70710677, %v5493_v2 }
 0x2e2   :  { %9567 = vst [vmem:[#allocation13_spill] sm:$0xff] %v5887_v50  ;;  %v1078_v2 = vmul.f32 2.1237322e-06, %v5904_v42  ;;  %v5962_v50 = vmul.f32 %v5826_v48, %v5826_v48  ;;  %v5972_v48 = vmul.f32 %v5829_v20, %v5829_v20 }
 0x2e3   :  { %9568 = vst [vmem:[#allocation76_spill] sm:$0xff] %v5890_v16  ;;  %v1729_v26 = vmul.f32 3.8918573e-05, %v5906_v57 }
 0x2e4   :  { %9569 = vst [vmem:[#allocation77_spill] sm:$0xff] %v5893_v41 }
 0x2e5   :  { %9570 = vst [vmem:[#allocation78_spill] sm:$0xff] %v5896_v60 }
 0x2e6   :  { %9571 = vst [vmem:[#allocation79_spill] sm:$0xff] %v5899_v47 }
 0x2e7   :  { %9572 = vst [vmem:[#allocation80_spill] sm:$0xff] %v5912_v10  ;;  %v1730_v10 = vadd.f32 0.001143296, %v1729_v26 }
 0x2e8   :  { %9573 = vst [vmem:[#allocation81_spill] sm:$0xff] %v5915_v56  ;;  %v5937_v56 = vmul.f32 0.70710677, %v5509_v25  ;;  %v5954_v25 = vmin.f32 %v2996_v22, 16.0 }
 0x2e9   :  { %9574 = vst [vmem:[#allocation82_spill] sm:$0xff] %v5920_v59  ;;  %v1718_v59 = vmul.f32 2.1237322e-06, %v5906_v57  ;;  %v1731_v1 = vmul.f32 %v1730_v10, %v5906_v57 }
 0x2ea   :  { %9575 = vst [vmem:[#allocation83_spill] sm:$0xff] %v5923_v4  ;;  %v5943_v4 = vadd.f32 %v4100_v54, %v9582_v27  ;;  %v2998_v54 = vmul.f32 2.1237322e-06, %v5954_v25 }
 0x2eb   :  { %9576 = vst [vmem:[#allocation84_spill] sm:$0xff] %v5926_v49  ;;  %v1089_v49 = vmul.f32 3.8918573e-05, %v5904_v42 }
 0x2ec   :  { %9578 = vst [vmem:[#allocation41_spill] sm:$0xff] %v5931_v15 }
 0x2ed   :  { %9579 = vst [vmem:[#allocation85_spill] sm:$0xff] %v5934_v11  ;;  %v5952_v11 = vmin.f32 %v2356_v39, 16.0  ;;  %v1090_v27 = vadd.f32 0.001143296, %v1089_v49 }
 0x2ee   :  { %9580 = vst [vmem:[#allocation86_spill] sm:$0xff] %v5937_v56  ;;  %v1719_v56 = vadd.f32 0.00028619796, %v1718_v59 }
 0x2ef   :  { %9581 = vst [vmem:[#allocation87_spill] sm:$0xff] %v5940_v53  ;;  %v1079_v53 = vadd.f32 0.00028619796, %v1078_v2  ;;  %v2358_v47 = vmul.f32 2.1237322e-06, %v5952_v11  ;;  %v1091_v39 = vmul.f32 %v1090_v27, %v5904_v42 }
 0x2f0   :  { %9583 = vst [vmem:[#allocation44_spill] sm:$0xff] %v5943_v4  ;;  %v2369_v60 = vmul.f32 3.8918573e-05, %v5952_v11  ;;  %v1720_v22 = vmul.f32 %v1719_v56, %v5906_v57  ;;  %v3009_v2 = vmul.f32 3.8918573e-05, %v5954_v25 }
 0x2f1   :  { %9584 = vst [vmem:[#allocation88_spill] sm:$0xff] %v5949_v30  ;;  %v1080_v30 = vmul.f32 %v1079_v53, %v5904_v42  ;;  %v2359_v59 = vadd.f32 0.00028619796, %v2358_v47  ;;  %v1092_v41 = vadd.f32 0.014752088, %v1091_v39 }
 0x2f2   :  { %9585 = vst [vmem:[#allocation89_spill] sm:$0xff] %v5956_v46  ;;  %v2370_v49 = vadd.f32 0.001143296, %v2369_v60  ;;  %v1721_v16 = vadd.f32 0.0036580483, %v1720_v22 }
 0x2f3   :  { %9586 = vst [vmem:[#allocation90_spill] sm:$0xff] %v5962_v50  ;;  %v1081_v26 = vadd.f32 0.0036580483, %v1080_v30  ;;  %v1732_v53 = vadd.f32 0.014752088, %v1731_v1  ;;  %v2360_v27 = vmul.f32 %v2359_v59, %v5952_v11  ;;  %v1093_v47 = vmul.f32 %v1092_v41, %v5904_v42 }
 0x2f4   :  { %9587 = vst [vmem:[#allocation91_spill] sm:$0xff] %v5972_v48  ;;  %v2371_v56 = vmul.f32 %v2370_v49, %v5952_v11  ;;  %v2999_v50 = vadd.f32 0.00028619796, %v2998_v54  ;;  %v1722_v60 = vmul.f32 %v1721_v16, %v5906_v57  ;;  %v3010_v10 = vadd.f32 0.001143296, %v3009_v2 }
 0x2f5   :  { %v1082_v8 = vmul.f32 %v1081_v26, %v5904_v42  ;;  %v1733_v30 = vmul.f32 %v1732_v53, %v5906_v57  ;;  %v2361_v39 = vadd.f32 0.0036580483, %v2360_v27  ;;  %v5982_v1 = vmul.f32 0.70710677, %v5931_v15 }
 0x2f6   :  { %v2372_v22 = vadd.f32 0.014752088, %v2371_v56  ;;  %v3000_v20 = vmul.f32 %v2999_v50, %v5954_v25  ;;  %v1094_v48 = vadd.f32 0.112945676, %v1093_v47  ;;  %v3011_v54 = vmul.f32 %v3010_v10, %v5954_v25 }
 0x2f7   :  { %9588 = vst [vmem:[#allocation92_spill] sm:$0xff] %v5982_v1  ;;  %v1083_v59 = vadd.f32 0.05243302, %v1082_v8  ;;  %v5986_v49 = vmul.f32 0.70710677, %v9506_v6  ;;  %v2362_v53 = vmul.f32 %v2361_v39, %v5952_v11 }
 0x2f8   :  { %v1723_v41 = vadd.f32 0.05243302, %v1722_v60  ;;  %v1734_v26 = vadd.f32 0.112945676, %v1733_v30  ;;  %v2373_v16 = vmul.f32 %v2372_v22, %v5952_v11  ;;  %v1095_v2 = vmul.f32 %v1094_v48, %v5904_v42 }
 0x2f9   :  { %9589 = vst [vmem:[#allocation93_spill] sm:$0xff] %v5986_v49  ;;  %v3001_v27 = vadd.f32 0.0036580483, %v3000_v20  ;;  %v3012_v50 = vadd.f32 0.014752088, %v3011_v54  ;;  %v1084_v8 = vmul.f32 %v1083_v59, %v5904_v42 }
 0x2fa   :  { %v5992_v56 = vmul.f32 0.70710677, %v9508_v58  ;;  %v1735_v47 = vmul.f32 %v1734_v26, %v5906_v57  ;;  %v2374_v10 = vadd.f32 0.112945676, %v2373_v16  ;;  %v5997_v6 = vmul.f32 0.70710677, %v9510_v29 }
 0x2fb   :  { %v6000_v60 = vmul.f32 0.70710677, %v5540_v51  ;;  %v1096_v30 = vadd.f32 0.4994258, %v1095_v2  ;;  %v3013_v48 = vmul.f32 %v3012_v50, %v5954_v25  ;;  %v6004_v20 = vmul.f32 0.70710677, %v5547_v44 }
 0x2fc   :  { %9590 = vst [vmem:[#allocation94_spill] sm:$0xff] %v5992_v56  ;;  %v1724_v58 = vmul.f32 %v1723_v41, %v5906_v57  ;;  %v1736_v39 = vadd.f32 0.4994258, %v1735_v47  ;;  %v2375_v22 = vmul.f32 %v2374_v10, %v5952_v11  ;;  %v2363_v54 = vadd.f32 0.05243302, %v2362_v53 }
 0x2fd   :  { %9591 = vst [vmem:[#allocation95_spill] sm:$0xff] %v6000_v60  ;;  %v1097_v59 = vmul.f32 %v1096_v30, %v5904_v42  ;;  %v3002_v29 = vmul.f32 %v3001_v27, %v5954_v25  ;;  %v3014_v26 = vadd.f32 0.112945676, %v3013_v48  ;;  %v6011_v51 = vmul.f32 0.70710677, %v9514_v3 }
 0x2fe   :  { %9592 = vst [vmem:[#allocation96_spill] sm:$0xff] %v6004_v20  ;;  %v1085_v16 = vadd.f32 0.18741608, %v1084_v8  ;;  %v1737_v2 = vmul.f32 %v1736_v39, %v5906_v57  ;;  %v2376_v50 = vadd.f32 0.4994258, %v2375_v22  ;;  %v6024_v53 = vmul.f32 %v5832_v31, %v5832_v31 }
 0x2ff   :  { %9593 = vst [vmem:[#allocation97_spill] sm:$0xff] %v6011_v51  ;;  %v6015_v44 = vmul.f32 0.70710677, %v9516_v36  ;;  %v6018_v41 = vmul.f32 0.70710677, %v9518_v18  ;;  %v6020_v47 = vadd.f32 1.0, %v1097_v59  ;;  %v3015_v8 = vmul.f32 %v3014_v26, %v5954_v25 }
 0x300   :  { %v1725_v27 = vadd.f32 0.18741608, %v1724_v58  ;;  %v6026_v10 = vadd.f32 1.0, %v1737_v2  ;;  %v2377_v3 = vmul.f32 %v2376_v50, %v5952_v11  ;;  %v6031_v30 = vmul.f32 0.70710677, %v9520_v21 }
 0x301   :  { %9594 = vst [vmem:[#allocation98_spill] sm:$0xff] %v6015_v44  ;;  %3988 = vrcp.f32 %v6020_v47  ;;  %v2364_v18 = vmul.f32 %v2363_v54, %v5952_v11  ;;  %v3003_v36 = vadd.f32 0.05243302, %v3002_v29  ;;  %v6036_v48 = vmul.f32 0.70710677, %v9522_v5 }
 0x302   :  { %9595 = vst [vmem:[#allocation99_spill] sm:$0xff] %v6018_v41  ;;  %v1086_v39 = vmul.f32 %v1085_v16, %v5904_v42  ;;  %3990 = vrcp.f32 %v6026_v10  ;;  %v6042_v58 = vmul.f32 %v5835_v0, %v5835_v0  ;;  %v6045_v22 = vmul.f32 0.70710677, %v9524_v40 }
 0x303   :  { %9596 = vst [vmem:[#allocation100_spill] sm:$0xff] %v6031_v30  ;;  %v6048_v21 = vmul.f32 0.70710677, %v5943_v4  ;;  %v6051_v59 = vmul.f32 0.70710677, %v5956_v46  ;;  %v6055_v5 = vmul.f32 %v5838_v35, %v5838_v35  ;;  %v1726_v54 = vmul.f32 %v1725_v27, %v5906_v57 }
 0x304   :  { %9597 = vst [vmem:[#allocation101_spill] sm:$0xff] %v6036_v48  ;;  %v6058_v42 = vmul.f32 0.70710677, %v9526_v17  ;;  %v6061_v29 = vadd.f32 1.0, %v2377_v3  ;;  %v3016_v26 = vadd.f32 0.4994258, %v3015_v8  ;;  %v3004_v2 = vmul.f32 %v3003_v36, %v5954_v25 }
 0x305   :  { %9598 = vst [vmem:[#allocation102_spill] sm:$0xff] %v6045_v22  ;;  %v6064_v40 = vmul.f32 0.70710677, %v9528_v7  ;;  %v2365_v16 = vadd.f32 0.18741608, %v2364_v18  ;;  %v6069_v50 = vmul.f32 %v5847_v61, %v5847_v61  ;;  %v6087_v18 = vmul.f32 %v5850_v12, %v5850_v12 }
 0x306   :  { %9599 = vst [vmem:[#allocation103_spill] sm:$0xff] %v6048_v21  ;;  %v6072_v46 = vmul.f32 0.70710677, %v9530_v45  ;;  %v6075_v17 = vmul.f32 0.70710677, %v9532_v43  ;;  %3992 = vrcp.f32 %v6061_v29  ;;  %v3017_v8 = vmul.f32 %v3016_v26, %v5954_v25 }
 0x307   :  { %9600 = vst [vmem:[#allocation104_spill] sm:$0xff] %v6051_v59  ;;  %v1087_v57 = vadd.f32 1.1283791, %v1086_v39  ;;  %v3989_v27 = vpop.eup %3988  ;;  %v6079_v7 = vmul.f32 0.70710677, %v9534_v23  ;;  %vm1104_vm6 = vweird.f32 %v6020_v47  ;;  %vm1744_vm8 = vweird.f32 %v6026_v10 }
 0x308   :  { %9601 = vst [vmem:[#allocation105_spill] sm:$0xff] %v6058_v42  ;;  %v6082_v3 = vmul.f32 0.70710677, %v9536_v33  ;;  %v3991_v45 = vpop.eup %3990  ;;  %v6090_v43 = vmul.f32 0.70710677, %v9538_v52  ;;  %v1100_v39 = vmul.f32 %v3989_v27, %v6020_v47  ;;  %v2366_v33 = vmul.f32 %v2365_v16, %v5952_v11 }
 0x309   :  { %9602 = vst [vmem:[#allocation106_spill] sm:$0xff] %v6064_v40  ;;  %v6093_v36 = vmul.f32 0.70710677, %v9540_v13  ;;  %v1727_v23 = vadd.f32 1.1283791, %v1726_v54  ;;  %v1740_v15 = vmul.f32 %v3991_v45, %v6026_v10  ;;  %v6098_v26 = vadd.f32 1.0, %v3017_v8 }
 0x30a   :  { %9603 = vst [vmem:[#allocation107_spill] sm:$0xff] %v6075_v17  ;;  %v3005_v4 = vadd.f32 0.18741608, %v3004_v2  ;;  %v1088_v61 = vmul.f32 %v1087_v57, %v5814_v55  ;;  %v1101_v12 = vsub.f32 1.0, %v1100_v39  ;;  %v1108_v31 = vand.u32 2147483647, %v6020_v47 }
 0x30b   :  { %9604 = vst [vmem:[#allocation108_spill] sm:$0xff] %v6079_v7  ;;  %v1110_v52 = vand.u32 2147483648, %v6020_v47  ;;  %v1741_v13 = vsub.f32 1.0, %v1740_v15  ;;  %v1748_v0 = vand.u32 2147483647, %v6026_v10  ;;  %3994 = vrcp.f32 %v6098_v26 }
 0x30c   :  { %9605 = vst [vmem:[#allocation109_spill] sm:$0xff] %v6082_v3  ;;  %v3993_v54 = vpop.eup %3992  ;;  %vm1105_vm7 = vweird.f32 %v3989_v27  ;;  %v1728_v11 = vmul.f32 %v1727_v23, %v5817_v19  ;;  %v1750_v16 = vand.u32 2147483648, %v6026_v10  ;;  %vm1745_vm9 = vweird.f32 %v3991_v45 }
 0x30d   :  { %9606 = vst [vmem:[#allocation110_spill] sm:$0xff] %v6090_v43  ;;  %v1742_v55 = vmul.f32 %v3991_v45, %v1741_v13  ;;  %v2380_v2 = vmul.f32 %v3993_v54, %v6061_v29  ;;  %vm1109_vm10 = vcmp.eq.f32.partialorder %v1108_v31, 8.507059e+37  ;;  %v1111_v15 = vor.u32 1.1754944e-38, %v1110_v52  ;;  %vm1106_vm11 = vmor %vm1104_vm6, %vm1105_vm7 }
 0x30e   :  { %9607 = vst [vmem:[#allocation111_spill] sm:$0xff] %v6093_v36  ;;  %v1102_v36 = vmul.f32 %v3989_v27, %v1101_v12  ;;  %v2367_v8 = vadd.f32 1.1283791, %v2366_v33  ;;  %vm1749_vm12 = vcmp.eq.f32.partialorder %v1748_v0, 8.507059e+37  ;;  %v3006_v19 = vmul.f32 %v3005_v4, %v5954_v25  ;;  %vm1746_vm13 = vmor %vm1744_vm8, %vm1745_vm9 }
 0x30f   :  { %v1743_v39 = vadd.f32 %v3991_v45, %v1742_v55  ;;  %v2381_v12 = vsub.f32 1.0, %v2380_v2  ;;  %v1751_v13 = vor.u32 1.1754944e-38, %v1750_v16  ;;  %v2388_v10 = vand.u32 2147483647, %v6061_v29 }
 0x310   :  { %v1103_v57 = vadd.f32 %v3989_v27, %v1102_v36  ;;  %v2390_v43 = vand.u32 2147483648, %v6061_v29  ;;  %vm2385_vm14 = vweird.f32 %v3993_v54  ;;  %v2368_v55 = vmul.f32 %v2367_v8, %v5871_v38 }
 0x311   :  { %v3995_v3 = vpop.eup %3994  ;;  %v1747_v31 = vsel %vm1746_vm13, %v3991_v45, %v1743_v39  ;;  %v2382_v52 = vmul.f32 %v3993_v54, %v2381_v12  ;;  %vm2384_vm15 = vweird.f32 %v6061_v29  ;;  %v3007_v25 = vadd.f32 1.1283791, %v3006_v19 }
 0x312   :  { %v1107_v23 = vsel %vm1106_vm11, %v3989_v27, %v1103_v57  ;;  %v1752_v47 = vsel %vm1749_vm12, %v1751_v13, %v1747_v31  ;;  %v3020_v0 = vmul.f32 %v3995_v3, %v6098_v26  ;;  %vm2386_vm1 = vmor %vm2384_vm15, %vm2385_vm14  ;;  %vm2389_vm2 = vcmp.eq.f32.partialorder %v2388_v10, 8.507059e+37 }
 0x313   :  { %v1112_v36 = vsel %vm1109_vm10, %v1111_v15, %v1107_v23  ;;  %v1753_v2 = vmul.f32 %v1752_v47, %v1728_v11  ;;  %v2383_v4 = vadd.f32 %v3993_v54, %v2382_v52  ;;  %v2391_v16 = vor.u32 1.1754944e-38, %v2390_v43 }
 0x314   :  { %v1113_v33 = vmul.f32 %v1112_v36, %v1088_v61  ;;  %v3021_v57 = vsub.f32 1.0, %v3020_v0  ;;  %v3028_v39 = vand.u32 2147483647, %v6098_v26  ;;  %v3030_v61 = vand.u32 2147483648, %v6098_v26 }
 0x315   :  { %v3864_v15 = vclamps-f32 %v1753_v2, 1.0  ;;  %v2387_v45 = vsel %vm2386_vm1, %v3993_v54, %v2383_v4  ;;  %vm3025_vm3 = vweird.f32 %v3995_v3  ;;  %v6121_v11 = vmul.f32 0.70710677, %v9542_v63  ;;  %v9611_v4 = vld [vmem:[#allocation74_spill] sm:$0xff] }
 0x316   :  { %v3848_v27 = vclamps-f32 %v1113_v33, 1.0  ;;  %v2392_v12 = vsel %vm2389_vm2, %v2391_v16, %v2387_v45  ;;  %v3022_v38 = vmul.f32 %v3995_v3, %v3021_v57  ;;  %v6124_v29 = vmul.f32 0.70710677, %v9560_v62  ;;  %v9613_v57 = vld [vmem:[#allocation76_spill] sm:$0xff] }
 0x317   :  { %9608 = vst [vmem:[#allocation112_spill] sm:$0xff] %v6121_v11  ;;  %v2393_v19 = vmul.f32 %v2392_v12, %v2368_v55  ;;  %v3574_v23 = vadd.f32 1.0, %v3864_v15  ;;  %vm3024_vm4 = vweird.f32 %v6098_v26  ;;  %v6130_v13 = vmul.f32 %v5853_v34, %v5853_v34 }
 0x318   :  { %v3558_v8 = vadd.f32 1.0, %v3848_v27  ;;  %9609 = vst [vmem:[#allocation113_spill] sm:$0xff] %v6124_v29  ;;  %v3023_v43 = vadd.f32 %v3995_v3, %v3022_v38  ;;  %v3008_v36 = vmul.f32 %v3007_v25, %v5902_v32  ;;  %vm3026_vm5 = vmor %vm3024_vm4, %vm3025_vm3  ;;  %v3031_v63 = vor.u32 1.1754944e-38, %v3030_v61  ;;  %v9612_v27 = vld [vmem:[#allocation75_spill] sm:$0xff]  ;;  %v9614_v61 = vld [vmem:[#allocation33_spill] sm:$0xff] }
 0x319   :  { %v3880_v10 = vclamps-f32 %v2393_v19, 1.0  ;;  %v3638_v31 = vmul.f32 %v3574_v23, %v5716_v37  ;;  %vm3029_vm6 = vcmp.eq.f32.partialorder %v3028_v39, 8.507059e+37  ;;  %v1916_v52 = vmul.f32 %v5909_v24, %v5909_v24  ;;  %v9615_v19 = vld [vmem:[#allocation77_spill] sm:$0xff] }
 0x31a   :  { %v3622_v54 = vmul.f32 %v3558_v8, %v5673_v14  ;;  %v3027_v62 = vsel %vm3026_vm5, %v3995_v3, %v3023_v43  ;;  %v2556_v26 = vmul.f32 %v5997_v6, %v5997_v6  ;;  %v6140_v47 = vmul.f32 %v5856_v9, %v5856_v9  ;;  %v9610_v3 = vld [vmem:[#allocation29_spill] sm:$0xff] }
 0x31b   :  { %v3032_v14 = vsel %vm3029_vm6, %v3031_v63, %v3027_v62  ;;  %v3590_v33 = vadd.f32 1.0, %v3880_v10  ;;  %v3196_v32 = vmul.f32 %v6072_v46, %v6072_v46  ;;  %v6146_v37 = vmul.f32 %v5865_v28, %v5865_v28  ;;  %v9616_v62 = vld [vmem:[#allocation78_spill] sm:$0xff] }
 0x31c   :  { %v3033_v55 = vmul.f32 %v3032_v14, %v3008_v36  ;;  %v3686_v0 = vadd.f32 %v3638_v31, %v3622_v54  ;;  %v6150_v2 = vmul.f32 %v9610_v3, %v9610_v3  ;;  %v6154_v25 = vmul.f32 %v9611_v4, %v9611_v4 }
 0x31d   :  { %v6158_v16 = vmul.f32 %v9612_v27, %v9612_v27  ;;  %v6162_v15 = vmul.f32 %v9613_v57, %v9613_v57  ;;  %v6165_v45 = vmin.f32 %v6055_v5, 16.0  ;;  %v3654_v12 = vmul.f32 %v3590_v33, %v9614_v61 }
 0x31e   :  { %v3896_v39 = vclamps-f32 %v3033_v55, 1.0  ;;  %v6168_v38 = vmin.f32 %v1916_v52, 16.0  ;;  %v6170_v8 = vmin.f32 %v2556_v26, 16.0  ;;  %v6174_v23 = vmul.f32 %v9615_v19, %v9615_v19  ;;  %v9617_v55 = vld [vmem:[#allocation43_spill] sm:$0xff] }
 0x31f   :  { %v1278_v43 = vmul.f32 2.1237322e-06, %v6165_v45  ;;  %v1289_v54 = vmul.f32 3.8918573e-05, %v6165_v45  ;;  %v6178_v10 = vmin.f32 %v3196_v32, 16.0  ;;  %v3702_v5 = vadd.f32 %v3686_v0, %v3654_v12 }
 0x320   :  { %v3606_v36 = vadd.f32 1.0, %v3896_v39  ;;  %v1918_v63 = vmul.f32 2.1237322e-06, %v6168_v38  ;;  %v1929_v31 = vmul.f32 3.8918573e-05, %v6168_v38  ;;  %v6184_v52 = vmul.f32 %v9616_v62, %v9616_v62 }
 0x321   :  { %v1279_v26 = vadd.f32 0.00028619796, %v1278_v43  ;;  %v1290_v14 = vadd.f32 0.001143296, %v1289_v54  ;;  %v2558_v33 = vmul.f32 2.1237322e-06, %v6170_v8 }
 0x322   :  { %v3670_v61 = vmul.f32 %v3606_v36, %v9617_v55  ;;  %v1919_v19 = vadd.f32 0.00028619796, %v1918_v63  ;;  %v1930_v57 = vadd.f32 0.001143296, %v1929_v31  ;;  %v2569_v32 = vmul.f32 3.8918573e-05, %v6170_v8 }
 0x323   :  { %v1280_v0 = vmul.f32 %v1279_v26, %v6165_v45  ;;  %v1291_v39 = vmul.f32 %v1290_v14, %v6165_v45  ;;  %v2559_v12 = vadd.f32 0.00028619796, %v2558_v33  ;;  %v3198_v4 = vmul.f32 2.1237322e-06, %v6178_v10 }
 0x324   :  { %v3718_v27 = vadd.f32 %v3702_v5, %v3670_v61  ;;  %v1920_v9 = vmul.f32 %v1919_v19, %v6168_v38  ;;  %v1931_v43 = vmul.f32 %v1930_v57, %v6168_v38  ;;  %v2570_v54 = vadd.f32 0.001143296, %v2569_v32 }
 0x325   :  { %v1281_v28 = vadd.f32 0.0036580483, %v1280_v0  ;;  %v1292_v3 = vadd.f32 0.014752088, %v1291_v39  ;;  %v2560_v36 = vmul.f32 %v2559_v12, %v6170_v8  ;;  %v3199_v63 = vadd.f32 0.00028619796, %v3198_v4 }
 0x326   :  { %v3734_v31 = vmul.f32 0.25, %v3718_v27  ;;  %v1921_v55 = vadd.f32 0.0036580483, %v1920_v9  ;;  %v1932_v34 = vadd.f32 0.014752088, %v1931_v43  ;;  %v2571_v26 = vmul.f32 %v2570_v54, %v6170_v8  ;;  %v9618_v27 = vld [vmem:[#allocation79_spill] sm:$0xff] }
 0x327   :  { %v1282_v14 = vmul.f32 %v1281_v28, %v6165_v45  ;;  %v1293_v33 = vmul.f32 %v1292_v3, %v6165_v45  ;;  %v2561_v5 = vadd.f32 0.0036580483, %v2560_v36  ;;  %v3200_v19 = vmul.f32 %v3199_v63, %v6178_v10  ;;  %v9619_v36 = vld [vmem:[#allocation80_spill] sm:$0xff] }
 0x328   :  { %3752 = vrot.lane.b32.xlu0 %v3734_v31, %s4158_s7  ;;  %v1922_v57 = vmul.f32 %v1921_v55, %v6168_v38  ;;  %v1933_v61 = vmul.f32 %v1932_v34, %v6168_v38  ;;  %v2572_v4 = vadd.f32 0.014752088, %v2571_v26  ;;  %v3209_v9 = vmul.f32 3.8918573e-05, %v6178_v10  ;;  %v9620_v26 = vld [vmem:[#allocation81_spill] sm:$0xff] }
 0x329   :  { %v6205_v32 = vmul.f32 %v9618_v27, %v9618_v27  ;;  %v1283_v28 = vadd.f32 0.05243302, %v1282_v14  ;;  %v1294_v0 = vadd.f32 0.112945676, %v1293_v33  ;;  %v2562_v3 = vmul.f32 %v2561_v5, %v6170_v8 }
 0x32a   :  { %v1923_v39 = vadd.f32 0.05243302, %v1922_v57  ;;  %v1934_v12 = vadd.f32 0.112945676, %v1933_v61  ;;  %v2573_v43 = vmul.f32 %v2572_v4, %v6170_v8  ;;  %v3210_v54 = vadd.f32 0.001143296, %v3209_v9 }
 0x32b   :  { %v6211_v63 = vmul.f32 %v9619_v36, %v9619_v36  ;;  %v1284_v34 = vmul.f32 %v1283_v28, %v6165_v45  ;;  %v1295_v31 = vmul.f32 %v1294_v0, %v6165_v45  ;;  %v3201_v55 = vadd.f32 0.0036580483, %v3200_v19  ;;  %v9621_v61 = vld [vmem:[#allocation82_spill] sm:$0xff]  ;;  %v9623_v9 = vld [vmem:[#allocation83_spill] sm:$0xff] }
 0x32c   :  { %v6217_v14 = vmul.f32 %v9620_v26, %v9620_v26  ;;  %v1935_v33 = vmul.f32 %v1934_v12, %v6168_v38  ;;  %v2574_v5 = vadd.f32 0.112945676, %v2573_v43  ;;  %v3211_v57 = vmul.f32 %v3210_v54, %v6178_v10  ;;  %v9624_v12 = vld [vmem:[#allocation84_spill] sm:$0xff] }
 0x32d   :  { %v6223_v4 = vmul.f32 %v9621_v61, %v9621_v61  ;;  %v6227_v36 = vmul.f32 %v9623_v9, %v9623_v9  ;;  %v1296_v28 = vadd.f32 0.4994258, %v1295_v31  ;;  %v1924_v19 = vmul.f32 %v1923_v39, %v6168_v38 }
 0x32e   :  { %v1936_v0 = vadd.f32 0.4994258, %v1935_v33  ;;  %v2563_v62 = vadd.f32 0.05243302, %v2562_v3  ;;  %v2575_v26 = vmul.f32 %v2574_v5, %v6170_v8  ;;  %v3212_v29 = vadd.f32 0.014752088, %v3211_v57 }
 0x32f   :  { %9622 = vst [vmem:[#allocation33_spill] sm:$0xff] %v6223_v4  ;;  %v6233_v43 = vmul.f32 %v9624_v12, %v9624_v12  ;;  %v1285_v54 = vadd.f32 0.18741608, %v1284_v34  ;;  %v1297_v61 = vmul.f32 %v1296_v28, %v6165_v45  ;;  %v3202_v27 = vmul.f32 %v3201_v55, %v6178_v10  ;;  %v9625_v4 = vld [vmem:[#allocation85_spill] sm:$0xff]  ;;  %v9627_v33 = vld [vmem:[#allocation86_spill] sm:$0xff]  ;;  %v9628_v57 = vld [vmem:[#allocation87_spill] sm:$0xff] }
 0x330   :  { %v6239_v9 = vmul.f32 %v9625_v4, %v9625_v4  ;;  %v1937_v39 = vmul.f32 %v1936_v0, %v6168_v38  ;;  %v2576_v31 = vadd.f32 0.4994258, %v2575_v26  ;;  %v3213_v3 = vmul.f32 %v3212_v29, %v6178_v10 }
 0x331   :  { %v6245_v5 = vmul.f32 %v9627_v33, %v9627_v33  ;;  %v6249_v34 = vmul.f32 %v9628_v57, %v9628_v57  ;;  %v6251_v28 = vadd.f32 1.0, %v1297_v61  ;;  %v1925_v55 = vadd.f32 0.18741608, %v1924_v19 }
 0x332   :  { %9626 = vst [vmem:[#allocation43_spill] sm:$0xff] %v6239_v9  ;;  %v6253_v12 = vadd.f32 1.0, %v1937_v39  ;;  %v2564_v4 = vmul.f32 %v2563_v62, %v6170_v8  ;;  %v2577_v0 = vmul.f32 %v2576_v31, %v6170_v8  ;;  %v3214_v26 = vadd.f32 0.112945676, %v3213_v3  ;;  %v9629_v9 = vld [vmem:[#allocation88_spill] sm:$0xff] }
 0x333   :  { %v6259_v29 = vmul.f32 %v9629_v9, %v9629_v9  ;;  %v1286_v33 = vmul.f32 %v1285_v54, %v6165_v45  ;;  %3996 = vrcp.f32 %v6251_v28  ;;  %v3203_v57 = vadd.f32 0.05243302, %v3202_v27 }
 0x334   :  { %v6265_v61 = vmul.f32 %v5982_v1, %v5982_v1  ;;  %v6269_v19 = vmul.f32 %v5986_v49, %v5986_v49  ;;  %v6273_v62 = vmul.f32 %v5992_v56, %v5992_v56  ;;  %3998 = vrcp.f32 %v6253_v12 }
 0x335   :  { %v6278_v45 = vmul.f32 %v6000_v60, %v6000_v60  ;;  %v6282_v27 = vmul.f32 %v6004_v20, %v6004_v20  ;;  %v6286_v54 = vmul.f32 %v6011_v51, %v6011_v51  ;;  %v1926_v39 = vmul.f32 %v1925_v55, %v6168_v38 }
 0x336   :  { %v6291_v31 = vmul.f32 %v6015_v44, %v6015_v44  ;;  %v2565_v3 = vadd.f32 0.18741608, %v2564_v4  ;;  %v6293_v1 = vadd.f32 1.0, %v2577_v0  ;;  %v3215_v9 = vmul.f32 %v3214_v26, %v6178_v10 }
 0x337   :  { %v6298_v60 = vmul.f32 %v6018_v41, %v6018_v41  ;;  %v6302_v20 = vmul.f32 %v6031_v30, %v6031_v30  ;;  %v1287_v51 = vadd.f32 1.1283791, %v1286_v33  ;;  %v3204_v38 = vmul.f32 %v3203_v57, %v6178_v10 }
 0x338   :  { %v6307_v55 = vmul.f32 %v6036_v48, %v6036_v48  ;;  %v6311_v4 = vmul.f32 %v6045_v22, %v6045_v22  ;;  %v6315_v0 = vmul.f32 %v6048_v21, %v6048_v21  ;;  %4000 = vrcp.f32 %v6293_v1 }
 0x339   :  { %v3997_v26 = vpop.eup %3996  ;;  %v6320_v33 = vmul.f32 %v6051_v59, %v6051_v59  ;;  %v6324_v57 = vmul.f32 %v6058_v42, %v6058_v42  ;;  %v1927_v48 = vadd.f32 1.1283791, %v1926_v39  ;;  %v3216_v44 = vadd.f32 0.4994258, %v3215_v9 }
 0x33a   :  { %9630 = vst [vmem:[#allocation114_spill] sm:$0xff] %v6311_v4  ;;  %v3999_v41 = vpop.eup %3998  ;;  %v6328_v22 = vmul.f32 %v6064_v40, %v6064_v40  ;;  %v6332_v21 = vmul.f32 %v6075_v17, %v6075_v17  ;;  %v1300_v30 = vmul.f32 %v3997_v26, %v6251_v28  ;;  %v2566_v59 = vmul.f32 %v2565_v3, %v6170_v8 }
 0x33b   :  { %9631 = vst [vmem:[#allocation115_spill] sm:$0xff] %v6315_v0  ;;  %v1288_v49 = vmul.f32 %v1287_v51, %v5838_v35  ;;  %v1940_v42 = vmul.f32 %v3999_v41, %v6253_v12  ;;  %v3205_v56 = vadd.f32 0.18741608, %v3204_v38  ;;  %v3217_v9 = vmul.f32 %v3216_v44, %v6178_v10 }
 0x33c   :  { %9632 = vst [vmem:[#allocation116_spill] sm:$0xff] %v6320_v33  ;;  %v1301_v39 = vsub.f32 1.0, %v1300_v30  ;;  %vm1304_vm7 = vweird.f32 %v6251_v28  ;;  %v1308_v40 = vand.u32 2147483647, %v6251_v28  ;;  %v1928_v17 = vmul.f32 %v1927_v48, %v5909_v24 }
 0x33d   :  { %9633 = vst [vmem:[#allocation117_spill] sm:$0xff] %v6324_v57  ;;  %v1310_v57 = vand.u32 2147483648, %v6251_v28  ;;  %v1948_v33 = vand.u32 2147483647, %v6253_v12  ;;  %v6344_v8 = vadd.f32 1.0, %v3217_v9  ;;  %vm1305_vm8 = vweird.f32 %v3997_v26 }
 0x33e   :  { %9634 = vst [vmem:[#allocation118_spill] sm:$0xff] %v6332_v21  ;;  %v1941_v21 = vsub.f32 1.0, %v1940_v42  ;;  %v4001_v35 = vpop.eup %4000  ;;  %v1302_v51 = vmul.f32 %v3997_v26, %v1301_v39  ;;  %vm1944_vm9 = vweird.f32 %v6253_v12  ;;  %v1950_v44 = vand.u32 2147483648, %v6253_v12  ;;  %vm1306_vm12 = vmor %vm1304_vm7, %vm1305_vm8 }
 0x33f   :  { %vm1945_vm10 = vweird.f32 %v3999_v41  ;;  %v2580_v3 = vmul.f32 %v4001_v35, %v6293_v1  ;;  %4002 = vrcp.f32 %v6344_v8  ;;  %vm1309_vm11 = vcmp.eq.f32.partialorder %v1308_v40, 8.507059e+37 }
 0x340   :  { %v1942_v30 = vmul.f32 %v3999_v41, %v1941_v21  ;;  %v1303_v38 = vadd.f32 %v3997_v26, %v1302_v51  ;;  %v1311_v24 = vor.u32 1.1754944e-38, %v1310_v57  ;;  %v2567_v48 = vadd.f32 1.1283791, %v2566_v59  ;;  %vm1946_vm14 = vmor %vm1944_vm9, %vm1945_vm10 }
 0x341   :  { %vm1949_vm13 = vcmp.eq.f32.partialorder %v1948_v33, 8.507059e+37  ;;  %v2581_v9 = vsub.f32 1.0, %v2580_v3  ;;  %v3206_v39 = vmul.f32 %v3205_v56, %v6178_v10  ;;  %v1951_v21 = vor.u32 1.1754944e-38, %v1950_v44  ;;  %v9635_v56 = vld [vmem:[#allocation90_spill] sm:$0xff]  ;;  %v9637_v3 = vld [vmem:[#allocation91_spill] sm:$0xff] }
 0x342   :  { %v1943_v42 = vadd.f32 %v3999_v41, %v1942_v30  ;;  %v1307_v0 = vsel %vm1306_vm12, %v3997_v26, %v1303_v38  ;;  %v2588_v4 = vand.u32 2147483647, %v6293_v1  ;;  %v2590_v51 = vand.u32 2147483648, %v6293_v1 }
 0x343   :  { %v1312_v40 = vsel %vm1309_vm11, %v1311_v24, %v1307_v0  ;;  %v2582_v59 = vmul.f32 %v4001_v35, %v2581_v9  ;;  %vm2585_vm15 = vweird.f32 %v4001_v35  ;;  %v6359_v28 = vmul.f32 %v6079_v7, %v6079_v7 }
 0x344   :  { %v1947_v57 = vsel %vm1946_vm14, %v3999_v41, %v1943_v42  ;;  %v1313_v33 = vmul.f32 %v1312_v40, %v1288_v49  ;;  %v6362_v10 = vmin.f32 %v9635_v56, 16.0  ;;  %vm2584_vm1 = vweird.f32 %v6293_v1 }
 0x345   :  { %v1952_v30 = vsel %vm1949_vm13, %v1951_v21, %v1947_v57  ;;  %v4003_v12 = vpop.eup %4002  ;;  %v2583_v44 = vadd.f32 %v4001_v35, %v2582_v59  ;;  %v6366_v38 = vmin.f32 %v9637_v3, 16.0  ;;  %v2568_v0 = vmul.f32 %v2567_v48, %v5997_v6  ;;  %vm2586_vm2 = vmor %vm2584_vm1, %vm2585_vm15  ;;  %v9643_v3 = vld [vmem:[#allocation55_spill] sm:$0xff] }
 0x346   :  { %9636 = vst [vmem:[#allocation90_spill] sm:$0xff] %v6362_v10  ;;  %v1953_v26 = vmul.f32 %v1952_v30, %v1928_v17  ;;  %v3853_v41 = vclamps-f32 %v1313_v33, 1.0  ;;  %v2591_v24 = vor.u32 1.1754944e-38, %v2590_v51  ;;  %v3220_v42 = vmul.f32 %v4003_v12, %v6344_v8 }
 0x347   :  { %9638 = vst [vmem:[#allocation91_spill] sm:$0xff] %v6366_v38  ;;  %v2587_v9 = vsel %vm2586_vm2, %v4001_v35, %v2583_v44  ;;  %vm2589_vm3 = vcmp.eq.f32.partialorder %v2588_v4, 8.507059e+37  ;;  %v3207_v21 = vadd.f32 1.1283791, %v3206_v39  ;;  %v6371_v59 = vmin.f32 %v6024_v53, 16.0 }
 0x348   :  { %v3869_v49 = vclamps-f32 %v1953_v26, 1.0  ;;  %v2592_v40 = vsel %vm2589_vm3, %v2591_v24, %v2587_v9  ;;  %v3221_v57 = vsub.f32 1.0, %v3220_v42  ;;  %v3563_v17 = vadd.f32 1.0, %v3853_v41 }
 0x349   :  { %v2593_v1 = vmul.f32 %v2592_v40, %v2568_v0  ;;  %v3230_v30 = vand.u32 2147483648, %v6344_v8  ;;  %v6375_v6 = vmin.f32 %v6042_v58, 16.0  ;;  %vm3225_vm4 = vweird.f32 %v4003_v12  ;;  %v9642_v58 = vld [vmem:[#allocation19_spill] sm:$0xff] }
 0x34a   :  { %v3579_v33 = vadd.f32 1.0, %v3869_v49  ;;  %v3222_v48 = vmul.f32 %v4003_v12, %v3221_v57  ;;  %v3228_v51 = vand.u32 2147483647, %v6344_v8  ;;  %v6379_v4 = vmin.f32 %v6069_v50, 16.0 }
 0x34b   :  { %v3885_v35 = vclamps-f32 %v2593_v1, 1.0  ;;  %v3208_v39 = vmul.f32 %v3207_v21, %v6072_v46  ;;  %v6383_v53 = vmin.f32 %v6087_v18, 16.0  ;;  %v6386_v56 = vmin.f32 %v6130_v13, 16.0  ;;  %v9654_v1 = vld [vmem:[#allocation109_spill] sm:$0xff] }
 0x34c   :  { %9639 = vst [vmem:[#allocation119_spill] sm:$0xff] %v6379_v4  ;;  %v3223_v26 = vadd.f32 %v4003_v12, %v3222_v48  ;;  %vm3224_vm5 = vweird.f32 %v6344_v8  ;;  %v3627_v44 = vmul.f32 %v3563_v17, %v9642_v58  ;;  %v3643_v41 = vmul.f32 %v3579_v33, %v9643_v3  ;;  %v9656_v3 = vld [vmem:[#allocation8_spill] sm:$0xff] }
 0x34d   :  { %9640 = vst [vmem:[#allocation120_spill] sm:$0xff] %v6383_v53  ;;  %vm3226_vm6 = vmor %vm3224_vm5, %vm3225_vm4  ;;  %v3231_v0 = vor.u32 1.1754944e-38, %v3230_v30  ;;  %v3595_v50 = vadd.f32 1.0, %v3885_v35  ;;  %v6392_v24 = vmin.f32 %v6140_v47, 16.0  ;;  %v6395_v46 = vmin.f32 %v6146_v37, 16.0 }
 0x34e   :  { %9641 = vst [vmem:[#allocation121_spill] sm:$0xff] %v6386_v56  ;;  %v3227_v18 = vsel %vm3226_vm6, %v4003_v12, %v3223_v26  ;;  %vm3229_vm7 = vcmp.eq.f32.partialorder %v3228_v51, 8.507059e+37  ;;  %v6398_v13 = vmin.f32 %v6150_v2, 16.0  ;;  %v6401_v8 = vmin.f32 %v6154_v25, 16.0  ;;  %v9651_v25 = vld [vmem:[#allocation37_spill] sm:$0xff] }
 0x34f   :  { %9644 = vst [vmem:[#allocation19_spill] sm:$0xff] %v6392_v24  ;;  %v3232_v42 = vsel %vm3229_vm7, %v3231_v0, %v3227_v18  ;;  %v6404_v49 = vmin.f32 %v6158_v16, 16.0  ;;  %v6407_v9 = vmin.f32 %v6205_v32, 16.0  ;;  %v6410_v47 = vmin.f32 %v6273_v62, 16.0 }
 0x350   :  { %9645 = vst [vmem:[#allocation55_spill] sm:$0xff] %v6395_v46  ;;  %v3233_v37 = vmul.f32 %v3232_v42, %v3208_v39  ;;  %v3691_v21 = vadd.f32 %v3643_v41, %v3627_v44  ;;  %v6413_v12 = vmin.f32 %v6162_v15, 16.0  ;;  %v6416_v2 = vmin.f32 %v6174_v23, 16.0 }
 0x351   :  { %9646 = vst [vmem:[#allocation122_spill] sm:$0xff] %v6398_v13  ;;  %v3659_v40 = vmul.f32 %v3595_v50, %v9651_v25  ;;  %v6420_v57 = vmin.f32 %v6184_v52, 16.0  ;;  %v6423_v16 = vmin.f32 %v6211_v63, 16.0  ;;  %v6426_v32 = vmin.f32 %v6217_v14, 16.0 }
 0x352   :  { %9647 = vst [vmem:[#allocation123_spill] sm:$0xff] %v6401_v8  ;;  %v3901_v62 = vclamps-f32 %v3233_v37, 1.0  ;;  %v6429_v17 = vmin.f32 %v6328_v22, 16.0  ;;  %v1198_v15 = vmul.f32 2.1237322e-06, %v6375_v6  ;;  %v6435_v30 = vmul.f32 %v9654_v1, %v9654_v1  ;;  %v9655_v22 = vld [vmem:[#allocation110_spill] sm:$0xff] }
 0x353   :  { %9648 = vst [vmem:[#allocation124_spill] sm:$0xff] %v6404_v49  ;;  %v1209_v23 = vmul.f32 3.8918573e-05, %v6375_v6  ;;  %v1838_v52 = vmul.f32 2.1237322e-06, %v6407_v9  ;;  %v3707_v48 = vadd.f32 %v3691_v21, %v3659_v40  ;;  %v6442_v39 = vmul.f32 %v9655_v22, %v9655_v22 }
 0x354   :  { %9649 = vst [vmem:[#allocation125_spill] sm:$0xff] %v6413_v12  ;;  %v1849_v63 = vmul.f32 3.8918573e-05, %v6407_v9  ;;  %v2478_v33 = vmul.f32 2.1237322e-06, %v6410_v47  ;;  %v3611_v14 = vadd.f32 1.0, %v3901_v62 }
 0x355   :  { %9650 = vst [vmem:[#allocation126_spill] sm:$0xff] %v6416_v2  ;;  %v1199_v51 = vadd.f32 0.00028619796, %v1198_v15  ;;  %v1210_v35 = vadd.f32 0.001143296, %v1209_v23 }
 0x356   :  { %9652 = vst [vmem:[#allocation37_spill] sm:$0xff] %v6423_v16  ;;  %v1839_v26 = vadd.f32 0.00028619796, %v1838_v52  ;;  %v1850_v58 = vadd.f32 0.001143296, %v1849_v63  ;;  %v3675_v41 = vmul.f32 %v3611_v14, %v9656_v3  ;;  %v9657_v52 = vld [vmem:[#allocation111_spill] sm:$0xff] }
 0x357   :  { %9653 = vst [vmem:[#allocation127_spill] sm:$0xff] %v6426_v32  ;;  %v2479_v44 = vadd.f32 0.00028619796, %v2478_v33  ;;  %v1200_v0 = vmul.f32 %v1199_v51, %v6375_v6  ;;  %v1211_v50 = vmul.f32 %v1210_v35, %v6375_v6  ;;  %v2489_v18 = vmul.f32 3.8918573e-05, %v6410_v47 }
 0x358   :  { %v1840_v42 = vmul.f32 %v1839_v26, %v6407_v9  ;;  %v1851_v37 = vmul.f32 %v1850_v58, %v6407_v9  ;;  %v3118_v25 = vmul.f32 2.1237322e-06, %v6429_v17  ;;  %v3723_v40 = vadd.f32 %v3707_v48, %v3675_v41 }
 0x359   :  { %v2480_v21 = vmul.f32 %v2479_v44, %v6410_v47  ;;  %v1201_v62 = vadd.f32 0.0036580483, %v1200_v0  ;;  %v1212_v15 = vadd.f32 0.014752088, %v1211_v50  ;;  %v2490_v23 = vadd.f32 0.001143296, %v2489_v18 }
 0x35a   :  { %v6454_v63 = vmul.f32 %v9657_v52, %v9657_v52  ;;  %v1841_v33 = vadd.f32 0.0036580483, %v1840_v42  ;;  %v1852_v14 = vadd.f32 0.014752088, %v1851_v37  ;;  %v3739_v35 = vmul.f32 0.25, %v3723_v40 }
 0x35b   :  { %v2481_v51 = vadd.f32 0.0036580483, %v2480_v21  ;;  %v1202_v26 = vmul.f32 %v1201_v62, %v6375_v6  ;;  %v1213_v58 = vmul.f32 %v1212_v15, %v6375_v6  ;;  %v2491_v44 = vmul.f32 %v2490_v23, %v6410_v47 }
 0x35c   :  { %v1842_v3 = vmul.f32 %v1841_v33, %v6407_v9  ;;  %v1853_v48 = vmul.f32 %v1852_v14, %v6407_v9  ;;  %v3119_v0 = vadd.f32 0.00028619796, %v3118_v25  ;;  %v6464_v50 = vmul.f32 %v6121_v11, %v6121_v11  ;;  %3776 = vrot.lane.b32.xlu2 %v3739_v35, %s4156_s2 }
 0x35d   :  { %v2482_v41 = vmul.f32 %v2481_v51, %v6410_v47  ;;  %v1203_v18 = vadd.f32 0.05243302, %v1202_v26  ;;  %v1214_v42 = vadd.f32 0.112945676, %v1213_v58  ;;  %v2492_v37 = vadd.f32 0.014752088, %v2491_v44 }
 0x35e   :  { %v1843_v21 = vadd.f32 0.05243302, %v1842_v3  ;;  %v1854_v40 = vadd.f32 0.112945676, %v1853_v48  ;;  %v3120_v15 = vmul.f32 %v3119_v0, %v6429_v17  ;;  %v3129_v14 = vmul.f32 3.8918573e-05, %v6429_v17 }
 0x35f   :  { %v2483_v62 = vadd.f32 0.05243302, %v2482_v41  ;;  %v1204_v23 = vmul.f32 %v1203_v18, %v6375_v6  ;;  %v1215_v33 = vmul.f32 %v1214_v42, %v6375_v6  ;;  %v2493_v25 = vmul.f32 %v2492_v37, %v6410_v47  ;;  %v9658_v51 = vld [vmem:[#allocation33_spill] sm:$0xff]  ;;  %v9662_v44 = vld [vmem:[#allocation43_spill] sm:$0xff] }
 0x360   :  { %v6473_v22 = vmin.f32 %v9658_v51, 16.0  ;;  %v6476_v35 = vmin.f32 %v6227_v36, 16.0  ;;  %v6479_v26 = vmin.f32 %v6233_v43, 16.0  ;;  %v1855_v58 = vmul.f32 %v1854_v40, %v6407_v9 }
 0x361   :  { %v6483_v3 = vmin.f32 %v9662_v44, 16.0  ;;  %v1216_v48 = vadd.f32 0.4994258, %v1215_v33  ;;  %v1844_v41 = vmul.f32 %v1843_v21, %v6407_v9  ;;  %v2494_v0 = vadd.f32 0.112945676, %v2493_v25 }
 0x362   :  { %9659 = vst [vmem:[#allocation8_spill] sm:$0xff] %v6473_v22  ;;  %v6487_v18 = vmin.f32 %v6245_v5, 16.0  ;;  %v1856_v42 = vadd.f32 0.4994258, %v1855_v58  ;;  %v2484_v37 = vmul.f32 %v2483_v62, %v6410_v47  ;;  %v3121_v36 = vadd.f32 0.0036580483, %v3120_v15 }
 0x363   :  { %9660 = vst [vmem:[#allocation33_spill] sm:$0xff] %v6476_v35  ;;  %v1205_v51 = vadd.f32 0.18741608, %v1204_v23  ;;  %v1217_v43 = vmul.f32 %v1216_v48, %v6375_v6  ;;  %v2495_v52 = vmul.f32 %v2494_v0, %v6410_v47  ;;  %v3130_v40 = vadd.f32 0.001143296, %v3129_v14 }
 0x364   :  { %9661 = vst [vmem:[#allocation128_spill] sm:$0xff] %v6479_v26  ;;  %v6493_v44 = vmin.f32 %v6249_v34, 16.0  ;;  %v6496_v33 = vmin.f32 %v6259_v29, 16.0  ;;  %v6499_v21 = vmin.f32 %v6265_v61, 16.0  ;;  %v1857_v5 = vmul.f32 %v1856_v42, %v6407_v9 }
 0x365   :  { %9663 = vst [vmem:[#allocation43_spill] sm:$0xff] %v6483_v3  ;;  %v6503_v62 = vmin.f32 %v6269_v19, 16.0  ;;  %v6506_v15 = vmin.f32 %v6278_v45, 16.0  ;;  %v6508_v23 = vadd.f32 1.0, %v1217_v43  ;;  %v1845_v25 = vadd.f32 0.18741608, %v1844_v41 }
 0x366   :  { %9664 = vst [vmem:[#allocation129_spill] sm:$0xff] %v6487_v18  ;;  %v6510_v14 = vadd.f32 1.0, %v1857_v5  ;;  %v2496_v34 = vadd.f32 0.4994258, %v2495_v52  ;;  %v3122_v29 = vmul.f32 %v3121_v36, %v6429_v17  ;;  %v3131_v58 = vmul.f32 %v3130_v40, %v6429_v17  ;;  %v9679_v43 = vld [vmem:[#allocation116_spill] sm:$0xff] }
 0x367   :  { %9665 = vst [vmem:[#allocation130_spill] sm:$0xff] %v6493_v44  ;;  %v6515_v61 = vmin.f32 %v6282_v27, 16.0  ;;  %v1206_v48 = vmul.f32 %v1205_v51, %v6375_v6  ;;  %4004 = vrcp.f32 %v6508_v23  ;;  %v2485_v19 = vadd.f32 0.18741608, %v2484_v37  ;;  %v9675_v6 = vld [vmem:[#allocation114_spill] sm:$0xff]  ;;  %v9677_v37 = vld [vmem:[#allocation115_spill] sm:$0xff] }
 0x368   :  { %9666 = vst [vmem:[#allocation131_spill] sm:$0xff] %v6496_v33  ;;  %v6520_v45 = vmin.f32 %v6286_v54, 16.0  ;;  %v6523_v41 = vmin.f32 %v6291_v31, 16.0  ;;  %v6526_v52 = vmin.f32 %v6298_v60, 16.0  ;;  %4006 = vrcp.f32 %v6510_v14 }
 0x369   :  { %9667 = vst [vmem:[#allocation132_spill] sm:$0xff] %v6499_v21  ;;  %v6530_v0 = vmin.f32 %v6302_v20, 16.0  ;;  %v6533_v27 = vmin.f32 %v6307_v55, 16.0  ;;  %v6536_v42 = vmin.f32 %v9675_v6, 16.0  ;;  %v1846_v54 = vmul.f32 %v1845_v25, %v6407_v9  ;;  %v9681_v20 = vld [vmem:[#allocation117_spill] sm:$0xff]  ;;  %v9682_v6 = vld [vmem:[#allocation118_spill] sm:$0xff] }
 0x36a   :  { %9668 = vst [vmem:[#allocation133_spill] sm:$0xff] %v6506_v15  ;;  %v6540_v36 = vmin.f32 %v9677_v37, 16.0  ;;  %v2497_v31 = vmul.f32 %v2496_v34, %v6410_v47  ;;  %v3123_v60 = vadd.f32 0.05243302, %v3122_v29  ;;  %v3132_v51 = vadd.f32 0.014752088, %v3131_v58 }
 0x36b   :  { %9669 = vst [vmem:[#allocation134_spill] sm:$0xff] %v6515_v61  ;;  %v6544_v40 = vmin.f32 %v9679_v43, 16.0  ;;  %v6547_v5 = vmin.f32 %v9681_v20, 16.0  ;;  %v1207_v55 = vadd.f32 1.1283791, %v1206_v48  ;;  %v2486_v11 = vmul.f32 %v2485_v19, %v6410_v47 }
 0x36c   :  { %9670 = vst [vmem:[#allocation135_spill] sm:$0xff] %v6520_v45  ;;  %v6551_v7 = vmin.f32 %v9682_v6, 16.0  ;;  %v6554_v9 = vmin.f32 %v6359_v28, 16.0  ;;  %v6556_v25 = vadd.f32 1.0, %v2497_v31  ;;  %v3133_v34 = vmul.f32 %v3132_v51, %v6429_v17  ;;  %v9689_v51 = vld [vmem:[#allocation69_spill] sm:$0xff] }
 0x36d   :  { %9671 = vst [vmem:[#allocation136_spill] sm:$0xff] %v6523_v41  ;;  %v4005_v29 = vpop.eup %4004  ;;  %v6560_v58 = vmin.f32 %v6435_v30, 16.0  ;;  %v6563_v37 = vmin.f32 %v6442_v39, 16.0  ;;  %v6566_v48 = vmin.f32 %v6454_v63, 16.0  ;;  %v1847_v47 = vadd.f32 1.1283791, %v1846_v54 }
 0x36e   :  { %9672 = vst [vmem:[#allocation137_spill] sm:$0xff] %v6526_v52  ;;  %v4007_v19 = vpop.eup %4006  ;;  %v6569_v43 = vmin.f32 %v6464_v50, 16.0  ;;  %v1220_v28 = vmul.f32 %v4005_v29, %v6508_v23  ;;  %4008 = vrcp.f32 %v6556_v25  ;;  %v3124_v31 = vmul.f32 %v3123_v60, %v6429_v17 }
 0x36f   :  { %9673 = vst [vmem:[#allocation138_spill] sm:$0xff] %v6530_v0  ;;  %v1208_v30 = vmul.f32 %v1207_v55, %v9689_v51  ;;  %v1228_v20 = vand.u32 2147483647, %v6508_v23  ;;  %v1860_v39 = vmul.f32 %v4007_v19, %v6510_v14  ;;  %v6577_v6 = vadd.f32 1.1283791, %v2486_v11 }
 0x370   :  { %9674 = vst [vmem:[#allocation139_spill] sm:$0xff] %v6533_v27  ;;  %v1221_v63 = vsub.f32 1.0, %v1220_v28  ;;  %v1230_v54 = vand.u32 2147483648, %v6508_v23  ;;  %v1868_v50 = vand.u32 2147483647, %v6510_v14  ;;  %vm1224_vm8 = vweird.f32 %v6508_v23 }
 0x371   :  { %9676 = vst [vmem:[#allocation114_spill] sm:$0xff] %v6536_v42  ;;  %v3134_v1 = vadd.f32 0.112945676, %v3133_v34  ;;  %v1870_v60 = vand.u32 2147483648, %v6510_v14  ;;  %vm1225_vm9 = vweird.f32 %v4005_v29  ;;  %v3125_v51 = vadd.f32 0.18741608, %v3124_v31 }
 0x372   :  { %9678 = vst [vmem:[#allocation115_spill] sm:$0xff] %v6540_v36  ;;  %v1222_v55 = vmul.f32 %v4005_v29, %v1221_v63  ;;  %vm6585_vm10 = vcmp.eq.f32.partialorder %v1228_v20, 8.507059e+37  ;;  %vm1864_vm11 = vweird.f32 %v6510_v14  ;;  %vm1865_vm12 = vweird.f32 %v4007_v19  ;;  %vm1226_vm14 = vmor %vm1224_vm8, %vm1225_vm9 }
 0x373   :  { %9680 = vst [vmem:[#allocation116_spill] sm:$0xff] %v6544_v40  ;;  %vm6590_vm13 = vcmp.eq.f32.partialorder %v1868_v50, 8.507059e+37  ;;  %v1871_v31 = vor.u32 1.1754944e-38, %v1870_v60  ;;  %vm1866_vm15 = vmor %vm1864_vm11, %vm1865_vm12  ;;  %v2508_v60 = vand.u32 2147483647, %v6556_v25  ;;  %vm2504_vm2 = vweird.f32 %v6556_v25 }
 0x374   :  { %9683 = vst [vmem:[#allocation117_spill] sm:$0xff] %v6551_v7  ;;  %v4009_v34 = vpop.eup %4008  ;;  %v1231_v7 = vor.u32 1.1754944e-38, %v1230_v54  ;;  %v6603_v54 = vmul.f32 3.8918573e-05, %v6362_v10 }
 0x375   :  { %9684 = vst [vmem:[#allocation118_spill] sm:$0xff] %v6554_v9  ;;  %v1223_v9 = vadd.f32 %v4005_v29, %v1222_v55  ;;  %v2500_v20 = vmul.f32 %v4009_v34, %v6556_v25  ;;  %vm2505_vm1 = vweird.f32 %v4009_v34  ;;  %vm2509_vm3 = vcmp.eq.f32.partialorder %v2508_v60, 8.507059e+37 }
 0x376   :  { %9685 = vst [vmem:[#allocation140_spill] sm:$0xff] %v6560_v58  ;;  %v3135_v58 = vmul.f32 %v3134_v1, %v6429_v17  ;;  %vm2506_vm4 = vmor %vm2504_vm2, %vm2505_vm1  ;;  %v6646_v60 = vmul.f32 2.1237322e-06, %v6392_v24 }
 0x377   :  { %9686 = vst [vmem:[#allocation141_spill] sm:$0xff] %v6563_v37  ;;  %v1861_v37 = vsub.f32 1.0, %v1860_v39  ;;  %v1227_v14 = vsel %vm1226_vm14, %v4005_v29, %v1223_v9  ;;  %v3126_v39 = vmul.f32 %v3125_v51, %v6429_v17  ;;  %v2501_v50 = vsub.f32 1.0, %v2500_v20 }
 0x378   :  { %9687 = vst [vmem:[#allocation142_spill] sm:$0xff] %v6566_v48  ;;  %v1232_v23 = vsel %vm6585_vm10, %v1231_v7, %v1227_v14  ;;  %v2510_v9 = vand.u32 2147483648, %v6556_v25  ;;  %v6618_v7 = vmul.f32 3.8918573e-05, %v6366_v38  ;;  %v6628_v20 = vmul.f32 2.1237322e-06, %v6379_v4 }
 0x379   :  { %9688 = vst [vmem:[#allocation143_spill] sm:$0xff] %v6569_v43  ;;  %v9690_v43 = vld [vmem:[#allocation79_spill] sm:$0xff]  ;;  %v1862_v28 = vmul.f32 %v4007_v19, %v1861_v37  ;;  %v6598_v37 = vmul.f32 2.1237322e-06, %v6362_v10  ;;  %v1233_v55 = vmul.f32 %v1232_v23, %v1208_v30  ;;  %v6624_v30 = vmul.f32 3.8918573e-05, %v6371_v59 }
 0x37a   :  { %v1848_v48 = vmul.f32 %v1847_v47, %v9690_v43  ;;  %v3136_v43 = vadd.f32 0.4994258, %v3135_v58  ;;  %v6634_v23 = vmul.f32 2.1237322e-06, %v6383_v53 }
 0x37b   :  { %v1863_v1 = vadd.f32 %v4007_v19, %v1862_v28  ;;  %v3851_v47 = vclamps-f32 %v1233_v55, 1.0 }
 0x37c   :  { %v3137_v63 = vmul.f32 %v3136_v43, %v6429_v17  ;;  %v2502_v17 = vmul.f32 %v4009_v34, %v2501_v50  ;;  %v6614_v43 = vmul.f32 2.1237322e-06, %v6366_v38  ;;  %v6643_v50 = vmul.f32 3.8918573e-05, %v6386_v56 }
 0x37d   :  { %v1867_v58 = vsel %vm1866_vm15, %v4007_v19, %v1863_v1  ;;  %v6621_v19 = vmul.f32 2.1237322e-06, %v6371_v59 }
 0x37e   :  { %v1872_v28 = vsel %vm6590_vm13, %v1871_v31, %v1867_v58  ;;  %v6611_v29 = vadd.f32 1.0, %v3137_v63  ;;  %v2503_v11 = vadd.f32 %v4009_v34, %v2502_v17  ;;  %v2511_v31 = vor.u32 1.1754944e-38, %v2510_v9 }
 0x37f   :  { %v1873_v51 = vmul.f32 %v1872_v28, %v1848_v48  ;;  %v3127_v48 = vadd.f32 1.1283791, %v3126_v39  ;;  %v6631_v63 = vmul.f32 3.8918573e-05, %v6379_v4  ;;  %v6637_v58 = vmul.f32 3.8918573e-05, %v6383_v53 }
 0x380   :  { %4010 = vrcp.f32 %v6611_v29  ;;  %v2507_v14 = vsel %vm2506_vm4, %v4009_v34, %v2503_v11  ;;  %v6640_v39 = vmul.f32 2.1237322e-06, %v6386_v56  ;;  %v9695_v34 = vld [vmem:[#allocation94_spill] sm:$0xff]  ;;  %v3148_v28 = vand.u32 2147483647, %v6611_v29 }
 0x381   :  { %v3867_v1 = vclamps-f32 %v1873_v51, 1.0  ;;  %v2512_v25 = vsel %vm2509_vm3, %v2511_v31, %v2507_v14  ;;  %v2488_v55 = vmul.f32 %v6577_v6, %v9695_v34  ;;  %v6652_v9 = vmul.f32 3.8918573e-05, %v6392_v24  ;;  %v9697_v24 = vld [vmem:[#allocation106_spill] sm:$0xff] }
 0x382   :  { %v6655_v51 = vmul.f32 2.1237322e-06, %v6395_v46  ;;  %v3150_v11 = vand.u32 2147483648, %v6611_v29  ;;  %v3561_v31 = vadd.f32 1.0, %v3851_v47  ;;  %v6659_v53 = vmul.f32 3.8918573e-05, %v6395_v46 }
 0x383   :  { %v3577_v14 = vadd.f32 1.0, %v3867_v1  ;;  %v2513_v4 = vmul.f32 %v2512_v25, %v2488_v55  ;;  %v6663_v6 = vmul.f32 2.1237322e-06, %v6398_v13  ;;  %v6666_v34 = vmul.f32 3.8918573e-05, %v6398_v13 }
 0x384   :  { %v3128_v10 = vmul.f32 %v3127_v48, %v9697_v24  ;;  %v6670_v56 = vmul.f32 2.1237322e-06, %v6401_v8  ;;  %v6673_v47 = vmul.f32 3.8918573e-05, %v6401_v8  ;;  %v6676_v1 = vmul.f32 2.1237322e-06, %v6404_v49 }
 0x385   :  { %9696 = vst [vmem:[#allocation69_spill] sm:$0xff] %v6666_v34  ;;  %vm6678_vm5 = vcmp.eq.f32.partialorder %v3148_v28, 8.507059e+37  ;;  %v6683_v46 = vmul.f32 3.8918573e-05, %v6404_v49  ;;  %v6686_v13 = vmul.f32 2.1237322e-06, %v6413_v12  ;;  %vm3144_vm7 = vweird.f32 %v6611_v29 }
 0x386   :  { %v4011_v17 = vpop.eup %4010  ;;  %9698 = vst [vmem:[#allocation79_spill] sm:$0xff] %v6670_v56  ;;  %v3151_v24 = vor.u32 1.1754944e-38, %v3150_v11  ;;  %v9703_v48 = vld [vmem:[#allocation17_spill] sm:$0xff]  ;;  %v9704_v34 = vld [vmem:[#allocation54_spill] sm:$0xff]  ;;  %v6694_v28 = vmul.f32 2.1237322e-06, %v6416_v2 }
 0x387   :  { %v3140_v38 = vmul.f32 %v4011_v17, %v6611_v29  ;;  %9699 = vst [vmem:[#allocation94_spill] sm:$0xff] %v6673_v47  ;;  %v3625_v56 = vmul.f32 %v3561_v31, %v9703_v48  ;;  %v3641_v8 = vmul.f32 %v3577_v14, %v9704_v34  ;;  %v6691_v47 = vmul.f32 3.8918573e-05, %v6413_v12 }
 0x388   :  { %9700 = vst [vmem:[#allocation106_spill] sm:$0xff] %v6676_v1  ;;  %v3883_v1 = vclamps-f32 %v2513_v4, 1.0  ;;  %vm3145_vm6 = vweird.f32 %v4011_v17  ;;  %v6698_v49 = vmul.f32 3.8918573e-05, %v6416_v2  ;;  %v1758_v11 = vmul.f32 2.1237322e-06, %v6420_v57 }
 0x389   :  { %v3141_v25 = vsub.f32 1.0, %v3140_v38  ;;  %v1769_v31 = vmul.f32 3.8918573e-05, %v6420_v57  ;;  %v6703_v14 = vmul.f32 2.1237322e-06, %v6423_v16  ;;  %vm3146_vm8 = vmor %vm3144_vm7, %vm3145_vm6 }
 0x38a   :  { %9705 = vst [vmem:[#allocation17_spill] sm:$0xff] %v6698_v49  ;;  %v6706_v4 = vmul.f32 3.8918573e-05, %v6423_v16  ;;  %v6709_v34 = vmul.f32 2.1237322e-06, %v6426_v32  ;;  %v3593_v49 = vadd.f32 1.0, %v3883_v1 }
 0x38b   :  { %v3142_v38 = vmul.f32 %v4011_v17, %v3141_v25  ;;  %9706 = vst [vmem:[#allocation54_spill] sm:$0xff] %v6703_v14  ;;  %v3689_v25 = vadd.f32 %v3641_v8, %v3625_v56  ;;  %v6712_v29 = vmul.f32 3.8918573e-05, %v6426_v32  ;;  %v6715_v2 = vmul.f32 2.1237322e-06, %v6473_v22 }
 0x38c   :  { %v6718_v12 = vmul.f32 3.8918573e-05, %v6473_v22  ;;  %v6721_v14 = vmul.f32 2.1237322e-06, %v6476_v35  ;;  %v6724_v16 = vmul.f32 3.8918573e-05, %v6476_v35 }
 0x38d   :  { %v3143_v48 = vadd.f32 %v4011_v17, %v3142_v38  ;;  %v6729_v8 = vmul.f32 2.1237322e-06, %v6479_v26  ;;  %v6732_v32 = vmul.f32 3.8918573e-05, %v6479_v26  ;;  %v6735_v22 = vmul.f32 2.1237322e-06, %v6483_v3 }
 0x38e   :  { %v6738_v1 = vmul.f32 3.8918573e-05, %v6483_v3  ;;  %v6744_v35 = vmul.f32 3.8918573e-05, %v6487_v18  ;;  %v6747_v55 = vmul.f32 2.1237322e-06, %v6493_v44 }
 0x38f   :  { %v3147_v38 = vsel %vm3146_vm8, %v4011_v17, %v3143_v48  ;;  %v6741_v48 = vmul.f32 2.1237322e-06, %v6487_v18  ;;  %v6757_v3 = vmul.f32 3.8918573e-05, %v6496_v33  ;;  %v6763_v18 = vmul.f32 3.8918573e-05, %v6499_v21 }
 0x390   :  { %v3152_v56 = vsel %vm6678_vm5, %v3151_v24, %v3147_v38  ;;  %9708 = vst [vmem:[#allocation145_spill] sm:$0xff] %v6744_v35  ;;  %v6750_v24 = vmul.f32 3.8918573e-05, %v6493_v44  ;;  %v6753_v38 = vmul.f32 2.1237322e-06, %v6496_v33 }
 0x391   :  { %v3153_v17 = vmul.f32 %v3152_v56, %v3128_v10  ;;  %9707 = vst [vmem:[#allocation144_spill] sm:$0xff] %v6741_v48  ;;  %v9712_v10 = vld [vmem:[#allocation36_spill] sm:$0xff]  ;;  %v6760_v48 = vmul.f32 2.1237322e-06, %v6499_v21  ;;  %v3038_v44 = vmul.f32 2.1237322e-06, %v6547_v5 }
 0x392   :  { %9709 = vst [vmem:[#allocation146_spill] sm:$0xff] %v6747_v55  ;;  %v3657_v56 = vmul.f32 %v3593_v49, %v9712_v10  ;;  %v2398_v55 = vmul.f32 2.1237322e-06, %v6503_v62  ;;  %v6771_v49 = vmul.f32 2.1237322e-06, %v6515_v61 }
 0x393   :  { %9710 = vst [vmem:[#allocation147_spill] sm:$0xff] %v6750_v24  ;;  %v3899_v26 = vclamps-f32 %v3153_v17, 1.0  ;;  %v9718_v17 = vld [vmem:[#allocation113_spill] sm:$0xff]  ;;  %v6776_v33 = vmul.f32 2.1237322e-06, %v6520_v45 }
 0x394   :  { %9711 = vst [vmem:[#allocation148_spill] sm:$0xff] %v6753_v38  ;;  %v3705_v35 = vadd.f32 %v3689_v25, %v3657_v56  ;;  %v6768_v38 = vmul.f32 2.1237322e-06, %v6506_v15  ;;  %v3476_v10 = vmul.f32 %v9718_v17, %v9718_v17  ;;  %v6779_v21 = vmul.f32 2.1237322e-06, %v6523_v41 }
 0x395   :  { %9713 = vst [vmem:[#allocation36_spill] sm:$0xff] %v6757_v3  ;;  %v3609_v24 = vadd.f32 1.0, %v3899_v26  ;;  %v1130_v25 = vadd.f32 0.001143296, %v6624_v30  ;;  %v1759_v56 = vadd.f32 0.00028619796, %v1758_v11 }
 0x396   :  { %9714 = vst [vmem:[#allocation149_spill] sm:$0xff] %v6760_v48  ;;  %v9720_v48 = vld [vmem:[#allocation16_spill] sm:$0xff]  ;;  %v1770_v15 = vadd.f32 0.001143296, %v1769_v31  ;;  %v3039_v17 = vadd.f32 0.00028619796, %v3038_v44 }
 0x397   :  { %9715 = vst [vmem:[#allocation150_spill] sm:$0xff] %v6763_v18  ;;  %v1119_v18 = vadd.f32 0.00028619796, %v6621_v19  ;;  %v3673_v26 = vmul.f32 %v3609_v24, %v9720_v48  ;;  %v1131_v45 = vmul.f32 %v1130_v25, %v6371_v59  ;;  %v1760_v41 = vmul.f32 %v1759_v56, %v6420_v57 }
 0x398   :  { %9716 = vst [vmem:[#allocation151_spill] sm:$0xff] %v6768_v38  ;;  %v2409_v38 = vmul.f32 3.8918573e-05, %v6503_v62  ;;  %v3040_v30 = vmul.f32 %v3039_v17, %v6547_v5  ;;  %v6791_v11 = vmin.f32 %v3476_v10, 16.0 }
 0x399   :  { %9717 = vst [vmem:[#allocation152_spill] sm:$0xff] %v6771_v49  ;;  %v1120_v61 = vmul.f32 %v1119_v18, %v6371_v59  ;;  %v2399_v49 = vadd.f32 0.00028619796, %v2398_v55  ;;  %v3721_v3 = vadd.f32 %v3705_v35, %v3673_v26  ;;  %v1132_v31 = vadd.f32 0.014752088, %v1131_v45 }
 0x39a   :  { %9719 = vst [vmem:[#allocation153_spill] sm:$0xff] %v6779_v21  ;;  %v1771_v21 = vmul.f32 %v1770_v15, %v6420_v57  ;;  %v2410_v24 = vadd.f32 0.001143296, %v2409_v38  ;;  %v1761_v55 = vadd.f32 0.0036580483, %v1760_v41 }
 0x39b   :  { %v1121_v19 = vadd.f32 0.0036580483, %v1120_v61  ;;  %v2400_v48 = vmul.f32 %v2399_v49, %v6503_v62  ;;  %9721 = vst [vmem:[#allocation16_spill] sm:$0xff] %v6791_v11  ;;  %v3737_v18 = vmul.f32 0.25, %v3721_v3  ;;  %v1133_v15 = vmul.f32 %v1132_v31, %v6371_v59 }
 0x39c   :  { %v1772_v35 = vadd.f32 0.014752088, %v1771_v21  ;;  %v2411_v25 = vmul.f32 %v2410_v24, %v6503_v62  ;;  %v1762_v61 = vmul.f32 %v1761_v55, %v6420_v57  ;;  %v3041_v38 = vadd.f32 0.0036580483, %v3040_v30 }
 0x39d   :  { %v1122_v44 = vmul.f32 %v1121_v19, %v6371_v59  ;;  %v2401_v26 = vadd.f32 0.0036580483, %v2400_v48  ;;  %3765 = vrot.lane.b32.xlu1 %v3737_v18, %s4157_s3  ;;  %v3049_v49 = vmul.f32 3.8918573e-05, %v6547_v5  ;;  %v1134_v10 = vadd.f32 0.112945676, %v1133_v15 }
 0x39e   :  { %v1773_v3 = vmul.f32 %v1772_v35, %v6420_v57  ;;  %v2412_v41 = vadd.f32 0.014752088, %v2411_v25  ;;  %v1763_v21 = vadd.f32 0.05243302, %v1762_v61  ;;  %v3042_v56 = vmul.f32 %v3041_v38, %v6547_v5 }
 0x39f   :  { %v1123_v17 = vadd.f32 0.05243302, %v1122_v44  ;;  %v2402_v45 = vmul.f32 %v2401_v26, %v6503_v62  ;;  %v3050_v19 = vadd.f32 0.001143296, %v3049_v49  ;;  %v6805_v30 = vmul.f32 2.1237322e-06, %v6526_v52 }
 0x3a0   :  { %v1774_v24 = vadd.f32 0.112945676, %v1773_v3  ;;  %v2413_v31 = vmul.f32 %v2412_v41, %v6503_v62  ;;  %v1135_v55 = vmul.f32 %v1134_v10, %v6371_v59  ;;  %v1764_v44 = vmul.f32 %v1763_v21, %v6420_v57 }
 0x3a1   :  { %v1124_v48 = vmul.f32 %v1123_v17, %v6371_v59  ;;  %v2403_v18 = vadd.f32 0.05243302, %v2402_v45  ;;  %v3051_v35 = vmul.f32 %v3050_v19, %v6547_v5  ;;  %v3043_v61 = vadd.f32 0.05243302, %v3042_v56 }
 0x3a2   :  { %v1775_v26 = vmul.f32 %v1774_v24, %v6420_v57  ;;  %v2414_v15 = vadd.f32 0.112945676, %v2413_v31  ;;  %v1136_v49 = vadd.f32 0.4994258, %v1135_v55  ;;  %v6813_v3 = vmul.f32 2.1237322e-06, %v6530_v0 }
 0x3a3   :  { %v2404_v25 = vmul.f32 %v2403_v18, %v6503_v62  ;;  %v1125_v38 = vadd.f32 0.18741608, %v1124_v48  ;;  %v3052_v17 = vadd.f32 0.014752088, %v3051_v35  ;;  %v1765_v45 = vadd.f32 0.18741608, %v1764_v44 }
 0x3a4   :  { %9722 = vst [vmem:[#allocation154_spill] sm:$0xff] %v6813_v3  ;;  %v1776_v41 = vadd.f32 0.4994258, %v1775_v26  ;;  %v2415_v10 = vmul.f32 %v2414_v15, %v6503_v62  ;;  %v6817_v21 = vmul.f32 2.1237322e-06, %v6533_v27  ;;  %v1137_v24 = vmul.f32 %v1136_v49, %v6371_v59 }
 0x3a5   :  { %v6820_v19 = vmul.f32 2.1237322e-06, %v6536_v42  ;;  %v3053_v56 = vmul.f32 %v3052_v17, %v6547_v5  ;;  %v6825_v48 = vmul.f32 3.8918573e-05, %v6536_v42  ;;  %v2405_v31 = vadd.f32 0.18741608, %v2404_v25 }
 0x3a6   :  { %9723 = vst [vmem:[#allocation155_spill] sm:$0xff] %v6817_v21  ;;  %v1777_v18 = vmul.f32 %v1776_v41, %v6420_v57  ;;  %v2416_v55 = vadd.f32 0.4994258, %v2415_v10  ;;  %v6829_v44 = vmul.f32 2.1237322e-06, %v6540_v36  ;;  %v1126_v35 = vmul.f32 %v1125_v38, %v6371_v59  ;;  %v9730_v59 = vld [vmem:[#allocation117_spill] sm:$0xff] }
 0x3a7   :  { %9724 = vst [vmem:[#allocation156_spill] sm:$0xff] %v6820_v19  ;;  %v6832_v26 = vadd.f32 1.0, %v1137_v24  ;;  %v3044_v15 = vmul.f32 %v3043_v61, %v6547_v5  ;;  %v1766_v49 = vmul.f32 %v1765_v45, %v6420_v57  ;;  %v3054_v42 = vadd.f32 0.112945676, %v3053_v56  ;;  %v9732_v57 = vld [vmem:[#allocation118_spill] sm:$0xff]  ;;  %v9734_v24 = vld [vmem:[#allocation140_spill] sm:$0xff] }
 0x3a8   :  { %9725 = vst [vmem:[#allocation157_spill] sm:$0xff] %v6825_v48  ;;  %v6836_v27 = vadd.f32 1.0, %v1777_v18  ;;  %v2417_v17 = vmul.f32 %v2416_v55, %v6503_v62  ;;  %v6840_v41 = vmul.f32 3.8918573e-05, %v6540_v36  ;;  %v6843_v25 = vmul.f32 2.1237322e-06, %v6544_v40 }
 0x3a9   :  { %9726 = vst [vmem:[#allocation158_spill] sm:$0xff] %v6829_v44  ;;  %v6846_v10 = vmul.f32 3.8918573e-05, %v6544_v40  ;;  %4012 = vrcp.f32 %v6832_v26  ;;  %v6850_v61 = vmul.f32 2.1237322e-06, %v9730_v59  ;;  %v2406_v45 = vmul.f32 %v2405_v31, %v6503_v62  ;;  %v9735_v18 = vld [vmem:[#allocation141_spill] sm:$0xff] }
 0x3aa   :  { %9727 = vst [vmem:[#allocation159_spill] sm:$0xff] %v6840_v41  ;;  %v6853_v38 = vmul.f32 2.1237322e-06, %v9732_v57  ;;  %4014 = vrcp.f32 %v6836_v27  ;;  %v6858_v56 = vmul.f32 2.1237322e-06, %v9734_v24  ;;  %v6863_v52 = vadd.f32 1.0, %v2417_v17 }
 0x3ab   :  { %9728 = vst [vmem:[#allocation160_spill] sm:$0xff] %v6843_v25  ;;  %v6861_v55 = vmul.f32 2.1237322e-06, %v9735_v18  ;;  %v3045_v40 = vadd.f32 0.18741608, %v3044_v15  ;;  %v3055_v59 = vmul.f32 %v3054_v42, %v6547_v5  ;;  %v1150_v31 = vand.u32 2147483648, %v6832_v26 }
 0x3ac   :  { %9729 = vst [vmem:[#allocation161_spill] sm:$0xff] %v6846_v10  ;;  %v1127_v36 = vadd.f32 1.1283791, %v1126_v35  ;;  %v1767_v0 = vadd.f32 1.1283791, %v1766_v49  ;;  %4016 = vrcp.f32 %v6863_v52  ;;  %v1790_v42 = vand.u32 2147483648, %v6836_v27 }
 0x3ad   :  { %9731 = vst [vmem:[#allocation162_spill] sm:$0xff] %v6850_v61  ;;  %v9737_v61 = vld [vmem:[#allocation142_spill] sm:$0xff]  ;;  %v1148_v62 = vand.u32 2147483647, %v6832_v26  ;;  %v1788_v18 = vand.u32 2147483647, %v6836_v27  ;;  %v3046_v49 = vmul.f32 %v3045_v40, %v6547_v5  ;;  %vm1144_vm9 = vweird.f32 %v6832_v26 }
 0x3ae   :  { %9733 = vst [vmem:[#allocation163_spill] sm:$0xff] %v6853_v38  ;;  %v6867_v57 = vmul.f32 2.1237322e-06, %v9737_v61  ;;  %v9739_v38 = vld [vmem:[#allocation143_spill] sm:$0xff]  ;;  %v6877_v15 = vmul.f32 2.1237322e-06, %v6791_v11  ;;  %vm1784_vm11 = vweird.f32 %v6836_v27  ;;  %vm2424_vm15 = vweird.f32 %v6863_v52 }
 0x3af   :  { %9736 = vst [vmem:[#allocation140_spill] sm:$0xff] %v6861_v55  ;;  %v6870_v10 = vmul.f32 2.1237322e-06, %v9739_v38  ;;  %v2407_v55 = vadd.f32 1.1283791, %v2406_v45  ;;  %v4013_v35 = vpop.eup %4012  ;;  %v9742_v61 = vld [vmem:[#allocation68_spill] sm:$0xff] }
 0x3b0   :  { %9738 = vst [vmem:[#allocation164_spill] sm:$0xff] %v6867_v57  ;;  %v3056_v17 = vadd.f32 0.4994258, %v3055_v59  ;;  %v4015_v38 = vpop.eup %4014  ;;  %v1140_v57 = vmul.f32 %v4013_v35, %v6832_v26  ;;  %v9743_v25 = vld [vmem:[#allocation78_spill] sm:$0xff]  ;;  %vm6885_vm10 = vcmp.eq.f32.partialorder %v1148_v62, 8.507059e+37  ;;  %vm6892_vm12 = vcmp.eq.f32.partialorder %v1788_v18, 8.507059e+37 }
 0x3b1   :  { %9740 = vst [vmem:[#allocation165_spill] sm:$0xff] %v6870_v10  ;;  %v1128_v10 = vmul.f32 %v1127_v36, %v9742_v61  ;;  %v1768_v45 = vmul.f32 %v1767_v0, %v9743_v25  ;;  %v1780_v11 = vmul.f32 %v4015_v38, %v6836_v27  ;;  %v9748_v61 = vld [vmem:[#allocation93_spill] sm:$0xff]  ;;  %v1791_v0 = vor.u32 1.1754944e-38, %v1790_v42 }
 0x3b2   :  { %9741 = vst [vmem:[#allocation166_spill] sm:$0xff] %v6877_v15  ;;  %v3057_v40 = vmul.f32 %v3056_v17, %v6547_v5  ;;  %v1141_v59 = vsub.f32 1.0, %v1140_v57  ;;  %v1151_v15 = vor.u32 1.1754944e-38, %v1150_v31  ;;  %v2408_v44 = vmul.f32 %v2407_v55, %v9748_v61  ;;  %v4017_v19 = vpop.eup %4016 }
 0x3b3   :  { %v1781_v48 = vsub.f32 1.0, %v1780_v11  ;;  %v6897_v25 = vadd.f32 1.1283791, %v3046_v49  ;;  %vm1145_vm13 = vweird.f32 %v4013_v35  ;;  %v2428_v3 = vand.u32 2147483647, %v6863_v52 }
 0x3b4   :  { %v6899_v62 = vadd.f32 1.0, %v3057_v40  ;;  %v1142_v21 = vmul.f32 %v4013_v35, %v1141_v59  ;;  %v2430_v5 = vand.u32 2147483648, %v6863_v52  ;;  %vm1785_vm14 = vweird.f32 %v4015_v38  ;;  %vm1146_vm1 = vmor %vm1144_vm9, %vm1145_vm13 }
 0x3b5   :  { %v1782_v57 = vmul.f32 %v4015_v38, %v1781_v48  ;;  %v2420_v18 = vmul.f32 %v4017_v19, %v6863_v52  ;;  %v6907_v11 = vadd.f32 0.00028619796, %v6598_v37  ;;  %v6910_v31 = vadd.f32 0.001143296, %v6603_v54  ;;  %vm1786_vm2 = vmor %vm1784_vm11, %vm1785_vm14 }
 0x3b6   :  { %4018 = vrcp.f32 %v6899_v62  ;;  %v1143_v55 = vadd.f32 %v4013_v35, %v1142_v21  ;;  %v6915_v48 = vadd.f32 0.00028619796, %v6614_v43  ;;  %v6918_v17 = vadd.f32 0.001143296, %v6618_v7 }
 0x3b7   :  { %v1783_v42 = vadd.f32 %v4015_v38, %v1782_v57  ;;  %v2421_v49 = vsub.f32 1.0, %v2420_v18  ;;  %vm6922_vm3 = vcmp.eq.f32.partialorder %v2428_v3, 8.507059e+37  ;;  %v2431_v54 = vor.u32 1.1754944e-38, %v2430_v5 }
 0x3b8   :  { %v1147_v21 = vsel %vm1146_vm1, %v4013_v35, %v1143_v55  ;;  %v6927_v26 = vadd.f32 0.00028619796, %v6628_v20  ;;  %vm2425_vm4 = vweird.f32 %v4017_v19  ;;  %v6934_v27 = vadd.f32 0.001143296, %v6631_v63 }
 0x3b9   :  { %v1152_v40 = vsel %vm6885_vm10, %v1151_v15, %v1147_v21  ;;  %v1787_v43 = vsel %vm1786_vm2, %v4015_v38, %v1783_v42  ;;  %v2422_v59 = vmul.f32 %v4017_v19, %v2421_v49  ;;  %v6937_v3 = vadd.f32 0.00028619796, %v6634_v23  ;;  %vm2426_vm5 = vmor %vm2424_vm15, %vm2425_vm4 }
 0x3ba   :  { %v1153_v7 = vmul.f32 %v1152_v40, %v1128_v10  ;;  %v1792_v35 = vsel %vm6892_vm12, %v1791_v0, %v1787_v43  ;;  %v6940_v57 = vadd.f32 0.001143296, %v6637_v58  ;;  %v1399_v41 = vadd.f32 0.00028619796, %v6640_v39 }
 0x3bb   :  { %v1793_v5 = vmul.f32 %v1792_v35, %v1768_v45  ;;  %v2423_v20 = vadd.f32 %v4017_v19, %v2422_v59  ;;  %v3068_v63 = vand.u32 2147483647, %v6899_v62  ;;  %v1410_v15 = vadd.f32 0.001143296, %v6643_v50  ;;  %v9755_v59 = vld [vmem:[#allocation53_spill] sm:$0xff]  ;;  %v9756_v35 = vld [vmem:[#allocation79_spill] sm:$0xff] }
 0x3bc   :  { %v4019_v61 = vpop.eup %4018  ;;  %v3849_v38 = vclamps-f32 %v1153_v7, 1.0  ;;  %v3070_v45 = vand.u32 2147483648, %v6899_v62  ;;  %v6950_v0 = vadd.f32 0.00028619796, %v6646_v60  ;;  %v6955_v52 = vadd.f32 0.001143296, %v6652_v9 }
 0x3bd   :  { %v3060_v10 = vmul.f32 %v4019_v61, %v6899_v62  ;;  %v3865_v23 = vclamps-f32 %v1793_v5, 1.0  ;;  %v2427_v36 = vsel %vm2426_vm5, %v4017_v19, %v2423_v20  ;;  %vm3064_vm6 = vweird.f32 %v6899_v62  ;;  %v9757_v20 = vld [vmem:[#allocation105_spill] sm:$0xff] }
 0x3be   :  { %v2432_v58 = vsel %vm6922_vm3, %v2431_v54, %v2427_v36  ;;  %v3559_v18 = vadd.f32 1.0, %v3849_v38  ;;  %v6959_v50 = vadd.f32 0.00028619796, %v6655_v51  ;;  %vm3065_vm7 = vweird.f32 %v4019_v61  ;;  %v9754_v51 = vld [vmem:[#allocation15_spill] sm:$0xff]  ;;  %v9758_v38 = vld [vmem:[#allocation94_spill] sm:$0xff] }
 0x3bf   :  { %v3061_v39 = vsub.f32 1.0, %v3060_v10  ;;  %v2433_v55 = vmul.f32 %v2432_v58, %v2408_v44  ;;  %v3575_v42 = vadd.f32 1.0, %v3865_v23  ;;  %vm6961_vm8 = vcmp.eq.f32.partialorder %v3068_v63, 8.507059e+37  ;;  %v9753_v44 = vld [vmem:[#allocation69_spill] sm:$0xff]  ;;  %vm3066_vm9 = vmor %vm3064_vm6, %vm3065_vm7  ;;  %v9759_v10 = vld [vmem:[#allocation106_spill] sm:$0xff] }
 0x3c0   :  { %v6966_v49 = vadd.f32 0.001143296, %v6659_v53  ;;  %v3071_v37 = vor.u32 1.1754944e-38, %v3070_v45  ;;  %v6969_v9 = vadd.f32 0.00028619796, %v6663_v6  ;;  %v3623_v43 = vmul.f32 %v3559_v18, %v9754_v51  ;;  %v9760_v18 = vld [vmem:[#allocation17_spill] sm:$0xff] }
 0x3c1   :  { %v3062_v19 = vmul.f32 %v4019_v61, %v3061_v39  ;;  %v3881_v21 = vclamps-f32 %v2433_v55, 1.0  ;;  %v6972_v54 = vadd.f32 0.001143296, %v9753_v44  ;;  %v3639_v7 = vmul.f32 %v3575_v42, %v9755_v59  ;;  %v9761_v42 = vld [vmem:[#allocation54_spill] sm:$0xff]  ;;  %v9762_v44 = vld [vmem:[#allocation35_spill] sm:$0xff] }
 0x3c2   :  { %v6977_v5 = vadd.f32 0.00028619796, %v9756_v35  ;;  %v3048_v53 = vmul.f32 %v6897_v25, %v9757_v20  ;;  %v6984_v6 = vadd.f32 0.001143296, %v9758_v38  ;;  %v6987_v63 = vadd.f32 0.00028619796, %v9759_v10 }
 0x3c3   :  { %v3063_v40 = vadd.f32 %v4019_v61, %v3062_v19  ;;  %v6990_v23 = vadd.f32 0.001143296, %v6683_v46  ;;  %v3591_v45 = vadd.f32 1.0, %v3881_v21  ;;  %v6993_v58 = vadd.f32 0.00028619796, %v6686_v13  ;;  %v9764_v20 = vld [vmem:[#allocation8_spill] sm:$0xff] }
 0x3c4   :  { %v6996_v39 = vadd.f32 0.001143296, %v6691_v47  ;;  %v7001_v62 = vadd.f32 0.00028619796, %v6694_v28  ;;  %v7004_v55 = vadd.f32 0.001143296, %v9760_v18  ;;  %v3687_v19 = vadd.f32 %v3639_v7, %v3623_v43 }
 0x3c5   :  { %v3067_v36 = vsel %vm3066_vm9, %v4019_v61, %v3063_v40  ;;  %v7007_v46 = vadd.f32 0.00028619796, %v9761_v42  ;;  %v7010_v13 = vadd.f32 0.001143296, %v6706_v4  ;;  %v7013_v47 = vadd.f32 0.00028619796, %v6709_v34 }
 0x3c6   :  { %v3072_v25 = vsel %vm6961_vm8, %v3071_v37, %v3067_v36  ;;  %v7016_v60 = vadd.f32 0.001143296, %v6712_v29  ;;  %v2039_v28 = vadd.f32 0.00028619796, %v6715_v2  ;;  %v2050_v21 = vadd.f32 0.001143296, %v6718_v12 }
 0x3c7   :  { %v3073_v61 = vmul.f32 %v3072_v25, %v3048_v53  ;;  %v3655_v40 = vmul.f32 %v3591_v45, %v9762_v44  ;;  %v7022_v51 = vadd.f32 0.00028619796, %v6721_v14  ;;  %v7025_v43 = vadd.f32 0.001143296, %v6724_v16  ;;  %v9763_v7 = vld [vmem:[#allocation121_spill] sm:$0xff]  ;;  %v9766_v10 = vld [vmem:[#allocation144_spill] sm:$0xff] }
 0x3c8   :  { %v7028_v4 = vadd.f32 0.00028619796, %v6729_v8  ;;  %v7031_v34 = vadd.f32 0.001143296, %v6732_v32  ;;  %v2679_v29 = vadd.f32 0.00028619796, %v6776_v33  ;;  %v1400_v35 = vmul.f32 %v1399_v41, %v9763_v7 }
 0x3c9   :  { %v3897_v37 = vclamps-f32 %v3073_v61, 1.0  ;;  %v3703_v59 = vadd.f32 %v3687_v19, %v3655_v40  ;;  %v7035_v12 = vadd.f32 0.00028619796, %v6735_v22  ;;  %v7039_v14 = vadd.f32 0.001143296, %v6738_v1  ;;  %v9765_v32 = vld [vmem:[#allocation14_spill] sm:$0xff] }
 0x3ca   :  { %v1411_v16 = vmul.f32 %v1410_v15, %v9763_v7  ;;  %v2040_v8 = vmul.f32 %v2039_v28, %v9764_v20  ;;  %v2051_v53 = vmul.f32 %v2050_v21, %v9764_v20  ;;  %v7046_v33 = vadd.f32 0.00028619796, %v9766_v10  ;;  %v9767_v36 = vld [vmem:[#allocation145_spill] sm:$0xff]  ;;  %v9768_v22 = vld [vmem:[#allocation146_spill] sm:$0xff]  ;;  %v9770_v41 = vld [vmem:[#allocation147_spill] sm:$0xff] }
 0x3cb   :  { %v3607_v2 = vadd.f32 1.0, %v3897_v37  ;;  %v7049_v45 = vadd.f32 0.001143296, %v9767_v36  ;;  %v7052_v25 = vadd.f32 0.00028619796, %v9768_v22  ;;  %v9772_v18 = vld [vmem:[#allocation148_spill] sm:$0xff] }
 0x3cc   :  { %v7055_v1 = vadd.f32 0.001143296, %v9770_v41  ;;  %v7058_v15 = vadd.f32 0.00028619796, %v9772_v18  ;;  %v3319_v42 = vadd.f32 0.00028619796, %v6858_v56 }
 0x3cd   :  { %v3671_v38 = vmul.f32 %v3607_v2, %v9765_v32  ;;  %9769 = vst [vmem:[#allocation68_spill] sm:$0xff] %v7052_v25  ;;  %v9774_v61 = vld [vmem:[#allocation135_spill] sm:$0xff]  ;;  %v9775_v21 = vld [vmem:[#allocation36_spill] sm:$0xff]  ;;  %v9777_v44 = vld [vmem:[#allocation149_spill] sm:$0xff]  ;;  %v1401_v2 = vadd.f32 0.0036580483, %v1400_v35 }
 0x3ce   :  { %9771 = vst [vmem:[#allocation78_spill] sm:$0xff] %v7055_v1  ;;  %v2680_v19 = vmul.f32 %v2679_v29, %v9774_v61  ;;  %v7063_v37 = vadd.f32 0.001143296, %v9775_v21  ;;  %v7066_v40 = vadd.f32 0.00028619796, %v9777_v44  ;;  %v3320_v22 = vmul.f32 %v3319_v42, %v9734_v24  ;;  %v9821_v25 = vld [vmem:[#allocation90_spill] sm:$0xff] }
 0x3cf   :  { %9773 = vst [vmem:[#allocation93_spill] sm:$0xff] %v7058_v15  ;;  %v3719_v28 = vadd.f32 %v3703_v59, %v3671_v38  ;;  %v1412_v32 = vadd.f32 0.014752088, %v1411_v16  ;;  %v2041_v10 = vadd.f32 0.0036580483, %v2040_v8  ;;  %v1402_v18 = vmul.f32 %v1401_v2, %v9763_v7 }
 0x3d0   :  { %9776 = vst [vmem:[#allocation69_spill] sm:$0xff] %v7063_v37  ;;  %v2052_v36 = vadd.f32 0.014752088, %v2051_v53  ;;  %v2681_v15 = vadd.f32 0.0036580483, %v2680_v19 }
 0x3d1   :  { %9778 = vst [vmem:[#allocation15_spill] sm:$0xff] %v7066_v40  ;;  %v3735_v41 = vmul.f32 0.25, %v3719_v28  ;;  %v2689_v56 = vmul.f32 3.8918573e-05, %v9774_v61  ;;  %v1413_v29 = vmul.f32 %v1412_v32, %v9763_v7  ;;  %v2042_v59 = vmul.f32 %v2041_v10, %v9764_v20 }
 0x3d2   :  { %v2053_v38 = vmul.f32 %v2052_v36, %v9764_v20  ;;  %v3321_v21 = vadd.f32 0.0036580483, %v3320_v22  ;;  %v1403_v35 = vadd.f32 0.05243302, %v1402_v18  ;;  %v2682_v16 = vmul.f32 %v2681_v15, %v9774_v61  ;;  %v9779_v22 = vld [vmem:[#allocation150_spill] sm:$0xff] }
 0x3d3   :  { %3754 = vrot.lane.b32.xlu0 %v3735_v41, %s4158_s7  ;;  %v2690_v8 = vadd.f32 0.001143296, %v2689_v56  ;;  %v3329_v53 = vmul.f32 3.8918573e-05, %v9734_v24  ;;  %v1414_v42 = vadd.f32 0.112945676, %v1413_v29 }
 0x3d4   :  { %v2043_v28 = vadd.f32 0.05243302, %v2042_v59  ;;  %v2054_v19 = vadd.f32 0.112945676, %v2053_v38  ;;  %v3322_v44 = vmul.f32 %v3321_v21, %v9734_v24  ;;  %v1404_v2 = vmul.f32 %v1403_v35, %v9763_v7  ;;  %v9781_v56 = vld [vmem:[#allocation151_spill] sm:$0xff] }
 0x3d5   :  { %v2683_v32 = vadd.f32 0.05243302, %v2682_v16  ;;  %v2691_v10 = vmul.f32 %v2690_v8, %v9774_v61  ;;  %v3330_v36 = vadd.f32 0.001143296, %v3329_v53  ;;  %v7081_v40 = vadd.f32 0.001143296, %v9779_v22 }
 0x3d6   :  { %v1415_v41 = vmul.f32 %v1414_v42, %v9763_v7  ;;  %v2044_v15 = vmul.f32 %v2043_v28, %v9764_v20  ;;  %v2055_v18 = vmul.f32 %v2054_v19, %v9764_v20  ;;  %v7087_v29 = vadd.f32 0.00028619796, %v9781_v56  ;;  %v9783_v22 = vld [vmem:[#allocation152_spill] sm:$0xff]  ;;  %v9784_v42 = vld [vmem:[#allocation153_spill] sm:$0xff] }
 0x3d7   :  { %9780 = vst [vmem:[#allocation53_spill] sm:$0xff] %v7081_v40  ;;  %v2692_v59 = vadd.f32 0.014752088, %v2691_v10  ;;  %v3323_v38 = vadd.f32 0.05243302, %v3322_v44  ;;  %v3331_v21 = vmul.f32 %v3330_v36, %v9734_v24  ;;  %v2684_v53 = vmul.f32 %v2683_v32, %v9774_v61  ;;  %v9787_v36 = vld [vmem:[#allocation154_spill] sm:$0xff] }
 0x3d8   :  { %9782 = vst [vmem:[#allocation79_spill] sm:$0xff] %v7087_v29  ;;  %v1405_v35 = vadd.f32 0.18741608, %v1404_v2  ;;  %v1416_v16 = vadd.f32 0.4994258, %v1415_v41 }
 0x3d9   :  { %v2056_v8 = vadd.f32 0.4994258, %v2055_v18  ;;  %v7092_v40 = vadd.f32 0.00028619796, %v9783_v22  ;;  %v7095_v37 = vadd.f32 0.00028619796, %v9784_v42  ;;  %v2693_v28 = vmul.f32 %v2692_v59, %v9774_v61 }
 0x3da   :  { %v3332_v19 = vadd.f32 0.014752088, %v3331_v21  ;;  %v7099_v56 = vadd.f32 0.00028619796, %v6805_v30  ;;  %v1417_v44 = vmul.f32 %v1416_v16, %v9763_v7  ;;  %v2045_v10 = vadd.f32 0.18741608, %v2044_v15 }
 0x3db   :  { %9785 = vst [vmem:[#allocation105_spill] sm:$0xff] %v7095_v37  ;;  %v2057_v2 = vmul.f32 %v2056_v8, %v9764_v20  ;;  %v7104_v41 = vadd.f32 0.00028619796, %v9787_v36  ;;  %v2694_v32 = vadd.f32 0.112945676, %v2693_v28  ;;  %v3324_v18 = vmul.f32 %v3323_v38, %v9734_v24  ;;  %v9791_v15 = vld [vmem:[#allocation156_spill] sm:$0xff] }
 0x3dc   :  { %9786 = vst [vmem:[#allocation94_spill] sm:$0xff] %v7099_v56  ;;  %v3333_v22 = vmul.f32 %v3332_v19, %v9734_v24  ;;  %v1406_v42 = vmul.f32 %v1405_v35, %v9763_v7  ;;  %v7109_v59 = vadd.f32 1.0, %v1417_v44  ;;  %v2685_v30 = vadd.f32 0.18741608, %v2684_v53  ;;  %v9789_v56 = vld [vmem:[#allocation155_spill] sm:$0xff]  ;;  %v9795_v19 = vld [vmem:[#allocation158_spill] sm:$0xff] }
 0x3dd   :  { %9788 = vst [vmem:[#allocation106_spill] sm:$0xff] %v7104_v41  ;;  %v7111_v21 = vadd.f32 1.0, %v2057_v2  ;;  %v7114_v16 = vadd.f32 0.00028619796, %v9789_v56  ;;  %v7117_v8 = vadd.f32 0.00028619796, %v9791_v15  ;;  %v2695_v36 = vmul.f32 %v2694_v32, %v9774_v61 }
 0x3de   :  { %v3334_v28 = vadd.f32 0.112945676, %v3333_v22  ;;  %v9793_v41 = vld [vmem:[#allocation157_spill] sm:$0xff]  ;;  %v7124_v37 = vadd.f32 0.00028619796, %v9795_v19  ;;  %4020 = vrcp.f32 %v7109_v59  ;;  %v2046_v7 = vmul.f32 %v2045_v10, %v9764_v20  ;;  %v9797_v35 = vld [vmem:[#allocation159_spill] sm:$0xff] }
 0x3df   :  { %9790 = vst [vmem:[#allocation17_spill] sm:$0xff] %v7114_v16  ;;  %v7121_v38 = vadd.f32 0.001143296, %v9793_v41  ;;  %v7129_v53 = vadd.f32 0.001143296, %v9797_v35  ;;  %v9799_v56 = vld [vmem:[#allocation160_spill] sm:$0xff]  ;;  %4022 = vrcp.f32 %v7111_v21  ;;  %v2686_v19 = vmul.f32 %v2685_v30, %v9774_v61 }
 0x3e0   :  { %9792 = vst [vmem:[#allocation54_spill] sm:$0xff] %v7117_v8  ;;  %v7132_v44 = vadd.f32 0.00028619796, %v9799_v56  ;;  %v9801_v2 = vld [vmem:[#allocation161_spill] sm:$0xff]  ;;  %v9803_v41 = vld [vmem:[#allocation162_spill] sm:$0xff]  ;;  %v9806_v10 = vld [vmem:[#allocation140_spill] sm:$0xff]  ;;  %vm1424_vm10 = vweird.f32 %v7109_v59  ;;  %vm2064_vm12 = vweird.f32 %v7111_v21 }
 0x3e1   :  { %9794 = vst [vmem:[#allocation35_spill] sm:$0xff] %v7121_v38  ;;  %v7135_v15 = vadd.f32 0.001143296, %v9801_v2  ;;  %v7139_v32 = vadd.f32 0.00028619796, %v9803_v41  ;;  %v9805_v38 = vld [vmem:[#allocation163_spill] sm:$0xff] }
 0x3e2   :  { %9796 = vst [vmem:[#allocation121_spill] sm:$0xff] %v7124_v37  ;;  %v1407_v22 = vadd.f32 1.1283791, %v1406_v42  ;;  %v3325_v37 = vadd.f32 0.18741608, %v3324_v18  ;;  %v9808_v2 = vld [vmem:[#allocation164_spill] sm:$0xff] }
 0x3e3   :  { %9798 = vst [vmem:[#allocation8_spill] sm:$0xff] %v7129_v53  ;;  %v7143_v20 = vadd.f32 0.00028619796, %v9805_v38  ;;  %v7146_v35 = vadd.f32 0.00028619796, %v9806_v10  ;;  %v9810_v53 = vld [vmem:[#allocation165_spill] sm:$0xff] }
 0x3e4   :  { %9800 = vst [vmem:[#allocation14_spill] sm:$0xff] %v7132_v44  ;;  %v2696_v56 = vadd.f32 0.4994258, %v2695_v36  ;;  %v3335_v44 = vmul.f32 %v3334_v28, %v9734_v24  ;;  %v7153_v8 = vadd.f32 0.00028619796, %v9810_v53  ;;  %v9812_v42 = vld [vmem:[#allocation166_spill] sm:$0xff]  ;;  %v4021_v10 = vpop.eup %4020 }
 0x3e5   :  { %9802 = vst [vmem:[#allocation144_spill] sm:$0xff] %v7135_v15  ;;  %v7150_v15 = vadd.f32 0.00028619796, %v9808_v2  ;;  %v2047_v41 = vadd.f32 1.1283791, %v2046_v7  ;;  %v1430_v28 = vand.u32 2147483648, %v7109_v59  ;;  %v3326_v2 = vmul.f32 %v3325_v37, %v9734_v24 }
 0x3e6   :  { %9804 = vst [vmem:[#allocation145_spill] sm:$0xff] %v7139_v32  ;;  %v7156_v32 = vadd.f32 0.00028619796, %v9812_v42  ;;  %v1428_v18 = vand.u32 2147483647, %v7109_v59  ;;  %v2697_v30 = vmul.f32 %v2696_v56, %v9774_v61  ;;  %v1420_v53 = vmul.f32 %v4021_v10, %v7109_v59  ;;  %v9815_v61 = vld [vmem:[#allocation82_spill] sm:$0xff] }
 0x3e7   :  { %9807 = vst [vmem:[#allocation146_spill] sm:$0xff] %v7146_v35  ;;  %v3336_v38 = vadd.f32 0.4994258, %v3335_v44  ;;  %v9814_v35 = vld [vmem:[#allocation72_spill] sm:$0xff]  ;;  %v2687_v16 = vadd.f32 1.1283791, %v2686_v19  ;;  %v2048_v44 = vmul.f32 %v2047_v41, %v9815_v61  ;;  %vm1425_vm13 = vweird.f32 %v4021_v10 }
 0x3e8   :  { %9809 = vst [vmem:[#allocation147_spill] sm:$0xff] %v7150_v15  ;;  %v1408_v36 = vmul.f32 %v1407_v22, %v9814_v35  ;;  %v4023_v15 = vpop.eup %4022  ;;  %v2068_v7 = vand.u32 2147483647, %v7111_v21  ;;  %v7165_v42 = vadd.f32 1.0, %v2697_v30  ;;  %v2070_v35 = vand.u32 2147483648, %v7111_v21  ;;  %vm1426_vm1 = vmor %vm1424_vm10, %vm1425_vm13 }
 0x3e9   :  { %9811 = vst [vmem:[#allocation148_spill] sm:$0xff] %v7153_v8  ;;  %v2060_v22 = vmul.f32 %v4023_v15, %v7111_v21  ;;  %v1421_v19 = vsub.f32 1.0, %v1420_v53  ;;  %vm7172_vm11 = vcmp.eq.f32.partialorder %v1428_v18, 8.507059e+37  ;;  %v1431_v56 = vor.u32 1.1754944e-38, %v1430_v28  ;;  %v9820_v53 = vld [vmem:[#allocation97_spill] sm:$0xff] }
 0x3ea   :  { %9813 = vst [vmem:[#allocation135_spill] sm:$0xff] %v7156_v32  ;;  %v3337_v32 = vmul.f32 %v3336_v38, %v9734_v24  ;;  %4024 = vrcp.f32 %v7165_v42  ;;  %v3327_v24 = vadd.f32 1.1283791, %v3326_v2  ;;  %vm7180_vm14 = vcmp.eq.f32.partialorder %v2068_v7, 8.507059e+37  ;;  %v9822_v2 = vld [vmem:[#allocation91_spill] sm:$0xff] }
 0x3eb   :  { %v2061_v30 = vsub.f32 1.0, %v2060_v22  ;;  %v1422_v8 = vmul.f32 %v4021_v10, %v1421_v19  ;;  %v2688_v18 = vmul.f32 %v2687_v16, %v9820_v53  ;;  %vm2065_vm15 = vweird.f32 %v4023_v15  ;;  %v9823_v22 = vld [vmem:[#allocation109_spill] sm:$0xff] }
 0x3ec   :  { %v7178_v38 = vadd.f32 1.0, %v3337_v32  ;;  %v2071_v29 = vor.u32 1.1754944e-38, %v2070_v35  ;;  %v7188_v28 = vmul.f32 %v6907_v11, %v9821_v25  ;;  %v7192_v32 = vmul.f32 %v6910_v31, %v9821_v25  ;;  %v9824_v11 = vld [vmem:[#allocation119_spill] sm:$0xff]  ;;  %vm2066_vm2 = vmor %vm2064_vm12, %vm2065_vm15 }
 0x3ed   :  { %v2062_v61 = vmul.f32 %v4023_v15, %v2061_v30  ;;  %v1423_v1 = vadd.f32 %v4021_v10, %v1422_v8  ;;  %v7196_v7 = vmul.f32 %v6915_v48, %v9822_v2  ;;  %v7201_v35 = vmul.f32 %v3327_v24, %v9823_v22  ;;  %v9825_v24 = vld [vmem:[#allocation120_spill] sm:$0xff] }
 0x3ee   :  { %4026 = vrcp.f32 %v7178_v38  ;;  %v7205_v8 = vmul.f32 %v6918_v17, %v9822_v2  ;;  %v7209_v19 = vmul.f32 %v6927_v26, %v9824_v11  ;;  %v2708_v48 = vand.u32 2147483647, %v7165_v42 }
 0x3ef   :  { %v2063_v16 = vadd.f32 %v4023_v15, %v2062_v61  ;;  %v1427_v30 = vsel %vm1426_vm1, %v4021_v10, %v1423_v1  ;;  %v7216_v59 = vmul.f32 %v6934_v27, %v9824_v11  ;;  %v7220_v53 = vmul.f32 %v6937_v3, %v9825_v24  ;;  %v9826_v27 = vld [vmem:[#allocation19_spill] sm:$0xff] }
 0x3f0   :  { %v4025_v31 = vpop.eup %4024  ;;  %v1432_v17 = vsel %vm7172_vm11, %v1431_v56, %v1427_v30  ;;  %v7227_v1 = vmul.f32 %v6940_v57, %v9825_v24  ;;  %v7233_v22 = vmul.f32 %v6950_v0, %v9826_v27  ;;  %v7237_v3 = vmul.f32 %v6955_v52, %v9826_v27  ;;  %v9829_v0 = vld [vmem:[#allocation55_spill] sm:$0xff] }
 0x3f1   :  { %v2067_v26 = vsel %vm2066_vm2, %v4023_v15, %v2063_v16  ;;  %v2700_v61 = vmul.f32 %v4025_v31, %v7165_v42  ;;  %v1433_v21 = vmul.f32 %v1432_v17, %v1408_v36  ;;  %vm2704_vm3 = vweird.f32 %v7165_v42  ;;  %v9836_v36 = vld [vmem:[#allocation126_spill] sm:$0xff] }
 0x3f2   :  { %v2072_v10 = vsel %vm7180_vm14, %v2071_v29, %v2067_v26  ;;  %v2710_v57 = vand.u32 2147483648, %v7165_v42  ;;  %vm7241_vm4 = vcmp.eq.f32.partialorder %v2708_v48, 8.507059e+37  ;;  %v7248_v41 = vmul.f32 %v6959_v50, %v9829_v0 }
 0x3f3   :  { %v2073_v15 = vmul.f32 %v2072_v10, %v2048_v44  ;;  %v2701_v56 = vsub.f32 1.0, %v2700_v61  ;;  %v3856_v16 = vclamps-f32 %v1433_v21, 1.0  ;;  %vm2705_vm5 = vweird.f32 %v4025_v31  ;;  %v9830_v61 = vld [vmem:[#allocation122_spill] sm:$0xff] }
 0x3f4   :  { %v4027_v37 = vpop.eup %4026  ;;  %v7252_v44 = vmul.f32 %v6966_v49, %v9829_v0  ;;  %v3348_v26 = vand.u32 2147483647, %v7178_v38  ;;  %v3350_v48 = vand.u32 2147483648, %v7178_v38  ;;  %v7258_v21 = vmul.f32 %v6969_v9, %v9830_v61  ;;  %vm2706_vm6 = vmor %vm2704_vm3, %vm2705_vm5 }
 0x3f5   :  { %v3340_v29 = vmul.f32 %v4027_v37, %v7178_v38  ;;  %v3872_v52 = vclamps-f32 %v2073_v15, 1.0  ;;  %v2702_v30 = vmul.f32 %v4025_v31, %v2701_v56  ;;  %v2711_v27 = vor.u32 1.1754944e-38, %v2710_v57 }
 0x3f6   :  { %v3566_v50 = vadd.f32 1.0, %v3856_v16  ;;  %vm3344_vm7 = vweird.f32 %v7178_v38  ;;  %vm3345_vm8 = vweird.f32 %v4027_v37  ;;  %v7265_v49 = vmul.f32 %v6972_v54, %v9830_v61  ;;  %v9832_v16 = vld [vmem:[#allocation124_spill] sm:$0xff]  ;;  %v9835_v61 = vld [vmem:[#allocation125_spill] sm:$0xff] }
 0x3f7   :  { %v3341_v17 = vsub.f32 1.0, %v3340_v29  ;;  %v2703_v10 = vadd.f32 %v4025_v31, %v2702_v30  ;;  %v3582_v2 = vadd.f32 1.0, %v3872_v52  ;;  %v9831_v29 = vld [vmem:[#allocation123_spill] sm:$0xff]  ;;  %v7277_v42 = vmul.f32 %v6987_v63, %v9832_v16  ;;  %vm3346_vm10 = vmor %vm3344_vm7, %vm3345_vm8 }
 0x3f8   :  { %v7269_v9 = vmul.f32 %v6977_v5, %v9831_v29  ;;  %v7273_v57 = vmul.f32 %v6984_v6, %v9831_v29  ;;  %vm3349_vm9 = vcmp.eq.f32.partialorder %v3348_v26, 8.507059e+37  ;;  %v3351_v54 = vor.u32 1.1754944e-38, %v3350_v48  ;;  %v9834_v5 = vld [vmem:[#allocation58_spill] sm:$0xff] }
 0x3f9   :  { %v3342_v15 = vmul.f32 %v4027_v37, %v3341_v17  ;;  %v2707_v56 = vsel %vm2706_vm6, %v4025_v31, %v2703_v10  ;;  %v9833_v31 = vld [vmem:[#allocation46_spill] sm:$0xff]  ;;  %v3646_v10 = vmul.f32 %v3582_v2, %v9834_v5  ;;  %v7285_v6 = vmul.f32 %v6990_v23, %v9832_v16  ;;  %v9837_v23 = vld [vmem:[#allocation37_spill] sm:$0xff] }
 0x3fa   :  { %v2712_v38 = vsel %vm7241_vm4, %v2711_v27, %v2707_v56  ;;  %v3630_v17 = vmul.f32 %v3566_v50, %v9833_v31  ;;  %v7289_v63 = vmul.f32 %v6993_v58, %v9835_v61  ;;  %v7293_v27 = vmul.f32 %v6996_v39, %v9835_v61  ;;  %v9838_v50 = vld [vmem:[#allocation127_spill] sm:$0xff]  ;;  %v9844_v5 = vld [vmem:[#allocation118_spill] sm:$0xff] }
 0x3fb   :  { %v3343_v52 = vadd.f32 %v4027_v37, %v3342_v15  ;;  %v2713_v30 = vmul.f32 %v2712_v38, %v2688_v18  ;;  %v7297_v18 = vmul.f32 %v7001_v62, %v9836_v36  ;;  %v7301_v2 = vmul.f32 %v7004_v55, %v9836_v36  ;;  %v9839_v55 = vld [vmem:[#allocation33_spill] sm:$0xff] }
 0x3fc   :  { %v7310_v39 = vmul.f32 %v7010_v13, %v9837_v23  ;;  %v2000_v62 = vmul.f32 %v7013_v47, %v9838_v50  ;;  %v2011_v15 = vmul.f32 %v7016_v60, %v9838_v50  ;;  %v7318_v38 = vmul.f32 %v7022_v51, %v9839_v55  ;;  %v9841_v60 = vld [vmem:[#allocation134_spill] sm:$0xff]  ;;  %v9843_v51 = vld [vmem:[#allocation43_spill] sm:$0xff] }
 0x3fd   :  { %v3347_v29 = vsel %vm3346_vm10, %v4027_v37, %v3343_v52  ;;  %v3888_v26 = vclamps-f32 %v2713_v30, 1.0  ;;  %v7305_v37 = vmul.f32 %v7007_v46, %v9837_v23  ;;  %v7322_v46 = vmul.f32 %v7025_v43, %v9839_v55  ;;  %v9840_v52 = vld [vmem:[#allocation128_spill] sm:$0xff] }
 0x3fe   :  { %v3352_v48 = vsel %vm3349_vm9, %v3351_v54, %v3347_v29  ;;  %v3694_v29 = vadd.f32 %v3646_v10, %v3630_v17  ;;  %v7326_v13 = vmul.f32 %v7028_v4, %v9840_v52  ;;  %v7330_v47 = vmul.f32 %v7031_v34, %v9840_v52  ;;  %v9842_v30 = vld [vmem:[#allocation24_spill] sm:$0xff] }
 0x3ff   :  { %v3353_v58 = vmul.f32 %v3352_v48, %v7201_v35  ;;  %v3598_v56 = vadd.f32 1.0, %v3888_v26  ;;  %v2640_v54 = vmul.f32 %v7092_v40, %v9841_v60  ;;  %v7337_v17 = vmul.f32 %v7035_v12, %v9843_v51  ;;  %v9845_v26 = vld [vmem:[#allocation129_spill] sm:$0xff]  ;;  %v9846_v48 = vld [vmem:[#allocation130_spill] sm:$0xff] }
 0x400   :  { %v7341_v43 = vmul.f32 %v7039_v14, %v9843_v51  ;;  %v3280_v4 = vmul.f32 %v7143_v20, %v9844_v5  ;;  %v7347_v34 = vmul.f32 %v7046_v33, %v9845_v26  ;;  %v7351_v40 = vmul.f32 %v7049_v45, %v9845_v26  ;;  %v9848_v14 = vld [vmem:[#allocation78_spill] sm:$0xff] }
 0x401   :  { %v3904_v35 = vclamps-f32 %v3353_v58, 1.0  ;;  %v3662_v31 = vmul.f32 %v3598_v56, %v9842_v30  ;;  %v9847_v58 = vld [vmem:[#allocation68_spill] sm:$0xff]  ;;  %v7359_v30 = vmul.f32 %v9848_v14, %v9846_v48  ;;  %v1361_v20 = vadd.f32 0.0036580483, %v7220_v53  ;;  %v9849_v51 = vld [vmem:[#allocation18_spill] sm:$0xff] }
 0x402   :  { %v7355_v12 = vmul.f32 %v9847_v58, %v9846_v48  ;;  %v2001_v52 = vadd.f32 0.0036580483, %v2000_v62  ;;  %v2012_v55 = vadd.f32 0.014752088, %v2011_v15  ;;  %v2641_v36 = vadd.f32 0.0036580483, %v2640_v54 }
 0x403   :  { %v3614_v10 = vadd.f32 1.0, %v3904_v35  ;;  %v3710_v56 = vadd.f32 %v3694_v29, %v3662_v31  ;;  %v1372_v35 = vadd.f32 0.014752088, %v7227_v1  ;;  %v1362_v45 = vmul.f32 %v1361_v20, %v9825_v24  ;;  %v9850_v54 = vld [vmem:[#allocation131_spill] sm:$0xff] }
 0x404   :  { %v2649_v58 = vmul.f32 3.8918573e-05, %v9841_v60  ;;  %v3281_v29 = vadd.f32 0.0036580483, %v3280_v4  ;;  %v2002_v14 = vmul.f32 %v2001_v52, %v9838_v50  ;;  %v2013_v48 = vmul.f32 %v2012_v55, %v9838_v50 }
 0x405   :  { %v3678_v33 = vmul.f32 %v3614_v10, %v9849_v51  ;;  %v1373_v26 = vmul.f32 %v1372_v35, %v9825_v24  ;;  %v2642_v53 = vmul.f32 %v2641_v36, %v9841_v60  ;;  %v1363_v1 = vadd.f32 0.05243302, %v1362_v45  ;;  %v9851_v10 = vld [vmem:[#allocation93_spill] sm:$0xff] }
 0x406   :  { %v2650_v51 = vadd.f32 0.001143296, %v2649_v58  ;;  %v3282_v62 = vmul.f32 %v3281_v29, %v9844_v5  ;;  %v7373_v20 = vmul.f32 %v9851_v10, %v9850_v54  ;;  %v2003_v35 = vadd.f32 0.05243302, %v2002_v14  ;;  %v9853_v58 = vld [vmem:[#allocation69_spill] sm:$0xff]  ;;  %v9855_v14 = vld [vmem:[#allocation132_spill] sm:$0xff] }
 0x407   :  { %v3726_v31 = vadd.f32 %v3710_v56, %v3678_v33  ;;  %v1374_v61 = vadd.f32 0.112945676, %v1373_v26  ;;  %v2014_v16 = vadd.f32 0.112945676, %v2013_v48  ;;  %v1364_v4 = vmul.f32 %v1363_v1, %v9825_v24 }
 0x408   :  { %9852 = vst [vmem:[#allocation36_spill] sm:$0xff] %v7373_v20  ;;  %v2643_v56 = vadd.f32 0.05243302, %v2642_v53  ;;  %v2651_v55 = vmul.f32 %v2650_v51, %v9841_v60  ;;  %v2004_v36 = vmul.f32 %v2003_v35, %v9838_v50  ;;  %v3283_v33 = vadd.f32 0.05243302, %v3282_v62  ;;  %v9856_v53 = vld [vmem:[#allocation15_spill] sm:$0xff] }
 0x409   :  { %v3742_v15 = vmul.f32 0.25, %v3726_v31  ;;  %v1375_v52 = vmul.f32 %v1374_v61, %v9825_v24  ;;  %v2015_v26 = vmul.f32 %v2014_v16, %v9838_v50  ;;  %v3289_v45 = vmul.f32 3.8918573e-05, %v9844_v5  ;;  %v9858_v51 = vld [vmem:[#allocation53_spill] sm:$0xff]  ;;  %v9861_v35 = vld [vmem:[#allocation79_spill] sm:$0xff] }
 0x40a   :  { %v7384_v48 = vmul.f32 %v9853_v58, %v9850_v54  ;;  %v1365_v29 = vadd.f32 0.18741608, %v1364_v4  ;;  %v2652_v61 = vadd.f32 0.014752088, %v2651_v55  ;;  %v7388_v1 = vmul.f32 %v9856_v53, %v9855_v14  ;;  %v9860_v62 = vld [vmem:[#allocation133_spill] sm:$0xff] }
 0x40b   :  { %3796 = vrot.lane.b32.xlu2 %v3742_v15, %s4159_s8  ;;  %v1376_v31 = vadd.f32 0.4994258, %v1375_v52  ;;  %v7392_v15 = vmul.f32 %v9858_v51, %v9855_v14  ;;  %v2016_v10 = vadd.f32 0.4994258, %v2015_v26  ;;  %v3290_v16 = vadd.f32 0.001143296, %v3289_v45 }
 0x40c   :  { %9854 = vst [vmem:[#allocation149_spill] sm:$0xff] %v7384_v48  ;;  %v7396_v0 = vmul.f32 %v9861_v35, %v9860_v62  ;;  %v2005_v54 = vadd.f32 0.18741608, %v2004_v36  ;;  %v2653_v4 = vmul.f32 %v2652_v61, %v9841_v60  ;;  %v9862_v52 = vld [vmem:[#allocation136_spill] sm:$0xff]  ;;  %v9863_v55 = vld [vmem:[#allocation105_spill] sm:$0xff]  ;;  %v2644_v51 = vmul.f32 %v2643_v56, %v9841_v60  ;;  %v9866_v14 = vld [vmem:[#allocation94_spill] sm:$0xff] }
 0x40d   :  { %9857 = vst [vmem:[#allocation150_spill] sm:$0xff] %v7388_v1  ;;  %v1377_v58 = vmul.f32 %v1376_v31, %v9825_v24  ;;  %v7402_v25 = vmul.f32 %v9863_v55, %v9862_v52  ;;  %v2017_v53 = vmul.f32 %v2016_v10, %v9838_v50  ;;  %v3291_v26 = vmul.f32 %v3290_v16, %v9844_v5  ;;  %v9865_v45 = vld [vmem:[#allocation137_spill] sm:$0xff]  ;;  %v9868_v61 = vld [vmem:[#allocation138_spill] sm:$0xff] }
 0x40e   :  { %9859 = vst [vmem:[#allocation151_spill] sm:$0xff] %v7392_v15  ;;  %v7409_v15 = vmul.f32 %v9866_v14, %v9865_v45  ;;  %v1366_v35 = vmul.f32 %v1365_v29, %v9825_v24  ;;  %v3284_v36 = vmul.f32 %v3283_v33, %v9844_v5  ;;  %v9869_v1 = vld [vmem:[#allocation106_spill] sm:$0xff]  ;;  %v2654_v10 = vadd.f32 0.112945676, %v2653_v4  ;;  %v9872_v16 = vld [vmem:[#allocation17_spill] sm:$0xff]  ;;  %v9877_v33 = vld [vmem:[#allocation35_spill] sm:$0xff] }
 0x40f   :  { %9864 = vst [vmem:[#allocation152_spill] sm:$0xff] %v7402_v25  ;;  %v7412_v31 = vadd.f32 1.0, %v1377_v58  ;;  %v7417_v55 = vmul.f32 %v9869_v1, %v9868_v61  ;;  %v7419_v52 = vadd.f32 1.0, %v2017_v53  ;;  %v3292_v56 = vadd.f32 0.014752088, %v3291_v26  ;;  %v9871_v25 = vld [vmem:[#allocation139_spill] sm:$0xff] }
 0x410   :  { %9867 = vst [vmem:[#allocation153_spill] sm:$0xff] %v7409_v15  ;;  %v7423_v48 = vmul.f32 %v9872_v16, %v9871_v25  ;;  %v9874_v14 = vld [vmem:[#allocation114_spill] sm:$0xff]  ;;  %v2006_v24 = vmul.f32 %v2005_v54, %v9838_v50  ;;  %v9879_v1 = vld [vmem:[#allocation115_spill] sm:$0xff]  ;;  %v9880_v58 = vld [vmem:[#allocation121_spill] sm:$0xff]  ;;  %v2645_v53 = vadd.f32 0.18741608, %v2644_v51  ;;  %v2655_v51 = vmul.f32 %v2654_v10, %v9841_v60 }
 0x411   :  { %9870 = vst [vmem:[#allocation154_spill] sm:$0xff] %v7417_v55  ;;  %v9875_v45 = vld [vmem:[#allocation54_spill] sm:$0xff]  ;;  %4028 = vrcp.f32 %v7412_v31  ;;  %v7433_v29 = vmul.f32 %v9877_v33, %v9874_v14  ;;  %v7437_v4 = vmul.f32 %v9880_v58, %v9879_v1  ;;  %v9882_v26 = vld [vmem:[#allocation8_spill] sm:$0xff]  ;;  %v1367_v50 = vadd.f32 1.1283791, %v1366_v35  ;;  %v9890_v58 = vld [vmem:[#allocation145_spill] sm:$0xff] }
 0x412   :  { %9873 = vst [vmem:[#allocation155_spill] sm:$0xff] %v7423_v48  ;;  %v7427_v15 = vmul.f32 %v9875_v45, %v9874_v14  ;;  %4030 = vrcp.f32 %v7419_v52  ;;  %v7442_v16 = vmul.f32 %v9882_v26, %v9879_v1  ;;  %v9884_v45 = vld [vmem:[#allocation116_spill] sm:$0xff]  ;;  %v9885_v25 = vld [vmem:[#allocation14_spill] sm:$0xff]  ;;  %v3285_v54 = vadd.f32 0.18741608, %v3284_v36  ;;  %v9891_v26 = vld [vmem:[#allocation141_spill] sm:$0xff] }
 0x413   :  { %9878 = vst [vmem:[#allocation157_spill] sm:$0xff] %v7433_v29  ;;  %v7446_v61 = vmul.f32 %v9885_v25, %v9884_v45  ;;  %v9887_v33 = vld [vmem:[#allocation144_spill] sm:$0xff]  ;;  %v9889_v29 = vld [vmem:[#allocation117_spill] sm:$0xff]  ;;  %v9892_v1 = vld [vmem:[#allocation146_spill] sm:$0xff]  ;;  %v2646_v10 = vmul.f32 %v2645_v53, %v9841_v60  ;;  %vm1384_vm11 = vweird.f32 %v7412_v31  ;;  %vm2024_vm13 = vweird.f32 %v7419_v52 }
 0x414   :  { %9876 = vst [vmem:[#allocation156_spill] sm:$0xff] %v7427_v15  ;;  %v7450_v14 = vmul.f32 %v9887_v33, %v9884_v45  ;;  %v3293_v15 = vmul.f32 %v3292_v56, %v9844_v5  ;;  %v9894_v25 = vld [vmem:[#allocation142_spill] sm:$0xff]  ;;  %v9897_v36 = vld [vmem:[#allocation143_spill] sm:$0xff]  ;;  %v9898_v48 = vld [vmem:[#allocation148_spill] sm:$0xff]  ;;  %v2007_v45 = vadd.f32 1.1283791, %v2006_v24 }
 0x415   :  { %9881 = vst [vmem:[#allocation158_spill] sm:$0xff] %v7437_v4  ;;  %v7454_v4 = vmul.f32 %v9890_v58, %v9889_v29  ;;  %v7468_v33 = vmul.f32 %v9898_v48, %v9897_v36  ;;  %v9901_v58 = vld [vmem:[#allocation135_spill] sm:$0xff]  ;;  %v2656_v56 = vadd.f32 0.4994258, %v2655_v51  ;;  %v1390_v36 = vand.u32 2147483648, %v7412_v31  ;;  %v9904_v51 = vld [vmem:[#allocation81_spill] sm:$0xff] }
 0x416   :  { %9883 = vst [vmem:[#allocation159_spill] sm:$0xff] %v7442_v16  ;;  %v7460_v16 = vmul.f32 %v9892_v1, %v9891_v26  ;;  %v3294_v29 = vadd.f32 0.112945676, %v3293_v15  ;;  %v9903_v1 = vld [vmem:[#allocation71_spill] sm:$0xff]  ;;  %v2008_v15 = vmul.f32 %v2007_v45, %v9904_v51  ;;  %v7514_v62 = vadd.f32 0.014752088, %v7192_v32 }
 0x417   :  { %9886 = vst [vmem:[#allocation160_spill] sm:$0xff] %v7446_v61  ;;  %v9895_v61 = vld [vmem:[#allocation147_spill] sm:$0xff]  ;;  %v4029_v20 = vpop.eup %4028  ;;  %v1368_v26 = vmul.f32 %v1367_v50, %v9903_v1  ;;  %v2028_v50 = vand.u32 2147483647, %v7419_v52  ;;  %v2030_v1 = vand.u32 2147483648, %v7419_v52 }
 0x418   :  { %9888 = vst [vmem:[#allocation161_spill] sm:$0xff] %v7450_v14  ;;  %v7464_v35 = vmul.f32 %v9895_v61, %v9894_v25  ;;  %v9900_v14 = vld [vmem:[#allocation16_spill] sm:$0xff]  ;;  %v1388_v61 = vand.u32 2147483647, %v7412_v31  ;;  %v3286_v25 = vmul.f32 %v3285_v54, %v9844_v5  ;;  %v4031_v48 = vpop.eup %4030  ;;  %v1380_v24 = vmul.f32 %v4029_v20, %v7412_v31 }
 0x419   :  { %9893 = vst [vmem:[#allocation162_spill] sm:$0xff] %v7460_v16  ;;  %v7472_v55 = vmul.f32 %v9901_v58, %v9900_v14  ;;  %v2657_v58 = vmul.f32 %v2656_v56, %v9841_v60  ;;  %v3295_v53 = vmul.f32 %v3294_v29, %v9844_v5  ;;  %v2020_v14 = vmul.f32 %v4031_v48, %v7419_v52 }
 0x41a   :  { %9896 = vst [vmem:[#allocation163_spill] sm:$0xff] %v7464_v35  ;;  %vm7489_vm12 = vcmp.eq.f32.partialorder %v1388_v61, 8.507059e+37  ;;  %v3287_v29 = vadd.f32 1.1283791, %v3286_v25  ;;  %vm1385_vm14 = vweird.f32 %v4029_v20  ;;  %v1391_v56 = vor.u32 1.1754944e-38, %v1390_v36  ;;  %v9910_v36 = vld [vmem:[#allocation108_spill] sm:$0xff] }
 0x41b   :  { %9899 = vst [vmem:[#allocation140_spill] sm:$0xff] %v7468_v33  ;;  %v2647_v33 = vadd.f32 1.1283791, %v2646_v10  ;;  %v7487_v54 = vadd.f32 1.0, %v2657_v58  ;;  %v3296_v35 = vadd.f32 0.4994258, %v3295_v53  ;;  %vm2025_vm15 = vweird.f32 %v4031_v48  ;;  %vm1386_vm2 = vmor %vm1384_vm11, %vm1385_vm14 }
 0x41c   :  { %9902 = vst [vmem:[#allocation164_spill] sm:$0xff] %v7472_v55  ;;  %v1381_v55 = vsub.f32 1.0, %v1380_v24  ;;  %v2021_v60 = vsub.f32 1.0, %v2020_v14  ;;  %vm7495_vm1 = vcmp.eq.f32.partialorder %v2028_v50, 8.507059e+37  ;;  %v2031_v58 = vor.u32 1.1754944e-38, %v2030_v1  ;;  %v9909_v53 = vld [vmem:[#allocation96_spill] sm:$0xff]  ;;  %vm2026_vm3 = vmor %vm2024_vm13, %vm2025_vm15 }
 0x41d   :  { %4032 = vrcp.f32 %v7487_v54  ;;  %v3297_v61 = vmul.f32 %v3296_v35, %v9844_v5  ;;  %v7501_v14 = vmul.f32 %v2647_v33, %v9909_v53  ;;  %v7504_v25 = vadd.f32 0.0036580483, %v7188_v28 }
 0x41e   :  { %v1382_v45 = vmul.f32 %v4029_v20, %v1381_v55  ;;  %v2022_v51 = vmul.f32 %v4031_v48, %v2021_v60  ;;  %v7509_v60 = vmul.f32 %v3287_v29, %v9910_v36  ;;  %v7519_v35 = vadd.f32 0.0036580483, %v7196_v7 }
 0x41f   :  { %v7511_v50 = vadd.f32 1.0, %v3297_v61  ;;  %v7522_v28 = vadd.f32 0.014752088, %v7205_v8  ;;  %v1321_v31 = vadd.f32 0.0036580483, %v7209_v19  ;;  %v2670_v16 = vand.u32 2147483648, %v7487_v54 }
 0x420   :  { %v1383_v24 = vadd.f32 %v4029_v20, %v1382_v45  ;;  %v2023_v55 = vadd.f32 %v4031_v48, %v2022_v51  ;;  %v2668_v29 = vand.u32 2147483647, %v7487_v54  ;;  %v1332_v7 = vadd.f32 0.014752088, %v7216_v59 }
 0x421   :  { %4034 = vrcp.f32 %v7511_v50  ;;  %v7533_v8 = vadd.f32 0.0036580483, %v7233_v22  ;;  %vm2664_vm4 = vweird.f32 %v7487_v54  ;;  %v1322_v59 = vmul.f32 %v1321_v31, %v9824_v11 }
 0x422   :  { %v1387_v5 = vsel %vm1386_vm2, %v4029_v20, %v1383_v24  ;;  %v2027_v1 = vsel %vm2026_vm3, %v4031_v48, %v2023_v55  ;;  %v7538_v48 = vadd.f32 0.014752088, %v7237_v3  ;;  %vm7548_vm5 = vcmp.eq.f32.partialorder %v2668_v29, 8.507059e+37 }
 0x423   :  { %v1392_v33 = vsel %vm7489_vm12, %v1391_v56, %v1387_v5  ;;  %v4033_v32 = vpop.eup %4032  ;;  %v2032_v52 = vsel %vm7495_vm1, %v2031_v58, %v2027_v1  ;;  %v7545_v56 = vadd.f32 0.014752088, %v7252_v44  ;;  %v7553_v51 = vadd.f32 0.0036580483, %v7258_v21 }
 0x424   :  { %v1393_v20 = vmul.f32 %v1392_v33, %v1368_v26  ;;  %v2033_v45 = vmul.f32 %v2032_v52, %v2008_v15  ;;  %v2660_v19 = vmul.f32 %v4033_v32, %v7487_v54  ;;  %v7542_v26 = vadd.f32 0.0036580483, %v7248_v41 }
 0x425   :  { %v7556_v3 = vadd.f32 0.014752088, %v7265_v49  ;;  %v3308_v41 = vand.u32 2147483647, %v7511_v50  ;;  %v7560_v44 = vadd.f32 0.0036580483, %v7269_v9  ;;  %vm2665_vm6 = vweird.f32 %v4033_v32 }
 0x426   :  { %v2661_v22 = vsub.f32 1.0, %v2660_v19  ;;  %v3855_v10 = vclamps-f32 %v1393_v20, 1.0  ;;  %v3871_v61 = vclamps-f32 %v2033_v45, 1.0  ;;  %v2671_v53 = vor.u32 1.1754944e-38, %v2670_v16  ;;  %vm2666_vm8 = vmor %vm2664_vm4, %vm2665_vm6 }
 0x427   :  { %v4035_v24 = vpop.eup %4034  ;;  %v3310_v55 = vand.u32 2147483648, %v7511_v50  ;;  %v7565_v21 = vadd.f32 0.014752088, %v7273_v57  ;;  %v7568_v49 = vadd.f32 0.0036580483, %v7277_v42  ;;  %vm3304_vm7 = vweird.f32 %v7511_v50 }
 0x428   :  { %v2662_v58 = vmul.f32 %v4033_v32, %v2661_v22  ;;  %v3300_v36 = vmul.f32 %v4035_v24, %v7511_v50  ;;  %v7571_v5 = vadd.f32 0.014752088, %v7285_v6  ;;  %v7575_v9 = vadd.f32 0.0036580483, %v7289_v63 }
 0x429   :  { %v7578_v33 = vadd.f32 0.014752088, %v7293_v27  ;;  %vm7582_vm9 = vcmp.eq.f32.partialorder %v3308_v41, 8.507059e+37  ;;  %v3565_v42 = vadd.f32 1.0, %v3855_v10  ;;  %v3581_v6 = vadd.f32 1.0, %v3871_v61  ;;  %v9916_v61 = vld [vmem:[#allocation57_spill] sm:$0xff] }
 0x42a   :  { %v2663_v31 = vadd.f32 %v4033_v32, %v2662_v58  ;;  %v3301_v57 = vsub.f32 1.0, %v3300_v36  ;;  %v3311_v20 = vor.u32 1.1754944e-38, %v3310_v55  ;;  %v7587_v52 = vadd.f32 0.0036580483, %v7297_v18 }
 0x42b   :  { %v7590_v63 = vadd.f32 0.014752088, %v7301_v2  ;;  %vm3305_vm10 = vweird.f32 %v4035_v24  ;;  %v1961_v45 = vadd.f32 0.0036580483, %v7305_v37  ;;  %v1972_v16 = vadd.f32 0.014752088, %v7310_v39 }
 0x42c   :  { %v2667_v29 = vsel %vm2666_vm8, %v4033_v32, %v2663_v31  ;;  %v3302_v54 = vmul.f32 %v4035_v24, %v3301_v57  ;;  %v7598_v32 = vadd.f32 0.0036580483, %v7318_v38  ;;  %v7601_v18 = vadd.f32 0.014752088, %v7322_v46  ;;  %v9915_v2 = vld [vmem:[#allocation23_spill] sm:$0xff]  ;;  %vm3306_vm11 = vmor %vm3304_vm7, %vm3305_vm10 }
 0x42d   :  { %v2672_v27 = vsel %vm7548_vm5, %v2671_v53, %v2667_v29  ;;  %v3629_v10 = vmul.f32 %v3565_v42, %v9915_v2  ;;  %v3645_v15 = vmul.f32 %v3581_v6, %v9916_v61  ;;  %v7606_v41 = vadd.f32 0.0036580483, %v7326_v13 }
 0x42e   :  { %v2673_v19 = vmul.f32 %v2672_v27, %v7501_v14  ;;  %v3303_v22 = vadd.f32 %v4035_v24, %v3302_v54  ;;  %v7611_v37 = vadd.f32 0.014752088, %v7330_v47  ;;  %v7614_v39 = vadd.f32 0.0036580483, %v7337_v17  ;;  %v9919_v27 = vld [vmem:[#allocation36_spill] sm:$0xff] }
 0x42f   :  { %v1333_v38 = vmul.f32 %v1332_v7, %v9824_v11  ;;  %v7618_v14 = vadd.f32 0.014752088, %v7341_v43  ;;  %v2601_v53 = vadd.f32 0.0036580483, %v7396_v0  ;;  %v1962_v13 = vmul.f32 %v1961_v45, %v9837_v23  ;;  %v9917_v0 = vld [vmem:[#allocation65_spill] sm:$0xff] }
 0x430   :  { %v3887_v58 = vclamps-f32 %v2673_v19, 1.0  ;;  %v3307_v46 = vsel %vm3306_vm11, %v4035_v24, %v3303_v22  ;;  %v7625_v47 = vadd.f32 0.0036580483, %v7347_v34  ;;  %v1973_v17 = vmul.f32 %v1972_v16, %v9837_v23 }
 0x431   :  { %v3312_v50 = vsel %vm7582_vm9, %v3311_v20, %v3307_v46  ;;  %v3693_v7 = vadd.f32 %v3645_v15, %v3629_v10  ;;  %v7630_v24 = vadd.f32 0.014752088, %v7351_v40  ;;  %v7633_v43 = vadd.f32 0.0036580483, %v7355_v12  ;;  %v9918_v20 = vld [vmem:[#allocation133_spill] sm:$0xff]  ;;  %v9921_v15 = vld [vmem:[#allocation10_spill] sm:$0xff] }
 0x432   :  { %v3597_v55 = vadd.f32 1.0, %v3887_v58  ;;  %v3313_v36 = vmul.f32 %v3312_v50, %v7509_v60  ;;  %v7637_v57 = vadd.f32 0.014752088, %v7359_v30  ;;  %v3241_v1 = vadd.f32 0.0036580483, %v7454_v4  ;;  %v9923_v50 = vld [vmem:[#allocation150_spill] sm:$0xff] }
 0x433   :  { %v1323_v34 = vadd.f32 0.05243302, %v1322_v59  ;;  %v1334_v6 = vadd.f32 0.112945676, %v1333_v38  ;;  %v1963_v29 = vadd.f32 0.05243302, %v1962_v13  ;;  %v2602_v60 = vmul.f32 %v2601_v53, %v9918_v20 }
 0x434   :  { %v3661_v31 = vmul.f32 %v3597_v55, %v9917_v0  ;;  %v3903_v42 = vclamps-f32 %v3313_v36, 1.0  ;;  %v7642_v54 = vadd.f32 0.0036580483, %v9919_v27  ;;  %v1974_v12 = vadd.f32 0.112945676, %v1973_v17  ;;  %v9920_v59 = vld [vmem:[#allocation149_spill] sm:$0xff] }
 0x435   :  { %v1324_v40 = vmul.f32 %v1323_v34, %v9824_v11  ;;  %v2609_v45 = vmul.f32 3.8918573e-05, %v9918_v20  ;;  %v1335_v30 = vmul.f32 %v1334_v6, %v9824_v11  ;;  %v1964_v4 = vmul.f32 %v1963_v29, %v9837_v23  ;;  %v9922_v53 = vld [vmem:[#allocation117_spill] sm:$0xff] }
 0x436   :  { %v3613_v19 = vadd.f32 1.0, %v3903_v42  ;;  %v3709_v16 = vadd.f32 %v3693_v7, %v3661_v31  ;;  %v7649_v22 = vadd.f32 0.014752088, %v9920_v59  ;;  %v1975_v2 = vmul.f32 %v1974_v12, %v9837_v23  ;;  %v9924_v31 = vld [vmem:[#allocation151_spill] sm:$0xff]  ;;  %v9925_v42 = vld [vmem:[#allocation152_spill] sm:$0xff] }
 0x437   :  { %v2603_v10 = vadd.f32 0.05243302, %v2602_v60  ;;  %v2610_v61 = vadd.f32 0.001143296, %v2609_v45  ;;  %v1325_v38 = vadd.f32 0.18741608, %v1324_v40  ;;  %v3242_v13 = vmul.f32 %v3241_v1, %v9922_v53 }
 0x438   :  { %v3677_v58 = vmul.f32 %v3613_v19, %v9921_v15  ;;  %v1336_v46 = vadd.f32 0.4994258, %v1335_v30  ;;  %v7655_v55 = vadd.f32 0.0036580483, %v9923_v50  ;;  %v1965_v17 = vadd.f32 0.18741608, %v1964_v4 }
 0x439   :  { %v1976_v36 = vadd.f32 0.4994258, %v1975_v2  ;;  %v2611_v7 = vmul.f32 %v2610_v61, %v9918_v20  ;;  %v7659_v34 = vadd.f32 0.014752088, %v9924_v31  ;;  %v7662_v6 = vadd.f32 0.0036580483, %v9925_v42 }
 0x43a   :  { %v3725_v0 = vadd.f32 %v3709_v16, %v3677_v58  ;;  %v1337_v29 = vmul.f32 %v1336_v46, %v9824_v11  ;;  %v9926_v60 = vld [vmem:[#allocation153_spill] sm:$0xff]  ;;  %v2604_v40 = vmul.f32 %v2603_v10, %v9918_v20  ;;  %v1326_v19 = vmul.f32 %v1325_v38, %v9824_v11  ;;  %v9927_v4 = vld [vmem:[#allocation154_spill] sm:$0xff]  ;;  %v9928_v10 = vld [vmem:[#allocation155_spill] sm:$0xff] }
 0x43b   :  { %v7666_v27 = vadd.f32 0.0036580483, %v9926_v60  ;;  %v1977_v1 = vmul.f32 %v1976_v36, %v9837_v23  ;;  %v2612_v12 = vadd.f32 0.014752088, %v2611_v7  ;;  %v3243_v30 = vadd.f32 0.05243302, %v3242_v13 }
 0x43c   :  { %v3741_v45 = vmul.f32 0.25, %v3725_v0  ;;  %v7671_v16 = vadd.f32 1.0, %v1337_v29  ;;  %v7674_v59 = vadd.f32 0.0036580483, %v9927_v4  ;;  %v1966_v2 = vmul.f32 %v1965_v17, %v9837_v23  ;;  %v9930_v46 = vld [vmem:[#allocation156_spill] sm:$0xff]  ;;  %v9932_v38 = vld [vmem:[#allocation157_spill] sm:$0xff] }
 0x43d   :  { %v7677_v61 = vadd.f32 1.0, %v1977_v1  ;;  %v2613_v15 = vmul.f32 %v2612_v12, %v9918_v20  ;;  %v7682_v58 = vadd.f32 0.0036580483, %v9928_v10  ;;  %v7685_v11 = vadd.f32 0.0036580483, %v9930_v46  ;;  %v9934_v50 = vld [vmem:[#allocation158_spill] sm:$0xff] }
 0x43e   :  { %3787 = vrot.lane.b32.xlu1 %v3741_v45, %s4160_s9  ;;  %v7688_v13 = vadd.f32 0.014752088, %v9932_v38  ;;  %4036 = vrcp.f32 %v7671_v16  ;;  %v7692_v23 = vadd.f32 0.0036580483, %v9934_v50  ;;  %v9936_v17 = vld [vmem:[#allocation159_spill] sm:$0xff]  ;;  %v9938_v0 = vld [vmem:[#allocation160_spill] sm:$0xff]  ;;  %v3244_v1 = vmul.f32 %v3243_v30, %v9922_v53 }
 0x43f   :  { %9929 = vst [vmem:[#allocation165_spill] sm:$0xff] %v7682_v58  ;;  %v7695_v36 = vadd.f32 0.014752088, %v9936_v17  ;;  %4038 = vrcp.f32 %v7677_v61  ;;  %v2605_v7 = vadd.f32 0.18741608, %v2604_v40  ;;  %v9940_v42 = vld [vmem:[#allocation161_spill] sm:$0xff]  ;;  %vm1344_vm12 = vweird.f32 %v7671_v16 }
 0x440   :  { %9931 = vst [vmem:[#allocation166_spill] sm:$0xff] %v7685_v11  ;;  %v7699_v31 = vadd.f32 0.0036580483, %v9938_v0  ;;  %v7702_v29 = vadd.f32 0.014752088, %v9940_v42  ;;  %v9942_v10 = vld [vmem:[#allocation30_spill] sm:$0xff]  ;;  %vm1984_vm13 = vweird.f32 %v7677_v61 }
 0x441   :  { %9933 = vst [vmem:[#allocation72_spill] sm:$0xff] %v7688_v13  ;;  %v1327_v60 = vadd.f32 1.1283791, %v1326_v19  ;;  %v1967_v12 = vadd.f32 1.1283791, %v1966_v2  ;;  %v9943_v46 = vld [vmem:[#allocation45_spill] sm:$0xff]  ;;  %v2606_v30 = vmul.f32 %v2605_v7, %v9918_v20 }
 0x442   :  { %9935 = vst [vmem:[#allocation82_spill] sm:$0xff] %v7692_v23  ;;  %v2614_v45 = vadd.f32 0.112945676, %v2613_v15  ;;  %v3249_v4 = vmul.f32 3.8918573e-05, %v9922_v53  ;;  %v7708_v38 = vmul.f32 %v9943_v46, %v9942_v10  ;;  %v9945_v50 = vld [vmem:[#allocation162_spill] sm:$0xff] }
 0x443   :  { %9937 = vst [vmem:[#allocation97_spill] sm:$0xff] %v7695_v36  ;;  %v7711_v17 = vadd.f32 0.0036580483, %v9945_v50  ;;  %v9947_v40 = vld [vmem:[#allocation163_spill] sm:$0xff]  ;;  %v9951_v19 = vld [vmem:[#allocation164_spill] sm:$0xff]  ;;  %v9953_v10 = vld [vmem:[#allocation70_spill] sm:$0xff] }
 0x444   :  { %9939 = vst [vmem:[#allocation109_spill] sm:$0xff] %v7699_v31  ;;  %v7714_v0 = vadd.f32 0.0036580483, %v9947_v40  ;;  %v9949_v31 = vld [vmem:[#allocation140_spill] sm:$0xff]  ;;  %v2615_v2 = vmul.f32 %v2614_v45, %v9918_v20  ;;  %v3250_v15 = vadd.f32 0.001143296, %v3249_v4  ;;  %v4037_v36 = vpop.eup %4036  ;;  %v1328_v46 = vmul.f32 %v1327_v60, %v9953_v10 }
 0x445   :  { %9941 = vst [vmem:[#allocation119_spill] sm:$0xff] %v7702_v29  ;;  %v7717_v42 = vadd.f32 0.0036580483, %v9949_v31  ;;  %v7720_v29 = vadd.f32 0.0036580483, %v9951_v19  ;;  %v1340_v31 = vmul.f32 %v4037_v36, %v7671_v16  ;;  %v9954_v19 = vld [vmem:[#allocation80_spill] sm:$0xff]  ;;  %vm1345_vm15 = vweird.f32 %v4037_v36 }
 0x446   :  { %9944 = vst [vmem:[#allocation120_spill] sm:$0xff] %v7708_v38  ;;  %v1348_v50 = vand.u32 2147483647, %v7671_v16  ;;  %v3245_v40 = vadd.f32 0.18741608, %v3244_v1  ;;  %v4039_v38 = vpop.eup %4038  ;;  %v3251_v60 = vmul.f32 %v3250_v15, %v9922_v53  ;;  %v1990_v10 = vand.u32 2147483648, %v7677_v61  ;;  %vm1346_vm3 = vmor %vm1344_vm12, %vm1345_vm15 }
 0x447   :  { %9946 = vst [vmem:[#allocation46_spill] sm:$0xff] %v7711_v17  ;;  %v2616_v17 = vadd.f32 0.4994258, %v2615_v2  ;;  %v1980_v7 = vmul.f32 %v4039_v38, %v7677_v61  ;;  %v1988_v45 = vand.u32 2147483647, %v7677_v61  ;;  %v1341_v4 = vsub.f32 1.0, %v1340_v31 }
 0x448   :  { %9948 = vst [vmem:[#allocation58_spill] sm:$0xff] %v7714_v0  ;;  %v1350_v0 = vand.u32 2147483648, %v7671_v16  ;;  %v2607_v1 = vadd.f32 1.1283791, %v2606_v30  ;;  %vm7736_vm14 = vcmp.eq.f32.partialorder %v1348_v50, 8.507059e+37  ;;  %v3246_v2 = vmul.f32 %v3245_v40, %v9922_v53  ;;  %v9959_v50 = vld [vmem:[#allocation95_spill] sm:$0xff] }
 0x449   :  { %9950 = vst [vmem:[#allocation37_spill] sm:$0xff] %v7717_v42  ;;  %v2617_v23 = vmul.f32 %v2616_v17, %v9918_v20  ;;  %v1342_v11 = vmul.f32 %v4037_v36, %v1341_v4  ;;  %vm1985_vm1 = vweird.f32 %v4039_v38  ;;  %vm7743_vm2 = vcmp.eq.f32.partialorder %v1988_v45, 8.507059e+37  ;;  %v9962_v61 = vld [vmem:[#allocation19_spill] sm:$0xff] }
 0x44a   :  { %9952 = vst [vmem:[#allocation127_spill] sm:$0xff] %v7720_v29  ;;  %v1968_v29 = vmul.f32 %v1967_v12, %v9954_v19  ;;  %v1981_v12 = vsub.f32 1.0, %v1980_v7  ;;  %v3252_v19 = vadd.f32 0.014752088, %v3251_v60  ;;  %v1351_v58 = vor.u32 1.1754944e-38, %v1350_v0  ;;  %v9960_v60 = vld [vmem:[#allocation90_spill] sm:$0xff]  ;;  %vm1986_vm4 = vmor %vm1984_vm13, %vm1985_vm1 }
 0x44b   :  { %v7741_v42 = vadd.f32 1.0, %v2617_v23  ;;  %v1343_v17 = vadd.f32 %v4037_v36, %v1342_v11  ;;  %v1991_v30 = vor.u32 1.1754944e-38, %v1990_v10  ;;  %v7749_v7 = vmul.f32 %v2607_v1, %v9959_v50  ;;  %v9961_v10 = vld [vmem:[#allocation91_spill] sm:$0xff] }
 0x44c   :  { %v1982_v15 = vmul.f32 %v4039_v38, %v1981_v12  ;;  %v3253_v20 = vmul.f32 %v3252_v19, %v9922_v53  ;;  %v3247_v0 = vadd.f32 1.1283791, %v3246_v2  ;;  %v7756_v45 = vmul.f32 %v7504_v25, %v9960_v60 }
 0x44d   :  { %4040 = vrcp.f32 %v7741_v42  ;;  %v1347_v4 = vsel %vm1346_vm3, %v4037_v36, %v1343_v17  ;;  %v7762_v11 = vmul.f32 %v7514_v62, %v9960_v60  ;;  %v7766_v1 = vmul.f32 %v7519_v35, %v9961_v10 }
 0x44e   :  { %v1983_v23 = vadd.f32 %v4039_v38, %v1982_v15  ;;  %v3254_v40 = vadd.f32 0.112945676, %v3253_v20  ;;  %v7770_v16 = vmul.f32 %v7522_v28, %v9961_v10  ;;  %v1352_v25 = vsel %vm7736_vm14, %v1351_v58, %v1347_v4  ;;  %v9963_v28 = vld [vmem:[#allocation55_spill] sm:$0xff]  ;;  %v9983_v10 = vld [vmem:[#allocation137_spill] sm:$0xff] }
 0x44f   :  { %v7777_v2 = vmul.f32 %v7533_v8, %v9962_v61  ;;  %v1353_v62 = vmul.f32 %v1352_v25, %v1328_v46  ;;  %v7783_v35 = vmul.f32 %v7538_v48, %v9962_v61  ;;  %v7787_v15 = vmul.f32 %v7542_v26, %v9963_v28  ;;  %v9964_v58 = vld [vmem:[#allocation107_spill] sm:$0xff]  ;;  %v9965_v46 = vld [vmem:[#allocation122_spill] sm:$0xff]  ;;  %v9968_v25 = vld [vmem:[#allocation125_spill] sm:$0xff] }
 0x450   :  { %v1987_v12 = vsel %vm1986_vm4, %v4039_v38, %v1983_v23  ;;  %v3255_v36 = vmul.f32 %v3254_v40, %v9922_v53  ;;  %v7790_v13 = vmul.f32 %v3247_v0, %v9964_v58  ;;  %v7794_v8 = vmul.f32 %v7545_v56, %v9963_v28  ;;  %v9982_v61 = vld [vmem:[#allocation56_spill] sm:$0xff] }
 0x451   :  { %v1992_v19 = vsel %vm7743_vm2, %v1991_v30, %v1987_v12  ;;  %v1522_v31 = vmul.f32 %v7553_v51, %v9965_v46  ;;  %v2628_v17 = vand.u32 2147483647, %v7741_v42  ;;  %v1533_v48 = vmul.f32 %v7556_v3, %v9965_v46  ;;  %v9966_v30 = vld [vmem:[#allocation123_spill] sm:$0xff]  ;;  %v9967_v51 = vld [vmem:[#allocation124_spill] sm:$0xff] }
 0x452   :  { %v3256_v38 = vadd.f32 0.4994258, %v3255_v36  ;;  %v7803_v26 = vmul.f32 %v7560_v44, %v9966_v30  ;;  %v7807_v50 = vmul.f32 %v7565_v21, %v9966_v30  ;;  %v1993_v23 = vmul.f32 %v1992_v19, %v1968_v29  ;;  %v9971_v36 = vld [vmem:[#allocation126_spill] sm:$0xff] }
 0x453   :  { %v4041_v20 = vpop.eup %4040  ;;  %v7813_v40 = vmul.f32 %v7568_v49, %v9967_v51  ;;  %v3854_v4 = vclamps-f32 %v1353_v62, 1.0  ;;  %v2630_v3 = vand.u32 2147483648, %v7741_v42  ;;  %v7818_v44 = vmul.f32 %v7571_v5, %v9967_v51  ;;  %v9972_v62 = vld [vmem:[#allocation33_spill] sm:$0xff] }
 0x454   :  { %v2620_v56 = vmul.f32 %v4041_v20, %v7741_v42  ;;  %v3257_v0 = vmul.f32 %v3256_v38, %v9922_v53  ;;  %v7822_v21 = vmul.f32 %v7575_v9, %v9968_v25  ;;  %vm2624_vm5 = vweird.f32 %v7741_v42  ;;  %v9977_v42 = vld [vmem:[#allocation131_spill] sm:$0xff] }
 0x455   :  { %v7829_v49 = vmul.f32 %v7578_v33, %v9968_v25  ;;  %vm7831_vm6 = vcmp.eq.f32.partialorder %v2628_v17, 8.507059e+37  ;;  %v7837_v5 = vmul.f32 %v7587_v52, %v9971_v36  ;;  %v7841_v9 = vmul.f32 %v7590_v63, %v9971_v36  ;;  %v9973_v52 = vld [vmem:[#allocation128_spill] sm:$0xff] }
 0x456   :  { %v2621_v29 = vsub.f32 1.0, %v2620_v56  ;;  %v7825_v12 = vadd.f32 1.0, %v3257_v0  ;;  %v7845_v19 = vmul.f32 %v7598_v32, %v9972_v62  ;;  %v3870_v58 = vclamps-f32 %v1993_v23, 1.0  ;;  %v9974_v23 = vld [vmem:[#allocation43_spill] sm:$0xff]  ;;  %v9979_v25 = vld [vmem:[#allocation132_spill] sm:$0xff] }
 0x457   :  { %vm2625_vm7 = vweird.f32 %v4041_v20  ;;  %v2631_v33 = vor.u32 1.1754944e-38, %v2630_v3  ;;  %v3564_v17 = vadd.f32 1.0, %v3854_v4  ;;  %v7850_v56 = vmul.f32 %v7601_v18, %v9972_v62  ;;  %v9975_v18 = vld [vmem:[#allocation129_spill] sm:$0xff] }
 0x458   :  { %v2622_v38 = vmul.f32 %v4041_v20, %v2621_v29  ;;  %4042 = vrcp.f32 %v7825_v12  ;;  %v7854_v0 = vmul.f32 %v7606_v41, %v9973_v52  ;;  %v7858_v32 = vmul.f32 %v7611_v37, %v9973_v52  ;;  %vm2626_vm8 = vmor %vm2624_vm5, %vm2625_vm7 }
 0x459   :  { %v2162_v29 = vmul.f32 %v7614_v39, %v9974_v23  ;;  %v2173_v3 = vmul.f32 %v7618_v14, %v9974_v23  ;;  %v7868_v4 = vmul.f32 %v7625_v47, %v9975_v18  ;;  %v7872_v41 = vmul.f32 %v7630_v24, %v9975_v18  ;;  %v9978_v18 = vld [vmem:[#allocation21_spill] sm:$0xff] }
 0x45a   :  { %v2623_v63 = vadd.f32 %v4041_v20, %v2622_v38  ;;  %v9976_v38 = vld [vmem:[#allocation130_spill] sm:$0xff]  ;;  %v3580_v62 = vadd.f32 1.0, %v3870_v58  ;;  %v7884_v36 = vmul.f32 %v7642_v54, %v9977_v42  ;;  %v7888_v47 = vmul.f32 %v7649_v22, %v9977_v42 }
 0x45b   :  { %v7876_v37 = vmul.f32 %v7633_v43, %v9976_v38  ;;  %v7880_v39 = vmul.f32 %v7637_v57, %v9976_v38  ;;  %v3628_v43 = vmul.f32 %v3564_v17, %v9978_v18  ;;  %v7895_v51 = vmul.f32 %v7655_v55, %v9979_v25  ;;  %v9980_v58 = vld [vmem:[#allocation138_spill] sm:$0xff] }
 0x45c   :  { %v2627_v14 = vsel %vm2626_vm8, %v4041_v20, %v2623_v63  ;;  %v7899_v57 = vmul.f32 %v7659_v34, %v9979_v25  ;;  %v2802_v22 = vmul.f32 %v7674_v59, %v9980_v58  ;;  %v1523_v63 = vadd.f32 0.05243302, %v1522_v31 }
 0x45d   :  { %v2632_v24 = vsel %vm7831_vm6, %v2631_v33, %v2627_v14  ;;  %v1534_v42 = vadd.f32 0.112945676, %v1533_v48  ;;  %v9981_v33 = vld [vmem:[#allocation136_spill] sm:$0xff]  ;;  %v2163_v55 = vadd.f32 0.05243302, %v2162_v29  ;;  %vm3264_vm9 = vweird.f32 %v7825_v12 }
 0x45e   :  { %v4043_v20 = vpop.eup %4042  ;;  %v2633_v54 = vmul.f32 %v2632_v24, %v7749_v7  ;;  %v7907_v17 = vmul.f32 %v7662_v6, %v9981_v33  ;;  %v2174_v18 = vadd.f32 0.112945676, %v2173_v3  ;;  %v3268_v34 = vand.u32 2147483647, %v7825_v12 }
 0x45f   :  { %v3260_v53 = vmul.f32 %v4043_v20, %v7825_v12  ;;  %v1524_v14 = vmul.f32 %v1523_v63, %v9965_v46  ;;  %v1535_v7 = vmul.f32 %v1534_v42, %v9965_v46  ;;  %v3270_v59 = vand.u32 2147483648, %v7825_v12 }
 0x460   :  { %v2175_v31 = vmul.f32 %v2174_v18, %v9974_v23  ;;  %v2809_v48 = vmul.f32 3.8918573e-05, %v9980_v58  ;;  %v3886_v25 = vclamps-f32 %v2633_v54, 1.0  ;;  %vm3265_vm10 = vweird.f32 %v4043_v20 }
 0x461   :  { %v3261_v24 = vsub.f32 1.0, %v3260_v53  ;;  %v1536_v6 = vadd.f32 0.4994258, %v1535_v7  ;;  %v2803_v29 = vadd.f32 0.05243302, %v2802_v22  ;;  %v2164_v33 = vmul.f32 %v2163_v55, %v9974_v23  ;;  %vm3266_vm12 = vmor %vm3264_vm9, %vm3265_vm10  ;;  %v9984_v7 = vld [vmem:[#allocation143_spill] sm:$0xff] }
 0x462   :  { %v2176_v38 = vadd.f32 0.4994258, %v2175_v31  ;;  %v2810_v30 = vadd.f32 0.001143296, %v2809_v48  ;;  %v3644_v63 = vmul.f32 %v3580_v62, %v9982_v61  ;;  %v7920_v42 = vmul.f32 %v7666_v27, %v9983_v10  ;;  %v9985_v61 = vld [vmem:[#allocation37_spill] sm:$0xff]  ;;  %v9988_v10 = vld [vmem:[#allocation114_spill] sm:$0xff] }
 0x463   :  { %v3262_v3 = vmul.f32 %v4043_v20, %v3261_v24  ;;  %v1525_v53 = vadd.f32 0.18741608, %v1524_v14  ;;  %v1537_v18 = vmul.f32 %v1536_v6, %v9965_v46  ;;  %vm3269_vm11 = vcmp.eq.f32.partialorder %v3268_v34, 8.507059e+37 }
 0x464   :  { %v2177_v54 = vmul.f32 %v2176_v38, %v9974_v23  ;;  %v2811_v22 = vmul.f32 %v2810_v30, %v9980_v58  ;;  %v3271_v55 = vor.u32 1.1754944e-38, %v3270_v59  ;;  %v3442_v62 = vmul.f32 %v9985_v61, %v9984_v7  ;;  %v9987_v61 = vld [vmem:[#allocation165_spill] sm:$0xff] }
 0x465   :  { %v3263_v60 = vadd.f32 %v4043_v20, %v3262_v3  ;;  %v7930_v24 = vadd.f32 1.0, %v1537_v18  ;;  %v2804_v27 = vmul.f32 %v2803_v29, %v9980_v58  ;;  %v3596_v31 = vadd.f32 1.0, %v3886_v25  ;;  %v9986_v3 = vld [vmem:[#allocation139_spill] sm:$0xff]  ;;  %v9989_v29 = vld [vmem:[#allocation166_spill] sm:$0xff]  ;;  %v9991_v25 = vld [vmem:[#allocation72_spill] sm:$0xff] }
 0x466   :  { %v2165_v48 = vadd.f32 0.18741608, %v2164_v33  ;;  %v7933_v34 = vadd.f32 1.0, %v2177_v54  ;;  %v1526_v30 = vmul.f32 %v1525_v53, %v9965_v46  ;;  %v2812_v12 = vadd.f32 0.014752088, %v2811_v22  ;;  %v9993_v33 = vld [vmem:[#allocation115_spill] sm:$0xff] }
 0x467   :  { %v3267_v14 = vsel %vm3266_vm12, %v4043_v20, %v3263_v60  ;;  %4044 = vrcp.f32 %v7930_v24  ;;  %v3692_v6 = vadd.f32 %v3644_v63, %v3628_v43  ;;  %v7940_v18 = vmul.f32 %v9987_v61, %v9986_v3  ;;  %v9994_v46 = vld [vmem:[#allocation82_spill] sm:$0xff]  ;;  %v9996_v63 = vld [vmem:[#allocation64_spill] sm:$0xff]  ;;  %v9997_v22 = vld [vmem:[#allocation97_spill] sm:$0xff] }
 0x468   :  { %v3272_v38 = vsel %vm3269_vm11, %v3271_v55, %v3267_v14  ;;  %v7944_v60 = vmul.f32 %v9989_v29, %v9988_v10  ;;  %v7948_v20 = vmul.f32 %v9991_v25, %v9988_v10  ;;  %v7952_v53 = vmul.f32 %v9994_v46, %v9993_v33  ;;  %v9999_v14 = vld [vmem:[#allocation116_spill] sm:$0xff] }
 0x469   :  { %v3273_v59 = vmul.f32 %v3272_v38, %v7790_v13  ;;  %4046 = vrcp.f32 %v7933_v34  ;;  %v2805_v13 = vadd.f32 0.18741608, %v2804_v27  ;;  %v3660_v54 = vmul.f32 %v3596_v31, %v9996_v63  ;;  %v10000_v38 = vld [vmem:[#allocation109_spill] sm:$0xff]  ;;  %v10002_v27 = vld [vmem:[#allocation119_spill] sm:$0xff] }
 0x46a   :  { %9990 = vst [vmem:[#allocation134_spill] sm:$0xff] %v7944_v60  ;;  %v7958_v55 = vmul.f32 %v9997_v22, %v9993_v33  ;;  %v7962_v61 = vmul.f32 %v10000_v38, %v9999_v14  ;;  %v1527_v29 = vadd.f32 1.1283791, %v1526_v30  ;;  %v2166_v25 = vmul.f32 %v2165_v48, %v9974_v23  ;;  %v10004_v22 = vld [vmem:[#allocation141_spill] sm:$0xff]  ;;  %v10005_v33 = vld [vmem:[#allocation46_spill] sm:$0xff] }
 0x46b   :  { %9992 = vst [vmem:[#allocation24_spill] sm:$0xff] %v7948_v20  ;;  %v3902_v43 = vclamps-f32 %v3273_v59, 1.0  ;;  %v2813_v46 = vmul.f32 %v2812_v12, %v9980_v58  ;;  %v3443_v10 = vadd.f32 0.05243302, %v3442_v62  ;;  %v7968_v59 = vmul.f32 %v10002_v27, %v9999_v14  ;;  %v10007_v38 = vld [vmem:[#allocation142_spill] sm:$0xff]  ;;  %v10009_v48 = vld [vmem:[#allocation9_spill] sm:$0xff] }
 0x46c   :  { %9995 = vst [vmem:[#allocation118_spill] sm:$0xff] %v7952_v53  ;;  %v3708_v53 = vadd.f32 %v3692_v6, %v3660_v54  ;;  %v3449_v31 = vmul.f32 3.8918573e-05, %v9984_v7  ;;  %v10008_v30 = vld [vmem:[#allocation58_spill] sm:$0xff]  ;;  %v2806_v23 = vmul.f32 %v2805_v13, %v9980_v58  ;;  %v10010_v14 = vld [vmem:[#allocation29_spill] sm:$0xff]  ;;  %vm1544_vm13 = vweird.f32 %v7930_v24 }
 0x46d   :  { %9998 = vst [vmem:[#allocation68_spill] sm:$0xff] %v7958_v55  ;;  %v3612_v3 = vadd.f32 1.0, %v3902_v43  ;;  %v4045_v63 = vpop.eup %4044  ;;  %v7973_v55 = vmul.f32 %v10005_v33, %v10004_v22  ;;  %v2814_v62 = vadd.f32 0.112945676, %v2813_v46  ;;  %v3444_v43 = vmul.f32 %v3443_v10, %v9984_v7  ;;  %v10011_v20 = vld [vmem:[#allocation85_spill] sm:$0xff] }
 0x46e   :  { %10001 = vst [vmem:[#allocation78_spill] sm:$0xff] %v7962_v61  ;;  %v7977_v61 = vmul.f32 %v10008_v30, %v10007_v38  ;;  %v1540_v6 = vmul.f32 %v4045_v63, %v7930_v24  ;;  %v3450_v54 = vadd.f32 0.001143296, %v3449_v31  ;;  %v2167_v33 = vadd.f32 1.1283791, %v2166_v25 }
 0x46f   :  { %10003 = vst [vmem:[#allocation18_spill] sm:$0xff] %v7968_v59  ;;  %v3676_v12 = vmul.f32 %v3612_v3, %v10009_v48  ;;  %v4047_v27 = vpop.eup %4046  ;;  %v1528_v59 = vmul.f32 %v1527_v29, %v10010_v14  ;;  %v2815_v22 = vmul.f32 %v2814_v62, %v9980_v58  ;;  %v1548_v13 = vand.u32 2147483647, %v7930_v24 }
 0x470   :  { %10006 = vst [vmem:[#allocation93_spill] sm:$0xff] %v7973_v55  ;;  %v1541_v55 = vsub.f32 1.0, %v1540_v6  ;;  %v2180_v46 = vmul.f32 %v4047_v27, %v7933_v34  ;;  %vm1545_vm14 = vweird.f32 %v4045_v63  ;;  %v1550_v3 = vand.u32 2147483648, %v7930_v24 }
 0x471   :  { %v3724_v30 = vadd.f32 %v3708_v53, %v3676_v12  ;;  %v2816_v48 = vadd.f32 0.4994258, %v2815_v22  ;;  %v3451_v10 = vmul.f32 %v3450_v54, %v9984_v7  ;;  %v3445_v29 = vadd.f32 0.18741608, %v3444_v43  ;;  %vm1546_vm1 = vmor %vm1544_vm13, %vm1545_vm14 }
 0x472   :  { %v1542_v38 = vmul.f32 %v4045_v63, %v1541_v55  ;;  %v2181_v14 = vsub.f32 1.0, %v2180_v46  ;;  %v2168_v25 = vmul.f32 %v2167_v33, %v10011_v20  ;;  %v2190_v62 = vand.u32 2147483648, %v7933_v34 }
 0x473   :  { %v3740_v31 = vmul.f32 0.25, %v3724_v30  ;;  %v2817_v53 = vmul.f32 %v2816_v48, %v9980_v58  ;;  %v3452_v12 = vadd.f32 0.014752088, %v3451_v10  ;;  %vm2185_vm15 = vweird.f32 %v4047_v27 }
 0x474   :  { %v1543_v6 = vadd.f32 %v4045_v63, %v1542_v38  ;;  %v2182_v60 = vmul.f32 %v4047_v27, %v2181_v14  ;;  %v2188_v22 = vand.u32 2147483647, %v7933_v34  ;;  %v1551_v55 = vor.u32 1.1754944e-38, %v1550_v3 }
 0x475   :  { %3785 = vrot.lane.b32.xlu0 %v3740_v31, %s4160_s9  ;;  %vm2184_vm2 = vweird.f32 %v7933_v34  ;;  %v7999_v20 = vadd.f32 1.0, %v2817_v53  ;;  %v3453_v43 = vmul.f32 %v3452_v12, %v9984_v7  ;;  %vm1549_vm3 = vcmp.eq.f32.partialorder %v1548_v13, 8.507059e+37 }
 0x476   :  { %v1547_v58 = vsel %vm1546_vm1, %v4045_v63, %v1543_v6  ;;  %v2183_v54 = vadd.f32 %v4047_v27, %v2182_v60  ;;  %v3446_v38 = vmul.f32 %v3445_v29, %v9984_v7  ;;  %vm2186_vm4 = vmor %vm2184_vm2, %vm2185_vm15  ;;  %v2191_v30 = vor.u32 1.1754944e-38, %v2190_v62  ;;  %v10013_v29 = vld [vmem:[#allocation127_spill] sm:$0xff] }
 0x477   :  { %v1552_v33 = vsel %vm1549_vm3, %v1551_v55, %v1547_v58  ;;  %v2807_v46 = vadd.f32 1.1283791, %v2806_v23  ;;  %4048 = vrcp.f32 %v7999_v20  ;;  %vm2189_vm5 = vcmp.eq.f32.partialorder %v2188_v22, 8.507059e+37  ;;  %v10015_v58 = vld [vmem:[#allocation112_spill] sm:$0xff] }
 0x478   :  { %v2187_v24 = vsel %vm2186_vm4, %v4047_v27, %v2183_v54  ;;  %v3454_v3 = vadd.f32 0.112945676, %v3453_v43  ;;  %v8005_v34 = vadd.f32 0.05243302, %v7756_v45  ;;  %v1553_v48 = vmul.f32 %v1552_v33, %v1528_v59  ;;  %v10012_v27 = vld [vmem:[#allocation16_spill] sm:$0xff] }
 0x479   :  { %v2192_v10 = vsel %vm2189_vm5, %v2191_v30, %v2187_v24  ;;  %v8008_v63 = vadd.f32 0.112945676, %v7762_v11  ;;  %v8011_v60 = vadd.f32 0.05243302, %v7766_v1  ;;  %v3447_v31 = vadd.f32 1.1283791, %v3446_v38 }
 0x47a   :  { %v2193_v13 = vmul.f32 %v2192_v10, %v2168_v25  ;;  %v3455_v23 = vmul.f32 %v3454_v3, %v9984_v7  ;;  %v8015_v14 = vadd.f32 0.112945676, %v7770_v16  ;;  %v8019_v62 = vmul.f32 %v10013_v29, %v10012_v27  ;;  %v10014_v59 = vld [vmem:[#allocation100_spill] sm:$0xff] }
 0x47b   :  { %v8022_v45 = vadd.f32 0.05243302, %v7777_v2  ;;  %v8025_v11 = vadd.f32 0.112945676, %v7783_v35  ;;  %v1483_v1 = vadd.f32 0.05243302, %v7787_v15  ;;  %v2808_v25 = vmul.f32 %v2807_v46, %v10014_v59 }
 0x47c   :  { %v2828_v53 = vand.u32 2147483647, %v7999_v20  ;;  %v3456_v12 = vadd.f32 0.4994258, %v3455_v23  ;;  %v1494_v16 = vadd.f32 0.112945676, %v7794_v8  ;;  %v8040_v54 = vmul.f32 %v3447_v31, %v10015_v58 }
 0x47d   :  { %v4049_v6 = vpop.eup %4048  ;;  %v3859_v22 = vclamps-f32 %v1553_v48, 1.0  ;;  %v2830_v55 = vand.u32 2147483648, %v7999_v20  ;;  %v8033_v43 = vadd.f32 0.05243302, %v7803_v26  ;;  %v8036_v2 = vadd.f32 0.112945676, %v7807_v50 }
 0x47e   :  { %v3875_v35 = vclamps-f32 %v2193_v13, 1.0  ;;  %v2820_v15 = vmul.f32 %v4049_v6, %v7999_v20  ;;  %v3457_v38 = vmul.f32 %v3456_v12, %v9984_v7  ;;  %vm2824_vm6 = vweird.f32 %v7999_v20 }
 0x47f   :  { %v8045_v8 = vadd.f32 0.05243302, %v7813_v40  ;;  %v8048_v33 = vadd.f32 0.112945676, %v7818_v44  ;;  %v8051_v26 = vadd.f32 0.05243302, %v7822_v21  ;;  %vm2825_vm8 = vweird.f32 %v4049_v6 }
 0x480   :  { %v2821_v50 = vsub.f32 1.0, %v2820_v15  ;;  %vm8053_vm7 = vcmp.eq.f32.partialorder %v2828_v53, 8.507059e+37  ;;  %v8057_v46 = vadd.f32 1.0, %v3457_v38  ;;  %v8060_v7 = vadd.f32 0.112945676, %v7829_v49  ;;  %vm2826_vm9 = vmor %vm2824_vm6, %vm2825_vm8  ;;  %v10019_v53 = vld [vmem:[#allocation61_spill] sm:$0xff] }
 0x481   :  { %v2831_v24 = vor.u32 1.1754944e-38, %v2830_v55  ;;  %v3569_v3 = vadd.f32 1.0, %v3859_v22  ;;  %v8063_v40 = vadd.f32 0.05243302, %v7837_v5  ;;  %v2134_v44 = vadd.f32 0.112945676, %v7858_v32 }
 0x482   :  { %v2822_v48 = vmul.f32 %v4049_v6, %v2821_v50  ;;  %4050 = vrcp.f32 %v8057_v46  ;;  %v3585_v21 = vadd.f32 1.0, %v3875_v35  ;;  %v8068_v10 = vadd.f32 0.112945676, %v7841_v9  ;;  %v10018_v9 = vld [vmem:[#allocation49_spill] sm:$0xff] }
 0x483   :  { %v8071_v13 = vadd.f32 0.05243302, %v7845_v19  ;;  %v2123_v49 = vadd.f32 0.05243302, %v7854_v0  ;;  %v1484_v31 = vmul.f32 %v1483_v1, %v9963_v28  ;;  %v8076_v5 = vadd.f32 0.112945676, %v7850_v56 }
 0x484   :  { %v2823_v23 = vadd.f32 %v4049_v6, %v2822_v48  ;;  %v8079_v32 = vadd.f32 0.05243302, %v7868_v4  ;;  %v1495_v29 = vmul.f32 %v1494_v16, %v9963_v28  ;;  %v3633_v59 = vmul.f32 %v3569_v3, %v10018_v9 }
 0x485   :  { %v8086_v19 = vadd.f32 0.112945676, %v7872_v41  ;;  %v8089_v0 = vadd.f32 0.05243302, %v7876_v37  ;;  %v2135_v1 = vmul.f32 %v2134_v44, %v9973_v52  ;;  %v3649_v12 = vmul.f32 %v3585_v21, %v10019_v53 }
 0x486   :  { %v2827_v56 = vsel %vm2826_vm9, %v4049_v6, %v2823_v23  ;;  %v8094_v4 = vadd.f32 0.112945676, %v7880_v39  ;;  %v8097_v16 = vadd.f32 0.05243302, %v7884_v36  ;;  %v8102_v41 = vadd.f32 0.112945676, %v7888_v47 }
 0x487   :  { %v2832_v20 = vsel %vm8053_vm7, %v2831_v24, %v2827_v56  ;;  %v1485_v22 = vadd.f32 0.18741608, %v1484_v31  ;;  %v2124_v37 = vmul.f32 %v2123_v49, %v9973_v52  ;;  %v2763_v6 = vadd.f32 0.05243302, %v7920_v42 }
 0x488   :  { %v4051_v55 = vpop.eup %4050  ;;  %v2833_v35 = vmul.f32 %v2832_v20, %v2808_v25  ;;  %v1496_v15 = vadd.f32 0.4994258, %v1495_v29  ;;  %v2136_v58 = vadd.f32 0.4994258, %v2135_v1  ;;  %v8108_v36 = vadd.f32 0.05243302, %v7895_v51 }
 0x489   :  { %v3460_v39 = vmul.f32 %v4051_v55, %v8057_v46  ;;  %v8111_v38 = vadd.f32 0.112945676, %v7899_v57  ;;  %v8114_v47 = vadd.f32 0.05243302, %v7907_v17  ;;  %vm3464_vm10 = vweird.f32 %v8057_v46  ;;  %v10020_v17 = vld [vmem:[#allocation137_spill] sm:$0xff] }
 0x48a   :  { %v3468_v50 = vand.u32 2147483647, %v8057_v46  ;;  %v1497_v25 = vmul.f32 %v1496_v15, %v9963_v28  ;;  %v2137_v42 = vmul.f32 %v2136_v58, %v9973_v52  ;;  %v3470_v24 = vand.u32 2147483648, %v8057_v46  ;;  %v10026_v58 = vld [vmem:[#allocation68_spill] sm:$0xff] }
 0x48b   :  { %v3461_v30 = vsub.f32 1.0, %v3460_v39  ;;  %v1486_v51 = vmul.f32 %v1485_v22, %v9963_v28  ;;  %v2125_v3 = vadd.f32 0.18741608, %v2124_v37  ;;  %v3891_v44 = vclamps-f32 %v2833_v35, 1.0  ;;  %v10024_v37 = vld [vmem:[#allocation24_spill] sm:$0xff] }
 0x48c   :  { %v8122_v57 = vadd.f32 1.0, %v1497_v25  ;;  %v8124_v48 = vadd.f32 1.0, %v2137_v42  ;;  %v2764_v21 = vmul.f32 %v2763_v6, %v10020_v17  ;;  %vm3465_vm11 = vweird.f32 %v4051_v55  ;;  %v10025_v6 = vld [vmem:[#allocation118_spill] sm:$0xff] }
 0x48d   :  { %v3462_v49 = vmul.f32 %v4051_v55, %v3461_v30  ;;  %v3697_v31 = vadd.f32 %v3649_v12, %v3633_v59  ;;  %v8128_v23 = vadd.f32 0.05243302, %v7940_v18  ;;  %vm8130_vm12 = vcmp.eq.f32.partialorder %v3468_v50, 8.507059e+37  ;;  %vm3466_vm13 = vmor %vm3464_vm10, %vm3465_vm11  ;;  %v10023_v12 = vld [vmem:[#allocation134_spill] sm:$0xff] }
 0x48e   :  { %v3403_v28 = vadd.f32 0.05243302, %v7977_v61  ;;  %4052 = vrcp.f32 %v8122_v57  ;;  %v2769_v9 = vmul.f32 3.8918573e-05, %v10020_v17  ;;  %v1487_v56 = vadd.f32 1.1283791, %v1486_v51 }
 0x48f   :  { %v3463_v1 = vadd.f32 %v4051_v55, %v3462_v49  ;;  %v2126_v53 = vmul.f32 %v2125_v3, %v9973_v52  ;;  %4054 = vrcp.f32 %v8124_v48  ;;  %v3471_v18 = vor.u32 1.1754944e-38, %v3470_v24  ;;  %v10027_v25 = vld [vmem:[#allocation142_spill] sm:$0xff] }
 0x490   :  { %v3601_v59 = vadd.f32 1.0, %v3891_v44  ;;  %v8142_v20 = vadd.f32 0.05243302, %v10023_v12  ;;  %v2765_v22 = vadd.f32 0.18741608, %v2764_v21  ;;  %v3404_v42 = vmul.f32 %v3403_v28, %v10027_v25  ;;  %v10029_v21 = vld [vmem:[#allocation40_spill] sm:$0xff] }
 0x491   :  { %v3467_v61 = vsel %vm3466_vm13, %v4051_v55, %v3463_v1  ;;  %v8145_v35 = vadd.f32 0.112945676, %v10024_v37  ;;  %v8148_v15 = vadd.f32 0.05243302, %v10025_v6  ;;  %v8151_v52 = vadd.f32 0.112945676, %v10026_v58 }
 0x492   :  { %v3472_v46 = vsel %vm8130_vm12, %v3471_v18, %v3467_v61  ;;  %v1508_v39 = vand.u32 2147483647, %v8122_v57  ;;  %v2770_v50 = vadd.f32 0.001143296, %v2769_v9  ;;  %v10028_v55 = vld [vmem:[#allocation12_spill] sm:$0xff]  ;;  %v3665_v49 = vmul.f32 %v3601_v59, %v10029_v21 }
 0x493   :  { %v3473_v30 = vmul.f32 %v3472_v46, %v8040_v54  ;;  %v1488_v24 = vmul.f32 %v1487_v56, %v10028_v55  ;;  %v2127_v51 = vadd.f32 1.1283791, %v2126_v53  ;;  %v3409_v3 = vmul.f32 3.8918573e-05, %v10027_v25 }
 0x494   :  { %v4053_v44 = vpop.eup %4052  ;;  %vm1504_vm14 = vweird.f32 %v8122_v57  ;;  %v2766_v29 = vmul.f32 %v2765_v22, %v10020_v17  ;;  %v2771_v1 = vmul.f32 %v2770_v50, %v10020_v17  ;;  %v1510_v54 = vand.u32 2147483648, %v8122_v57 }
 0x495   :  { %v4055_v18 = vpop.eup %4054  ;;  %v3907_v9 = vclamps-f32 %v3473_v30, 1.0  ;;  %v1500_v28 = vmul.f32 %v4053_v44, %v8122_v57  ;;  %v3410_v12 = vadd.f32 0.001143296, %v3409_v3  ;;  %v3713_v56 = vadd.f32 %v3697_v31, %v3665_v49  ;;  %v10032_v31 = vld [vmem:[#allocation25_spill] sm:$0xff] }
 0x496   :  { %vm8166_vm15 = vcmp.eq.f32.partialorder %v1508_v39, 8.507059e+37  ;;  %v2140_v59 = vmul.f32 %v4055_v18, %v8124_v48  ;;  %v2772_v61 = vadd.f32 0.014752088, %v2771_v1  ;;  %v3405_v22 = vadd.f32 0.18741608, %v3404_v42 }
 0x497   :  { %v3617_v37 = vadd.f32 1.0, %v3907_v9  ;;  %v1501_v6 = vsub.f32 1.0, %v1500_v28  ;;  %v3411_v58 = vmul.f32 %v3410_v12, %v10027_v25  ;;  %vm2144_vm1 = vweird.f32 %v8124_v48 }
 0x498   :  { %v2141_v46 = vsub.f32 1.0, %v2140_v59  ;;  %v2150_v50 = vand.u32 2147483648, %v8124_v48  ;;  %v2773_v30 = vmul.f32 %v2772_v61, %v10020_v17  ;;  %vm1505_vm2 = vweird.f32 %v4053_v44 }
 0x499   :  { %v3681_v39 = vmul.f32 %v3617_v37, %v10032_v31  ;;  %v1502_v55 = vmul.f32 %v4053_v44, %v1501_v6  ;;  %v3412_v3 = vadd.f32 0.014752088, %v3411_v58  ;;  %vm2145_vm3 = vweird.f32 %v4055_v18  ;;  %vm1506_vm4 = vmor %vm1504_vm14, %vm1505_vm2 }
 0x49a   :  { %v2142_v21 = vmul.f32 %v4055_v18, %v2141_v46  ;;  %v2148_v49 = vand.u32 2147483647, %v8124_v48  ;;  %v2774_v1 = vadd.f32 0.112945676, %v2773_v30  ;;  %v3406_v28 = vmul.f32 %v3405_v22, %v10027_v25  ;;  %vm2146_vm5 = vmor %vm2144_vm1, %vm2145_vm3  ;;  %v10034_v48 = vld [vmem:[#allocation18_spill] sm:$0xff] }
 0x49b   :  { %v3729_v42 = vadd.f32 %v3713_v56, %v3681_v39  ;;  %v1503_v9 = vadd.f32 %v4053_v44, %v1502_v55  ;;  %v3413_v12 = vmul.f32 %v3412_v3, %v10027_v25  ;;  %v1511_v59 = vor.u32 1.1754944e-38, %v1510_v54 }
 0x49c   :  { %v2143_v61 = vadd.f32 %v4055_v18, %v2142_v21  ;;  %v2767_v37 = vadd.f32 1.1283791, %v2766_v29  ;;  %v2775_v6 = vmul.f32 %v2774_v1, %v10020_v17  ;;  %v2151_v30 = vor.u32 1.1754944e-38, %v2150_v50  ;;  %v10035_v21 = vld [vmem:[#allocation84_spill] sm:$0xff] }
 0x49d   :  { %v3745_v58 = vmul.f32 0.25, %v3729_v42  ;;  %v1507_v46 = vsel %vm1506_vm4, %v4053_v44, %v1503_v9  ;;  %v3414_v56 = vadd.f32 0.112945676, %v3413_v12  ;;  %vm2149_vm6 = vcmp.eq.f32.partialorder %v2148_v49, 8.507059e+37  ;;  %v10033_v44 = vld [vmem:[#allocation78_spill] sm:$0xff]  ;;  %v10036_v49 = vld [vmem:[#allocation93_spill] sm:$0xff] }
 0x49e   :  { %v1512_v22 = vsel %vm8166_vm15, %v1511_v59, %v1507_v46  ;;  %v2147_v31 = vsel %vm2146_vm5, %v4055_v18, %v2143_v61  ;;  %v2776_v39 = vadd.f32 0.4994258, %v2775_v6  ;;  %v3407_v54 = vadd.f32 1.1283791, %v3406_v28  ;;  %v10038_v6 = vld [vmem:[#allocation90_spill] sm:$0xff] }
 0x49f   :  { %3809 = vrot.lane.b32.xlu2 %v3745_v58, %s4161_s10  ;;  %v1513_v57 = vmul.f32 %v1512_v22, %v1488_v24  ;;  %v2152_v29 = vsel %vm2149_vm6, %v2151_v30, %v2147_v31  ;;  %v3415_v55 = vmul.f32 %v3414_v56, %v10027_v25  ;;  %v8189_v3 = vadd.f32 0.05243302, %v10033_v44  ;;  %v10037_v24 = vld [vmem:[#allocation99_spill] sm:$0xff] }
 0x4a0   :  { %v8192_v50 = vadd.f32 0.112945676, %v10034_v48  ;;  %v2128_v53 = vmul.f32 %v2127_v51, %v10035_v21  ;;  %v2777_v18 = vmul.f32 %v2776_v39, %v10020_v17  ;;  %v8197_v1 = vadd.f32 0.05243302, %v10036_v49  ;;  %v10039_v51 = vld [vmem:[#allocation111_spill] sm:$0xff]  ;;  %v10048_v49 = vld [vmem:[#allocation130_spill] sm:$0xff] }
 0x4a1   :  { %v8200_v42 = vadd.f32 0.05243302, %v8019_v62  ;;  %v8203_v9 = vmul.f32 %v2767_v37, %v10037_v24  ;;  %v3416_v28 = vadd.f32 0.4994258, %v3415_v55  ;;  %v3858_v12 = vclamps-f32 %v1513_v57, 1.0  ;;  %v10040_v37 = vld [vmem:[#allocation91_spill] sm:$0xff] }
 0x4a2   :  { %v2153_v59 = vmul.f32 %v2152_v29, %v2128_v53  ;;  %v8205_v61 = vadd.f32 1.0, %v2777_v18  ;;  %v8209_v58 = vmul.f32 %v8005_v34, %v10038_v6  ;;  %v8212_v17 = vmul.f32 %v3407_v54, %v10039_v51  ;;  %v10041_v34 = vld [vmem:[#allocation19_spill] sm:$0xff]  ;;  %v10043_v57 = vld [vmem:[#allocation124_spill] sm:$0xff]  ;;  %v10047_v18 = vld [vmem:[#allocation129_spill] sm:$0xff] }
 0x4a3   :  { %v3417_v46 = vmul.f32 %v3416_v28, %v10027_v25  ;;  %v8217_v62 = vmul.f32 %v8008_v63, %v10038_v6  ;;  %v8221_v30 = vmul.f32 %v8011_v60, %v10040_v37  ;;  %v8226_v56 = vmul.f32 %v8015_v14, %v10040_v37  ;;  %v10042_v63 = vld [vmem:[#allocation123_spill] sm:$0xff]  ;;  %v10049_v28 = vld [vmem:[#allocation48_spill] sm:$0xff] }
 0x4a4   :  { %4056 = vrcp.f32 %v8205_v61  ;;  %v1444_v22 = vmul.f32 %v8022_v45, %v10041_v34  ;;  %v1455_v25 = vmul.f32 %v8025_v11, %v10041_v34  ;;  %v8236_v39 = vmul.f32 %v8033_v43, %v10042_v63  ;;  %v10044_v11 = vld [vmem:[#allocation125_spill] sm:$0xff] }
 0x4a5   :  { %v8232_v31 = vadd.f32 1.0, %v3417_v46  ;;  %v8240_v60 = vmul.f32 %v8036_v2, %v10042_v63  ;;  %v8244_v14 = vmul.f32 %v8045_v8, %v10043_v57  ;;  %v3874_v29 = vclamps-f32 %v2153_v59, 1.0  ;;  %v10045_v8 = vld [vmem:[#allocation126_spill] sm:$0xff] }
 0x4a6   :  { %v3568_v54 = vadd.f32 1.0, %v3858_v12  ;;  %v8248_v45 = vmul.f32 %v8048_v33, %v10043_v57  ;;  %v8252_v55 = vmul.f32 %v8051_v26, %v10044_v11  ;;  %v2788_v43 = vand.u32 2147483647, %v8205_v61  ;;  %v10046_v26 = vld [vmem:[#allocation33_spill] sm:$0xff] }
 0x4a7   :  { %4058 = vrcp.f32 %v8232_v31  ;;  %v8258_v2 = vmul.f32 %v8060_v7, %v10044_v11  ;;  %v8262_v44 = vmul.f32 %v8063_v40, %v10045_v8  ;;  %v2790_v48 = vand.u32 2147483648, %v8205_v61 }
 0x4a8   :  { %v8267_v33 = vmul.f32 %v8068_v10, %v10045_v8  ;;  %v2084_v21 = vmul.f32 %v8071_v13, %v10046_v26  ;;  %v2095_v53 = vmul.f32 %v8076_v5, %v10046_v26  ;;  %v8275_v7 = vmul.f32 %v8079_v32, %v10047_v18  ;;  %v10050_v32 = vld [vmem:[#allocation131_spill] sm:$0xff] }
 0x4a9   :  { %v8279_v40 = vmul.f32 %v8086_v19, %v10047_v18  ;;  %v8283_v24 = vmul.f32 %v8089_v0, %v10048_v49  ;;  %v8287_v10 = vmul.f32 %v8094_v4, %v10048_v49  ;;  %vm2784_vm7 = vweird.f32 %v8205_v61  ;;  %v10053_v4 = vld [vmem:[#allocation136_spill] sm:$0xff] }
 0x4aa   :  { %v4057_v13 = vpop.eup %4056  ;;  %v3584_v5 = vadd.f32 1.0, %v3874_v29  ;;  %v3632_v12 = vmul.f32 %v3568_v54, %v10049_v28  ;;  %v8293_v59 = vmul.f32 %v8097_v16, %v10050_v32  ;;  %vm8296_vm8 = vcmp.eq.f32.partialorder %v2788_v43, 8.507059e+37  ;;  %v10054_v18 = vld [vmem:[#allocation132_spill] sm:$0xff] }
 0x4ab   :  { %v2780_v19 = vmul.f32 %v4057_v13, %v8205_v61  ;;  %v8302_v0 = vmul.f32 %v8102_v41, %v10050_v32  ;;  %v2724_v46 = vmul.f32 %v8114_v47, %v10053_v4  ;;  %v2791_v29 = vor.u32 1.1754944e-38, %v2790_v48 }
 0x4ac   :  { %v8308_v54 = vmul.f32 %v8108_v36, %v10054_v18  ;;  %v1445_v16 = vadd.f32 0.18741608, %v1444_v22  ;;  %v1456_v28 = vadd.f32 0.4994258, %v1455_v25  ;;  %vm3424_vm9 = vweird.f32 %v8232_v31 }
 0x4ad   :  { %v4059_v8 = vpop.eup %4058  ;;  %v2781_v11 = vsub.f32 1.0, %v2780_v19  ;;  %v8313_v43 = vmul.f32 %v8111_v38, %v10054_v18  ;;  %v2096_v41 = vadd.f32 0.4994258, %v2095_v53  ;;  %vm2785_vm10 = vweird.f32 %v4057_v13  ;;  %v10056_v18 = vld [vmem:[#allocation60_spill] sm:$0xff] }
 0x4ae   :  { %v3420_v32 = vmul.f32 %v4059_v8, %v8232_v31  ;;  %v1457_v47 = vmul.f32 %v1456_v28, %v10041_v34  ;;  %v2085_v48 = vadd.f32 0.18741608, %v2084_v21  ;;  %v1446_v36 = vmul.f32 %v1445_v16, %v10041_v34  ;;  %vm2786_vm12 = vmor %vm2784_vm7, %vm2785_vm10  ;;  %v10058_v28 = vld [vmem:[#allocation114_spill] sm:$0xff] }
 0x4af   :  { %10055 = vst [vmem:[#allocation69_spill] sm:$0xff] %v8313_v43  ;;  %v2782_v37 = vmul.f32 %v4057_v13, %v2781_v11  ;;  %v2097_v22 = vmul.f32 %v2096_v41, %v10046_v26  ;;  %v2725_v25 = vadd.f32 0.18741608, %v2724_v46  ;;  %v3428_v6 = vand.u32 2147483647, %v8232_v31  ;;  %v10057_v46 = vld [vmem:[#allocation139_spill] sm:$0xff] }
 0x4b0   :  { %v3421_v19 = vsub.f32 1.0, %v3420_v32  ;;  %v3430_v63 = vand.u32 2147483648, %v8232_v31  ;;  %v8321_v38 = vadd.f32 1.0, %v1457_v47  ;;  %vm3425_vm11 = vweird.f32 %v4059_v8 }
 0x4b1   :  { %v2783_v53 = vadd.f32 %v4057_v13, %v2782_v37  ;;  %v3648_v43 = vmul.f32 %v3584_v5, %v10056_v18  ;;  %v8324_v49 = vadd.f32 1.0, %v2097_v22  ;;  %v2086_v11 = vmul.f32 %v2085_v48, %v10046_v26  ;;  %vm3426_vm13 = vmor %vm3424_vm9, %vm3425_vm11  ;;  %v10059_v48 = vld [vmem:[#allocation141_spill] sm:$0xff] }
 0x4b2   :  { %v3422_v34 = vmul.f32 %v4059_v8, %v3421_v19  ;;  %4060 = vrcp.f32 %v8321_v38  ;;  %v2729_v21 = vmul.f32 3.8918573e-05, %v10053_v4  ;;  %v8334_v37 = vmul.f32 %v8128_v23, %v10057_v46 }
 0x4b3   :  { %v2787_v32 = vsel %vm2786_vm12, %v4057_v13, %v2783_v53  ;;  %v1447_v16 = vadd.f32 1.1283791, %v1446_v36  ;;  %v2726_v18 = vmul.f32 %v2725_v25, %v10053_v4  ;;  %v8341_v41 = vmul.f32 %v8142_v20, %v10058_v28  ;;  %v10060_v25 = vld [vmem:[#allocation73_spill] sm:$0xff] }
 0x4b4   :  { %v2792_v5 = vsel %vm8296_vm8, %v2791_v29, %v2787_v32  ;;  %v3423_v61 = vadd.f32 %v4059_v8, %v3422_v34  ;;  %4062 = vrcp.f32 %v8324_v49  ;;  %vm3429_vm14 = vcmp.eq.f32.partialorder %v3428_v6, 8.507059e+37 }
 0x4b5   :  { %v2793_v26 = vmul.f32 %v2792_v5, %v8203_v9  ;;  %v3431_v23 = vor.u32 1.1754944e-38, %v3430_v63  ;;  %v3696_v13 = vadd.f32 %v3648_v43, %v3632_v12  ;;  %v3364_v51 = vmul.f32 %v8197_v1, %v10059_v48 }
 0x4b6   :  { %v3427_v47 = vsel %vm3426_vm13, %v4059_v8, %v3423_v61  ;;  %v2087_v29 = vadd.f32 1.1283791, %v2086_v11  ;;  %v2730_v36 = vadd.f32 0.001143296, %v2729_v21  ;;  %v1448_v19 = vmul.f32 %v1447_v16, %v10060_v25 }
 0x4b7   :  { %v3890_v22 = vclamps-f32 %v2793_v26, 1.0  ;;  %v3432_v20 = vsel %vm3429_vm14, %v3431_v23, %v3427_v47  ;;  %v8351_v53 = vadd.f32 1.1283791, %v2726_v18  ;;  %vm1464_vm15 = vweird.f32 %v8321_v38 }
 0x4b8   :  { %v4061_v9 = vpop.eup %4060  ;;  %v3433_v34 = vmul.f32 %v3432_v20, %v8212_v17  ;;  %v2731_v6 = vmul.f32 %v2730_v36, %v10053_v4  ;;  %v3369_v31 = vmul.f32 3.8918573e-05, %v10059_v48  ;;  %v1468_v8 = vand.u32 2147483647, %v8321_v38  ;;  %v10061_v17 = vld [vmem:[#allocation39_spill] sm:$0xff] }
 0x4b9   :  { %v3600_v63 = vadd.f32 1.0, %v3890_v22  ;;  %v1460_v1 = vmul.f32 %v4061_v9, %v8321_v38  ;;  %v1470_v12 = vand.u32 2147483648, %v8321_v38  ;;  %vm2104_vm1 = vweird.f32 %v8324_v49 }
 0x4ba   :  { %v4063_v43 = vpop.eup %4062  ;;  %v3906_v11 = vclamps-f32 %v3433_v34, 1.0  ;;  %v2732_v21 = vadd.f32 0.014752088, %v2731_v6  ;;  %v3370_v32 = vadd.f32 0.001143296, %v3369_v31  ;;  %v2110_v61 = vand.u32 2147483648, %v8324_v49 }
 0x4bb   :  { %v3664_v16 = vmul.f32 %v3600_v63, %v10061_v17  ;;  %v1461_v18 = vsub.f32 1.0, %v1460_v1  ;;  %v2100_v5 = vmul.f32 %v4063_v43, %v8324_v49  ;;  %v3365_v47 = vadd.f32 0.18741608, %v3364_v51  ;;  %v10062_v34 = vld [vmem:[#allocation22_spill] sm:$0xff] }
 0x4bc   :  { %v3616_v26 = vadd.f32 1.0, %v3906_v11  ;;  %v2733_v23 = vmul.f32 %v2732_v21, %v10053_v4  ;;  %v3371_v36 = vmul.f32 %v3370_v32, %v10059_v48  ;;  %vm1465_vm2 = vweird.f32 %v4061_v9 }
 0x4bd   :  { %v3712_v22 = vadd.f32 %v3696_v13, %v3664_v16  ;;  %v1462_v20 = vmul.f32 %v4061_v9, %v1461_v18  ;;  %v2101_v25 = vsub.f32 1.0, %v2100_v5  ;;  %vm8367_vm3 = vcmp.eq.f32.partialorder %v1468_v8, 8.507059e+37  ;;  %vm1466_vm5 = vmor %vm1464_vm15, %vm1465_vm2 }
 0x4be   :  { %v3680_v6 = vmul.f32 %v3616_v26, %v10062_v34  ;;  %v2734_v63 = vadd.f32 0.112945676, %v2733_v23  ;;  %v3372_v1 = vadd.f32 0.014752088, %v3371_v36  ;;  %vm2105_vm4 = vweird.f32 %v4063_v43  ;;  %v10066_v34 = vld [vmem:[#allocation115_spill] sm:$0xff] }
 0x4bf   :  { %v1463_v17 = vadd.f32 %v4061_v9, %v1462_v20  ;;  %v2102_v46 = vmul.f32 %v4063_v43, %v2101_v25  ;;  %v2108_v11 = vand.u32 2147483647, %v8324_v49  ;;  %v1471_v13 = vor.u32 1.1754944e-38, %v1470_v12  ;;  %vm2106_vm6 = vmor %vm2104_vm1, %vm2105_vm4  ;;  %v10065_v12 = vld [vmem:[#allocation83_spill] sm:$0xff] }
 0x4c0   :  { %v3728_v51 = vadd.f32 %v3712_v22, %v3680_v6  ;;  %v2735_v21 = vmul.f32 %v2734_v63, %v10053_v4  ;;  %v3373_v32 = vmul.f32 %v3372_v1, %v10059_v48  ;;  %v2111_v18 = vor.u32 1.1754944e-38, %v2110_v61 }
 0x4c1   :  { %v1467_v8 = vsel %vm1466_vm5, %v4061_v9, %v1463_v17  ;;  %v2103_v16 = vadd.f32 %v4063_v43, %v2102_v46  ;;  %v3366_v5 = vmul.f32 %v3365_v47, %v10059_v48  ;;  %v2088_v20 = vmul.f32 %v2087_v29, %v10065_v12  ;;  %v10067_v29 = vld [vmem:[#allocation116_spill] sm:$0xff] }
 0x4c2   :  { %v3744_v26 = vmul.f32 0.25, %v3728_v51  ;;  %v1472_v23 = vsel %vm8367_vm3, %v1471_v13, %v1467_v8  ;;  %v2736_v36 = vadd.f32 0.4994258, %v2735_v21  ;;  %v3374_v38 = vadd.f32 0.112945676, %v3373_v32  ;;  %v10069_v21 = vld [vmem:[#allocation110_spill] sm:$0xff] }
 0x4c3   :  { %v1473_v22 = vmul.f32 %v1472_v23, %v1448_v19  ;;  %v2107_v25 = vsel %vm2106_vm6, %v4063_v43, %v2103_v16  ;;  %vm2109_vm7 = vcmp.eq.f32.partialorder %v2108_v11, 8.507059e+37  ;;  %v2895_v46 = vmul.f32 %v8145_v35, %v10058_v28 }
 0x4c4   :  { %3807 = vrot.lane.b32.xlu1 %v3744_v26, %s4161_s10  ;;  %v2112_v9 = vsel %vm2109_vm7, %v2111_v18, %v2107_v25  ;;  %v2737_v61 = vmul.f32 %v2736_v36, %v10053_v4  ;;  %v3375_v47 = vmul.f32 %v3374_v38, %v10059_v48  ;;  %v8389_v49 = vmul.f32 %v8148_v15, %v10066_v34 }
 0x4c5   :  { %v8393_v19 = vmul.f32 %v8151_v52, %v10066_v34  ;;  %v8397_v43 = vmul.f32 %v8189_v3, %v10067_v29  ;;  %v2113_v6 = vmul.f32 %v2112_v9, %v2088_v20  ;;  %v8401_v35 = vmul.f32 %v8192_v50, %v10067_v29  ;;  %v10068_v52 = vld [vmem:[#allocation98_spill] sm:$0xff]  ;;  %v10073_v20 = vld [vmem:[#allocation59_spill] sm:$0xff] }
 0x4c6   :  { %v8403_v4 = vadd.f32 1.0, %v2737_v61  ;;  %v3367_v31 = vadd.f32 1.1283791, %v3366_v5  ;;  %v3376_v63 = vadd.f32 0.4994258, %v3375_v47  ;;  %v8407_v15 = vmul.f32 %v8200_v42, %v10012_v27  ;;  %v10074_v61 = vld [vmem:[#allocation130_spill] sm:$0xff] }
 0x4c7   :  { %v3857_v1 = vclamps-f32 %v1473_v22, 1.0  ;;  %v8411_v17 = vmul.f32 %v8351_v53, %v10068_v52  ;;  %v8414_v3 = vadd.f32 0.18741608, %v8209_v58  ;;  %v3873_v11 = vclamps-f32 %v2113_v6, 1.0  ;;  %v10075_v6 = vld [vmem:[#allocation69_spill] sm:$0xff] }
 0x4c8   :  { %4064 = vrcp.f32 %v8403_v4  ;;  %v8418_v50 = vadd.f32 0.4994258, %v8217_v62  ;;  %v8421_v51 = vadd.f32 0.18741608, %v8221_v30  ;;  %v3377_v42 = vmul.f32 %v3376_v63, %v10059_v48 }
 0x4c9   :  { %v8425_v13 = vadd.f32 0.4994258, %v8226_v56  ;;  %v8428_v53 = vadd.f32 0.18741608, %v8236_v39  ;;  %v1616_v58 = vadd.f32 0.4994258, %v8248_v45  ;;  %v8432_v32 = vmul.f32 %v3367_v31, %v10069_v21 }
 0x4ca   :  { %v8435_v8 = vadd.f32 0.4994258, %v8240_v60  ;;  %v1605_v62 = vadd.f32 0.18741608, %v8244_v14  ;;  %v8439_v30 = vadd.f32 0.18741608, %v8252_v55  ;;  %vm2744_vm8 = vweird.f32 %v8403_v4 }
 0x4cb   :  { %v2748_v48 = vand.u32 2147483647, %v8403_v4  ;;  %v8442_v56 = vadd.f32 1.0, %v3377_v42  ;;  %v3567_v16 = vadd.f32 1.0, %v3857_v1  ;;  %v8445_v39 = vadd.f32 0.4994258, %v8258_v2 }
 0x4cc   :  { %v2750_v45 = vand.u32 2147483648, %v8403_v4  ;;  %v3583_v18 = vadd.f32 1.0, %v3873_v11  ;;  %v8449_v5 = vadd.f32 0.18741608, %v8262_v44  ;;  %v8452_v60 = vadd.f32 0.4994258, %v8267_v33 }
 0x4cd   :  { %4066 = vrcp.f32 %v8442_v56  ;;  %v8456_v14 = vadd.f32 0.18741608, %v8275_v7  ;;  %v2256_v55 = vadd.f32 0.4994258, %v8287_v10  ;;  %v1617_v26 = vmul.f32 %v1616_v58, %v10043_v57  ;;  %v10072_v10 = vld [vmem:[#allocation47_spill] sm:$0xff] }
 0x4ce   :  { %v4065_v2 = vpop.eup %4064  ;;  %v8461_v23 = vadd.f32 0.4994258, %v8279_v40  ;;  %v2245_v36 = vadd.f32 0.18741608, %v8283_v24  ;;  %v2896_v44 = vadd.f32 0.4994258, %v2895_v46  ;;  %v1606_v38 = vmul.f32 %v1605_v62, %v10043_v57 }
 0x4cf   :  { %v2740_v33 = vmul.f32 %v4065_v2, %v8403_v4  ;;  %vm8467_vm9 = vcmp.eq.f32.partialorder %v2748_v48, 8.507059e+37  ;;  %v3631_v22 = vmul.f32 %v3567_v16, %v10072_v10  ;;  %v2751_v12 = vor.u32 1.1754944e-38, %v2750_v45 }
 0x4d0   :  { %v3647_v25 = vmul.f32 %v3583_v18, %v10073_v20  ;;  %v8474_v40 = vadd.f32 0.18741608, %v8293_v59  ;;  %v8477_v24 = vadd.f32 0.4994258, %v8302_v0  ;;  %v8480_v46 = vadd.f32 0.18741608, %v8308_v54 }
 0x4d1   :  { %v2741_v57 = vsub.f32 1.0, %v2740_v33  ;;  %v8482_v9 = vadd.f32 1.0, %v1617_v26  ;;  %v2257_v47 = vmul.f32 %v2256_v55, %v10074_v61  ;;  %v8486_v31 = vadd.f32 0.4994258, %v10075_v6 }
 0x4d2   :  { %v8489_v63 = vadd.f32 0.18741608, %v8334_v37  ;;  %v2246_v59 = vmul.f32 %v2245_v36, %v10074_v61  ;;  %v2897_v1 = vmul.f32 %v2896_v44, %v10058_v28  ;;  %vm2745_vm10 = vweird.f32 %v4065_v2  ;;  %v10076_v36 = vld [vmem:[#allocation34_spill] sm:$0xff] }
 0x4d3   :  { %v4067_v0 = vpop.eup %4066  ;;  %v2742_v52 = vmul.f32 %v4065_v2, %v2741_v57  ;;  %v2885_v54 = vadd.f32 0.18741608, %v8341_v41  ;;  %4068 = vrcp.f32 %v8482_v9  ;;  %vm3384_vm11 = vweird.f32 %v8442_v56  ;;  %vm2746_vm12 = vmor %vm2744_vm8, %vm2745_vm10 }
 0x4d4   :  { %v3380_v11 = vmul.f32 %v4067_v0, %v8442_v56  ;;  %v3388_v42 = vand.u32 2147483647, %v8442_v56  ;;  %v3390_v37 = vand.u32 2147483648, %v8442_v56  ;;  %v3695_v21 = vadd.f32 %v3647_v25, %v3631_v22  ;;  %v10079_v25 = vld [vmem:[#allocation75_spill] sm:$0xff] }
 0x4d5   :  { %v2743_v58 = vadd.f32 %v4065_v2, %v2742_v52  ;;  %v8500_v62 = vadd.f32 0.18741608, %v8389_v49  ;;  %v8502_v48 = vadd.f32 1.0, %v2257_v47  ;;  %v1607_v16 = vadd.f32 1.1283791, %v1606_v38 }
 0x4d6   :  { %v3381_v41 = vsub.f32 1.0, %v3380_v11  ;;  %v2247_v45 = vadd.f32 1.1283791, %v2246_v59  ;;  %v8506_v18 = vadd.f32 1.0, %v2897_v1  ;;  %v2886_v26 = vmul.f32 %v2885_v54, %v10058_v28 }
 0x4d7   :  { %v2747_v55 = vsel %vm2746_vm12, %v4065_v2, %v2743_v58  ;;  %4070 = vrcp.f32 %v8502_v48  ;;  %v3529_v44 = vmul.f32 3.8918573e-05, %v10076_v36  ;;  %vm3385_vm13 = vweird.f32 %v4067_v0 }
 0x4d8   :  { %v2752_v49 = vsel %vm8467_vm9, %v2751_v12, %v2747_v55  ;;  %v3382_v33 = vmul.f32 %v4067_v0, %v3381_v41  ;;  %v1628_v4 = vand.u32 2147483647, %v8482_v9  ;;  %vm8515_vm14 = vcmp.eq.f32.partialorder %v3388_v42, 8.507059e+37  ;;  %vm3386_vm15 = vmor %vm3384_vm11, %vm3385_vm13 }
 0x4d9   :  { %v4069_v10 = vpop.eup %4068  ;;  %v2753_v38 = vmul.f32 %v2752_v49, %v8411_v17  ;;  %v1630_v2 = vand.u32 2147483648, %v8482_v9  ;;  %4072 = vrcp.f32 %v8506_v18  ;;  %v3391_v20 = vor.u32 1.1754944e-38, %v3390_v37  ;;  %v10080_v17 = vld [vmem:[#allocation87_spill] sm:$0xff] }
 0x4da   :  { %v3383_v28 = vadd.f32 %v4067_v0, %v3382_v33  ;;  %v1608_v7 = vmul.f32 %v1607_v16, %v10079_v25  ;;  %v1620_v12 = vmul.f32 %v4069_v10, %v8482_v9  ;;  %vm1624_vm1 = vweird.f32 %v8482_v9  ;;  %v10083_v16 = vld [vmem:[#allocation38_spill] sm:$0xff] }
 0x4db   :  { %v3889_v57 = vclamps-f32 %v2753_v38, 1.0  ;;  %v2248_v61 = vmul.f32 %v2247_v45, %v10080_v17  ;;  %v3530_v47 = vadd.f32 0.001143296, %v3529_v44  ;;  %vm8527_vm2 = vcmp.eq.f32.partialorder %v1628_v4, 8.507059e+37 }
 0x4dc   :  { %v3387_v6 = vsel %vm3386_vm15, %v4067_v0, %v3383_v28  ;;  %v1621_v59 = vsub.f32 1.0, %v1620_v12  ;;  %v2887_v52 = vadd.f32 1.1283791, %v2886_v26  ;;  %v1631_v37 = vor.u32 1.1754944e-38, %v1630_v2 }
 0x4dd   :  { %v4071_v54 = vpop.eup %4070  ;;  %v3392_v11 = vsel %vm8515_vm14, %v3391_v20, %v3387_v6  ;;  %v3599_v42 = vadd.f32 1.0, %v3889_v57  ;;  %vm2264_vm3 = vweird.f32 %v8502_v48  ;;  %vm1625_vm4 = vweird.f32 %v4069_v10 }
 0x4de   :  { %v3393_v56 = vmul.f32 %v3392_v11, %v8432_v32  ;;  %v1622_v58 = vmul.f32 %v4069_v10, %v1621_v59  ;;  %v2260_v0 = vmul.f32 %v4071_v54, %v8502_v48  ;;  %v2268_v55 = vand.u32 2147483647, %v8502_v48  ;;  %vm1626_vm5 = vmor %vm1624_vm1, %vm1625_vm4 }
 0x4df   :  { %v4073_v41 = vpop.eup %4072  ;;  %v3663_v45 = vmul.f32 %v3599_v42, %v10083_v16  ;;  %v2270_v26 = vand.u32 2147483648, %v8502_v48  ;;  %v3531_v44 = vmul.f32 %v3530_v47, %v10076_v36  ;;  %vm2265_vm6 = vweird.f32 %v4071_v54  ;;  %v10085_v42 = vld [vmem:[#allocation102_spill] sm:$0xff] }
 0x4e0   :  { %v3905_v49 = vclamps-f32 %v3393_v56, 1.0  ;;  %v1623_v33 = vadd.f32 %v4069_v10, %v1622_v58  ;;  %v2261_v4 = vsub.f32 1.0, %v2260_v0  ;;  %v2900_v38 = vmul.f32 %v4073_v41, %v8506_v18  ;;  %vm2266_vm8 = vmor %vm2264_vm3, %vm2265_vm6 }
 0x4e1   :  { %v3711_v22 = vadd.f32 %v3695_v21, %v3663_v45  ;;  %v2908_v32 = vand.u32 2147483647, %v8506_v18  ;;  %v3532_v2 = vadd.f32 0.014752088, %v3531_v44  ;;  %vm2905_vm7 = vweird.f32 %v4073_v41  ;;  %v10084_v21 = vld [vmem:[#allocation20_spill] sm:$0xff] }
 0x4e2   :  { %v3615_v28 = vadd.f32 1.0, %v3905_v49  ;;  %v1627_v20 = vsel %vm1626_vm5, %v4069_v10, %v1623_v33  ;;  %v2262_v25 = vmul.f32 %v4071_v54, %v2261_v4  ;;  %v2901_v12 = vsub.f32 1.0, %v2900_v38 }
 0x4e3   :  { %v1632_v57 = vsel %vm8527_vm2, %v1631_v37, %v1627_v20  ;;  %v2910_v17 = vand.u32 2147483648, %v8506_v18  ;;  %v3533_v47 = vmul.f32 %v3532_v2, %v10076_v36  ;;  %vm2269_vm9 = vcmp.eq.f32.partialorder %v2268_v55, 8.507059e+37  ;;  %v10088_v20 = vld [vmem:[#allocation91_spill] sm:$0xff] }
 0x4e4   :  { %v3679_v6 = vmul.f32 %v3615_v28, %v10084_v21  ;;  %v1633_v9 = vmul.f32 %v1632_v57, %v1608_v7  ;;  %v2263_v59 = vadd.f32 %v4071_v54, %v2262_v25  ;;  %v2902_v11 = vmul.f32 %v4073_v41, %v2901_v12  ;;  %v10089_v12 = vld [vmem:[#allocation125_spill] sm:$0xff] }
 0x4e5   :  { %v2271_v10 = vor.u32 1.1754944e-38, %v2270_v26  ;;  %v2888_v56 = vmul.f32 %v2887_v52, %v10085_v42  ;;  %v3534_v1 = vadd.f32 0.112945676, %v3533_v47  ;;  %vm2904_vm10 = vweird.f32 %v8506_v18 }
 0x4e6   :  { %v3727_v37 = vadd.f32 %v3711_v22, %v3679_v6  ;;  %v2267_v58 = vsel %vm2266_vm8, %v4071_v54, %v2263_v59  ;;  %v2903_v0 = vadd.f32 %v4073_v41, %v2902_v11  ;;  %vm2906_vm11 = vmor %vm2904_vm10, %vm2905_vm7  ;;  %vm2909_vm12 = vcmp.eq.f32.partialorder %v2908_v32, 8.507059e+37  ;;  %v10086_v22 = vld [vmem:[#allocation123_spill] sm:$0xff]  ;;  %v10094_v59 = vld [vmem:[#allocation132_spill] sm:$0xff] }
 0x4e7   :  { %v2272_v16 = vsel %vm2269_vm9, %v2271_v10, %v2267_v58  ;;  %v2911_v7 = vor.u32 1.1754944e-38, %v2910_v17  ;;  %v3535_v45 = vmul.f32 %v3534_v1, %v10076_v36  ;;  %v3861_v48 = vclamps-f32 %v1633_v9, 1.0  ;;  %v10095_v10 = vld [vmem:[#allocation63_spill] sm:$0xff] }
 0x4e8   :  { %v3743_v44 = vmul.f32 0.25, %v3727_v37  ;;  %v2273_v49 = vmul.f32 %v2272_v16, %v2248_v61  ;;  %v2907_v55 = vsel %vm2906_vm11, %v4073_v41, %v2903_v0  ;;  %v2936_v26 = vadd.f32 0.4994258, %v8393_v19  ;;  %v10087_v41 = vld [vmem:[#allocation90_spill] sm:$0xff] }
 0x4e9   :  { %v2965_v52 = vadd.f32 0.18741608, %v8397_v43  ;;  %v2912_v33 = vsel %vm2909_vm12, %v2911_v7, %v2907_v55  ;;  %v3536_v54 = vadd.f32 0.4994258, %v3535_v45  ;;  %v2976_v18 = vadd.f32 0.4994258, %v8401_v35 }
 0x4ea   :  { %3798 = vrot.lane.b32.xlu0 %v3743_v44, %s4159_s8  ;;  %v3877_v4 = vclamps-f32 %v2273_v49, 1.0  ;;  %v2913_v38 = vmul.f32 %v2912_v33, %v2888_v56  ;;  %v1577_v32 = vmul.f32 %v8435_v8, %v10086_v22  ;;  %v3485_v2 = vadd.f32 0.18741608, %v8407_v15  ;;  %v10097_v45 = vld [vmem:[#allocation42_spill] sm:$0xff] }
 0x4eb   :  { %v3537_v61 = vmul.f32 %v3536_v54, %v10076_v36  ;;  %v8566_v19 = vmul.f32 %v8414_v3, %v10087_v41  ;;  %v8570_v43 = vmul.f32 %v8418_v50, %v10087_v41  ;;  %v3571_v28 = vadd.f32 1.0, %v3861_v48 }
 0x4ec   :  { %v8574_v35 = vmul.f32 %v8421_v51, %v10088_v20  ;;  %v8578_v8 = vmul.f32 %v8425_v13, %v10088_v20  ;;  %v1566_v15 = vmul.f32 %v8428_v53, %v10086_v22  ;;  %v3893_v36 = vclamps-f32 %v2913_v38, 1.0  ;;  %v10090_v51 = vld [vmem:[#allocation126_spill] sm:$0xff]  ;;  %v10091_v13 = vld [vmem:[#allocation129_spill] sm:$0xff] }
 0x4ed   :  { %v8582_v25 = vadd.f32 1.0, %v3537_v61  ;;  %v3587_v3 = vadd.f32 1.0, %v3877_v4  ;;  %v8586_v50 = vmul.f32 %v8439_v30, %v10089_v12  ;;  %v8590_v57 = vmul.f32 %v8445_v39, %v10089_v12  ;;  %v10092_v39 = vld [vmem:[#allocation131_spill] sm:$0xff]  ;;  %v10101_v20 = vld [vmem:[#allocation86_spill] sm:$0xff] }
 0x4ee   :  { %v8594_v17 = vmul.f32 %v8449_v5, %v10090_v51  ;;  %v2217_v47 = vmul.f32 %v8461_v23, %v10091_v13  ;;  %v8598_v53 = vadd.f32 1.0, %v1577_v32  ;;  %v8603_v21 = vmul.f32 %v8452_v60, %v10090_v51  ;;  %v10093_v5 = vld [vmem:[#allocation51_spill] sm:$0xff] }
 0x4ef   :  { %4074 = vrcp.f32 %v8582_v25  ;;  %v2206_v30 = vmul.f32 %v8456_v14, %v10091_v13  ;;  %v8609_v6 = vmul.f32 %v8474_v40, %v10092_v39  ;;  %v3635_v9 = vmul.f32 %v3571_v28, %v10093_v5  ;;  %v10096_v40 = vld [vmem:[#allocation139_spill] sm:$0xff] }
 0x4f0   :  { %v8614_v23 = vmul.f32 %v8477_v24, %v10092_v39  ;;  %v8618_v11 = vmul.f32 %v8480_v46, %v10094_v59  ;;  %4076 = vrcp.f32 %v8598_v53  ;;  %v3603_v60 = vadd.f32 1.0, %v3893_v36 }
 0x4f1   :  { %v3651_v42 = vmul.f32 %v3587_v3, %v10095_v10  ;;  %v8624_v14 = vmul.f32 %v8486_v31, %v10094_v59  ;;  %v2846_v56 = vmul.f32 %v8489_v63, %v10096_v40  ;;  %v8630_v24 = vmul.f32 %v8500_v62, %v10066_v34 }
 0x4f2   :  { %v8633_v1 = vmul.f32 %v2936_v26, %v10066_v34  ;;  %v1567_v46 = vadd.f32 1.1283791, %v1566_v15  ;;  %v8635_v37 = vadd.f32 1.0, %v2217_v47  ;;  %v3548_v58 = vand.u32 2147483647, %v8582_v25 }
 0x4f3   :  { %v3550_v0 = vand.u32 2147483648, %v8582_v25  ;;  %v8640_v31 = vmul.f32 %v2965_v52, %v10067_v29  ;;  %v2849_v16 = vmul.f32 3.8918573e-05, %v10096_v40  ;;  %v8644_v63 = vmul.f32 %v2976_v18, %v10067_v29  ;;  %v10098_v52 = vld [vmem:[#allocation74_spill] sm:$0xff] }
 0x4f4   :  { %v3486_v62 = vmul.f32 %v3485_v2, %v10012_v27  ;;  %v2207_v7 = vadd.f32 1.1283791, %v2206_v30  ;;  %4078 = vrcp.f32 %v8635_v37  ;;  %vm3544_vm13 = vweird.f32 %v8582_v25 }
 0x4f5   :  { %v4075_v34 = vpop.eup %4074  ;;  %v3667_v44 = vmul.f32 %v3603_v60, %v10097_v45  ;;  %v3699_v48 = vadd.f32 %v3651_v42, %v3635_v9  ;;  %v2850_v49 = vadd.f32 0.001143296, %v2849_v16  ;;  %v1568_v33 = vmul.f32 %v1567_v46, %v10098_v52 }
 0x4f6   :  { %v4077_v55 = vpop.eup %4076  ;;  %v3540_v26 = vmul.f32 %v4075_v34, %v8582_v25  ;;  %v1588_v29 = vand.u32 2147483647, %v8598_v53  ;;  %v3489_v54 = vmul.f32 3.8918573e-05, %v10012_v27  ;;  %vm8654_vm14 = vcmp.eq.f32.partialorder %v3548_v58, 8.507059e+37 }
 0x4f7   :  { %v3551_v4 = vor.u32 1.1754944e-38, %v3550_v0  ;;  %v1580_v38 = vmul.f32 %v4077_v55, %v8598_v53  ;;  %v2851_v22 = vmul.f32 %v2850_v49, %v10096_v40  ;;  %vm1584_vm15 = vweird.f32 %v8598_v53 }
 0x4f8   :  { %v3541_v32 = vsub.f32 1.0, %v3540_v26  ;;  %v1590_v2 = vand.u32 2147483648, %v8598_v53  ;;  %v3490_v61 = vadd.f32 0.001143296, %v3489_v54  ;;  %v8662_v41 = vadd.f32 %v3699_v48, %v3667_v44  ;;  %v10104_v48 = vld [vmem:[#allocation120_spill] sm:$0xff] }
 0x4f9   :  { %v1581_v28 = vsub.f32 1.0, %v1580_v38  ;;  %v2208_v15 = vmul.f32 %v2207_v7, %v10101_v20  ;;  %v2852_v36 = vadd.f32 0.014752088, %v2851_v22  ;;  %vm3545_vm1 = vweird.f32 %v4075_v34 }
 0x4fa   :  { %v4079_v3 = vpop.eup %4078  ;;  %v3542_v12 = vmul.f32 %v4075_v34, %v3541_v32  ;;  %vm8665_vm2 = vcmp.eq.f32.partialorder %v1588_v29, 8.507059e+37  ;;  %v3491_v13 = vmul.f32 %v3490_v61, %v10012_v27  ;;  %vm1585_vm3 = vweird.f32 %v4077_v55  ;;  %vm3546_vm4 = vmor %vm3544_vm13, %vm3545_vm1  ;;  %v10105_v32 = vld [vmem:[#allocation101_spill] sm:$0xff] }
 0x4fb   :  { %v1582_v47 = vmul.f32 %v4077_v55, %v1581_v28  ;;  %v2220_v30 = vmul.f32 %v4079_v3, %v8635_v37  ;;  %v2853_v39 = vmul.f32 %v2852_v36, %v10096_v40  ;;  %v1591_v9 = vor.u32 1.1754944e-38, %v1590_v2  ;;  %vm1586_vm5 = vmor %vm1584_vm15, %vm1585_vm3 }
 0x4fc   :  { %v3543_v5 = vadd.f32 %v4075_v34, %v3542_v12  ;;  %v2847_v59 = vadd.f32 1.1283791, %v2846_v56  ;;  %v3492_v60 = vadd.f32 0.014752088, %v3491_v13  ;;  %v2228_v46 = vand.u32 2147483647, %v8635_v37 }
 0x4fd   :  { %v1583_v10 = vadd.f32 %v4077_v55, %v1582_v47  ;;  %v2221_v42 = vsub.f32 1.0, %v2220_v30  ;;  %v2854_v58 = vadd.f32 0.112945676, %v2853_v39  ;;  %vm2225_vm6 = vweird.f32 %v4079_v3  ;;  %v10107_v13 = vld [vmem:[#allocation31_spill] sm:$0xff] }
 0x4fe   :  { %v3547_v0 = vsel %vm3546_vm4, %v4075_v34, %v3543_v5  ;;  %v2230_v16 = vand.u32 2147483648, %v8635_v37  ;;  %v3493_v7 = vmul.f32 %v3492_v60, %v10012_v27  ;;  %v3487_v26 = vadd.f32 1.1283791, %v3486_v62 }
 0x4ff   :  { %v3552_v56 = vsel %vm8654_vm14, %v3551_v4, %v3547_v0  ;;  %v1587_v45 = vsel %vm1586_vm5, %v4077_v55, %v1583_v10  ;;  %v2222_v25 = vmul.f32 %v4079_v3, %v2221_v42  ;;  %v2855_v44 = vmul.f32 %v2854_v58, %v10096_v40 }
 0x500   :  { %v3553_v49 = vmul.f32 %v3552_v56, %v10104_v48  ;;  %v1592_v34 = vsel %vm8665_vm2, %v1591_v9, %v1587_v45  ;;  %v3494_v53 = vadd.f32 0.112945676, %v3493_v7  ;;  %vm2224_vm7 = vweird.f32 %v8635_v37  ;;  %v10106_v37 = vld [vmem:[#allocation113_spill] sm:$0xff]  ;;  %v10112_v56 = vld [vmem:[#allocation62_spill] sm:$0xff]  ;;  %v10113_v48 = vld [vmem:[#allocation67_spill] sm:$0xff] }
 0x501   :  { %v1593_v52 = vmul.f32 %v1592_v34, %v1568_v33  ;;  %v2223_v29 = vadd.f32 %v4079_v3, %v2222_v25  ;;  %v2856_v54 = vadd.f32 0.4994258, %v2855_v44  ;;  %vm2226_vm8 = vmor %vm2224_vm7, %vm2225_vm6  ;;  %v2231_v18 = vor.u32 1.1754944e-38, %v2230_v16 }
 0x502   :  { %v3909_v38 = vclamps-f32 %v3553_v49, 1.0  ;;  %v3495_v55 = vmul.f32 %v3494_v53, %v10012_v27  ;;  %v8689_v4 = vadd.f32 1.0, %v8570_v43  ;;  %vm2229_vm9 = vcmp.eq.f32.partialorder %v2228_v46, 8.507059e+37  ;;  %v10108_v46 = vld [vmem:[#allocation66_spill] sm:$0xff] }
 0x503   :  { %v2227_v22 = vsel %vm2226_vm8, %v4079_v3, %v2223_v29  ;;  %v8692_v2 = vmul.f32 %v2847_v59, %v10105_v32  ;;  %v2857_v62 = vmul.f32 %v2856_v54, %v10096_v40  ;;  %v8696_v28 = vmul.f32 %v3487_v26, %v10106_v37 }
 0x504   :  { %v3619_v33 = vadd.f32 1.0, %v3909_v38  ;;  %v2232_v61 = vsel %vm2229_vm9, %v2231_v18, %v2227_v22  ;;  %v3496_v20 = vadd.f32 0.4994258, %v3495_v55  ;;  %v3860_v36 = vclamps-f32 %v1593_v52, 1.0  ;;  %v10116_v18 = vld [vmem:[#allocation76_spill] sm:$0xff] }
 0x505   :  { %v2233_v12 = vmul.f32 %v2232_v61, %v2208_v15  ;;  %v8698_v51 = vadd.f32 1.0, %v2857_v62  ;;  %v1007_v43 = vadd.f32 1.1283791, %v8566_v19  ;;  %v1047_v30 = vadd.f32 1.1283791, %v8574_v35 }
 0x506   :  { %v3683_v3 = vmul.f32 %v3619_v33, %v10107_v13  ;;  %v3497_v47 = vmul.f32 %v3496_v20, %v10012_v27  ;;  %v8705_v40 = vadd.f32 1.0, %v8578_v8  ;;  %v1647_v5 = vadd.f32 1.1283791, %v8586_v50  ;;  %v10117_v20 = vld [vmem:[#allocation77_spill] sm:$0xff] }
 0x507   :  { %v3876_v39 = vclamps-f32 %v2233_v12, 1.0  ;;  %4080 = vrcp.f32 %v8698_v51  ;;  %v8710_v15 = vadd.f32 1.0, %v8590_v57  ;;  %v1687_v59 = vadd.f32 1.1283791, %v8594_v17 }
 0x508   :  { %v3731_v9 = vadd.f32 %v8662_v41, %v3683_v3  ;;  %v8713_v19 = vadd.f32 1.0, %v3497_v47  ;;  %v8717_v27 = vadd.f32 1.0, %v8603_v21  ;;  %v3570_v35 = vadd.f32 1.0, %v3860_v36  ;;  %v10118_v47 = vld [vmem:[#allocation88_spill] sm:$0xff] }
 0x509   :  { %v2287_v8 = vadd.f32 1.1283791, %v8609_v6  ;;  %v8721_v60 = vadd.f32 1.0, %v8614_v23  ;;  %v2327_v50 = vadd.f32 1.1283791, %v8618_v11  ;;  %v3586_v41 = vadd.f32 1.0, %v3876_v39 }
 0x50a   :  { %v3747_v10 = vmul.f32 0.25, %v3731_v9  ;;  %v2868_v57 = vand.u32 2147483647, %v8698_v51  ;;  %4082 = vrcp.f32 %v8713_v19  ;;  %v2870_v42 = vand.u32 2147483648, %v8698_v51 }
 0x50b   :  { %v8728_v17 = vadd.f32 1.0, %v8624_v14  ;;  %v8731_v21 = vadd.f32 1.1283791, %v8630_v24  ;;  %v8734_v6 = vadd.f32 1.0, %v8633_v1  ;;  %v8738_v23 = vadd.f32 1.1283791, %v8640_v31 }
 0x50c   :  { %3820 = vrot.lane.b32.xlu1 %v3747_v10, %s4162_s11  ;;  %v8741_v11 = vadd.f32 1.0, %v8644_v63  ;;  %v8744_v58 = vmul.f32 %v1007_v43, %v10108_v46  ;;  %4084 = vrcp.f32 %v8689_v4  ;;  %vm2864_vm10 = vweird.f32 %v8698_v51  ;;  %v10111_v63 = vld [vmem:[#allocation50_spill] sm:$0xff]  ;;  %v10119_v10 = vld [vmem:[#allocation92_spill] sm:$0xff] }
 0x50d   :  { %v4081_v14 = vpop.eup %4080  ;;  %v3508_v24 = vand.u32 2147483647, %v8713_v19  ;;  %v3510_v1 = vand.u32 2147483648, %v8713_v19  ;;  %v1028_v0 = vand.u32 2147483647, %v8689_v4  ;;  %vm8752_vm11 = vcmp.eq.f32.partialorder %v2868_v57, 8.507059e+37 }
 0x50e   :  { %v2860_v31 = vmul.f32 %v4081_v14, %v8698_v51  ;;  %v3634_v7 = vmul.f32 %v3570_v35, %v10111_v63  ;;  %v3650_v45 = vmul.f32 %v3586_v41, %v10112_v56  ;;  %v2871_v25 = vor.u32 1.1754944e-38, %v2870_v42  ;;  %v10121_v63 = vld [vmem:[#allocation104_spill] sm:$0xff] }
 0x50f   :  { %vm3504_vm12 = vweird.f32 %v8713_v19  ;;  %v1030_v44 = vand.u32 2147483648, %v8689_v4  ;;  %v8761_v49 = vmul.f32 %v1047_v30, %v10113_v48  ;;  %4086 = vrcp.f32 %v8705_v40 }
 0x510   :  { %v4083_v34 = vpop.eup %4082  ;;  %v2861_v26 = vsub.f32 1.0, %v2860_v31  ;;  %v1068_v53 = vand.u32 2147483647, %v8705_v40  ;;  %v1070_v52 = vand.u32 2147483648, %v8705_v40  ;;  %vm8767_vm13 = vcmp.eq.f32.partialorder %v3508_v24, 8.507059e+37  ;;  %v10120_v24 = vld [vmem:[#allocation103_spill] sm:$0xff] }
 0x511   :  { %v3500_v29 = vmul.f32 %v4083_v34, %v8713_v19  ;;  %v3511_v38 = vor.u32 1.1754944e-38, %v3510_v1  ;;  %v8772_v55 = vmul.f32 %v1647_v5, %v10116_v18  ;;  %vm2865_vm14 = vweird.f32 %v4081_v14 }
 0x512   :  { %v8774_v22 = vpop.eup %4084  ;;  %v2862_v32 = vmul.f32 %v4081_v14, %v2861_v26  ;;  %v8776_v62 = vadd.f32 %v3650_v45, %v3634_v7  ;;  %4088 = vrcp.f32 %v8710_v15  ;;  %v1668_v61 = vand.u32 2147483647, %v8710_v15  ;;  %vm2866_vm15 = vmor %vm2864_vm10, %vm2865_vm14 }
 0x513   :  { %v3501_v33 = vsub.f32 1.0, %v3500_v29  ;;  %v1670_v37 = vand.u32 2147483648, %v8710_v15  ;;  %v8782_v36 = vmul.f32 %v1687_v59, %v10117_v20  ;;  %4090 = vrcp.f32 %v8717_v27 }
 0x514   :  { %v2863_v12 = vadd.f32 %v4081_v14, %v2862_v32  ;;  %v1708_v43 = vand.u32 2147483647, %v8717_v27  ;;  %v1710_v13 = vand.u32 2147483648, %v8717_v27  ;;  %vm3505_vm1 = vweird.f32 %v4083_v34 }
 0x515   :  { %v3502_v3 = vmul.f32 %v4083_v34, %v3501_v33  ;;  %v8790_v30 = vmul.f32 %v2287_v8, %v10118_v47  ;;  %4092 = vrcp.f32 %v8721_v60  ;;  %v8793_v39 = vpop.eup %4086  ;;  %v2308_v9 = vand.u32 2147483647, %v8721_v60  ;;  %vm3506_vm2 = vmor %vm3504_vm12, %vm3505_vm1 }
 0x516   :  { %v2867_v5 = vsel %vm2866_vm15, %v4081_v14, %v2863_v12  ;;  %v2310_v59 = vand.u32 2147483648, %v8721_v60  ;;  %4094 = vrcp.f32 %v8728_v17  ;;  %v8801_v57 = vmul.f32 %v2327_v50, %v10119_v10 }
 0x517   :  { %v2872_v51 = vsel %vm8752_vm11, %v2871_v25, %v2867_v5  ;;  %v3503_v35 = vadd.f32 %v4083_v34, %v3502_v3  ;;  %4096 = vrcp.f32 %v8734_v6  ;;  %v2348_v42 = vand.u32 2147483647, %v8728_v17 }
 0x518   :  { %v8804_v8 = vpop.eup %4088  ;;  %v2873_v41 = vmul.f32 %v2872_v51, %v8692_v2  ;;  %v2350_v46 = vand.u32 2147483648, %v8728_v17  ;;  %4098 = vrcp.f32 %v8741_v11  ;;  %v8814_v50 = vmul.f32 %v8731_v21, %v10120_v24 }
 0x519   :  { %v3507_v14 = vsel %vm3506_vm2, %v4083_v34, %v3503_v35  ;;  %v2948_v1 = vand.u32 2147483647, %v8734_v6  ;;  %v2950_v31 = vand.u32 2147483648, %v8734_v6  ;;  %v8818_v16 = vpop.eup %4090  ;;  %v8824_v7 = vmul.f32 %v8738_v23, %v10121_v63  ;;  %v10123_v35 = vld [vmem:[#allocation26_spill] sm:$0xff] }
 0x51a   :  { %v3892_v2 = vclamps-f32 %v2873_v41, 1.0  ;;  %v3512_v19 = vsel %vm8767_vm13, %v3511_v38, %v3507_v14  ;;  %v2988_v56 = vand.u32 2147483647, %v8741_v11  ;;  %v2990_v25 = vand.u32 2147483648, %v8741_v11 }
 0x51b   :  { %v8827_v45 = vpop.eup %4092  ;;  %v3513_v21 = vmul.f32 %v3512_v19, %v8696_v28  ;;  %v1020_v48 = vmul.f32 %v8774_v22, %v8689_v4  ;;  %vm1025_vm3 = vweird.f32 %v8774_v22  ;;  %vm1024_vm4 = vweird.f32 %v8689_v4 }
 0x51c   :  { %v8834_v34 = vpop.eup %4094  ;;  %v3602_v26 = vadd.f32 1.0, %v3892_v2  ;;  %v8837_v23 = vor.u32 1.1754944e-38, %v1030_v44  ;;  %v1060_v29 = vmul.f32 %v8793_v39, %v8705_v40  ;;  %vm1065_vm5 = vweird.f32 %v8793_v39  ;;  %v10122_v44 = vld [vmem:[#allocation11_spill] sm:$0xff]  ;;  %vm8916_vm10 = vmor %vm1024_vm4, %vm1025_vm3 }
 0x51d   :  { %v8842_v28 = vpop.eup %4096  ;;  %v3908_v54 = vclamps-f32 %v3513_v21, 1.0  ;;  %vm1064_vm6 = vweird.f32 %v8705_v40  ;;  %v8845_v38 = vor.u32 1.1754944e-38, %v1070_v52  ;;  %v1660_v18 = vmul.f32 %v8804_v8, %v8710_v15 }
 0x51e   :  { %vm1665_vm7 = vweird.f32 %v8804_v8  ;;  %v8850_v32 = vpop.eup %4098  ;;  %v3666_v33 = vmul.f32 %v3602_v26, %v10122_v44  ;;  %vm1664_vm8 = vweird.f32 %v8710_v15  ;;  %v8854_v20 = vor.u32 1.1754944e-38, %v1670_v37  ;;  %vm8939_vm3 = vmor %vm1064_vm6, %vm1065_vm5 }
 0x51f   :  { %v1700_v12 = vmul.f32 %v8818_v16, %v8717_v27  ;;  %v8858_v3 = vor.u32 1.1754944e-38, %v1710_v13  ;;  %v3618_v52 = vadd.f32 1.0, %v3908_v54  ;;  %vm2304_vm9 = vweird.f32 %v8721_v60  ;;  %vm8960_vm5 = vmor %vm1664_vm8, %vm1665_vm7 }
 0x520   :  { %v2300_v47 = vmul.f32 %v8827_v45, %v8721_v60  ;;  %vm2305_vm11 = vweird.f32 %v8827_v45  ;;  %v8865_v5 = vor.u32 1.1754944e-38, %v2310_v59  ;;  %v3714_v37 = vadd.f32 %v8776_v62, %v3666_v33 }
 0x521   :  { %v2340_v13 = vmul.f32 %v8834_v34, %v8728_v17  ;;  %v2940_v51 = vmul.f32 %v8842_v28, %v8734_v6  ;;  %v3682_v10 = vmul.f32 %v3618_v52, %v10123_v35  ;;  %vm8878_vm15 = vcmp.eq.f32.partialorder %v1668_v61, 8.507059e+37  ;;  %vm8973_vm6 = vmor %vm2304_vm9, %vm2305_vm11 }
 0x522   :  { %v8882_v62 = vor.u32 1.1754944e-38, %v2350_v46  ;;  %v2980_v41 = vmul.f32 %v8850_v32, %v8741_v11  ;;  %vm8890_vm0 = vcmp.eq.f32.partialorder %v1028_v0, 8.507059e+37  ;;  %vm8896_vm13 = vcmp.eq.f32.partialorder %v2308_v9, 8.507059e+37 }
 0x523   :  { %vm8900_vm14 = vcmp.eq.f32.partialorder %v2948_v1, 8.507059e+37  ;;  %v2951_v24 = vor.u32 1.1754944e-38, %v2950_v31  ;;  %v1021_v2 = vsub.f32 1.0, %v1020_v48  ;;  %v3730_v19 = vadd.f32 %v3714_v37, %v3682_v10 }
 0x524   :  { %v1061_v0 = vsub.f32 1.0, %v1060_v29  ;;  %v1661_v63 = vsub.f32 1.0, %v1660_v18  ;;  %v1701_v21 = vsub.f32 1.0, %v1700_v12  ;;  %v2301_v26 = vsub.f32 1.0, %v2300_v47 }
 0x525   :  { %v2341_v54 = vsub.f32 1.0, %v2340_v13  ;;  %v2941_v9 = vsub.f32 1.0, %v2940_v51  ;;  %v2981_v44 = vsub.f32 1.0, %v2980_v41  ;;  %v3746_v33 = vmul.f32 0.25, %v3730_v19 }
 0x526   :  { %vm8908_vm12 = vcmp.eq.f32.partialorder %v1068_v53, 8.507059e+37  ;;  %v1022_v48 = vmul.f32 %v8774_v22, %v1021_v2  ;;  %v1062_v29 = vmul.f32 %v8793_v39, %v1061_v0  ;;  %v1662_v18 = vmul.f32 %v8804_v8, %v1661_v63 }
 0x527   :  { %vm8925_vm2 = vcmp.eq.f32.partialorder %v1708_v43, 8.507059e+37  ;;  %vm8931_vm1 = vcmp.eq.f32.partialorder %v2348_v42, 8.507059e+37  ;;  %v10138_v4 = vmov 0  ;;  %v1702_v52 = vmul.f32 %v8818_v16, %v1701_v21  ;;  %v8947_v42 = vpop.permute.xlu1 %3763  ;;  %3818 = vrot.lane.b32.xlu0 %v3746_v33, %s4162_s11  ;;  %v8990_v21 = vpop.permute.xlu0 %3752 }
 0x528   :  { %v10139_v4 = vsel %vm8931_vm1, 4294967295, %v10138_v4  ;;  %v2302_v43 = vmul.f32 %v8827_v45, %v2301_v26  ;;  %v2342_v47 = vmul.f32 %v8834_v34, %v2341_v54  ;;  %v2942_v37 = vmul.f32 %v8842_v28, %v2941_v9  ;;  %v10170_v26 = vld [vmem:[#allocation41_spill] sm:$0xff] }
 0x529   :  { %vm8952_vm4 = vcmp.eq.f32.partialorder %v2988_v56, 8.507059e+37  ;;  %v10142_v40 = vmov 0  ;;  %v2982_v51 = vmul.f32 %v8850_v32, %v2981_v44  ;;  %v1023_v35 = vadd.f32 %v8774_v22, %v1022_v48 }
 0x52a   :  { %v10143_v40 = vsel %vm8952_vm4, 4294967295, %v10142_v40  ;;  %v1663_v10 = vadd.f32 %v8804_v8, %v1662_v18  ;;  %v2991_v56 = vor.u32 1.1754944e-38, %v2990_v25  ;;  %v1063_v15 = vadd.f32 %v8793_v39, %v1062_v29  ;;  %v10165_v18 = vld [vmem:[#allocation52_spill] sm:$0xff] }
 0x52b   :  { %v2303_v2 = vadd.f32 %v8827_v45, %v2302_v43  ;;  %v2943_v19 = vadd.f32 %v8842_v28, %v2942_v37  ;;  %vm10148_vm7 = vweird.f32 %v8842_v28  ;;  %vm10149_vm8 = vweird.f32 %v8734_v6 }
 0x52c   :  { %vm2946_vm4 = vmor %vm10149_vm8, %vm10148_vm7  ;;  %v1703_v25 = vadd.f32 %v8818_v16, %v1702_v52  ;;  %v2343_v0 = vadd.f32 %v8834_v34, %v2342_v47  ;;  %v2983_v60 = vadd.f32 %v8850_v32, %v2982_v51  ;;  %v1667_v63 = vsel %vm8960_vm5, %v8804_v8, %v1663_v10 }
 0x52d   :  { %vm10150_vm9 = vweird.f32 %v8818_v16  ;;  %vm10151_vm11 = vweird.f32 %v8717_v27  ;;  %v1672_v6 = vsel %vm8878_vm15, %v8854_v20, %v1667_v63  ;;  %v2307_v54 = vsel %vm8973_vm6, %v8827_v45, %v2303_v2  ;;  %v10171_v27 = vld [vmem:[#allocation89_spill] sm:$0xff] }
 0x52e   :  { %vm8996_vm1 = vmor %vm10151_vm11, %vm10150_vm9  ;;  %v2947_v8 = vsel %vm2946_vm4, %v8842_v28, %v2943_v19  ;;  %v1027_v9 = vsel %vm8916_vm10, %v8774_v22, %v1023_v35  ;;  %vm10154_vm5 = vweird.f32 %v8834_v34  ;;  %vm10155_vm7 = vweird.f32 %v8728_v17  ;;  %v10169_v19 = vld [vmem:[#allocation28_spill] sm:$0xff] }
 0x52f   :  { %vm9014_vm8 = vmor %vm10155_vm7, %vm10154_vm5  ;;  %v1673_v20 = vmul.f32 %v1672_v6, %v8772_v55  ;;  %v2312_v45 = vsel %vm8896_vm13, %v8865_v5, %v2307_v54  ;;  %v2952_v28 = vsel %vm8900_vm14, %v2951_v24, %v2947_v8  ;;  %v1032_v22 = vsel %vm8890_vm0, %v8837_v23, %v1027_v9  ;;  %v3766_v29 = vpop.permute.xlu1 %3765  ;;  %v3755_v10 = vpop.permute.xlu0 %3754 }
 0x530   :  { %vm10158_vm10 = vweird.f32 %v8850_v32  ;;  %vm10159_vm15 = vweird.f32 %v8741_v11  ;;  %v2313_v55 = vmul.f32 %v2312_v45, %v8790_v30  ;;  %v2953_v59 = vmul.f32 %v2952_v28, %v8814_v50 }
 0x531   :  { %vm9031_vm4 = vmor %vm10159_vm15, %vm10158_vm10  ;;  %v1033_v5 = vmul.f32 %v1032_v22, %v8744_v58  ;;  %v1067_v61 = vsel %vm8939_vm3, %v8793_v39, %v1063_v15  ;;  %v3862_v14 = vclamps-f32 %v1673_v20, 1.0  ;;  %v1707_v23 = vsel %vm8996_vm1, %v8818_v16, %v1703_v25 }
 0x532   :  { %v2347_v11 = vsel %vm9014_vm8, %v8834_v34, %v2343_v0  ;;  %v2987_v30 = vsel %vm9031_vm4, %v8850_v32, %v2983_v60  ;;  %v3878_v50 = vclamps-f32 %v2313_v55, 1.0  ;;  %v3894_v46 = vclamps-f32 %v2953_v59, 1.0  ;;  %v10164_v32 = vld [vmem:[#allocation27_spill] sm:$0xff] }
 0x533   :  { %v3846_v58 = vclamps-f32 %v1033_v5, 1.0  ;;  %v1072_v39 = vsel %vm8908_vm12, %v8845_v38, %v1067_v61  ;;  %v3572_v24 = vadd.f32 1.0, %v3862_v14  ;;  %v1712_v16 = vsel %vm8925_vm2, %v8858_v3, %v1707_v23  ;;  %v3775_v38 = vpop.permute.xlu2 %3774 }
 0x534   :  { %vm10162_vm0 = vnez %v10139_v4  ;;  %vm10163_vm13 = vnez %v10143_v40  ;;  %v868_v33 = vmul.f32 0.5, %v10164_v32  ;;  %v3588_v31 = vadd.f32 1.0, %v3878_v50  ;;  %v10167_v40 = vld [vmem:[#allocation32_spill] sm:$0xff] }
 0x535   :  { %v2352_v34 = vsel %vm10162_vm0, %v8882_v62, %v2347_v11  ;;  %v2992_v44 = vsel %vm10163_vm13, %v2991_v56, %v2987_v30  ;;  %v3556_v48 = vadd.f32 1.0, %v3846_v58  ;;  %v1713_v1 = vmul.f32 %v1712_v16, %v8782_v36  ;;  %v10166_v62 = vld [vmem:[#allocation13_spill] sm:$0xff]  ;;  %v10168_v56 = vld [vmem:[#allocation44_spill] sm:$0xff] }
 0x536   :  { %v3636_v12 = vmul.f32 %v3572_v24, %v10165_v18  ;;  %v2353_v53 = vmul.f32 %v2352_v34, %v8801_v57  ;;  %v2993_v3 = vmul.f32 %v2992_v44, %v8824_v7  ;;  %v1073_v4 = vmul.f32 %v1072_v39, %v8761_v49 }
 0x537   :  { %v900_v52 = vmul.f32 0.5, %v10166_v62  ;;  %v3604_v43 = vadd.f32 1.0, %v3894_v46  ;;  %v3620_v47 = vmul.f32 %v3556_v48, %v868_v33  ;;  %v3863_v37 = vclamps-f32 %v1713_v1, 1.0  ;;  %v3788_v17 = vpop.permute.xlu1 %3787  ;;  %v3786_v14 = vpop.permute.xlu0 %3785 }
 0x538   :  { %v885_v13 = vmul.f32 0.5, %v10167_v40  ;;  %v3879_v51 = vclamps-f32 %v2353_v53, 1.0  ;;  %v3895_v35 = vclamps-f32 %v2993_v3, 1.0  ;;  %v3847_v36 = vclamps-f32 %v1073_v4, 1.0 }
 0x539   :  { %v916_v41 = vmul.f32 0.5, %v10168_v56  ;;  %v3652_v15 = vmul.f32 %v3588_v31, %v900_v52  ;;  %v3684_v2 = vadd.f32 %v3636_v12, %v3620_v47  ;;  %v3573_v57 = vadd.f32 1.0, %v3863_v37 }
 0x53a   :  { %v869_v7 = vmul.f32 0.5, %v10169_v19  ;;  %v3589_v25 = vadd.f32 1.0, %v3879_v51  ;;  %v3557_v49 = vadd.f32 1.0, %v3847_v36  ;;  %v901_v6 = vmul.f32 0.5, %v10170_v26 }
 0x53b   :  { %v3668_v0 = vmul.f32 %v3604_v43, %v916_v41  ;;  %v3700_v60 = vadd.f32 %v3684_v2, %v3652_v15  ;;  %v3637_v63 = vmul.f32 %v3573_v57, %v885_v13  ;;  %v3605_v54 = vadd.f32 1.0, %v3895_v35  ;;  %v3777_v55 = vpop.permute.xlu2 %3776 }
 0x53c   :  { %v3621_v8 = vmul.f32 %v3557_v49, %v869_v7  ;;  %v917_v20 = vmul.f32 0.5, %v10171_v27  ;;  %v3653_v45 = vmul.f32 %v3589_v25, %v901_v6  ;;  %vm3758_vm12 = vcmask 261248  }
 0x53d   :  { %v3716_v9 = vadd.f32 %v3700_v60, %v3668_v0  ;;  %vm3769_vm14 = vcmask 392448   ;;  %vm10172_vm1 = vcmask 130048   ;;  %vm3780_vm2 = vcmask 523648  }
 0x53e   :  { %v3685_v28 = vadd.f32 %v3637_v63, %v3621_v8  ;;  %v3669_v59 = vmul.f32 %v3605_v54, %v917_v20  ;;  %vm3791_vm3 = vcmask 654848   ;;  %vm10173_vm6 = vmmov %vm10172_vm1  ;;  %vm3802_vm9 = vcmask 786048  }
 0x53f   :  { %v3732_v22 = vmul.f32 0.25, %v3716_v9  ;;  %vm3813_vm11 = vcmask 917248   ;;  %v3808_v11 = vpop.permute.xlu1 %3807  ;;  %vm3824_vm5 = vcmask 1048448  }
 0x540   :  { %v3701_v5 = vadd.f32 %v3685_v28, %v3653_v45 }
 0x541   :  { %3748 = vst.msk [vmem:[#allocation5] sm:$0xff] %vm10172_vm1, %v3732_v22 }
 0x542   :  { %3759 = vst.msk [vmem:[#allocation5] sm:$0xff] %vm3758_vm12, %v8990_v21  ;;  %v3717_v61 = vadd.f32 %v3701_v5, %v3669_v59 }
 0x543   :  { %3770 = vst.msk [vmem:[#allocation5] sm:$0xff] %vm3769_vm14, %v8947_v42  ;;  %v3797_v30 = vpop.permute.xlu2 %3796 }
 0x544   :  { %v3733_v23 = vmul.f32 0.25, %v3717_v61  ;;  %3781 = vst.msk [vmem:[#allocation5] sm:$0xff] %vm3780_vm2, %v3775_v38 }
 0x545   :  { %3792 = vst.msk [vmem:[#allocation5] sm:$0xff] %vm3791_vm3, %v3786_v14 }
 0x546   :  { %3749 = vst.msk [vmem:[#allocation5 + $0x8] sm:$0xff] %vm10173_vm6, %v3733_v23 }
 0x547   :  { %3760 = vst.msk [vmem:[#allocation5 + $0x8] sm:$0xff] %vm3758_vm12, %v3755_v10 }
 0x548   :  { %3771 = vst.msk [vmem:[#allocation5 + $0x8] sm:$0xff] %vm3769_vm14, %v3766_v29 }
 0x549   :  { %3782 = vst.msk [vmem:[#allocation5 + $0x8] sm:$0xff] %vm3780_vm2, %v3777_v55 }
 0x54a   :  { %3793 = vst.msk [vmem:[#allocation5 + $0x8] sm:$0xff] %vm3791_vm3, %v3788_v17 }
 0x54b   :  { %3803 = vst.msk [vmem:[#allocation5] sm:$0xff] %vm3802_vm9, %v3797_v30  ;;  %v3810_v50 = vpop.permute.xlu2 %3809 }
 0x54c   :  { %3814 = vst.msk [vmem:[#allocation5] sm:$0xff] %vm3813_vm11, %v3808_v11 }
 0x55c   :  { %v3799_v21 = vpop.permute.xlu0 %3798 }
 0x55d   :  { %3804 = vst.msk [vmem:[#allocation5 + $0x8] sm:$0xff] %vm3802_vm9, %v3799_v21 }
 0x55e   :  { %3815 = vst.msk [vmem:[#allocation5 + $0x8] sm:$0xff] %vm3813_vm11, %v3810_v50 }
 0x57e   :  { %v3821_v42 = vpop.permute.xlu1 %3820 }
 0x57f   :  { %3826 = vst.msk [vmem:[#allocation5 + $0x8] sm:$0xff] %vm3824_vm5, %v3821_v42 }
 0x599   :  { %v3819_v46 = vpop.permute.xlu0 %3818 }
 0x59a   :  { %3825 = vst.msk [vmem:[#allocation5] sm:$0xff] %vm3824_vm5, %v3819_v46 }
 0x59b   :  { %3839 = dma.vmem_to_hbm [thread:$0]  %s3832_s13, 256, %s3834_s16, [#allocation4], %s4154_s20, %s4154_s20, %s4155_s21  }
 0x59c   :  { %4151 = dma.done.wait [#allocation4], 256  }
 0x59d   :  { %4152 = vsyncadd [#allocation4], 4294967040 }
 0x59e   :  { %3844 = vsyncpa [#allocation3], 1 }
 0x59f   :  { %3845 = vsyncpa [#allocation4], 1 }

</bundles_post_ra>
